<compile_context>
chip_gen: v6e
topology: v6e:2x2x1
jax: 0.10.0
libtpu: 0.0.40
codegen_flags: <defaults>
</compile_context>

<pallas_src>
import functools

import jax
import jax.numpy as jnp
from jax import lax
from jax.experimental import pallas as pl
from jax.experimental.pallas import tpu as pltpu


_C_PAD = 128      # all activations / kernel outputs are padded to 128 channels (lanes)
_BN_EPS = 1e-5

# (in_ch, out_ch, kernel, stride, pad, has_bn_relu)
_LAYER_DEFS = [
    (3, 8, 3, 2, 1, True),
    (8, 16, 3, 2, 1, True),
    (16, 32, 4, 2, 1, True),
    (32, 64, 4, 2, 1, True),
    (64, 128, 4, 1, 0, True),
    (128, 5, 1, 1, 0, False),   # final 1x1 conv with bias, no BN/ReLU
]


def _round_up(x, m):
    return (x + m - 1) // m * m


def _pick_m_tiling(M):
    """Pad M to a sublane multiple and pick a big tile; split M>=512 into two blocks
    so dimension_semantics=('parallel',) can shard across v7x's two TensorCores."""
    m8 = _round_up(M, 8)
    if m8 >= 512:
        tm = min(1024, _round_up(m8 // 2, 8))
    else:
        tm = m8
    m_pad = _round_up(M, tm)
    return m_pad, tm


# ----------------------------------------------------------------------------------
# Pallas kernels
# ----------------------------------------------------------------------------------
def _matmul_bias_act_kernel(x_ref, w_ref, b_ref, o_ref, *, apply_relu):
    # default precision: bf16-operand MXU matmul, f32 accumulation
    acc = jnp.dot(x_ref[...], w_ref[...], preferred_element_type=jnp.float32)
    y = acc + b_ref[...]
    if apply_relu:
        y = jnp.maximum(y, 0.0)
    o_ref[...] = y


def _head_kernel(x_ref, w5_ref, b5_ref, w6_ref, b6_ref, o_ref):
    # fused layers 5 (conv+BN+ReLU as matmul) and 6 (1x1 conv as matmul)
    h = jnp.dot(x_ref[...], w5_ref[...], preferred_element_type=jnp.float32)
    h = jnp.maximum(h + b5_ref[...], 0.0)
    o_ref[...] = jnp.dot(h, w6_ref[...], preferred_element_type=jnp.float32) + b6_ref[...]


def _matmul_bias_act(patches, wmat, bias, apply_relu):
    """patches: (M, K) f32, wmat: (K, 128) f32, bias: (128,) f32 -> (m_pad, 128) f32."""
    M, K = patches.shape
    N = wmat.shape[1]
    m_pad, tm = _pick_m_tiling(M)
    if m_pad != M:
        patches = jnp.pad(patches, ((0, m_pad - M), (0, 0)))
    return pl.pallas_call(
        functools.partial(_matmul_bias_act_kernel, apply_relu=apply_relu),
        out_shape=jax.ShapeDtypeStruct((m_pad, N), jnp.float32),
        grid=(m_pad // tm,),
        in_specs=[
            pl.BlockSpec((tm, K), lambda i: (i, 0)),
            pl.BlockSpec((K, N), lambda i: (0, 0)),
            pl.BlockSpec((1, N), lambda i: (0, 0)),
        ],
        out_specs=pl.BlockSpec((tm, N), lambda i: (i, 0)),
        compiler_params=pltpu.CompilerParams(dimension_semantics=("parallel",)),
    )(patches, wmat, bias.reshape(1, N))


def _head(x, w5, b5, w6, b6):
    """Fused layers 5+6: x (M, K5) -> (m_pad, 128)."""
    M, K = x.shape
    N5 = w5.shape[1]
    N6 = w6.shape[1]
    m_pad, tm = _pick_m_tiling(M)
    if m_pad != M:
        x = jnp.pad(x, ((0, m_pad - M), (0, 0)))
    return pl.pallas_call(
        _head_kernel,
        out_shape=jax.ShapeDtypeStruct((m_pad, N6), jnp.float32),
        grid=(m_pad // tm,),
        in_specs=[
            pl.BlockSpec((tm, K), lambda i: (i, 0)),
            pl.BlockSpec((K, N5), lambda i: (0, 0)),
            pl.BlockSpec((1, N5), lambda i: (0, 0)),
            pl.BlockSpec((N5, N6), lambda i: (0, 0)),
            pl.BlockSpec((1, N6), lambda i: (0, 0)),
        ],
        out_specs=pl.BlockSpec((tm, N6), lambda i: (i, 0)),
        compiler_params=pltpu.CompilerParams(dimension_semantics=("parallel",)),
    )(x, w5, b5.reshape(1, N5), w6, b6.reshape(1, N6))


# ----------------------------------------------------------------------------------
# Glue: NHWC im2col and weight preparation (all trace-time / tiny XLA ops)
# ----------------------------------------------------------------------------------
def _im2col_nhwc(x, k, stride, pad):
    """x: (B, H, W, C) -> patches (B*Ho*Wo, k*k*C) with flat K index (i*k+j)*C + c."""
    B, H, W, C = x.shape
    xp = jnp.pad(x, ((0, 0), (pad, pad), (pad, pad), (0, 0)))
    Ho = (H + 2 * pad - k) // stride + 1
    Wo = (W + 2 * pad - k) // stride + 1
    cols = []
    for i in range(k):
        for j in range(k):
            cols.append(xp[:, i:i + stride * Ho:stride, j:j + stride * Wo:stride, :])
    patches = jnp.stack(cols, axis=3)                       # (B, Ho, Wo, k*k, C)
    patches = patches.reshape(B * Ho * Wo, k * k * C)
    return patches, Ho, Wo


def _prepare_pallas_params(params):
    """Fold BN scale into weights, reorder OIHW -> (k*k*C_in_pad, 128), pad K and N."""
    prepped = []
    c_in_pad = _LAYER_DEFS[0][0]        # layer-1 input keeps its real 3 channels
    for p, (cin, cout, k, stride, pad, has_bn) in zip(params, _LAYER_DEFS):
        wm = jnp.transpose(p["w"], (2, 3, 1, 0))            # (k, k, cin, cout)
        wm = wm * p["scale"].reshape(1, 1, 1, cout)         # fold BN scale into weights
        wm = jnp.pad(wm, ((0, 0), (0, 0),
                          (0, c_in_pad - cin), (0, _C_PAD - cout)))
        wmat = wm.reshape(k * k * c_in_pad, _C_PAD)
        k_pad = _round_up(wmat.shape[0], 128)
        if k_pad != wmat.shape[0]:
            wmat = jnp.pad(wmat, ((0, k_pad - wmat.shape[0]), (0, 0)))
        bias = jnp.pad(p["bias"], (0, _C_PAD - cout))
        prepped.append(dict(wmat=wmat, bias=bias))
        c_in_pad = _C_PAD               # from layer 2 on, activations carry 128 channels
    return prepped


# ----------------------------------------------------------------------------------
# CNN parameters (deterministic init) and forward passes
# ----------------------------------------------------------------------------------
def init_params(key):
    params = []
    for (cin, cout, k, stride, pad, has_bn) in _LAYER_DEFS:
        key, kw, kg, kb, km, kv = jax.random.split(key, 6)
        w = 0.1 * jax.random.normal(kw, (cout, cin, k, k), jnp.float32)
        if has_bn:
            gamma = jax.random.uniform(kg, (cout,), jnp.float32, 0.5, 1.5)
            beta = 0.1 * jax.random.normal(kb, (cout,), jnp.float32)
            mean = 0.1 * jax.random.normal(km, (cout,), jnp.float32)
            var = jax.random.uniform(kv, (cout,), jnp.float32, 0.5, 1.5)
            inv_std = 1.0 / jnp.sqrt(var + _BN_EPS)
            scale = gamma * inv_std                  # folded BN scale
            bias = beta - mean * gamma * inv_std     # folded BN bias
        else:
            scale = jnp.ones((cout,), jnp.float32)
            bias = 0.1 * jax.random.normal(kb, (cout,), jnp.float32)   # conv bias
        params.append(dict(w=w, scale=scale, bias=bias))
    return params


@jax.jit
def cnn_forward_pallas(x, params):
    B = x.shape[0]
    pp = _prepare_pallas_params(params)
    y = jnp.transpose(x, (0, 2, 3, 1))         # single NCHW -> NHWC at the boundary

    # Layers 1-4: im2col (XLA glue) + fused matmul + bias + ReLU Pallas kernel.
    # Outputs are (M, 128) lane-dense; activations stay NHWC-flat between layers.
    for lp, (_, _, k, stride, pad, _) in zip(pp[:4], _LAYER_DEFS[:4]):
        patches, Ho, Wo = _im2col_nhwc(y, k, stride, pad)
        k_pad = lp["wmat"].shape[0]
        if patches.shape[1] != k_pad:
            patches = jnp.pad(patches, ((0, 0), (0, k_pad - patches.shape[1])))
        out = _matmul_bias_act(patches, lp["wmat"], lp["bias"], apply_relu=True)
        y = out[: B * Ho * Wo].reshape(B, Ho, Wo, _C_PAD)

    # Layers 5+6 fused into one kernel.  With a 64x64 input, layer 5 (k=4, s=1, p=0)
    # sees a 4x4 map, so its "im2col" is just a flatten of the layer-4 output.
    _, _, k5, s5, p5, _ = _LAYER_DEFS[4]
    patches5, Ho5, Wo5 = _im2col_nhwc(y, k5, s5, p5)
    k5_pad = pp[4]["wmat"].shape[0]
    if patches5.shape[1] != k5_pad:
        patches5 = jnp.pad(patches5, ((0, 0), (0, k5_pad - patches5.shape[1])))
    out = _head(patches5, pp[4]["wmat"], pp[4]["bias"], pp[5]["wmat"], pp[5]["bias"])

    n_out = _LAYER_DEFS[-1][1]
    out = out[: B * Ho5 * Wo5, :n_out].reshape(B, Ho5, Wo5, n_out)
    out = out.transpose(0, 3, 1, 2)            # tiny (1x1 spatial) NHWC -> NCHW
    return out.reshape(B, -1)


@jax.jit
def cnn_forward_reference(x, params):
    """Pure-JAX reference (lax.conv, default precision) for correctness checking."""
    y = x
    for p, (_, _, k, stride, pad, has_bn) in zip(params, _LAYER_DEFS):
        y = lax.conv_general_dilated(
            y, p["w"], (stride, stride), [(pad, pad), (pad, pad)],
            dimension_numbers=("NCHW", "OIHW", "NCHW"),
        )
        y = y * p["scale"].reshape(1, -1, 1, 1) + p["bias"].reshape(1, -1, 1, 1)
        if has_bn:
            y = jnp.maximum(y, 0.0)
    return y.reshape(x.shape[0], -1)


if __name__ == "__main__":
    key = jax.random.PRNGKey(0)
    key, kx = jax.random.split(key)
    # batch=2, in_channels=3, 64x64 spatial -> final feature map is 1x1 -> output (2, 5)
    x = jax.random.normal(kx, (2, 3, 64, 64), jnp.float32)

    params = init_params(key)

    out = jax.block_until_ready(cnn_forward_pallas(x, params))
    ref = jax.block_until_ready(cnn_forward_reference(x, params))

    assert out.shape == (2, 5), out.shape
    # default-precision (bf16-operand) MXU matmuls vs XLA conv: allow a loose tolerance
    assert jnp.allclose(out, ref, rtol=5e-2, atol=5e-2), (out, ref)
    print("KERNEL_OK")
</pallas_src>

<mosaic_0001>
module attributes {stable_mosaic.version = 11 : i64} {
  func.func @_matmul_bias_act_kernel(%arg0: i32, %arg1: memref<1024x128xf32, #tpu.memory_space<vmem>>, %arg2: memref<128x128xf32, #tpu.memory_space<vmem>>, %arg3: memref<1x128xf32, #tpu.memory_space<vmem>>, %arg4: memref<1024x128xf32, #tpu.memory_space<vmem>>) attributes {dimension_semantics = [#tpu.dimension_semantics<parallel>], iteration_bounds = array<i64: 2>, scalar_prefetch = 0 : i64, scratch_operands = 0 : i64, tpu.core_type = #tpu.core_type<tc>, window_params = [{transform_indices = @transform_0, window_bounds = array<i64: 1024, 128>}, {pipeline_mode = #tpu.pipeline_mode<synchronous>, transform_indices = @transform_1, window_bounds = array<i64: 128, 128>}, {pipeline_mode = #tpu.pipeline_mode<synchronous>, transform_indices = @transform_2, window_bounds = array<i64: 1, 128>}, {transform_indices = @transform_3, window_bounds = array<i64: 1024, 128>}]} {
    %c0 = arith.constant 0 : index
    %c0_0 = arith.constant 0 : index
    %0 = vector.load %arg1[%c0, %c0_0] : memref<1024x128xf32, #tpu.memory_space<vmem>>, vector<1024x128xf32>
    %c0_1 = arith.constant 0 : index
    %c0_2 = arith.constant 0 : index
    %1 = vector.load %arg2[%c0_1, %c0_2] : memref<128x128xf32, #tpu.memory_space<vmem>>, vector<128x128xf32>
    %cst = arith.constant dense<0.000000e+00> : vector<1024x128xf32>
    %2 = tpu.matmul %0, %1, %cst {dimension_numbers = #tpu.dot_dimension_numbers<[1], [0], [0], [1], [0, 0, 1, 1], [], []>} : vector<1024x128xf32>, vector<128x128xf32>, vector<1024x128xf32> -> vector<1024x128xf32>
    %c0_3 = arith.constant 0 : index
    %c0_4 = arith.constant 0 : index
    %3 = vector.load %arg3[%c0_3, %c0_4] : memref<1x128xf32, #tpu.memory_space<vmem>>, vector<1x128xf32>
    %4 = vector.broadcast %3 : vector<1x128xf32> to vector<1024x128xf32>
    %5 = arith.addf %2, %4 : vector<1024x128xf32>
    %cst_5 = arith.constant 0.000000e+00 : f32
    %6 = vector.broadcast %cst_5 : f32 to vector<1024x128xf32>
    %7 = arith.maximumf %5, %6 : vector<1024x128xf32>
    %c0_6 = arith.constant 0 : index
    %c0_7 = arith.constant 0 : index
    %8 = vector.load %arg4[%c0_6, %c0_7] : memref<1024x128xf32, #tpu.memory_space<vmem>>, vector<1024x128xf32>
    tpu.vector_store %arg4[%c0_6, %c0_7], %7 {strides = array<i32>} : memref<1024x128xf32, #tpu.memory_space<vmem>>, vector<1024x128xf32>,
    return
  }
  func.func @transform_0(%arg0: i32) -> (i32, i32) {
    %c0_i32 = arith.constant 0 : i32
    %c0_i32_0 = arith.constant 0 : i32
    return %arg0, %c0_i32 : i32, i32
  }
  func.func @transform_1(%arg0: i32) -> (i32, i32) {
    %c0_i32 = arith.constant 0 : i32
    %c0_i32_0 = arith.constant 0 : i32
    %c0_i32_1 = arith.constant 0 : i32
    return %c0_i32, %c0_i32_0 : i32, i32
  }
  func.func @transform_2(%arg0: i32) -> (i32, i32) {
    %c0_i32 = arith.constant 0 : i32
    %c0_i32_0 = arith.constant 0 : i32
    %c0_i32_1 = arith.constant 0 : i32
    return %c0_i32, %c0_i32_0 : i32, i32
  }
  func.func @transform_3(%arg0: i32) -> (i32, i32) {
    %c0_i32 = arith.constant 0 : i32
    %c0_i32_0 = arith.constant 0 : i32
    return %arg0, %c0_i32 : i32, i32
  }
}

module attributes {stable_mosaic.version = 11 : i64} {
  func.func @_matmul_bias_act_kernel(%arg0: i32, %arg1: memref<256x1152xf32, #tpu.memory_space<vmem>>, %arg2: memref<1152x128xf32, #tpu.memory_space<vmem>>, %arg3: memref<1x128xf32, #tpu.memory_space<vmem>>, %arg4: memref<256x128xf32, #tpu.memory_space<vmem>>) attributes {dimension_semantics = [#tpu.dimension_semantics<parallel>], iteration_bounds = array<i64: 2>, scalar_prefetch = 0 : i64, scratch_operands = 0 : i64, tpu.core_type = #tpu.core_type<tc>, window_params = [{transform_indices = @transform_0, window_bounds = array<i64: 256, 1152>}, {pipeline_mode = #tpu.pipeline_mode<synchronous>, transform_indices = @transform_1, window_bounds = array<i64: 1152, 128>}, {pipeline_mode = #tpu.pipeline_mode<synchronous>, transform_indices = @transform_2, window_bounds = array<i64: 1, 128>}, {transform_indices = @transform_3, window_bounds = array<i64: 256, 128>}]} {
    %c0 = arith.constant 0 : index
    %c0_0 = arith.constant 0 : index
    %0 = vector.load %arg1[%c0, %c0_0] : memref<256x1152xf32, #tpu.memory_space<vmem>>, vector<256x1152xf32>
    %c0_1 = arith.constant 0 : index
    %c0_2 = arith.constant 0 : index
    %1 = vector.load %arg2[%c0_1, %c0_2] : memref<1152x128xf32, #tpu.memory_space<vmem>>, vector<1152x128xf32>
    %cst = arith.constant dense<0.000000e+00> : vector<256x128xf32>
    %2 = tpu.matmul %0, %1, %cst {dimension_numbers = #tpu.dot_dimension_numbers<[1], [0], [0], [1], [0, 0, 1, 1], [], []>} : vector<256x1152xf32>, vector<1152x128xf32>, vector<256x128xf32> -> vector<256x128xf32>
    %c0_3 = arith.constant 0 : index
    %c0_4 = arith.constant 0 : index
    %3 = vector.load %arg3[%c0_3, %c0_4] : memref<1x128xf32, #tpu.memory_space<vmem>>, vector<1x128xf32>
    %4 = vector.broadcast %3 : vector<1x128xf32> to vector<256x128xf32>
    %5 = arith.addf %2, %4 : vector<256x128xf32>
    %cst_5 = arith.constant 0.000000e+00 : f32
    %6 = vector.broadcast %cst_5 : f32 to vector<256x128xf32>
    %7 = arith.maximumf %5, %6 : vector<256x128xf32>
    %c0_6 = arith.constant 0 : index
    %c0_7 = arith.constant 0 : index
    %8 = vector.load %arg4[%c0_6, %c0_7] : memref<256x128xf32, #tpu.memory_space<vmem>>, vector<256x128xf32>
    tpu.vector_store %arg4[%c0_6, %c0_7], %7 {strides = array<i32>} : memref<256x128xf32, #tpu.memory_space<vmem>>, vector<256x128xf32>,
    return
  }
  func.func @transform_0(%arg0: i32) -> (i32, i32) {
    %c0_i32 = arith.constant 0 : i32
    %c0_i32_0 = arith.constant 0 : i32
    return %arg0, %c0_i32 : i32, i32
  }
  func.func @transform_1(%arg0: i32) -> (i32, i32) {
    %c0_i32 = arith.constant 0 : i32
    %c0_i32_0 = arith.constant 0 : i32
    %c0_i32_1 = arith.constant 0 : i32
    return %c0_i32, %c0_i32_0 : i32, i32
  }
  func.func @transform_2(%arg0: i32) -> (i32, i32) {
    %c0_i32 = arith.constant 0 : i32
    %c0_i32_0 = arith.constant 0 : i32
    %c0_i32_1 = arith.constant 0 : i32
    return %c0_i32, %c0_i32_0 : i32, i32
  }
  func.func @transform_3(%arg0: i32) -> (i32, i32) {
    %c0_i32 = arith.constant 0 : i32
    %c0_i32_0 = arith.constant 0 : i32
    return %arg0, %c0_i32 : i32, i32
  }
}

module attributes {stable_mosaic.version = 11 : i64} {
  func.func @_matmul_bias_act_kernel(%arg0: i32, %arg1: memref<128x2048xf32, #tpu.memory_space<vmem>>, %arg2: memref<2048x128xf32, #tpu.memory_space<vmem>>, %arg3: memref<1x128xf32, #tpu.memory_space<vmem>>, %arg4: memref<128x128xf32, #tpu.memory_space<vmem>>) attributes {dimension_semantics = [#tpu.dimension_semantics<parallel>], iteration_bounds = array<i64: 1>, scalar_prefetch = 0 : i64, scratch_operands = 0 : i64, tpu.core_type = #tpu.core_type<tc>, window_params = [{transform_indices = @transform_0, window_bounds = array<i64: 128, 2048>}, {pipeline_mode = #tpu.pipeline_mode<synchronous>, transform_indices = @transform_1, window_bounds = array<i64: 2048, 128>}, {pipeline_mode = #tpu.pipeline_mode<synchronous>, transform_indices = @transform_2, window_bounds = array<i64: 1, 128>}, {transform_indices = @transform_3, window_bounds = array<i64: 128, 128>}]} {
    %c0 = arith.constant 0 : index
    %c0_0 = arith.constant 0 : index
    %0 = vector.load %arg1[%c0, %c0_0] : memref<128x2048xf32, #tpu.memory_space<vmem>>, vector<128x2048xf32>
    %c0_1 = arith.constant 0 : index
    %c0_2 = arith.constant 0 : index
    %1 = vector.load %arg2[%c0_1, %c0_2] : memref<2048x128xf32, #tpu.memory_space<vmem>>, vector<2048x128xf32>
    %cst = arith.constant dense<0.000000e+00> : vector<128x128xf32>
    %2 = tpu.matmul %0, %1, %cst {dimension_numbers = #tpu.dot_dimension_numbers<[1], [0], [0], [1], [0, 0, 1, 1], [], []>} : vector<128x2048xf32>, vector<2048x128xf32>, vector<128x128xf32> -> vector<128x128xf32>
    %c0_3 = arith.constant 0 : index
    %c0_4 = arith.constant 0 : index
    %3 = vector.load %arg3[%c0_3, %c0_4] : memref<1x128xf32, #tpu.memory_space<vmem>>, vector<1x128xf32>
    %4 = vector.broadcast %3 : vector<1x128xf32> to vector<128x128xf32>
    %5 = arith.addf %2, %4 : vector<128x128xf32>
    %cst_5 = arith.constant 0.000000e+00 : f32
    %6 = vector.broadcast %cst_5 : f32 to vector<128x128xf32>
    %7 = arith.maximumf %5, %6 : vector<128x128xf32>
    %c0_6 = arith.constant 0 : index
    %c0_7 = arith.constant 0 : index
    %8 = vector.load %arg4[%c0_6, %c0_7] : memref<128x128xf32, #tpu.memory_space<vmem>>, vector<128x128xf32>
    tpu.vector_store %arg4[%c0_6, %c0_7], %7 {strides = array<i32>} : memref<128x128xf32, #tpu.memory_space<vmem>>, vector<128x128xf32>,
    return
  }
  func.func @transform_0(%arg0: i32) -> (i32, i32) {
    %c0_i32 = arith.constant 0 : i32
    %c0_i32_0 = arith.constant 0 : i32
    return %arg0, %c0_i32 : i32, i32
  }
  func.func @transform_1(%arg0: i32) -> (i32, i32) {
    %c0_i32 = arith.constant 0 : i32
    %c0_i32_0 = arith.constant 0 : i32
    %c0_i32_1 = arith.constant 0 : i32
    return %c0_i32, %c0_i32_0 : i32, i32
  }
  func.func @transform_2(%arg0: i32) -> (i32, i32) {
    %c0_i32 = arith.constant 0 : i32
    %c0_i32_0 = arith.constant 0 : i32
    %c0_i32_1 = arith.constant 0 : i32
    return %c0_i32, %c0_i32_0 : i32, i32
  }
  func.func @transform_3(%arg0: i32) -> (i32, i32) {
    %c0_i32 = arith.constant 0 : i32
    %c0_i32_0 = arith.constant 0 : i32
    return %arg0, %c0_i32 : i32, i32
  }
}

module attributes {stable_mosaic.version = 11 : i64} {
  func.func @_matmul_bias_act_kernel(%arg0: i32, %arg1: memref<32x2048xf32, #tpu.memory_space<vmem>>, %arg2: memref<2048x128xf32, #tpu.memory_space<vmem>>, %arg3: memref<1x128xf32, #tpu.memory_space<vmem>>, %arg4: memref<32x128xf32, #tpu.memory_space<vmem>>) attributes {dimension_semantics = [#tpu.dimension_semantics<parallel>], iteration_bounds = array<i64: 1>, scalar_prefetch = 0 : i64, scratch_operands = 0 : i64, tpu.core_type = #tpu.core_type<tc>, window_params = [{transform_indices = @transform_0, window_bounds = array<i64: 32, 2048>}, {pipeline_mode = #tpu.pipeline_mode<synchronous>, transform_indices = @transform_1, window_bounds = array<i64: 2048, 128>}, {pipeline_mode = #tpu.pipeline_mode<synchronous>, transform_indices = @transform_2, window_bounds = array<i64: 1, 128>}, {transform_indices = @transform_3, window_bounds = array<i64: 32, 128>}]} {
    %c0 = arith.constant 0 : index
    %c0_0 = arith.constant 0 : index
    %0 = vector.load %arg1[%c0, %c0_0] : memref<32x2048xf32, #tpu.memory_space<vmem>>, vector<32x2048xf32>
    %c0_1 = arith.constant 0 : index
    %c0_2 = arith.constant 0 : index
    %1 = vector.load %arg2[%c0_1, %c0_2] : memref<2048x128xf32, #tpu.memory_space<vmem>>, vector<2048x128xf32>
    %cst = arith.constant dense<0.000000e+00> : vector<32x128xf32>
    %2 = tpu.matmul %0, %1, %cst {dimension_numbers = #tpu.dot_dimension_numbers<[1], [0], [0], [1], [0, 0, 1, 1], [], []>} : vector<32x2048xf32>, vector<2048x128xf32>, vector<32x128xf32> -> vector<32x128xf32>
    %c0_3 = arith.constant 0 : index
    %c0_4 = arith.constant 0 : index
    %3 = vector.load %arg3[%c0_3, %c0_4] : memref<1x128xf32, #tpu.memory_space<vmem>>, vector<1x128xf32>
    %4 = vector.broadcast %3 : vector<1x128xf32> to vector<32x128xf32>
    %5 = arith.addf %2, %4 : vector<32x128xf32>
    %cst_5 = arith.constant 0.000000e+00 : f32
    %6 = vector.broadcast %cst_5 : f32 to vector<32x128xf32>
    %7 = arith.maximumf %5, %6 : vector<32x128xf32>
    %c0_6 = arith.constant 0 : index
    %c0_7 = arith.constant 0 : index
    %8 = vector.load %arg4[%c0_6, %c0_7] : memref<32x128xf32, #tpu.memory_space<vmem>>, vector<32x128xf32>
    tpu.vector_store %arg4[%c0_6, %c0_7], %7 {strides = array<i32>} : memref<32x128xf32, #tpu.memory_space<vmem>>, vector<32x128xf32>,
    return
  }
  func.func @transform_0(%arg0: i32) -> (i32, i32) {
    %c0_i32 = arith.constant 0 : i32
    %c0_i32_0 = arith.constant 0 : i32
    return %arg0, %c0_i32 : i32, i32
  }
  func.func @transform_1(%arg0: i32) -> (i32, i32) {
    %c0_i32 = arith.constant 0 : i32
    %c0_i32_0 = arith.constant 0 : i32
    %c0_i32_1 = arith.constant 0 : i32
    return %c0_i32, %c0_i32_0 : i32, i32
  }
  func.func @transform_2(%arg0: i32) -> (i32, i32) {
    %c0_i32 = arith.constant 0 : i32
    %c0_i32_0 = arith.constant 0 : i32
    %c0_i32_1 = arith.constant 0 : i32
    return %c0_i32, %c0_i32_0 : i32, i32
  }
  func.func @transform_3(%arg0: i32) -> (i32, i32) {
    %c0_i32 = arith.constant 0 : i32
    %c0_i32_0 = arith.constant 0 : i32
    return %arg0, %c0_i32 : i32, i32
  }
}

module attributes {stable_mosaic.version = 11 : i64} {
  func.func @_head_kernel(%arg0: i32, %arg1: memref<8x2048xf32, #tpu.memory_space<vmem>>, %arg2: memref<2048x128xf32, #tpu.memory_space<vmem>>, %arg3: memref<1x128xf32, #tpu.memory_space<vmem>>, %arg4: memref<128x128xf32, #tpu.memory_space<vmem>>, %arg5: memref<1x128xf32, #tpu.memory_space<vmem>>, %arg6: memref<8x128xf32, #tpu.memory_space<vmem>>) attributes {dimension_semantics = [#tpu.dimension_semantics<parallel>], iteration_bounds = array<i64: 1>, scalar_prefetch = 0 : i64, scratch_operands = 0 : i64, tpu.core_type = #tpu.core_type<tc>, window_params = [{transform_indices = @transform_0, window_bounds = array<i64: 8, 2048>}, {pipeline_mode = #tpu.pipeline_mode<synchronous>, transform_indices = @transform_1, window_bounds = array<i64: 2048, 128>}, {pipeline_mode = #tpu.pipeline_mode<synchronous>, transform_indices = @transform_2, window_bounds = array<i64: 1, 128>}, {pipeline_mode = #tpu.pipeline_mode<synchronous>, transform_indices = @transform_3, window_bounds = array<i64: 128, 128>}, {pipeline_mode = #tpu.pipeline_mode<synchronous>, transform_indices = @transform_4, window_bounds = array<i64: 1, 128>}, {transform_indices = @transform_5, window_bounds = array<i64: 8, 128>}]} {
    %c0 = arith.constant 0 : index
    %c0_0 = arith.constant 0 : index
    %0 = vector.load %arg1[%c0, %c0_0] : memref<8x2048xf32, #tpu.memory_space<vmem>>, vector<8x2048xf32>
    %c0_1 = arith.constant 0 : index
    %c0_2 = arith.constant 0 : index
    %1 = vector.load %arg2[%c0_1, %c0_2] : memref<2048x128xf32, #tpu.memory_space<vmem>>, vector<2048x128xf32>
    %cst = arith.constant dense<0.000000e+00> : vector<8x128xf32>
    %2 = tpu.matmul %0, %1, %cst {dimension_numbers = #tpu.dot_dimension_numbers<[1], [0], [0], [1], [0, 0, 1, 1], [], []>} : vector<8x2048xf32>, vector<2048x128xf32>, vector<8x128xf32> -> vector<8x128xf32>
    %c0_3 = arith.constant 0 : index
    %c0_4 = arith.constant 0 : index
    %3 = vector.load %arg3[%c0_3, %c0_4] : memref<1x128xf32, #tpu.memory_space<vmem>>, vector<1x128xf32>
    %4 = vector.broadcast %3 : vector<1x128xf32> to vector<8x128xf32>
    %5 = arith.addf %2, %4 : vector<8x128xf32>
    %cst_5 = arith.constant 0.000000e+00 : f32
    %6 = vector.broadcast %cst_5 : f32 to vector<8x128xf32>
    %7 = arith.maximumf %5, %6 : vector<8x128xf32>
    %c0_6 = arith.constant 0 : index
    %c0_7 = arith.constant 0 : index
    %8 = vector.load %arg4[%c0_6, %c0_7] : memref<128x128xf32, #tpu.memory_space<vmem>>, vector<128x128xf32>
    %cst_8 = arith.constant dense<0.000000e+00> : vector<8x128xf32>
    %9 = tpu.matmul %7, %8, %cst_8 {dimension_numbers = #tpu.dot_dimension_numbers<[1], [0], [0], [1], [0, 0, 1, 1], [], []>} : vector<8x128xf32>, vector<128x128xf32>, vector<8x128xf32> -> vector<8x128xf32>
    %c0_9 = arith.constant 0 : index
    %c0_10 = arith.constant 0 : index
    %10 = vector.load %arg5[%c0_9, %c0_10] : memref<1x128xf32, #tpu.memory_space<vmem>>, vector<1x128xf32>
    %11 = vector.broadcast %10 : vector<1x128xf32> to vector<8x128xf32>
    %12 = arith.addf %9, %11 : vector<8x128xf32>
    %c0_11 = arith.constant 0 : index
    %c0_12 = arith.constant 0 : index
    %13 = vector.load %arg6[%c0_11, %c0_12] : memref<8x128xf32, #tpu.memory_space<vmem>>, vector<8x128xf32>
    tpu.vector_store %arg6[%c0_11, %c0_12], %12 {strides = array<i32>} : memref<8x128xf32, #tpu.memory_space<vmem>>, vector<8x128xf32>,
    return
  }
  func.func @transform_0(%arg0: i32) -> (i32, i32) {
    %c0_i32 = arith.constant 0 : i32
    %c0_i32_0 = arith.constant 0 : i32
    return %arg0, %c0_i32 : i32, i32
  }
  func.func @transform_1(%arg0: i32) -> (i32, i32) {
    %c0_i32 = arith.constant 0 : i32
    %c0_i32_0 = arith.constant 0 : i32
    %c0_i32_1 = arith.constant 0 : i32
    return %c0_i32, %c0_i32_0 : i32, i32
  }
  func.func @transform_2(%arg0: i32) -> (i32, i32) {
    %c0_i32 = arith.constant 0 : i32
    %c0_i32_0 = arith.constant 0 : i32
    %c0_i32_1 = arith.constant 0 : i32
    return %c0_i32, %c0_i32_0 : i32, i32
  }
  func.func @transform_3(%arg0: i32) -> (i32, i32) {
    %c0_i32 = arith.constant 0 : i32
    %c0_i32_0 = arith.constant 0 : i32
    %c0_i32_1 = arith.constant 0 : i32
    return %c0_i32, %c0_i32_0 : i32, i32
  }
  func.func @transform_4(%arg0: i32) -> (i32, i32) {
    %c0_i32 = arith.constant 0 : i32
    %c0_i32_0 = arith.constant 0 : i32
    %c0_i32_1 = arith.constant 0 : i32
    return %c0_i32, %c0_i32_0 : i32, i32
  }
  func.func @transform_5(%arg0: i32) -> (i32, i32) {
    %c0_i32 = arith.constant 0 : i32
    %c0_i32_0 = arith.constant 0 : i32
    return %arg0, %c0_i32 : i32, i32
  }
}

</mosaic_0001>

<bundles_post_ra>
// kernel: cnn_forward_pallas.5
= control target key start
LH: loop header
LB: loop body
LE: loop exit
PB: predicated region body
PF: predicated region fallthrough
CT: control target
= control target key end

     0   :  { %s1790_s12 = smov 0   ;;  %s2257_s0 = inlined_call_operand.vmem [shape: f32[2048,128], index: 0, kind: input, shape index: {}]   ;;  %s2258_s1 = inlined_call_operand.vmem [shape: f32[128,128], index: 1, kind: input, shape index: {}]   ;;  %s2259_s2 = inlined_call_operand.vmem [shape: f32[1,128], index: 2, kind: input, shape index: {}]   ;;  %s2260_s3 = inlined_call_operand.vmem [shape: f32[2048,128], index: 3, kind: output, shape index: {}]  }
   0x1 LB: > { %s1342_s13 = sadd.s32 4294967295, %s1768_s12   ;;  %p1346_p0 = scmp.ge.s32.totalorder %s1768_s12, 1  ;;  %s1768_s12 = sphi %s1790_s12, %s13_s12  }
   0x2   : > { %p138_p1 = scmp.lt.s32.totalorder %s1768_s12, 3 }
   0x4   : > { %p139_p2 = pnand %p1346_p0, %p138_p1 }
   0x5   : > { %s1347_s30 = sshll.u32 (!%p139_p2), %s1342_s13, 7 }
   0x6   : > { %142 = sbr.rel (%p139_p2) target bundleno = 369 (0x171), region = 32  ;;  %p163_p3 = scmp.lt.s32.totalorder (!%p139_p2), %s1347_s30, 255 }
   0xb   : > { %v317_v0 = vld [vmem:[%s2258_s1 + $0x78] sm:$0xff]  ;;  %v316_v1 = vld [vmem:[%s2258_s1 + $0x70] sm:$0xff]  ;;  %v315_v2 = vld [vmem:[%s2258_s1 + $0x68] sm:$0xff]  ;;  %s2262_s30 = smov (!%p163_p3, %s1347_s30), 255 }
   0xc   : > { %1498 = vmatprep.subr.mxu0 %v317_v0  ;;  %1722 = vmatprep.subr.mxu1 %v317_v0  ;;  %v314_v3 = vld [vmem:[%s2258_s1 + $0x60] sm:$0xff]  ;;  %v313_v4 = vld [vmem:[%s2258_s1 + $0x58] sm:$0xff]  ;;  %v312_v5 = vld [vmem:[%s2258_s1 + $0x50] sm:$0xff]  ;;  %s1348_s17 = sshll.u32 %s2262_s30, 3 }
   0xd   : > { %1499 = vmatpush3.msra.mxu0 %v317_v0  ;;  %1738 = vmatpush3.msra.mxu1 %v317_v0  ;;  %v311_v6 = vld [vmem:[%s2258_s1 + $0x48] sm:$0xff]  ;;  %v310_v7 = vld [vmem:[%s2258_s1 + $0x40] sm:$0xff]  ;;  %v309_v8 = vld [vmem:[%s2258_s1 + $0x38] sm:$0xff]  ;;  %s1853_s22 = scalar_lea.vmem %s2257_s0, %s1348_s17  ;;  %s1998_s29 = scalar_lea.vmem %s2260_s3, %s1348_s17 }
   0xe   : > { %1500 = vmatprep.subr.mxu0 %v316_v1  ;;  %1723 = vmatprep.subr.mxu1 %v316_v1  ;;  %v308_v9 = vld [vmem:[%s2258_s1 + $0x30] sm:$0xff]  ;;  %v307_v10 = vld [vmem:[%s2258_s1 + $0x28] sm:$0xff]  ;;  %v306_v11 = vld [vmem:[%s2258_s1 + $0x20] sm:$0xff] }
   0xf   : > { %1501 = vmatpush3.msra.mxu0 %v316_v1  ;;  %1739 = vmatpush3.msra.mxu1 %v316_v1  ;;  %v305_v12 = vld [vmem:[%s2258_s1 + $0x18] sm:$0xff]  ;;  %v304_v13 = vld [vmem:[%s2258_s1 + $0x10] sm:$0xff]  ;;  %v303_v14 = vld [vmem:[%s2258_s1 + $0x8] sm:$0xff] }
  0x10   : > { %1502 = vmatprep.subr.mxu0 %v315_v2  ;;  %1724 = vmatprep.subr.mxu1 %v315_v2  ;;  %v302_v15 = vld [vmem:[%s2258_s1] sm:$0xff]  ;;  %v175_v18 = vld [vmem:[%s1853_s22 + $0x8] sm:$0xff]  ;;  %v176_v20 = vld [vmem:[%s1853_s22 + $0x10] sm:$0xff] }
  0x11   : > { %1503 = vmatpush3.msra.mxu0 %v315_v2  ;;  %1740 = vmatpush3.msra.mxu1 %v315_v2  ;;  %v174_v16 = vld [vmem:[%s1853_s22] sm:$0xff]  ;;  %v239_v19 = vld [vmem:[%s1853_s22 + $0x208] sm:$0xff]  ;;  %v240_v21 = vld [vmem:[%s1853_s22 + $0x210] sm:$0xff] }
  0x12   : > { %1504 = vmatprep.subr.mxu0 %v314_v3  ;;  %1725 = vmatprep.subr.mxu1 %v314_v3  ;;  %v238_v17 = vld [vmem:[%s1853_s22 + $0x200] sm:$0xff]  ;;  %v177_v22 = vld [vmem:[%s1853_s22 + $0x18] sm:$0xff]  ;;  %v179_v26 = vld [vmem:[%s1853_s22 + $0x28] sm:$0xff] }
  0x13   : > { %1505 = vmatpush3.msra.mxu0 %v314_v3  ;;  %1741 = vmatpush3.msra.mxu1 %v314_v3  ;;  %v241_v23 = vld [vmem:[%s1853_s22 + $0x218] sm:$0xff]  ;;  %v178_v24 = vld [vmem:[%s1853_s22 + $0x20] sm:$0xff]  ;;  %v243_v27 = vld [vmem:[%s1853_s22 + $0x228] sm:$0xff] }
  0x14   : > { %1506 = vmatprep.subr.mxu0 %v313_v4  ;;  %1726 = vmatprep.subr.mxu1 %v313_v4  ;;  %v242_v25 = vld [vmem:[%s1853_s22 + $0x220] sm:$0xff]  ;;  %v180_v28 = vld [vmem:[%s1853_s22 + $0x30] sm:$0xff]  ;;  %v181_v30 = vld [vmem:[%s1853_s22 + $0x38] sm:$0xff] }
  0x15   : > { %1507 = vmatpush3.msra.mxu0 %v313_v4  ;;  %1742 = vmatpush3.msra.mxu1 %v313_v4  ;;  %v244_v29 = vld [vmem:[%s1853_s22 + $0x230] sm:$0xff]  ;;  %v245_v31 = vld [vmem:[%s1853_s22 + $0x238] sm:$0xff]  ;;  %v182_v32 = vld [vmem:[%s1853_s22 + $0x40] sm:$0xff] }
  0x16   : > { %1508 = vmatprep.subr.mxu0 %v312_v5  ;;  %1727 = vmatprep.subr.mxu1 %v312_v5  ;;  %v246_v33 = vld [vmem:[%s1853_s22 + $0x240] sm:$0xff]  ;;  %v183_v34 = vld [vmem:[%s1853_s22 + $0x48] sm:$0xff]  ;;  %v184_v36 = vld [vmem:[%s1853_s22 + $0x50] sm:$0xff] }
  0x17   : > { %1509 = vmatpush3.msra.mxu0 %v312_v5  ;;  %1743 = vmatpush3.msra.mxu1 %v312_v5  ;;  %v247_v35 = vld [vmem:[%s1853_s22 + $0x248] sm:$0xff]  ;;  %v248_v37 = vld [vmem:[%s1853_s22 + $0x250] sm:$0xff]  ;;  %v185_v38 = vld [vmem:[%s1853_s22 + $0x58] sm:$0xff] }
  0x18   : > { %1510 = vmatprep.subr.mxu0 %v311_v6  ;;  %1728 = vmatprep.subr.mxu1 %v311_v6  ;;  %v249_v39 = vld [vmem:[%s1853_s22 + $0x258] sm:$0xff]  ;;  %v186_v40 = vld [vmem:[%s1853_s22 + $0x60] sm:$0xff]  ;;  %v187_v42 = vld [vmem:[%s1853_s22 + $0x68] sm:$0xff] }
  0x19   : > { %1511 = vmatpush3.msra.mxu0 %v311_v6  ;;  %1744 = vmatpush3.msra.mxu1 %v311_v6  ;;  %v250_v41 = vld [vmem:[%s1853_s22 + $0x260] sm:$0xff]  ;;  %v251_v43 = vld [vmem:[%s1853_s22 + $0x268] sm:$0xff]  ;;  %v188_v44 = vld [vmem:[%s1853_s22 + $0x70] sm:$0xff] }
  0x1a   : > { %1512 = vmatprep.subr.mxu0 %v310_v7  ;;  %1729 = vmatprep.subr.mxu1 %v310_v7  ;;  %v252_v45 = vld [vmem:[%s1853_s22 + $0x270] sm:$0xff]  ;;  %v189_v46 = vld [vmem:[%s1853_s22 + $0x78] sm:$0xff]  ;;  %v190_v48 = vld [vmem:[%s1853_s22 + $0x80] sm:$0xff] }
  0x1b   : > { %1513 = vmatpush3.msra.mxu0 %v310_v7  ;;  %1745 = vmatpush3.msra.mxu1 %v310_v7  ;;  %v253_v47 = vld [vmem:[%s1853_s22 + $0x278] sm:$0xff]  ;;  %v254_v49 = vld [vmem:[%s1853_s22 + $0x280] sm:$0xff]  ;;  %v191_v50 = vld [vmem:[%s1853_s22 + $0x88] sm:$0xff] }
  0x1c   : > { %1514 = vmatprep.subr.mxu0 %v309_v8  ;;  %1730 = vmatprep.subr.mxu1 %v309_v8  ;;  %v255_v51 = vld [vmem:[%s1853_s22 + $0x288] sm:$0xff]  ;;  %v192_v52 = vld [vmem:[%s1853_s22 + $0x90] sm:$0xff]  ;;  %v193_v54 = vld [vmem:[%s1853_s22 + $0x98] sm:$0xff] }
  0x1d   : > { %1515 = vmatpush3.msra.mxu0 %v309_v8  ;;  %1746 = vmatpush3.msra.mxu1 %v309_v8  ;;  %v256_v53 = vld [vmem:[%s1853_s22 + $0x290] sm:$0xff]  ;;  %v257_v55 = vld [vmem:[%s1853_s22 + $0x298] sm:$0xff]  ;;  %v194_v56 = vld [vmem:[%s1853_s22 + $0xa0] sm:$0xff] }
  0x1e   : > { %1516 = vmatprep.subr.mxu0 %v308_v9  ;;  %1731 = vmatprep.subr.mxu1 %v308_v9  ;;  %v258_v57 = vld [vmem:[%s1853_s22 + $0x2a0] sm:$0xff]  ;;  %v195_v58 = vld [vmem:[%s1853_s22 + $0xa8] sm:$0xff]  ;;  %v196_v60 = vld [vmem:[%s1853_s22 + $0xb0] sm:$0xff] }
  0x1f   : > { %1517 = vmatpush3.msra.mxu0 %v308_v9  ;;  %1747 = vmatpush3.msra.mxu1 %v308_v9  ;;  %v259_v59 = vld [vmem:[%s1853_s22 + $0x2a8] sm:$0xff]  ;;  %v260_v61 = vld [vmem:[%s1853_s22 + $0x2b0] sm:$0xff]  ;;  %v197_v62 = vld [vmem:[%s1853_s22 + $0xb8] sm:$0xff] }
  0x20   : > { %1518 = vmatprep.subr.mxu0 %v307_v10  ;;  %1732 = vmatprep.subr.mxu1 %v307_v10  ;;  %v261_v63 = vld [vmem:[%s1853_s22 + $0x2b8] sm:$0xff]  ;;  %v198_v0 = vld [vmem:[%s1853_s22 + $0xc0] sm:$0xff]  ;;  %v199_v2 = vld [vmem:[%s1853_s22 + $0xc8] sm:$0xff] }
  0x21   : > { %1519 = vmatpush3.msra.mxu0 %v307_v10  ;;  %1748 = vmatpush3.msra.mxu1 %v307_v10  ;;  %v262_v1 = vld [vmem:[%s1853_s22 + $0x2c0] sm:$0xff]  ;;  %v263_v3 = vld [vmem:[%s1853_s22 + $0x2c8] sm:$0xff]  ;;  %v200_v4 = vld [vmem:[%s1853_s22 + $0xd0] sm:$0xff] }
  0x22   : > { %1520 = vmatprep.subr.mxu0 %v306_v11  ;;  %1733 = vmatprep.subr.mxu1 %v306_v11  ;;  %v264_v5 = vld [vmem:[%s1853_s22 + $0x2d0] sm:$0xff]  ;;  %v201_v6 = vld [vmem:[%s1853_s22 + $0xd8] sm:$0xff]  ;;  %v202_v8 = vld [vmem:[%s1853_s22 + $0xe0] sm:$0xff] }
  0x23   : > { %1521 = vmatpush3.msra.mxu0 %v306_v11  ;;  %1749 = vmatpush3.msra.mxu1 %v306_v11  ;;  %v265_v7 = vld [vmem:[%s1853_s22 + $0x2d8] sm:$0xff]  ;;  %v266_v9 = vld [vmem:[%s1853_s22 + $0x2e0] sm:$0xff]  ;;  %v203_v10 = vld [vmem:[%s1853_s22 + $0xe8] sm:$0xff] }
  0x24   : > { %1522 = vmatprep.subr.mxu0 %v305_v12  ;;  %1734 = vmatprep.subr.mxu1 %v305_v12  ;;  %v267_v11 = vld [vmem:[%s1853_s22 + $0x2e8] sm:$0xff] }
  0x25   : > { %1523 = vmatpush3.msra.mxu0 %v305_v12  ;;  %1750 = vmatpush3.msra.mxu1 %v305_v12  ;;  %v204_v12 = vld [vmem:[%s1853_s22 + $0xf0] sm:$0xff] }
  0x26   : > { %1524 = vmatprep.subr.mxu0 %v304_v13  ;;  %1735 = vmatprep.subr.mxu1 %v304_v13 }
  0x27   : > { %1525 = vmatpush3.msra.mxu0 %v304_v13  ;;  %1751 = vmatpush3.msra.mxu1 %v304_v13  ;;  %v268_v13 = vld [vmem:[%s1853_s22 + $0x2f0] sm:$0xff] }
  0x28   : > { %1526 = vmatprep.subr.mxu0 %v303_v14  ;;  %1736 = vmatprep.subr.mxu1 %v303_v14 }
  0x29   : > { %1527 = vmatpush3.msra.mxu0 %v303_v14  ;;  %1752 = vmatpush3.msra.mxu1 %v303_v14  ;;  %v205_v14 = vld [vmem:[%s1853_s22 + $0xf8] sm:$0xff] }
  0x2a   : > { %1528 = vmatprep.subr.mxu0 %v302_v15  ;;  %1737 = vmatprep.subr.mxu1 %v302_v15 }
  0x2b   : > { %1529 = vmatpush3.msra.mxu0 %v302_v15  ;;  %1753 = vmatpush3.msra.mxu1 %v302_v15  ;;  %v269_v15 = vld [vmem:[%s1853_s22 + $0x2f8] sm:$0xff] }
  0x2c   : > { %1530 = vmatprep.mubr.f32.mxu0 %v174_v16  ;;  %1626 = vmatprep.mubr.f32.mxu1 %v238_v17  ;;  %v206_v16 = vld [vmem:[%s1853_s22 + $0x100] sm:$0xff] }
  0x2d   : > { %1531 = vmatmul.mubr.f32.vlgmr.msra.gmra.mxu0 %v175_v18  ;;  %1627 = vmatmul.mubr.f32.vlgmr.msra.gmra.mxu1 %v239_v19  ;;  %v270_v17 = vld [vmem:[%s1853_s22 + $0x300] sm:$0xff]  ;;  %v207_v18 = vld [vmem:[%s1853_s22 + $0x108] sm:$0xff] }
  0x2e   : > { %1533 = vmatprep.mubr.f32.mxu0 %v176_v20  ;;  %1629 = vmatprep.mubr.f32.mxu1 %v240_v21  ;;  %v271_v19 = vld [vmem:[%s1853_s22 + $0x308] sm:$0xff]  ;;  %v208_v20 = vld [vmem:[%s1853_s22 + $0x110] sm:$0xff] }
  0x2f   : > { %v272_v21 = vld [vmem:[%s1853_s22 + $0x310] sm:$0xff] }
  0x31   : > { %1534 = vmatmul.mubr.f32.gmra.mxu0 %v177_v22  ;;  %1630 = vmatmul.mubr.f32.gmra.mxu1 %v241_v23  ;;  %v209_v22 = vld [vmem:[%s1853_s22 + $0x118] sm:$0xff] }
  0x32   : > { %1536 = vmatprep.mubr.f32.mxu0 %v178_v24  ;;  %1632 = vmatprep.mubr.f32.mxu1 %v242_v25  ;;  %v273_v23 = vld [vmem:[%s1853_s22 + $0x318] sm:$0xff]  ;;  %v210_v24 = vld [vmem:[%s1853_s22 + $0x120] sm:$0xff] }
  0x33   : > { %v274_v25 = vld [vmem:[%s1853_s22 + $0x320] sm:$0xff] }
  0x35   : > { %1537 = vmatmul.mubr.f32.gmra.mxu0 %v179_v26  ;;  %1633 = vmatmul.mubr.f32.gmra.mxu1 %v243_v27  ;;  %v211_v26 = vld [vmem:[%s1853_s22 + $0x128] sm:$0xff] }
  0x36   : > { %1539 = vmatprep.mubr.f32.mxu0 %v180_v28  ;;  %1635 = vmatprep.mubr.f32.mxu1 %v244_v29  ;;  %v275_v27 = vld [vmem:[%s1853_s22 + $0x328] sm:$0xff]  ;;  %v212_v28 = vld [vmem:[%s1853_s22 + $0x130] sm:$0xff] }
  0x37   : > { %v276_v29 = vld [vmem:[%s1853_s22 + $0x330] sm:$0xff] }
  0x39   : > { %1540 = vmatmul.mubr.f32.gmra.mxu0 %v181_v30  ;;  %1636 = vmatmul.mubr.f32.gmra.mxu1 %v245_v31  ;;  %v213_v30 = vld [vmem:[%s1853_s22 + $0x138] sm:$0xff] }
  0x3a   : > { %1542 = vmatprep.mubr.f32.mxu0 %v182_v32  ;;  %1638 = vmatprep.mubr.f32.mxu1 %v246_v33  ;;  %v277_v31 = vld [vmem:[%s1853_s22 + $0x338] sm:$0xff]  ;;  %v214_v32 = vld [vmem:[%s1853_s22 + $0x140] sm:$0xff] }
  0x3b   : > { %v278_v33 = vld [vmem:[%s1853_s22 + $0x340] sm:$0xff] }
  0x3d   : > { %1543 = vmatmul.mubr.f32.gmra.mxu0 %v183_v34  ;;  %1639 = vmatmul.mubr.f32.gmra.mxu1 %v247_v35  ;;  %v215_v34 = vld [vmem:[%s1853_s22 + $0x148] sm:$0xff] }
  0x3e   : > { %1545 = vmatprep.mubr.f32.mxu0 %v184_v36  ;;  %1641 = vmatprep.mubr.f32.mxu1 %v248_v37  ;;  %v279_v35 = vld [vmem:[%s1853_s22 + $0x348] sm:$0xff]  ;;  %v216_v36 = vld [vmem:[%s1853_s22 + $0x150] sm:$0xff] }
  0x3f   : > { %v280_v37 = vld [vmem:[%s1853_s22 + $0x350] sm:$0xff] }
  0x41   : > { %1546 = vmatmul.mubr.f32.gmra.mxu0 %v185_v38  ;;  %1642 = vmatmul.mubr.f32.gmra.mxu1 %v249_v39  ;;  %v217_v38 = vld [vmem:[%s1853_s22 + $0x158] sm:$0xff] }
  0x42   : > { %1548 = vmatprep.mubr.f32.mxu0 %v186_v40  ;;  %1644 = vmatprep.mubr.f32.mxu1 %v250_v41  ;;  %v281_v39 = vld [vmem:[%s1853_s22 + $0x358] sm:$0xff]  ;;  %v218_v40 = vld [vmem:[%s1853_s22 + $0x160] sm:$0xff] }
  0x43   : > { %v282_v41 = vld [vmem:[%s1853_s22 + $0x360] sm:$0xff] }
  0x45   : > { %1549 = vmatmul.mubr.f32.gmra.mxu0 %v187_v42  ;;  %1645 = vmatmul.mubr.f32.gmra.mxu1 %v251_v43  ;;  %v219_v42 = vld [vmem:[%s1853_s22 + $0x168] sm:$0xff] }
  0x46   : > { %1551 = vmatprep.mubr.f32.mxu0 %v188_v44  ;;  %1647 = vmatprep.mubr.f32.mxu1 %v252_v45  ;;  %v283_v43 = vld [vmem:[%s1853_s22 + $0x368] sm:$0xff]  ;;  %v220_v44 = vld [vmem:[%s1853_s22 + $0x170] sm:$0xff] }
  0x47   : > { %v284_v45 = vld [vmem:[%s1853_s22 + $0x370] sm:$0xff] }
  0x49   : > { %1552 = vmatmul.mubr.f32.gmra.mxu0 %v189_v46  ;;  %1648 = vmatmul.mubr.f32.gmra.mxu1 %v253_v47  ;;  %v221_v46 = vld [vmem:[%s1853_s22 + $0x178] sm:$0xff] }
  0x4a   : > { %1554 = vmatprep.mubr.f32.mxu0 %v190_v48  ;;  %1650 = vmatprep.mubr.f32.mxu1 %v254_v49  ;;  %v285_v47 = vld [vmem:[%s1853_s22 + $0x378] sm:$0xff]  ;;  %v222_v48 = vld [vmem:[%s1853_s22 + $0x180] sm:$0xff] }
  0x4b   : > { %v286_v49 = vld [vmem:[%s1853_s22 + $0x380] sm:$0xff] }
  0x4d   : > { %1555 = vmatmul.mubr.f32.gmra.mxu0 %v191_v50  ;;  %1651 = vmatmul.mubr.f32.gmra.mxu1 %v255_v51  ;;  %v223_v50 = vld [vmem:[%s1853_s22 + $0x188] sm:$0xff] }
  0x4e   : > { %1557 = vmatprep.mubr.f32.mxu0 %v192_v52  ;;  %1653 = vmatprep.mubr.f32.mxu1 %v256_v53  ;;  %v287_v51 = vld [vmem:[%s1853_s22 + $0x388] sm:$0xff]  ;;  %v224_v52 = vld [vmem:[%s1853_s22 + $0x190] sm:$0xff] }
  0x4f   : > { %v288_v53 = vld [vmem:[%s1853_s22 + $0x390] sm:$0xff] }
  0x51   : > { %1558 = vmatmul.mubr.f32.gmra.mxu0 %v193_v54  ;;  %1654 = vmatmul.mubr.f32.gmra.mxu1 %v257_v55  ;;  %v225_v54 = vld [vmem:[%s1853_s22 + $0x198] sm:$0xff] }
  0x52   : > { %1560 = vmatprep.mubr.f32.mxu0 %v194_v56  ;;  %1656 = vmatprep.mubr.f32.mxu1 %v258_v57  ;;  %v289_v55 = vld [vmem:[%s1853_s22 + $0x398] sm:$0xff]  ;;  %v226_v56 = vld [vmem:[%s1853_s22 + $0x1a0] sm:$0xff] }
  0x53   : > { %v290_v57 = vld [vmem:[%s1853_s22 + $0x3a0] sm:$0xff] }
  0x55   : > { %1561 = vmatmul.mubr.f32.gmra.mxu0 %v195_v58  ;;  %1657 = vmatmul.mubr.f32.gmra.mxu1 %v259_v59  ;;  %v227_v58 = vld [vmem:[%s1853_s22 + $0x1a8] sm:$0xff] }
  0x56   : > { %1563 = vmatprep.mubr.f32.mxu0 %v196_v60  ;;  %1659 = vmatprep.mubr.f32.mxu1 %v260_v61  ;;  %v291_v59 = vld [vmem:[%s1853_s22 + $0x3a8] sm:$0xff]  ;;  %v228_v60 = vld [vmem:[%s1853_s22 + $0x1b0] sm:$0xff] }
  0x57   : > { %v292_v61 = vld [vmem:[%s1853_s22 + $0x3b0] sm:$0xff] }
  0x59   : > { %1564 = vmatmul.mubr.f32.gmra.mxu0 %v197_v62  ;;  %1660 = vmatmul.mubr.f32.gmra.mxu1 %v261_v63  ;;  %v229_v62 = vld [vmem:[%s1853_s22 + $0x1b8] sm:$0xff] }
  0x5a   : > { %1566 = vmatprep.mubr.f32.mxu0 %v198_v0  ;;  %1662 = vmatprep.mubr.f32.mxu1 %v262_v1  ;;  %v293_v63 = vld [vmem:[%s1853_s22 + $0x3b8] sm:$0xff]  ;;  %v230_v0 = vld [vmem:[%s1853_s22 + $0x1c0] sm:$0xff] }
  0x5b   : > { %v294_v1 = vld [vmem:[%s1853_s22 + $0x3c0] sm:$0xff] }
  0x5d   : > { %1567 = vmatmul.mubr.f32.gmra.mxu0 %v199_v2  ;;  %1663 = vmatmul.mubr.f32.gmra.mxu1 %v263_v3  ;;  %v231_v2 = vld [vmem:[%s1853_s22 + $0x1c8] sm:$0xff] }
  0x5e   : > { %1569 = vmatprep.mubr.f32.mxu0 %v200_v4  ;;  %1665 = vmatprep.mubr.f32.mxu1 %v264_v5  ;;  %v295_v3 = vld [vmem:[%s1853_s22 + $0x3c8] sm:$0xff]  ;;  %v232_v4 = vld [vmem:[%s1853_s22 + $0x1d0] sm:$0xff] }
  0x5f   : > { %v296_v5 = vld [vmem:[%s1853_s22 + $0x3d0] sm:$0xff] }
  0x61   : > { %1570 = vmatmul.mubr.f32.gmra.mxu0 %v201_v6  ;;  %1666 = vmatmul.mubr.f32.gmra.mxu1 %v265_v7  ;;  %v233_v6 = vld [vmem:[%s1853_s22 + $0x1d8] sm:$0xff] }
  0x62   : > { %1572 = vmatprep.mubr.f32.mxu0 %v202_v8  ;;  %1668 = vmatprep.mubr.f32.mxu1 %v266_v9  ;;  %v297_v7 = vld [vmem:[%s1853_s22 + $0x3d8] sm:$0xff]  ;;  %v234_v8 = vld [vmem:[%s1853_s22 + $0x1e0] sm:$0xff] }
  0x63   : > { %v298_v9 = vld [vmem:[%s1853_s22 + $0x3e0] sm:$0xff] }
  0x65   : > { %1573 = vmatmul.mubr.f32.gmra.mxu0 %v203_v10  ;;  %1669 = vmatmul.mubr.f32.gmra.mxu1 %v267_v11  ;;  %v235_v10 = vld [vmem:[%s1853_s22 + $0x1e8] sm:$0xff] }
  0x66   : > { %1575 = vmatprep.mubr.f32.mxu0 %v204_v12  ;;  %1671 = vmatprep.mubr.f32.mxu1 %v268_v13  ;;  %v299_v11 = vld [vmem:[%s1853_s22 + $0x3e8] sm:$0xff]  ;;  %v236_v12 = vld [vmem:[%s1853_s22 + $0x1f0] sm:$0xff] }
  0x67   : > { %v300_v13 = vld [vmem:[%s1853_s22 + $0x3f0] sm:$0xff] }
  0x69   : > { %1576 = vmatmul.mubr.f32.gmra.mxu0 %v205_v14  ;;  %1672 = vmatmul.mubr.f32.gmra.mxu1 %v269_v15  ;;  %v237_v14 = vld [vmem:[%s1853_s22 + $0x1f8] sm:$0xff] }
  0x6a   : > { %1578 = vmatprep.mubr.f32.mxu0 %v206_v16  ;;  %1674 = vmatprep.mubr.f32.mxu1 %v270_v17  ;;  %v301_v15 = vld [vmem:[%s1853_s22 + $0x3f8] sm:$0xff]  ;;  %v1989_v16 = vld [vmem:[%s2259_s2] ss:$0 sm:$0xff] }
  0x6d   : > { %1579 = vmatmul.mubr.f32.gmra.mxu0 %v207_v18  ;;  %1675 = vmatmul.mubr.f32.gmra.mxu1 %v271_v19 }
  0x6e   : > { %1581 = vmatprep.mubr.f32.mxu0 %v208_v20  ;;  %1677 = vmatprep.mubr.f32.mxu1 %v272_v21 }
  0x71   : > { %1582 = vmatmul.mubr.f32.gmra.mxu0 %v209_v22  ;;  %1678 = vmatmul.mubr.f32.gmra.mxu1 %v273_v23 }
  0x72   : > { %1584 = vmatprep.mubr.f32.mxu0 %v210_v24  ;;  %1680 = vmatprep.mubr.f32.mxu1 %v274_v25 }
  0x75   : > { %1585 = vmatmul.mubr.f32.gmra.mxu0 %v211_v26  ;;  %1681 = vmatmul.mubr.f32.gmra.mxu1 %v275_v27 }
  0x76   : > { %1587 = vmatprep.mubr.f32.mxu0 %v212_v28  ;;  %1683 = vmatprep.mubr.f32.mxu1 %v276_v29 }
  0x79   : > { %1588 = vmatmul.mubr.f32.gmra.mxu0 %v213_v30  ;;  %1684 = vmatmul.mubr.f32.gmra.mxu1 %v277_v31 }
  0x7a   : > { %1590 = vmatprep.mubr.f32.mxu0 %v214_v32  ;;  %1686 = vmatprep.mubr.f32.mxu1 %v278_v33 }
  0x7d   : > { %1591 = vmatmul.mubr.f32.gmra.mxu0 %v215_v34  ;;  %1687 = vmatmul.mubr.f32.gmra.mxu1 %v279_v35 }
  0x7e   : > { %1593 = vmatprep.mubr.f32.mxu0 %v216_v36  ;;  %1689 = vmatprep.mubr.f32.mxu1 %v280_v37 }
  0x81   : > { %1594 = vmatmul.mubr.f32.gmra.mxu0 %v217_v38  ;;  %1690 = vmatmul.mubr.f32.gmra.mxu1 %v281_v39 }
  0x82   : > { %1596 = vmatprep.mubr.f32.mxu0 %v218_v40  ;;  %1692 = vmatprep.mubr.f32.mxu1 %v282_v41 }
  0x85   : > { %1597 = vmatmul.mubr.f32.gmra.mxu0 %v219_v42  ;;  %1693 = vmatmul.mubr.f32.gmra.mxu1 %v283_v43 }
  0x86   : > { %1599 = vmatprep.mubr.f32.mxu0 %v220_v44  ;;  %1695 = vmatprep.mubr.f32.mxu1 %v284_v45 }
  0x89   : > { %1600 = vmatmul.mubr.f32.gmra.mxu0 %v221_v46  ;;  %1696 = vmatmul.mubr.f32.gmra.mxu1 %v285_v47 }
  0x8a   : > { %1602 = vmatprep.mubr.f32.mxu0 %v222_v48  ;;  %1698 = vmatprep.mubr.f32.mxu1 %v286_v49 }
  0x8d   : > { %1603 = vmatmul.mubr.f32.gmra.mxu0 %v223_v50  ;;  %1699 = vmatmul.mubr.f32.gmra.mxu1 %v287_v51 }
  0x8e   : > { %1605 = vmatprep.mubr.f32.mxu0 %v224_v52  ;;  %1701 = vmatprep.mubr.f32.mxu1 %v288_v53 }
  0x91   : > { %1606 = vmatmul.mubr.f32.gmra.mxu0 %v225_v54  ;;  %1702 = vmatmul.mubr.f32.gmra.mxu1 %v289_v55 }
  0x92   : > { %1608 = vmatprep.mubr.f32.mxu0 %v226_v56  ;;  %1704 = vmatprep.mubr.f32.mxu1 %v290_v57 }
  0x95   : > { %1609 = vmatmul.mubr.f32.gmra.mxu0 %v227_v58  ;;  %1705 = vmatmul.mubr.f32.gmra.mxu1 %v291_v59 }
  0x96   : > { %1611 = vmatprep.mubr.f32.mxu0 %v228_v60  ;;  %1707 = vmatprep.mubr.f32.mxu1 %v292_v61 }
  0x99   : > { %1612 = vmatmul.mubr.f32.gmra.mxu0 %v229_v62  ;;  %1708 = vmatmul.mubr.f32.gmra.mxu1 %v293_v63 }
  0x9a   : > { %1614 = vmatprep.mubr.f32.mxu0 %v230_v0  ;;  %1710 = vmatprep.mubr.f32.mxu1 %v294_v1 }
  0x9d   : > { %1615 = vmatmul.mubr.f32.gmra.mxu0 %v231_v2  ;;  %1711 = vmatmul.mubr.f32.gmra.mxu1 %v295_v3 }
  0x9e   : > { %1617 = vmatprep.mubr.f32.mxu0 %v232_v4  ;;  %1713 = vmatprep.mubr.f32.mxu1 %v296_v5 }
  0xa1   : > { %1618 = vmatmul.mubr.f32.gmra.mxu0 %v233_v6  ;;  %1714 = vmatmul.mubr.f32.gmra.mxu1 %v297_v7 }
  0xa2   : > { %1620 = vmatprep.mubr.f32.mxu0 %v234_v8  ;;  %1716 = vmatprep.mubr.f32.mxu1 %v298_v9 }
  0xa5   : > { %1621 = vmatmul.mubr.f32.gmra.mxu0 %v235_v10  ;;  %1717 = vmatmul.mubr.f32.gmra.mxu1 %v299_v11 }
  0xa6   : > { %1623 = vmatprep.mubr.f32.mxu0 %v236_v12  ;;  %1719 = vmatprep.mubr.f32.mxu1 %v300_v13 }
  0xa9   : > { %1624 = vmatmul.mubr.f32.gmra.mxu0 %v237_v14  ;;  %1720 = vmatmul.mubr.f32.gmra.mxu1 %v301_v15 }
  0xed   : > { %v1532_v17 = vpop.f32.mrf.mxu0  ;;  %v1628_v18 = vpop.f32.mrf.mxu1 }
  0xee   : > { %v397_v19 = vadd.f32 %v1532_v17, %v1989_v16  ;;  %v717_v20 = vadd.f32 %v1628_v18, %v1989_v16 }
  0xef   : > { %v391_v21 = vpop.f32.mrf.mxu0  ;;  %v711_v22 = vpop.f32.mrf.mxu1 }
  0xf0   : > { %v1031_v23 = vmax.f32 %v397_v19, 0.0  ;;  %v1095_v24 = vmax.f32 %v717_v20, 0.0  ;;  %v392_v25 = vadd.f32 %v1989_v16, %v391_v21  ;;  %v712_v26 = vadd.f32 %v1989_v16, %v711_v22 }
  0xf1   : > { %v1535_v27 = vpop.f32.mrf.mxu0  ;;  %v1631_v28 = vpop.f32.mrf.mxu1 }
  0xf2   : > { %1159 = vst [vmem:[%s1998_s29 + $0x8] sm:$0xff] %v1031_v23  ;;  %1223 = vst [vmem:[%s1998_s29 + $0x208] sm:$0xff] %v1095_v24  ;;  %v1030_v29 = vmax.f32 %v392_v25, 0.0  ;;  %v1094_v30 = vmax.f32 %v712_v26, 0.0  ;;  %v407_v31 = vadd.f32 %v1535_v27, %v1989_v16  ;;  %v727_v32 = vadd.f32 %v1631_v28, %v1989_v16 }
  0xf3   : > { %v401_v33 = vpop.f32.mrf.mxu0  ;;  %v721_v34 = vpop.f32.mrf.mxu1 }
  0xf4   : > { %1158 = vst [vmem:[%s1998_s29] sm:$0xff] %v1030_v29  ;;  %1222 = vst [vmem:[%s1998_s29 + $0x200] sm:$0xff] %v1094_v30  ;;  %v1033_v35 = vmax.f32 %v407_v31, 0.0  ;;  %v1097_v36 = vmax.f32 %v727_v32, 0.0  ;;  %v402_v37 = vadd.f32 %v1989_v16, %v401_v33  ;;  %v722_v38 = vadd.f32 %v1989_v16, %v721_v34 }
  0xf5   : > { %v1538_v39 = vpop.f32.mrf.mxu0  ;;  %v1634_v40 = vpop.f32.mrf.mxu1 }
  0xf6   : > { %1161 = vst [vmem:[%s1998_s29 + $0x18] sm:$0xff] %v1033_v35  ;;  %1225 = vst [vmem:[%s1998_s29 + $0x218] sm:$0xff] %v1097_v36  ;;  %v1032_v41 = vmax.f32 %v402_v37, 0.0  ;;  %v1096_v42 = vmax.f32 %v722_v38, 0.0  ;;  %v417_v43 = vadd.f32 %v1538_v39, %v1989_v16  ;;  %v737_v44 = vadd.f32 %v1634_v40, %v1989_v16 }
  0xf7   : > { %v411_v45 = vpop.f32.mrf.mxu0  ;;  %v731_v46 = vpop.f32.mrf.mxu1 }
  0xf8   : > { %1160 = vst [vmem:[%s1998_s29 + $0x10] sm:$0xff] %v1032_v41  ;;  %1224 = vst [vmem:[%s1998_s29 + $0x210] sm:$0xff] %v1096_v42  ;;  %v1035_v47 = vmax.f32 %v417_v43, 0.0  ;;  %v1099_v48 = vmax.f32 %v737_v44, 0.0  ;;  %v412_v49 = vadd.f32 %v1989_v16, %v411_v45  ;;  %v732_v50 = vadd.f32 %v1989_v16, %v731_v46 }
  0xf9   : > { %v1541_v51 = vpop.f32.mrf.mxu0  ;;  %v1637_v52 = vpop.f32.mrf.mxu1 }
  0xfa   : > { %1163 = vst [vmem:[%s1998_s29 + $0x28] sm:$0xff] %v1035_v47  ;;  %1227 = vst [vmem:[%s1998_s29 + $0x228] sm:$0xff] %v1099_v48  ;;  %v1034_v53 = vmax.f32 %v412_v49, 0.0  ;;  %v1098_v54 = vmax.f32 %v732_v50, 0.0  ;;  %v427_v55 = vadd.f32 %v1541_v51, %v1989_v16  ;;  %v747_v56 = vadd.f32 %v1637_v52, %v1989_v16 }
  0xfb   : > { %v421_v57 = vpop.f32.mrf.mxu0  ;;  %v741_v58 = vpop.f32.mrf.mxu1 }
  0xfc   : > { %1162 = vst [vmem:[%s1998_s29 + $0x20] sm:$0xff] %v1034_v53  ;;  %1226 = vst [vmem:[%s1998_s29 + $0x220] sm:$0xff] %v1098_v54  ;;  %v1037_v59 = vmax.f32 %v427_v55, 0.0  ;;  %v1101_v60 = vmax.f32 %v747_v56, 0.0  ;;  %v422_v61 = vadd.f32 %v1989_v16, %v421_v57  ;;  %v742_v62 = vadd.f32 %v1989_v16, %v741_v58 }
  0xfd   : > { %v1544_v63 = vpop.f32.mrf.mxu0  ;;  %v1640_v0 = vpop.f32.mrf.mxu1 }
  0xfe   : > { %1165 = vst [vmem:[%s1998_s29 + $0x38] sm:$0xff] %v1037_v59  ;;  %1229 = vst [vmem:[%s1998_s29 + $0x238] sm:$0xff] %v1101_v60  ;;  %v1036_v1 = vmax.f32 %v422_v61, 0.0  ;;  %v1100_v2 = vmax.f32 %v742_v62, 0.0  ;;  %v437_v3 = vadd.f32 %v1544_v63, %v1989_v16  ;;  %v757_v4 = vadd.f32 %v1640_v0, %v1989_v16 }
  0xff   : > { %v431_v5 = vpop.f32.mrf.mxu0  ;;  %v751_v6 = vpop.f32.mrf.mxu1 }
 0x100   : > { %1164 = vst [vmem:[%s1998_s29 + $0x30] sm:$0xff] %v1036_v1  ;;  %1228 = vst [vmem:[%s1998_s29 + $0x230] sm:$0xff] %v1100_v2  ;;  %v1039_v7 = vmax.f32 %v437_v3, 0.0  ;;  %v1103_v8 = vmax.f32 %v757_v4, 0.0  ;;  %v432_v9 = vadd.f32 %v1989_v16, %v431_v5  ;;  %v752_v10 = vadd.f32 %v1989_v16, %v751_v6 }
 0x101   : > { %v1547_v11 = vpop.f32.mrf.mxu0  ;;  %v1643_v12 = vpop.f32.mrf.mxu1 }
 0x102   : > { %1167 = vst [vmem:[%s1998_s29 + $0x48] sm:$0xff] %v1039_v7  ;;  %1231 = vst [vmem:[%s1998_s29 + $0x248] sm:$0xff] %v1103_v8  ;;  %v1038_v13 = vmax.f32 %v432_v9, 0.0  ;;  %v1102_v14 = vmax.f32 %v752_v10, 0.0  ;;  %v447_v15 = vadd.f32 %v1547_v11, %v1989_v16  ;;  %v767_v17 = vadd.f32 %v1643_v12, %v1989_v16 }
 0x103   : > { %v441_v18 = vpop.f32.mrf.mxu0  ;;  %v761_v19 = vpop.f32.mrf.mxu1 }
 0x104   : > { %1166 = vst [vmem:[%s1998_s29 + $0x40] sm:$0xff] %v1038_v13  ;;  %1230 = vst [vmem:[%s1998_s29 + $0x240] sm:$0xff] %v1102_v14  ;;  %v1041_v20 = vmax.f32 %v447_v15, 0.0  ;;  %v1105_v21 = vmax.f32 %v767_v17, 0.0  ;;  %v442_v22 = vadd.f32 %v1989_v16, %v441_v18  ;;  %v762_v23 = vadd.f32 %v1989_v16, %v761_v19 }
 0x105   : > { %v1550_v24 = vpop.f32.mrf.mxu0  ;;  %v1646_v25 = vpop.f32.mrf.mxu1 }
 0x106   : > { %1169 = vst [vmem:[%s1998_s29 + $0x58] sm:$0xff] %v1041_v20  ;;  %1233 = vst [vmem:[%s1998_s29 + $0x258] sm:$0xff] %v1105_v21  ;;  %v1040_v26 = vmax.f32 %v442_v22, 0.0  ;;  %v1104_v27 = vmax.f32 %v762_v23, 0.0  ;;  %v457_v28 = vadd.f32 %v1550_v24, %v1989_v16  ;;  %v777_v29 = vadd.f32 %v1646_v25, %v1989_v16 }
 0x107   : > { %v451_v30 = vpop.f32.mrf.mxu0  ;;  %v771_v31 = vpop.f32.mrf.mxu1 }
 0x108   : > { %1168 = vst [vmem:[%s1998_s29 + $0x50] sm:$0xff] %v1040_v26  ;;  %1232 = vst [vmem:[%s1998_s29 + $0x250] sm:$0xff] %v1104_v27  ;;  %v1043_v32 = vmax.f32 %v457_v28, 0.0  ;;  %v1107_v33 = vmax.f32 %v777_v29, 0.0  ;;  %v452_v34 = vadd.f32 %v1989_v16, %v451_v30  ;;  %v772_v35 = vadd.f32 %v1989_v16, %v771_v31 }
 0x109   : > { %v1553_v36 = vpop.f32.mrf.mxu0  ;;  %v1649_v37 = vpop.f32.mrf.mxu1 }
 0x10a   : > { %1171 = vst [vmem:[%s1998_s29 + $0x68] sm:$0xff] %v1043_v32  ;;  %1235 = vst [vmem:[%s1998_s29 + $0x268] sm:$0xff] %v1107_v33  ;;  %v1042_v38 = vmax.f32 %v452_v34, 0.0  ;;  %v1106_v39 = vmax.f32 %v772_v35, 0.0  ;;  %v467_v40 = vadd.f32 %v1553_v36, %v1989_v16  ;;  %v787_v41 = vadd.f32 %v1649_v37, %v1989_v16 }
 0x10b   : > { %v461_v42 = vpop.f32.mrf.mxu0  ;;  %v781_v43 = vpop.f32.mrf.mxu1 }
 0x10c   : > { %1170 = vst [vmem:[%s1998_s29 + $0x60] sm:$0xff] %v1042_v38  ;;  %1234 = vst [vmem:[%s1998_s29 + $0x260] sm:$0xff] %v1106_v39  ;;  %v1045_v44 = vmax.f32 %v467_v40, 0.0  ;;  %v1109_v45 = vmax.f32 %v787_v41, 0.0  ;;  %v462_v46 = vadd.f32 %v1989_v16, %v461_v42  ;;  %v782_v47 = vadd.f32 %v1989_v16, %v781_v43 }
 0x10d   : > { %v1556_v48 = vpop.f32.mrf.mxu0  ;;  %v1652_v49 = vpop.f32.mrf.mxu1 }
 0x10e   : > { %1173 = vst [vmem:[%s1998_s29 + $0x78] sm:$0xff] %v1045_v44  ;;  %1237 = vst [vmem:[%s1998_s29 + $0x278] sm:$0xff] %v1109_v45  ;;  %v1044_v50 = vmax.f32 %v462_v46, 0.0  ;;  %v1108_v51 = vmax.f32 %v782_v47, 0.0  ;;  %v477_v52 = vadd.f32 %v1556_v48, %v1989_v16  ;;  %v797_v53 = vadd.f32 %v1652_v49, %v1989_v16 }
 0x10f   : > { %v471_v54 = vpop.f32.mrf.mxu0  ;;  %v791_v55 = vpop.f32.mrf.mxu1 }
 0x110   : > { %1172 = vst [vmem:[%s1998_s29 + $0x70] sm:$0xff] %v1044_v50  ;;  %1236 = vst [vmem:[%s1998_s29 + $0x270] sm:$0xff] %v1108_v51  ;;  %v1047_v56 = vmax.f32 %v477_v52, 0.0  ;;  %v1111_v57 = vmax.f32 %v797_v53, 0.0  ;;  %v472_v58 = vadd.f32 %v1989_v16, %v471_v54  ;;  %v792_v59 = vadd.f32 %v1989_v16, %v791_v55 }
 0x111   : > { %v1559_v60 = vpop.f32.mrf.mxu0  ;;  %v1655_v61 = vpop.f32.mrf.mxu1 }
 0x112   : > { %1175 = vst [vmem:[%s1998_s29 + $0x88] sm:$0xff] %v1047_v56  ;;  %1239 = vst [vmem:[%s1998_s29 + $0x288] sm:$0xff] %v1111_v57  ;;  %v1046_v62 = vmax.f32 %v472_v58, 0.0  ;;  %v1110_v63 = vmax.f32 %v792_v59, 0.0  ;;  %v487_v0 = vadd.f32 %v1559_v60, %v1989_v16  ;;  %v807_v1 = vadd.f32 %v1655_v61, %v1989_v16 }
 0x113   : > { %v481_v2 = vpop.f32.mrf.mxu0  ;;  %v801_v3 = vpop.f32.mrf.mxu1 }
 0x114   : > { %1174 = vst [vmem:[%s1998_s29 + $0x80] sm:$0xff] %v1046_v62  ;;  %1238 = vst [vmem:[%s1998_s29 + $0x280] sm:$0xff] %v1110_v63  ;;  %v1049_v4 = vmax.f32 %v487_v0, 0.0  ;;  %v1113_v5 = vmax.f32 %v807_v1, 0.0  ;;  %v482_v6 = vadd.f32 %v1989_v16, %v481_v2  ;;  %v802_v7 = vadd.f32 %v1989_v16, %v801_v3 }
 0x115   : > { %v1562_v8 = vpop.f32.mrf.mxu0  ;;  %v1658_v9 = vpop.f32.mrf.mxu1 }
 0x116   : > { %1177 = vst [vmem:[%s1998_s29 + $0x98] sm:$0xff] %v1049_v4  ;;  %1241 = vst [vmem:[%s1998_s29 + $0x298] sm:$0xff] %v1113_v5  ;;  %v1048_v10 = vmax.f32 %v482_v6, 0.0  ;;  %v1112_v11 = vmax.f32 %v802_v7, 0.0  ;;  %v497_v12 = vadd.f32 %v1562_v8, %v1989_v16  ;;  %v817_v13 = vadd.f32 %v1658_v9, %v1989_v16 }
 0x117   : > { %v491_v14 = vpop.f32.mrf.mxu0  ;;  %v811_v15 = vpop.f32.mrf.mxu1 }
 0x118   : > { %1176 = vst [vmem:[%s1998_s29 + $0x90] sm:$0xff] %v1048_v10  ;;  %1240 = vst [vmem:[%s1998_s29 + $0x290] sm:$0xff] %v1112_v11  ;;  %v1051_v17 = vmax.f32 %v497_v12, 0.0  ;;  %v1115_v18 = vmax.f32 %v817_v13, 0.0  ;;  %v492_v19 = vadd.f32 %v1989_v16, %v491_v14  ;;  %v812_v20 = vadd.f32 %v1989_v16, %v811_v15 }
 0x119   : > { %v1565_v21 = vpop.f32.mrf.mxu0  ;;  %v1661_v22 = vpop.f32.mrf.mxu1 }
 0x11a   : > { %1179 = vst [vmem:[%s1998_s29 + $0xa8] sm:$0xff] %v1051_v17  ;;  %1243 = vst [vmem:[%s1998_s29 + $0x2a8] sm:$0xff] %v1115_v18  ;;  %v1050_v23 = vmax.f32 %v492_v19, 0.0  ;;  %v1114_v24 = vmax.f32 %v812_v20, 0.0  ;;  %v507_v25 = vadd.f32 %v1565_v21, %v1989_v16  ;;  %v827_v26 = vadd.f32 %v1661_v22, %v1989_v16 }
 0x11b   : > { %v501_v27 = vpop.f32.mrf.mxu0  ;;  %v821_v28 = vpop.f32.mrf.mxu1 }
 0x11c   : > { %1178 = vst [vmem:[%s1998_s29 + $0xa0] sm:$0xff] %v1050_v23  ;;  %1242 = vst [vmem:[%s1998_s29 + $0x2a0] sm:$0xff] %v1114_v24  ;;  %v1053_v29 = vmax.f32 %v507_v25, 0.0  ;;  %v1117_v30 = vmax.f32 %v827_v26, 0.0  ;;  %v502_v31 = vadd.f32 %v1989_v16, %v501_v27  ;;  %v822_v32 = vadd.f32 %v1989_v16, %v821_v28 }
 0x11d   : > { %v1568_v33 = vpop.f32.mrf.mxu0  ;;  %v1664_v34 = vpop.f32.mrf.mxu1 }
 0x11e   : > { %1181 = vst [vmem:[%s1998_s29 + $0xb8] sm:$0xff] %v1053_v29  ;;  %1245 = vst [vmem:[%s1998_s29 + $0x2b8] sm:$0xff] %v1117_v30  ;;  %v1052_v35 = vmax.f32 %v502_v31, 0.0  ;;  %v1116_v36 = vmax.f32 %v822_v32, 0.0  ;;  %v517_v37 = vadd.f32 %v1568_v33, %v1989_v16  ;;  %v837_v38 = vadd.f32 %v1664_v34, %v1989_v16 }
 0x11f   : > { %v511_v39 = vpop.f32.mrf.mxu0  ;;  %v831_v40 = vpop.f32.mrf.mxu1 }
 0x120   : > { %1180 = vst [vmem:[%s1998_s29 + $0xb0] sm:$0xff] %v1052_v35  ;;  %1244 = vst [vmem:[%s1998_s29 + $0x2b0] sm:$0xff] %v1116_v36  ;;  %v1055_v41 = vmax.f32 %v517_v37, 0.0  ;;  %v1119_v42 = vmax.f32 %v837_v38, 0.0  ;;  %v512_v43 = vadd.f32 %v1989_v16, %v511_v39  ;;  %v832_v44 = vadd.f32 %v1989_v16, %v831_v40 }
 0x121   : > { %v1571_v45 = vpop.f32.mrf.mxu0  ;;  %v1667_v46 = vpop.f32.mrf.mxu1 }
 0x122   : > { %1183 = vst [vmem:[%s1998_s29 + $0xc8] sm:$0xff] %v1055_v41  ;;  %1247 = vst [vmem:[%s1998_s29 + $0x2c8] sm:$0xff] %v1119_v42  ;;  %v1054_v47 = vmax.f32 %v512_v43, 0.0  ;;  %v1118_v48 = vmax.f32 %v832_v44, 0.0  ;;  %v527_v49 = vadd.f32 %v1571_v45, %v1989_v16  ;;  %v847_v50 = vadd.f32 %v1667_v46, %v1989_v16 }
 0x123   : > { %v521_v51 = vpop.f32.mrf.mxu0  ;;  %v841_v52 = vpop.f32.mrf.mxu1 }
 0x124   : > { %1182 = vst [vmem:[%s1998_s29 + $0xc0] sm:$0xff] %v1054_v47  ;;  %1246 = vst [vmem:[%s1998_s29 + $0x2c0] sm:$0xff] %v1118_v48  ;;  %v1057_v53 = vmax.f32 %v527_v49, 0.0  ;;  %v1121_v54 = vmax.f32 %v847_v50, 0.0  ;;  %v522_v55 = vadd.f32 %v1989_v16, %v521_v51  ;;  %v842_v56 = vadd.f32 %v1989_v16, %v841_v52 }
 0x125   : > { %v1574_v57 = vpop.f32.mrf.mxu0  ;;  %v1670_v58 = vpop.f32.mrf.mxu1 }
 0x126   : > { %1185 = vst [vmem:[%s1998_s29 + $0xd8] sm:$0xff] %v1057_v53  ;;  %1249 = vst [vmem:[%s1998_s29 + $0x2d8] sm:$0xff] %v1121_v54  ;;  %v1056_v59 = vmax.f32 %v522_v55, 0.0  ;;  %v1120_v60 = vmax.f32 %v842_v56, 0.0  ;;  %v537_v61 = vadd.f32 %v1574_v57, %v1989_v16  ;;  %v857_v62 = vadd.f32 %v1670_v58, %v1989_v16 }
 0x127   : > { %v531_v63 = vpop.f32.mrf.mxu0  ;;  %v851_v0 = vpop.f32.mrf.mxu1 }
 0x128   : > { %1184 = vst [vmem:[%s1998_s29 + $0xd0] sm:$0xff] %v1056_v59  ;;  %1248 = vst [vmem:[%s1998_s29 + $0x2d0] sm:$0xff] %v1120_v60  ;;  %v1059_v1 = vmax.f32 %v537_v61, 0.0  ;;  %v1123_v2 = vmax.f32 %v857_v62, 0.0  ;;  %v532_v3 = vadd.f32 %v1989_v16, %v531_v63  ;;  %v852_v4 = vadd.f32 %v1989_v16, %v851_v0 }
 0x129   : > { %v1577_v5 = vpop.f32.mrf.mxu0  ;;  %v1673_v6 = vpop.f32.mrf.mxu1 }
 0x12a   : > { %1187 = vst [vmem:[%s1998_s29 + $0xe8] sm:$0xff] %v1059_v1  ;;  %1251 = vst [vmem:[%s1998_s29 + $0x2e8] sm:$0xff] %v1123_v2  ;;  %v1058_v7 = vmax.f32 %v532_v3, 0.0  ;;  %v1122_v8 = vmax.f32 %v852_v4, 0.0  ;;  %v547_v9 = vadd.f32 %v1577_v5, %v1989_v16  ;;  %v867_v10 = vadd.f32 %v1673_v6, %v1989_v16 }
 0x12b   : > { %v541_v11 = vpop.f32.mrf.mxu0  ;;  %v861_v12 = vpop.f32.mrf.mxu1 }
 0x12c   : > { %1186 = vst [vmem:[%s1998_s29 + $0xe0] sm:$0xff] %v1058_v7  ;;  %1250 = vst [vmem:[%s1998_s29 + $0x2e0] sm:$0xff] %v1122_v8  ;;  %v1061_v13 = vmax.f32 %v547_v9, 0.0  ;;  %v1125_v14 = vmax.f32 %v867_v10, 0.0  ;;  %v542_v15 = vadd.f32 %v1989_v16, %v541_v11  ;;  %v862_v17 = vadd.f32 %v1989_v16, %v861_v12 }
 0x12d   : > { %v1580_v18 = vpop.f32.mrf.mxu0  ;;  %v1676_v19 = vpop.f32.mrf.mxu1 }
 0x12e   : > { %1189 = vst [vmem:[%s1998_s29 + $0xf8] sm:$0xff] %v1061_v13  ;;  %1253 = vst [vmem:[%s1998_s29 + $0x2f8] sm:$0xff] %v1125_v14  ;;  %v1060_v20 = vmax.f32 %v542_v15, 0.0  ;;  %v1124_v21 = vmax.f32 %v862_v17, 0.0  ;;  %v557_v22 = vadd.f32 %v1580_v18, %v1989_v16  ;;  %v877_v23 = vadd.f32 %v1676_v19, %v1989_v16 }
 0x12f   : > { %v551_v24 = vpop.f32.mrf.mxu0  ;;  %v871_v25 = vpop.f32.mrf.mxu1 }
 0x130   : > { %1188 = vst [vmem:[%s1998_s29 + $0xf0] sm:$0xff] %v1060_v20  ;;  %1252 = vst [vmem:[%s1998_s29 + $0x2f0] sm:$0xff] %v1124_v21  ;;  %v1063_v26 = vmax.f32 %v557_v22, 0.0  ;;  %v1127_v27 = vmax.f32 %v877_v23, 0.0  ;;  %v552_v28 = vadd.f32 %v1989_v16, %v551_v24  ;;  %v872_v29 = vadd.f32 %v1989_v16, %v871_v25 }
 0x131   : > { %v1583_v30 = vpop.f32.mrf.mxu0  ;;  %v1679_v31 = vpop.f32.mrf.mxu1 }
 0x132   : > { %1191 = vst [vmem:[%s1998_s29 + $0x108] sm:$0xff] %v1063_v26  ;;  %1255 = vst [vmem:[%s1998_s29 + $0x308] sm:$0xff] %v1127_v27  ;;  %v1062_v32 = vmax.f32 %v552_v28, 0.0  ;;  %v1126_v33 = vmax.f32 %v872_v29, 0.0  ;;  %v567_v34 = vadd.f32 %v1583_v30, %v1989_v16  ;;  %v887_v35 = vadd.f32 %v1679_v31, %v1989_v16 }
 0x133   : > { %v561_v36 = vpop.f32.mrf.mxu0  ;;  %v881_v37 = vpop.f32.mrf.mxu1 }
 0x134   : > { %1190 = vst [vmem:[%s1998_s29 + $0x100] sm:$0xff] %v1062_v32  ;;  %1254 = vst [vmem:[%s1998_s29 + $0x300] sm:$0xff] %v1126_v33  ;;  %v1065_v38 = vmax.f32 %v567_v34, 0.0  ;;  %v1129_v39 = vmax.f32 %v887_v35, 0.0  ;;  %v562_v40 = vadd.f32 %v1989_v16, %v561_v36  ;;  %v882_v41 = vadd.f32 %v1989_v16, %v881_v37 }
 0x135   : > { %v1586_v42 = vpop.f32.mrf.mxu0  ;;  %v1682_v43 = vpop.f32.mrf.mxu1 }
 0x136   : > { %1193 = vst [vmem:[%s1998_s29 + $0x118] sm:$0xff] %v1065_v38  ;;  %1257 = vst [vmem:[%s1998_s29 + $0x318] sm:$0xff] %v1129_v39  ;;  %v1064_v44 = vmax.f32 %v562_v40, 0.0  ;;  %v1128_v45 = vmax.f32 %v882_v41, 0.0  ;;  %v577_v46 = vadd.f32 %v1586_v42, %v1989_v16  ;;  %v897_v47 = vadd.f32 %v1682_v43, %v1989_v16 }
 0x137   : > { %v571_v48 = vpop.f32.mrf.mxu0  ;;  %v891_v49 = vpop.f32.mrf.mxu1 }
 0x138   : > { %1192 = vst [vmem:[%s1998_s29 + $0x110] sm:$0xff] %v1064_v44  ;;  %1256 = vst [vmem:[%s1998_s29 + $0x310] sm:$0xff] %v1128_v45  ;;  %v1067_v50 = vmax.f32 %v577_v46, 0.0  ;;  %v1131_v51 = vmax.f32 %v897_v47, 0.0  ;;  %v572_v52 = vadd.f32 %v1989_v16, %v571_v48  ;;  %v892_v53 = vadd.f32 %v1989_v16, %v891_v49 }
 0x139   : > { %v1589_v54 = vpop.f32.mrf.mxu0  ;;  %v1685_v55 = vpop.f32.mrf.mxu1 }
 0x13a   : > { %1195 = vst [vmem:[%s1998_s29 + $0x128] sm:$0xff] %v1067_v50  ;;  %1259 = vst [vmem:[%s1998_s29 + $0x328] sm:$0xff] %v1131_v51  ;;  %v1066_v56 = vmax.f32 %v572_v52, 0.0  ;;  %v1130_v57 = vmax.f32 %v892_v53, 0.0  ;;  %v587_v58 = vadd.f32 %v1589_v54, %v1989_v16  ;;  %v907_v59 = vadd.f32 %v1685_v55, %v1989_v16 }
 0x13b   : > { %v581_v60 = vpop.f32.mrf.mxu0  ;;  %v901_v61 = vpop.f32.mrf.mxu1 }
 0x13c   : > { %1194 = vst [vmem:[%s1998_s29 + $0x120] sm:$0xff] %v1066_v56  ;;  %1258 = vst [vmem:[%s1998_s29 + $0x320] sm:$0xff] %v1130_v57  ;;  %v1069_v62 = vmax.f32 %v587_v58, 0.0  ;;  %v1133_v63 = vmax.f32 %v907_v59, 0.0  ;;  %v582_v0 = vadd.f32 %v1989_v16, %v581_v60  ;;  %v902_v1 = vadd.f32 %v1989_v16, %v901_v61 }
 0x13d   : > { %v1592_v2 = vpop.f32.mrf.mxu0  ;;  %v1688_v3 = vpop.f32.mrf.mxu1 }
 0x13e   : > { %1197 = vst [vmem:[%s1998_s29 + $0x138] sm:$0xff] %v1069_v62  ;;  %1261 = vst [vmem:[%s1998_s29 + $0x338] sm:$0xff] %v1133_v63  ;;  %v1068_v4 = vmax.f32 %v582_v0, 0.0  ;;  %v1132_v5 = vmax.f32 %v902_v1, 0.0  ;;  %v597_v6 = vadd.f32 %v1592_v2, %v1989_v16  ;;  %v917_v7 = vadd.f32 %v1688_v3, %v1989_v16 }
 0x13f   : > { %v591_v8 = vpop.f32.mrf.mxu0  ;;  %v911_v9 = vpop.f32.mrf.mxu1 }
 0x140   : > { %1196 = vst [vmem:[%s1998_s29 + $0x130] sm:$0xff] %v1068_v4  ;;  %1260 = vst [vmem:[%s1998_s29 + $0x330] sm:$0xff] %v1132_v5  ;;  %v1071_v10 = vmax.f32 %v597_v6, 0.0  ;;  %v1135_v11 = vmax.f32 %v917_v7, 0.0  ;;  %v592_v12 = vadd.f32 %v1989_v16, %v591_v8  ;;  %v912_v13 = vadd.f32 %v1989_v16, %v911_v9 }
 0x141   : > { %v1595_v14 = vpop.f32.mrf.mxu0  ;;  %v1691_v15 = vpop.f32.mrf.mxu1 }
 0x142   : > { %1199 = vst [vmem:[%s1998_s29 + $0x148] sm:$0xff] %v1071_v10  ;;  %1263 = vst [vmem:[%s1998_s29 + $0x348] sm:$0xff] %v1135_v11  ;;  %v1070_v17 = vmax.f32 %v592_v12, 0.0  ;;  %v1134_v18 = vmax.f32 %v912_v13, 0.0  ;;  %v607_v19 = vadd.f32 %v1595_v14, %v1989_v16  ;;  %v927_v20 = vadd.f32 %v1691_v15, %v1989_v16 }
 0x143   : > { %v601_v21 = vpop.f32.mrf.mxu0  ;;  %v921_v22 = vpop.f32.mrf.mxu1 }
 0x144   : > { %1198 = vst [vmem:[%s1998_s29 + $0x140] sm:$0xff] %v1070_v17  ;;  %1262 = vst [vmem:[%s1998_s29 + $0x340] sm:$0xff] %v1134_v18  ;;  %v1073_v23 = vmax.f32 %v607_v19, 0.0  ;;  %v1137_v24 = vmax.f32 %v927_v20, 0.0  ;;  %v602_v25 = vadd.f32 %v1989_v16, %v601_v21  ;;  %v922_v26 = vadd.f32 %v1989_v16, %v921_v22 }
 0x145   : > { %v1598_v27 = vpop.f32.mrf.mxu0  ;;  %v1694_v28 = vpop.f32.mrf.mxu1 }
 0x146   : > { %1201 = vst [vmem:[%s1998_s29 + $0x158] sm:$0xff] %v1073_v23  ;;  %1265 = vst [vmem:[%s1998_s29 + $0x358] sm:$0xff] %v1137_v24  ;;  %v1072_v29 = vmax.f32 %v602_v25, 0.0  ;;  %v1136_v30 = vmax.f32 %v922_v26, 0.0  ;;  %v617_v31 = vadd.f32 %v1598_v27, %v1989_v16  ;;  %v937_v32 = vadd.f32 %v1694_v28, %v1989_v16 }
 0x147   : > { %v611_v33 = vpop.f32.mrf.mxu0  ;;  %v931_v34 = vpop.f32.mrf.mxu1 }
 0x148   : > { %1200 = vst [vmem:[%s1998_s29 + $0x150] sm:$0xff] %v1072_v29  ;;  %1264 = vst [vmem:[%s1998_s29 + $0x350] sm:$0xff] %v1136_v30  ;;  %v1075_v35 = vmax.f32 %v617_v31, 0.0  ;;  %v1139_v36 = vmax.f32 %v937_v32, 0.0  ;;  %v612_v37 = vadd.f32 %v1989_v16, %v611_v33  ;;  %v932_v38 = vadd.f32 %v1989_v16, %v931_v34 }
 0x149   : > { %v1601_v39 = vpop.f32.mrf.mxu0  ;;  %v1697_v40 = vpop.f32.mrf.mxu1 }
 0x14a   : > { %1203 = vst [vmem:[%s1998_s29 + $0x168] sm:$0xff] %v1075_v35  ;;  %1267 = vst [vmem:[%s1998_s29 + $0x368] sm:$0xff] %v1139_v36  ;;  %v1074_v41 = vmax.f32 %v612_v37, 0.0  ;;  %v1138_v42 = vmax.f32 %v932_v38, 0.0  ;;  %v627_v43 = vadd.f32 %v1601_v39, %v1989_v16  ;;  %v947_v44 = vadd.f32 %v1697_v40, %v1989_v16 }
 0x14b   : > { %v621_v45 = vpop.f32.mrf.mxu0  ;;  %v941_v46 = vpop.f32.mrf.mxu1 }
 0x14c   : > { %1202 = vst [vmem:[%s1998_s29 + $0x160] sm:$0xff] %v1074_v41  ;;  %1266 = vst [vmem:[%s1998_s29 + $0x360] sm:$0xff] %v1138_v42  ;;  %v1077_v47 = vmax.f32 %v627_v43, 0.0  ;;  %v1141_v48 = vmax.f32 %v947_v44, 0.0  ;;  %v622_v49 = vadd.f32 %v1989_v16, %v621_v45  ;;  %v942_v50 = vadd.f32 %v1989_v16, %v941_v46 }
 0x14d   : > { %v1604_v51 = vpop.f32.mrf.mxu0  ;;  %v1700_v52 = vpop.f32.mrf.mxu1 }
 0x14e   : > { %1205 = vst [vmem:[%s1998_s29 + $0x178] sm:$0xff] %v1077_v47  ;;  %1269 = vst [vmem:[%s1998_s29 + $0x378] sm:$0xff] %v1141_v48  ;;  %v1076_v53 = vmax.f32 %v622_v49, 0.0  ;;  %v1140_v54 = vmax.f32 %v942_v50, 0.0  ;;  %v637_v55 = vadd.f32 %v1604_v51, %v1989_v16  ;;  %v957_v56 = vadd.f32 %v1700_v52, %v1989_v16 }
 0x14f   : > { %v631_v57 = vpop.f32.mrf.mxu0  ;;  %v951_v58 = vpop.f32.mrf.mxu1 }
 0x150   : > { %1204 = vst [vmem:[%s1998_s29 + $0x170] sm:$0xff] %v1076_v53  ;;  %1268 = vst [vmem:[%s1998_s29 + $0x370] sm:$0xff] %v1140_v54  ;;  %v1079_v59 = vmax.f32 %v637_v55, 0.0  ;;  %v1143_v60 = vmax.f32 %v957_v56, 0.0  ;;  %v632_v61 = vadd.f32 %v1989_v16, %v631_v57  ;;  %v952_v62 = vadd.f32 %v1989_v16, %v951_v58 }
 0x151   : > { %v1607_v63 = vpop.f32.mrf.mxu0  ;;  %v1703_v0 = vpop.f32.mrf.mxu1 }
 0x152   : > { %1207 = vst [vmem:[%s1998_s29 + $0x188] sm:$0xff] %v1079_v59  ;;  %1271 = vst [vmem:[%s1998_s29 + $0x388] sm:$0xff] %v1143_v60  ;;  %v1078_v1 = vmax.f32 %v632_v61, 0.0  ;;  %v1142_v2 = vmax.f32 %v952_v62, 0.0  ;;  %v647_v3 = vadd.f32 %v1607_v63, %v1989_v16  ;;  %v967_v4 = vadd.f32 %v1703_v0, %v1989_v16 }
 0x153   : > { %v641_v5 = vpop.f32.mrf.mxu0  ;;  %v961_v6 = vpop.f32.mrf.mxu1 }
 0x154   : > { %1206 = vst [vmem:[%s1998_s29 + $0x180] sm:$0xff] %v1078_v1  ;;  %1270 = vst [vmem:[%s1998_s29 + $0x380] sm:$0xff] %v1142_v2  ;;  %v1081_v7 = vmax.f32 %v647_v3, 0.0  ;;  %v1145_v8 = vmax.f32 %v967_v4, 0.0  ;;  %v642_v9 = vadd.f32 %v1989_v16, %v641_v5  ;;  %v962_v10 = vadd.f32 %v1989_v16, %v961_v6 }
 0x155   : > { %v1610_v11 = vpop.f32.mrf.mxu0  ;;  %v1706_v12 = vpop.f32.mrf.mxu1 }
 0x156   : > { %1209 = vst [vmem:[%s1998_s29 + $0x198] sm:$0xff] %v1081_v7  ;;  %1273 = vst [vmem:[%s1998_s29 + $0x398] sm:$0xff] %v1145_v8  ;;  %v1080_v13 = vmax.f32 %v642_v9, 0.0  ;;  %v1144_v14 = vmax.f32 %v962_v10, 0.0  ;;  %v657_v15 = vadd.f32 %v1610_v11, %v1989_v16  ;;  %v977_v17 = vadd.f32 %v1706_v12, %v1989_v16 }
 0x157   : > { %v651_v18 = vpop.f32.mrf.mxu0  ;;  %v971_v19 = vpop.f32.mrf.mxu1 }
 0x158   : > { %1208 = vst [vmem:[%s1998_s29 + $0x190] sm:$0xff] %v1080_v13  ;;  %1272 = vst [vmem:[%s1998_s29 + $0x390] sm:$0xff] %v1144_v14  ;;  %v1083_v20 = vmax.f32 %v657_v15, 0.0  ;;  %v1147_v21 = vmax.f32 %v977_v17, 0.0  ;;  %v652_v22 = vadd.f32 %v1989_v16, %v651_v18  ;;  %v972_v23 = vadd.f32 %v1989_v16, %v971_v19 }
 0x159   : > { %v1613_v24 = vpop.f32.mrf.mxu0  ;;  %v1709_v25 = vpop.f32.mrf.mxu1 }
 0x15a   : > { %1211 = vst [vmem:[%s1998_s29 + $0x1a8] sm:$0xff] %v1083_v20  ;;  %1275 = vst [vmem:[%s1998_s29 + $0x3a8] sm:$0xff] %v1147_v21  ;;  %v1082_v26 = vmax.f32 %v652_v22, 0.0  ;;  %v1146_v27 = vmax.f32 %v972_v23, 0.0  ;;  %v667_v28 = vadd.f32 %v1613_v24, %v1989_v16  ;;  %v987_v29 = vadd.f32 %v1709_v25, %v1989_v16 }
 0x15b   : > { %v661_v30 = vpop.f32.mrf.mxu0  ;;  %v981_v31 = vpop.f32.mrf.mxu1 }
 0x15c   : > { %1210 = vst [vmem:[%s1998_s29 + $0x1a0] sm:$0xff] %v1082_v26  ;;  %1274 = vst [vmem:[%s1998_s29 + $0x3a0] sm:$0xff] %v1146_v27  ;;  %v1085_v32 = vmax.f32 %v667_v28, 0.0  ;;  %v1149_v33 = vmax.f32 %v987_v29, 0.0  ;;  %v662_v34 = vadd.f32 %v1989_v16, %v661_v30  ;;  %v982_v35 = vadd.f32 %v1989_v16, %v981_v31 }
 0x15d   : > { %v1616_v36 = vpop.f32.mrf.mxu0  ;;  %v1712_v37 = vpop.f32.mrf.mxu1 }
 0x15e   : > { %1213 = vst [vmem:[%s1998_s29 + $0x1b8] sm:$0xff] %v1085_v32  ;;  %1277 = vst [vmem:[%s1998_s29 + $0x3b8] sm:$0xff] %v1149_v33  ;;  %v1084_v38 = vmax.f32 %v662_v34, 0.0  ;;  %v1148_v39 = vmax.f32 %v982_v35, 0.0  ;;  %v677_v40 = vadd.f32 %v1616_v36, %v1989_v16  ;;  %v997_v41 = vadd.f32 %v1712_v37, %v1989_v16 }
 0x15f   : > { %v671_v42 = vpop.f32.mrf.mxu0  ;;  %v991_v43 = vpop.f32.mrf.mxu1 }
 0x160   : > { %1212 = vst [vmem:[%s1998_s29 + $0x1b0] sm:$0xff] %v1084_v38  ;;  %1276 = vst [vmem:[%s1998_s29 + $0x3b0] sm:$0xff] %v1148_v39  ;;  %v1087_v44 = vmax.f32 %v677_v40, 0.0  ;;  %v1151_v45 = vmax.f32 %v997_v41, 0.0  ;;  %v672_v46 = vadd.f32 %v1989_v16, %v671_v42  ;;  %v992_v47 = vadd.f32 %v1989_v16, %v991_v43 }
 0x161   : > { %v1619_v48 = vpop.f32.mrf.mxu0  ;;  %v1715_v49 = vpop.f32.mrf.mxu1 }
 0x162   : > { %1215 = vst [vmem:[%s1998_s29 + $0x1c8] sm:$0xff] %v1087_v44  ;;  %1279 = vst [vmem:[%s1998_s29 + $0x3c8] sm:$0xff] %v1151_v45  ;;  %v1086_v50 = vmax.f32 %v672_v46, 0.0  ;;  %v1150_v51 = vmax.f32 %v992_v47, 0.0  ;;  %v687_v52 = vadd.f32 %v1619_v48, %v1989_v16  ;;  %v1007_v53 = vadd.f32 %v1715_v49, %v1989_v16 }
 0x163   : > { %v681_v54 = vpop.f32.mrf.mxu0  ;;  %v1001_v55 = vpop.f32.mrf.mxu1 }
 0x164   : > { %1214 = vst [vmem:[%s1998_s29 + $0x1c0] sm:$0xff] %v1086_v50  ;;  %1278 = vst [vmem:[%s1998_s29 + $0x3c0] sm:$0xff] %v1150_v51  ;;  %v1089_v56 = vmax.f32 %v687_v52, 0.0  ;;  %v1153_v57 = vmax.f32 %v1007_v53, 0.0  ;;  %v682_v58 = vadd.f32 %v1989_v16, %v681_v54  ;;  %v1002_v59 = vadd.f32 %v1989_v16, %v1001_v55 }
 0x165   : > { %v1622_v60 = vpop.f32.mrf.mxu0  ;;  %v1718_v61 = vpop.f32.mrf.mxu1 }
 0x166   : > { %1217 = vst [vmem:[%s1998_s29 + $0x1d8] sm:$0xff] %v1089_v56  ;;  %1281 = vst [vmem:[%s1998_s29 + $0x3d8] sm:$0xff] %v1153_v57  ;;  %v1088_v62 = vmax.f32 %v682_v58, 0.0  ;;  %v1152_v63 = vmax.f32 %v1002_v59, 0.0  ;;  %v697_v0 = vadd.f32 %v1622_v60, %v1989_v16  ;;  %v1017_v1 = vadd.f32 %v1718_v61, %v1989_v16 }
 0x167   : > { %v691_v2 = vpop.f32.mrf.mxu0  ;;  %v1011_v3 = vpop.f32.mrf.mxu1 }
 0x168   : > { %1216 = vst [vmem:[%s1998_s29 + $0x1d0] sm:$0xff] %v1088_v62  ;;  %1280 = vst [vmem:[%s1998_s29 + $0x3d0] sm:$0xff] %v1152_v63  ;;  %v1091_v4 = vmax.f32 %v697_v0, 0.0  ;;  %v1155_v5 = vmax.f32 %v1017_v1, 0.0  ;;  %v692_v6 = vadd.f32 %v1989_v16, %v691_v2  ;;  %v1012_v7 = vadd.f32 %v1989_v16, %v1011_v3 }
 0x169   : > { %v1625_v8 = vpop.f32.mrf.mxu0  ;;  %v1721_v9 = vpop.f32.mrf.mxu1 }
 0x16a   : > { %1219 = vst [vmem:[%s1998_s29 + $0x1e8] sm:$0xff] %v1091_v4  ;;  %1283 = vst [vmem:[%s1998_s29 + $0x3e8] sm:$0xff] %v1155_v5  ;;  %v1090_v10 = vmax.f32 %v692_v6, 0.0  ;;  %v1154_v11 = vmax.f32 %v1012_v7, 0.0  ;;  %v707_v12 = vadd.f32 %v1625_v8, %v1989_v16  ;;  %v1027_v13 = vadd.f32 %v1721_v9, %v1989_v16 }
 0x16b   : > { %v701_v14 = vpop.f32.mrf.mxu0  ;;  %v1021_v15 = vpop.f32.mrf.mxu1 }
 0x16c   : > { %1218 = vst [vmem:[%s1998_s29 + $0x1e0] sm:$0xff] %v1090_v10  ;;  %1282 = vst [vmem:[%s1998_s29 + $0x3e0] sm:$0xff] %v1154_v11  ;;  %v1093_v17 = vmax.f32 %v707_v12, 0.0  ;;  %v1157_v18 = vmax.f32 %v1027_v13, 0.0  ;;  %v702_v19 = vadd.f32 %v1989_v16, %v701_v14  ;;  %v1022_v20 = vadd.f32 %v1989_v16, %v1021_v15 }
 0x16e   : > { %1221 = vst [vmem:[%s1998_s29 + $0x1f8] sm:$0xff] %v1093_v17  ;;  %1285 = vst [vmem:[%s1998_s29 + $0x3f8] sm:$0xff] %v1157_v18  ;;  %v1092_v21 = vmax.f32 %v702_v19, 0.0  ;;  %v1156_v22 = vmax.f32 %v1022_v20, 0.0 }
 0x170   : > { %1220 = vst [vmem:[%s1998_s29 + $0x1f0] sm:$0xff] %v1092_v21  ;;  %1284 = vst [vmem:[%s1998_s29 + $0x3f0] sm:$0xff] %v1156_v22 }
 0x171 PF: > { %s13_s12 = sadd.s32 1, %s1768_s12  }
 0x172   : > { %p10_p4 = scmp.ge.s32.totalorder %s13_s12, 4  }
 0x174   :  { %12 = sbr.rel (!%p10_p4) target bundleno = 1 (0x1), region = 62 }

// kernel: cnn_forward_pallas.6
= control target key start
LH: loop header
LB: loop body
LE: loop exit
PB: predicated region body
PF: predicated region fallthrough
CT: control target
= control target key end

     0   :  { %s2072_s12 = smov 0   ;;  %s3235_s0 = inlined_call_operand.vmem [shape: f32[512,1152], index: 0, kind: input, shape index: {}]   ;;  %s3236_s1 = inlined_call_operand.vmem [shape: f32[1152,128], index: 1, kind: input, shape index: {}]   ;;  %s3237_s2 = inlined_call_operand.vmem [shape: f32[1,128], index: 2, kind: input, shape index: {}]   ;;  %s3238_s3 = inlined_call_operand.vmem [shape: f32[512,128], index: 3, kind: output, shape index: {}]  }
   0x1 LB: > { %s1861_s13 = sadd.s32 4294967295, %s2049_s12   ;;  %p1865_p0 = scmp.ge.s32.totalorder %s2049_s12, 1  ;;  %s2049_s12 = sphi %s2072_s12, %s13_s12  }
   0x2   : > { %p139_p1 = scmp.lt.s32.totalorder %s2049_s12, 3 }
   0x4   : > { %p140_p2 = pnand %p1865_p0, %p139_p1 }
   0x6   : > { %143 = sbr.rel (%p140_p2) target bundleno = 561 (0x231), region = 32 }
   0xb   : > { %v480_v0 = vld [vmem:[%s3236_s1 + $0x78] sm:$0xff]  ;;  %v2051_v2 = vmov 0.0   ;;  %v479_v3 = vld [vmem:[%s3236_s1 + $0x70] sm:$0xff]  ;;  %v478_v5 = vld [vmem:[%s3236_s1 + $0x68] sm:$0xff]  ;;  %s1866_s4 = sshll.u32 %s1861_s13, 5 }
   0xc   : > { %v512_v1 = vld [vmem:[%s3236_s1 + $0x178] sm:$0xff]  ;;  %616 = vmatprep.subr.mxu0 %v2051_v2  ;;  %841 = vmatprep.subr.mxu1 %v2051_v2  ;;  %v511_v4 = vld [vmem:[%s3236_s1 + $0x170] sm:$0xff]  ;;  %v510_v6 = vld [vmem:[%s3236_s1 + $0x168] sm:$0xff]  ;;  %p165_p3 = scmp.lt.s32.totalorder %s1866_s4, 63 }
   0xd   : > { %617 = vmatpush1.msra.mxu0 %v480_v0  ;;  %842 = vmatpush1.msra.mxu1 %v512_v1  ;;  %v477_v7 = vld [vmem:[%s3236_s1 + $0x60] sm:$0xff]  ;;  %v476_v9 = vld [vmem:[%s3236_s1 + $0x58] sm:$0xff]  ;;  %v475_v11 = vld [vmem:[%s3236_s1 + $0x50] sm:$0xff] }
   0xe   : > { %618 = vmatprep.subr.mxu0 %v2051_v2  ;;  %843 = vmatprep.subr.mxu1 %v2051_v2  ;;  %v509_v8 = vld [vmem:[%s3236_s1 + $0x160] sm:$0xff]  ;;  %v508_v10 = vld [vmem:[%s3236_s1 + $0x158] sm:$0xff]  ;;  %v507_v12 = vld [vmem:[%s3236_s1 + $0x150] sm:$0xff]  ;;  %s3258_s4 = smov (!%p165_p3, %s1866_s4), 63 }
   0xf   : > { %619 = vmatpush1.msra.mxu0 %v479_v3  ;;  %844 = vmatpush1.msra.mxu1 %v511_v4  ;;  %v474_v13 = vld [vmem:[%s3236_s1 + $0x48] sm:$0xff]  ;;  %v473_v15 = vld [vmem:[%s3236_s1 + $0x40] sm:$0xff]  ;;  %v472_v17 = vld [vmem:[%s3236_s1 + $0x38] sm:$0xff]  ;;  %s2033_s26 = smul.u32 72, %s3258_s4 }
  0x10   : > { %620 = vmatprep.subr.mxu0 %v2051_v2  ;;  %845 = vmatprep.subr.mxu1 %v2051_v2  ;;  %v506_v14 = vld [vmem:[%s3236_s1 + $0x148] sm:$0xff]  ;;  %v505_v16 = vld [vmem:[%s3236_s1 + $0x140] sm:$0xff]  ;;  %v504_v18 = vld [vmem:[%s3236_s1 + $0x138] sm:$0xff] }
  0x11   : > { %621 = vmatpush1.msra.mxu0 %v478_v5  ;;  %846 = vmatpush1.msra.mxu1 %v510_v6  ;;  %v471_v19 = vld [vmem:[%s3236_s1 + $0x30] sm:$0xff]  ;;  %v470_v21 = vld [vmem:[%s3236_s1 + $0x28] sm:$0xff]  ;;  %v469_v23 = vld [vmem:[%s3236_s1 + $0x20] sm:$0xff]  ;;  %s2326_s10 = scalar_lea.vmem %s3235_s0, %s2033_s26 }
  0x12   : > { %622 = vmatprep.subr.mxu0 %v2051_v2  ;;  %847 = vmatprep.subr.mxu1 %v2051_v2  ;;  %v503_v20 = vld [vmem:[%s3236_s1 + $0x130] sm:$0xff]  ;;  %v502_v22 = vld [vmem:[%s3236_s1 + $0x128] sm:$0xff]  ;;  %v501_v24 = vld [vmem:[%s3236_s1 + $0x120] sm:$0xff] }
  0x13   : > { %623 = vmatpush1.msra.mxu0 %v477_v7  ;;  %848 = vmatpush1.msra.mxu1 %v509_v8  ;;  %v468_v25 = vld [vmem:[%s3236_s1 + $0x18] sm:$0xff]  ;;  %v467_v27 = vld [vmem:[%s3236_s1 + $0x10] sm:$0xff]  ;;  %v466_v29 = vld [vmem:[%s3236_s1 + $0x8] sm:$0xff] }
  0x14   : > { %624 = vmatprep.subr.mxu0 %v2051_v2  ;;  %849 = vmatprep.subr.mxu1 %v2051_v2  ;;  %v500_v26 = vld [vmem:[%s3236_s1 + $0x118] sm:$0xff]  ;;  %v499_v28 = vld [vmem:[%s3236_s1 + $0x110] sm:$0xff]  ;;  %v498_v30 = vld [vmem:[%s3236_s1 + $0x108] sm:$0xff] }
  0x15   : > { %625 = vmatpush1.msra.mxu0 %v476_v9  ;;  %850 = vmatpush1.msra.mxu1 %v508_v10  ;;  %v465_v31 = vld [vmem:[%s3236_s1] sm:$0xff]  ;;  %v496_v33 = vld [vmem:[%s3236_s1 + $0xf8] sm:$0xff]  ;;  %v495_v35 = vld [vmem:[%s3236_s1 + $0xf0] sm:$0xff] }
  0x16   : > { %626 = vmatprep.subr.mxu0 %v2051_v2  ;;  %851 = vmatprep.subr.mxu1 %v2051_v2  ;;  %v497_v32 = vld [vmem:[%s3236_s1 + $0x100] sm:$0xff]  ;;  %v528_v34 = vld [vmem:[%s3236_s1 + $0x1f8] sm:$0xff]  ;;  %v527_v36 = vld [vmem:[%s3236_s1 + $0x1f0] sm:$0xff] }
  0x17   : > { %627 = vmatpush1.msra.mxu0 %v475_v11  ;;  %852 = vmatpush1.msra.mxu1 %v507_v12  ;;  %v494_v37 = vld [vmem:[%s3236_s1 + $0xe8] sm:$0xff]  ;;  %v493_v39 = vld [vmem:[%s3236_s1 + $0xe0] sm:$0xff]  ;;  %v492_v41 = vld [vmem:[%s3236_s1 + $0xd8] sm:$0xff] }
  0x18   : > { %628 = vmatprep.subr.mxu0 %v2051_v2  ;;  %853 = vmatprep.subr.mxu1 %v2051_v2  ;;  %v526_v38 = vld [vmem:[%s3236_s1 + $0x1e8] sm:$0xff]  ;;  %v525_v40 = vld [vmem:[%s3236_s1 + $0x1e0] sm:$0xff]  ;;  %v524_v42 = vld [vmem:[%s3236_s1 + $0x1d8] sm:$0xff] }
  0x19   : > { %629 = vmatpush1.msra.mxu0 %v474_v13  ;;  %854 = vmatpush1.msra.mxu1 %v506_v14  ;;  %v491_v43 = vld [vmem:[%s3236_s1 + $0xd0] sm:$0xff]  ;;  %v490_v45 = vld [vmem:[%s3236_s1 + $0xc8] sm:$0xff]  ;;  %v489_v47 = vld [vmem:[%s3236_s1 + $0xc0] sm:$0xff] }
  0x1a   : > { %630 = vmatprep.subr.mxu0 %v2051_v2  ;;  %855 = vmatprep.subr.mxu1 %v2051_v2  ;;  %v523_v44 = vld [vmem:[%s3236_s1 + $0x1d0] sm:$0xff]  ;;  %v522_v46 = vld [vmem:[%s3236_s1 + $0x1c8] sm:$0xff]  ;;  %v521_v48 = vld [vmem:[%s3236_s1 + $0x1c0] sm:$0xff] }
  0x1b   : > { %631 = vmatpush1.msra.mxu0 %v473_v15  ;;  %856 = vmatpush1.msra.mxu1 %v505_v16  ;;  %v488_v49 = vld [vmem:[%s3236_s1 + $0xb8] sm:$0xff]  ;;  %v487_v51 = vld [vmem:[%s3236_s1 + $0xb0] sm:$0xff]  ;;  %v486_v53 = vld [vmem:[%s3236_s1 + $0xa8] sm:$0xff] }
  0x1c   : > { %632 = vmatprep.subr.mxu0 %v2051_v2  ;;  %857 = vmatprep.subr.mxu1 %v2051_v2  ;;  %v520_v50 = vld [vmem:[%s3236_s1 + $0x1b8] sm:$0xff]  ;;  %v519_v52 = vld [vmem:[%s3236_s1 + $0x1b0] sm:$0xff]  ;;  %v518_v54 = vld [vmem:[%s3236_s1 + $0x1a8] sm:$0xff] }
  0x1d   : > { %633 = vmatpush1.msra.mxu0 %v472_v17  ;;  %858 = vmatpush1.msra.mxu1 %v504_v18  ;;  %v485_v55 = vld [vmem:[%s3236_s1 + $0xa0] sm:$0xff]  ;;  %v484_v57 = vld [vmem:[%s3236_s1 + $0x98] sm:$0xff]  ;;  %v483_v59 = vld [vmem:[%s3236_s1 + $0x90] sm:$0xff] }
  0x1e   : > { %634 = vmatprep.subr.mxu0 %v2051_v2  ;;  %859 = vmatprep.subr.mxu1 %v2051_v2  ;;  %v517_v56 = vld [vmem:[%s3236_s1 + $0x1a0] sm:$0xff]  ;;  %v516_v58 = vld [vmem:[%s3236_s1 + $0x198] sm:$0xff]  ;;  %v515_v60 = vld [vmem:[%s3236_s1 + $0x190] sm:$0xff] }
  0x1f   : > { %635 = vmatpush1.msra.mxu0 %v471_v19  ;;  %860 = vmatpush1.msra.mxu1 %v503_v20  ;;  %v482_v61 = vld [vmem:[%s3236_s1 + $0x88] sm:$0xff]  ;;  %v481_v63 = vld [vmem:[%s3236_s1 + $0x80] sm:$0xff]  ;;  %v180_v3 = vld [vmem:[%s2326_s10 + $0x18] sm:$0xff] }
  0x20   : > { %636 = vmatprep.subr.mxu0 %v2051_v2  ;;  %861 = vmatprep.subr.mxu1 %v2051_v2  ;;  %v514_v62 = vld [vmem:[%s3236_s1 + $0x188] sm:$0xff]  ;;  %v513_v1 = vld [vmem:[%s3236_s1 + $0x180] sm:$0xff]  ;;  %v179_v5 = vld [vmem:[%s2326_s10 + $0x10] sm:$0xff] }
  0x21   : > { %637 = vmatpush1.msra.mxu0 %v470_v21  ;;  %862 = vmatpush1.msra.mxu1 %v502_v22  ;;  %v178_v0 = vld [vmem:[%s2326_s10 + $0x8] sm:$0xff]  ;;  %v177_v4 = vld [vmem:[%s2326_s10] sm:$0xff]  ;;  %v544_v6 = vld [vmem:[%s3236_s1 + $0x278] sm:$0xff] }
  0x22   : > { %638 = vmatprep.subr.mxu0 %v2051_v2  ;;  %863 = vmatprep.subr.mxu1 %v2051_v2  ;;  %v576_v7 = vld [vmem:[%s3236_s1 + $0x378] sm:$0xff]  ;;  %v187_v8 = vld [vmem:[%s2326_s10 + $0x50] sm:$0xff]  ;;  %v189_v9 = vld [vmem:[%s2326_s10 + $0x60] sm:$0xff] }
  0x23   : > { %639 = vmatpush1.msra.mxu0 %v469_v23  ;;  %864 = vmatpush1.msra.mxu1 %v501_v24  ;;  %v186_v10 = vld [vmem:[%s2326_s10 + $0x48] sm:$0xff]  ;;  %v188_v11 = vld [vmem:[%s2326_s10 + $0x58] sm:$0xff]  ;;  %v543_v12 = vld [vmem:[%s3236_s1 + $0x270] sm:$0xff] }
  0x24   : > { %640 = vmatprep.subr.mxu0 %v2051_v2  ;;  %865 = vmatprep.subr.mxu1 %v2051_v2  ;;  %v575_v13 = vld [vmem:[%s3236_s1 + $0x370] sm:$0xff]  ;;  %v196_v14 = vld [vmem:[%s2326_s10 + $0x98] sm:$0xff]  ;;  %v198_v15 = vld [vmem:[%s2326_s10 + $0xa8] sm:$0xff] }
  0x25   : > { %641 = vmatpush1.msra.mxu0 %v468_v25  ;;  %866 = vmatpush1.msra.mxu1 %v500_v26  ;;  %v195_v16 = vld [vmem:[%s2326_s10 + $0x90] sm:$0xff]  ;;  %v197_v17 = vld [vmem:[%s2326_s10 + $0xa0] sm:$0xff]  ;;  %v542_v18 = vld [vmem:[%s3236_s1 + $0x268] sm:$0xff] }
  0x26   : > { %642 = vmatprep.subr.mxu0 %v2051_v2  ;;  %867 = vmatprep.subr.mxu1 %v2051_v2  ;;  %v574_v19 = vld [vmem:[%s3236_s1 + $0x368] sm:$0xff]  ;;  %v205_v20 = vld [vmem:[%s2326_s10 + $0xe0] sm:$0xff]  ;;  %v207_v21 = vld [vmem:[%s2326_s10 + $0xf0] sm:$0xff] }
  0x27   : > { %643 = vmatpush1.msra.mxu0 %v467_v27  ;;  %868 = vmatpush1.msra.mxu1 %v499_v28  ;;  %v204_v22 = vld [vmem:[%s2326_s10 + $0xd8] sm:$0xff]  ;;  %v206_v23 = vld [vmem:[%s2326_s10 + $0xe8] sm:$0xff]  ;;  %v541_v24 = vld [vmem:[%s3236_s1 + $0x260] sm:$0xff] }
  0x28   : > { %644 = vmatprep.subr.mxu0 %v2051_v2  ;;  %869 = vmatprep.subr.mxu1 %v2051_v2  ;;  %v573_v25 = vld [vmem:[%s3236_s1 + $0x360] sm:$0xff]  ;;  %v214_v26 = vld [vmem:[%s2326_s10 + $0x128] sm:$0xff]  ;;  %v216_v27 = vld [vmem:[%s2326_s10 + $0x138] sm:$0xff] }
  0x29   : > { %645 = vmatpush1.msra.mxu0 %v466_v29  ;;  %870 = vmatpush1.msra.mxu1 %v498_v30  ;;  %v213_v28 = vld [vmem:[%s2326_s10 + $0x120] sm:$0xff]  ;;  %v215_v29 = vld [vmem:[%s2326_s10 + $0x130] sm:$0xff]  ;;  %v540_v30 = vld [vmem:[%s3236_s1 + $0x258] sm:$0xff] }
  0x2a   : > { %646 = vmatprep.subr.mxu0 %v2051_v2  ;;  %871 = vmatprep.subr.mxu1 %v2051_v2 }
  0x2b   : > { %647 = vmatpush1.msra.mxu0 %v465_v31  ;;  %872 = vmatpush1.msra.mxu1 %v497_v32  ;;  %v572_v31 = vld [vmem:[%s3236_s1 + $0x358] sm:$0xff]  ;;  %v223_v32 = vld [vmem:[%s2326_s10 + $0x170] sm:$0xff] }
  0x2c   : > { %648 = vmatprep.subr.mxu0 %v2051_v2  ;;  %873 = vmatprep.subr.mxu1 %v2051_v2 }
  0x2d   : > { %649 = vmatpush2.msra.mxu0 %v496_v33  ;;  %874 = vmatpush2.msra.mxu1 %v528_v34  ;;  %v225_v33 = vld [vmem:[%s2326_s10 + $0x180] sm:$0xff]  ;;  %v222_v34 = vld [vmem:[%s2326_s10 + $0x168] sm:$0xff] }
  0x2e   : > { %650 = vmatprep.subr.mxu0 %v2051_v2  ;;  %875 = vmatprep.subr.mxu1 %v2051_v2 }
  0x2f   : > { %651 = vmatpush2.msra.mxu0 %v495_v35  ;;  %876 = vmatpush2.msra.mxu1 %v527_v36  ;;  %v224_v35 = vld [vmem:[%s2326_s10 + $0x178] sm:$0xff]  ;;  %v539_v36 = vld [vmem:[%s3236_s1 + $0x250] sm:$0xff] }
  0x30   : > { %652 = vmatprep.subr.mxu0 %v2051_v2  ;;  %877 = vmatprep.subr.mxu1 %v2051_v2 }
  0x31   : > { %653 = vmatpush2.msra.mxu0 %v494_v37  ;;  %878 = vmatpush2.msra.mxu1 %v526_v38  ;;  %v571_v37 = vld [vmem:[%s3236_s1 + $0x350] sm:$0xff]  ;;  %v232_v38 = vld [vmem:[%s2326_s10 + $0x1b8] sm:$0xff] }
  0x32   : > { %654 = vmatprep.subr.mxu0 %v2051_v2  ;;  %879 = vmatprep.subr.mxu1 %v2051_v2 }
  0x33   : > { %655 = vmatpush2.msra.mxu0 %v493_v39  ;;  %880 = vmatpush2.msra.mxu1 %v525_v40  ;;  %v234_v39 = vld [vmem:[%s2326_s10 + $0x1c8] sm:$0xff]  ;;  %v231_v40 = vld [vmem:[%s2326_s10 + $0x1b0] sm:$0xff] }
  0x34   : > { %656 = vmatprep.subr.mxu0 %v2051_v2  ;;  %881 = vmatprep.subr.mxu1 %v2051_v2 }
  0x35   : > { %657 = vmatpush2.msra.mxu0 %v492_v41  ;;  %882 = vmatpush2.msra.mxu1 %v524_v42  ;;  %v233_v41 = vld [vmem:[%s2326_s10 + $0x1c0] sm:$0xff]  ;;  %v538_v42 = vld [vmem:[%s3236_s1 + $0x248] sm:$0xff] }
  0x36   : > { %658 = vmatprep.subr.mxu0 %v2051_v2  ;;  %883 = vmatprep.subr.mxu1 %v2051_v2 }
  0x37   : > { %659 = vmatpush2.msra.mxu0 %v491_v43  ;;  %884 = vmatpush2.msra.mxu1 %v523_v44  ;;  %v570_v43 = vld [vmem:[%s3236_s1 + $0x348] sm:$0xff]  ;;  %v241_v44 = vld [vmem:[%s2326_s10 + $0x200] sm:$0xff] }
  0x38   : > { %660 = vmatprep.subr.mxu0 %v2051_v2  ;;  %885 = vmatprep.subr.mxu1 %v2051_v2 }
  0x39   : > { %661 = vmatpush2.msra.mxu0 %v490_v45  ;;  %886 = vmatpush2.msra.mxu1 %v522_v46  ;;  %v243_v45 = vld [vmem:[%s2326_s10 + $0x210] sm:$0xff]  ;;  %v240_v46 = vld [vmem:[%s2326_s10 + $0x1f8] sm:$0xff] }
  0x3a   : > { %662 = vmatprep.subr.mxu0 %v2051_v2  ;;  %887 = vmatprep.subr.mxu1 %v2051_v2 }
  0x3b   : > { %663 = vmatpush2.msra.mxu0 %v489_v47  ;;  %888 = vmatpush2.msra.mxu1 %v521_v48  ;;  %v242_v47 = vld [vmem:[%s2326_s10 + $0x208] sm:$0xff]  ;;  %v537_v48 = vld [vmem:[%s3236_s1 + $0x240] sm:$0xff] }
  0x3c   : > { %664 = vmatprep.subr.mxu0 %v2051_v2  ;;  %889 = vmatprep.subr.mxu1 %v2051_v2 }
  0x3d   : > { %665 = vmatpush2.msra.mxu0 %v488_v49  ;;  %890 = vmatpush2.msra.mxu1 %v520_v50  ;;  %v569_v49 = vld [vmem:[%s3236_s1 + $0x340] sm:$0xff]  ;;  %v250_v50 = vld [vmem:[%s2326_s10 + $0x248] sm:$0xff] }
  0x3e   : > { %666 = vmatprep.subr.mxu0 %v2051_v2  ;;  %891 = vmatprep.subr.mxu1 %v2051_v2 }
  0x3f   : > { %667 = vmatpush2.msra.mxu0 %v487_v51  ;;  %892 = vmatpush2.msra.mxu1 %v519_v52  ;;  %v252_v51 = vld [vmem:[%s2326_s10 + $0x258] sm:$0xff]  ;;  %v249_v52 = vld [vmem:[%s2326_s10 + $0x240] sm:$0xff] }
  0x40   : > { %668 = vmatprep.subr.mxu0 %v2051_v2  ;;  %893 = vmatprep.subr.mxu1 %v2051_v2 }
  0x41   : > { %669 = vmatpush2.msra.mxu0 %v486_v53  ;;  %894 = vmatpush2.msra.mxu1 %v518_v54  ;;  %v251_v53 = vld [vmem:[%s2326_s10 + $0x250] sm:$0xff]  ;;  %v536_v54 = vld [vmem:[%s3236_s1 + $0x238] sm:$0xff] }
  0x42   : > { %670 = vmatprep.subr.mxu0 %v2051_v2  ;;  %895 = vmatprep.subr.mxu1 %v2051_v2 }
  0x43   : > { %671 = vmatpush2.msra.mxu0 %v485_v55  ;;  %896 = vmatpush2.msra.mxu1 %v517_v56  ;;  %v568_v55 = vld [vmem:[%s3236_s1 + $0x338] sm:$0xff]  ;;  %v259_v56 = vld [vmem:[%s2326_s10 + $0x290] sm:$0xff] }
  0x44   : > { %672 = vmatprep.subr.mxu0 %v2051_v2  ;;  %897 = vmatprep.subr.mxu1 %v2051_v2 }
  0x45   : > { %673 = vmatpush2.msra.mxu0 %v484_v57  ;;  %898 = vmatpush2.msra.mxu1 %v516_v58  ;;  %v261_v57 = vld [vmem:[%s2326_s10 + $0x2a0] sm:$0xff]  ;;  %v258_v58 = vld [vmem:[%s2326_s10 + $0x288] sm:$0xff] }
  0x46   : > { %674 = vmatprep.subr.mxu0 %v2051_v2  ;;  %899 = vmatprep.subr.mxu1 %v2051_v2 }
  0x47   : > { %675 = vmatpush2.msra.mxu0 %v483_v59  ;;  %900 = vmatpush2.msra.mxu1 %v515_v60  ;;  %v260_v59 = vld [vmem:[%s2326_s10 + $0x298] sm:$0xff]  ;;  %v535_v60 = vld [vmem:[%s3236_s1 + $0x230] sm:$0xff] }
  0x48   : > { %676 = vmatprep.subr.mxu0 %v2051_v2  ;;  %901 = vmatprep.subr.mxu1 %v2051_v2 }
  0x49   : > { %677 = vmatpush2.msra.mxu0 %v482_v61  ;;  %902 = vmatpush2.msra.mxu1 %v514_v62  ;;  %v567_v61 = vld [vmem:[%s3236_s1 + $0x330] sm:$0xff]  ;;  %v268_v62 = vld [vmem:[%s2326_s10 + $0x2d8] sm:$0xff] }
  0x4a   : > { %678 = vmatprep.subr.mxu0 %v2051_v2  ;;  %903 = vmatprep.subr.mxu1 %v2051_v2 }
  0x4b   : > { %679 = vmatpush2.msra.mxu0 %v481_v63  ;;  %680 = vmatprep.mubr.f32.mxu0 %v178_v0  ;;  %v270_v63 = vld [vmem:[%s2326_s10 + $0x2e8] sm:$0xff]  ;;  %v267_v0 = vld [vmem:[%s2326_s10 + $0x2d0] sm:$0xff] }
  0x4c   : > { %904 = vmatpush2.msra.mxu1 %v513_v1  ;;  %905 = vmatprep.mubr.f32.mxu1 %v180_v3  ;;  %v269_v1 = vld [vmem:[%s2326_s10 + $0x2e0] sm:$0xff]  ;;  %v534_v3 = vld [vmem:[%s3236_s1 + $0x228] sm:$0xff] }
  0x4d   : > { %681 = vmatmul.mubr.f32.vlgmr.msra.gmra.mxu0 %v177_v4  ;;  %906 = vmatmul.mubr.f32.vlgmr.msra.gmra.mxu1 %v179_v5  ;;  %v566_v4 = vld [vmem:[%s3236_s1 + $0x328] sm:$0xff]  ;;  %v277_v5 = vld [vmem:[%s2326_s10 + $0x320] sm:$0xff] }
  0x4e   : > { %1066 = vmatprep.subr.mxu0 %v2051_v2  ;;  %1291 = vmatprep.subr.mxu1 %v2051_v2 }
  0x4f   : > { %1067 = vmatpush1.msra.mxu0 %v544_v6  ;;  %1292 = vmatpush1.msra.mxu1 %v576_v7  ;;  %v279_v6 = vld [vmem:[%s2326_s10 + $0x330] sm:$0xff]  ;;  %v276_v7 = vld [vmem:[%s2326_s10 + $0x318] sm:$0xff] }
  0x50   : > { %685 = vmatprep.mubr.f32.mxu0 %v187_v8  ;;  %910 = vmatprep.mubr.f32.mxu1 %v189_v9  ;;  %v278_v8 = vld [vmem:[%s2326_s10 + $0x328] sm:$0xff]  ;;  %v533_v9 = vld [vmem:[%s3236_s1 + $0x220] sm:$0xff] }
  0x51   : > { %686 = vmatmul.mubr.f32.gmra.mxu0 %v186_v10  ;;  %911 = vmatmul.mubr.f32.gmra.mxu1 %v188_v11  ;;  %v565_v10 = vld [vmem:[%s3236_s1 + $0x320] sm:$0xff]  ;;  %v286_v11 = vld [vmem:[%s2326_s10 + $0x368] sm:$0xff] }
  0x52   : > { %1068 = vmatprep.subr.mxu0 %v2051_v2  ;;  %1293 = vmatprep.subr.mxu1 %v2051_v2 }
  0x53   : > { %1069 = vmatpush1.msra.mxu0 %v543_v12  ;;  %1294 = vmatpush1.msra.mxu1 %v575_v13  ;;  %v288_v12 = vld [vmem:[%s2326_s10 + $0x378] sm:$0xff]  ;;  %v285_v13 = vld [vmem:[%s2326_s10 + $0x360] sm:$0xff] }
  0x54   : > { %690 = vmatprep.mubr.f32.mxu0 %v196_v14  ;;  %915 = vmatprep.mubr.f32.mxu1 %v198_v15  ;;  %v287_v14 = vld [vmem:[%s2326_s10 + $0x370] sm:$0xff]  ;;  %v532_v15 = vld [vmem:[%s3236_s1 + $0x218] sm:$0xff] }
  0x55   : > { %691 = vmatmul.mubr.f32.gmra.mxu0 %v195_v16  ;;  %916 = vmatmul.mubr.f32.gmra.mxu1 %v197_v17  ;;  %v564_v16 = vld [vmem:[%s3236_s1 + $0x318] sm:$0xff]  ;;  %v295_v17 = vld [vmem:[%s2326_s10 + $0x3b0] sm:$0xff] }
  0x56   : > { %1070 = vmatprep.subr.mxu0 %v2051_v2  ;;  %1295 = vmatprep.subr.mxu1 %v2051_v2 }
  0x57   : > { %1071 = vmatpush1.msra.mxu0 %v542_v18  ;;  %1296 = vmatpush1.msra.mxu1 %v574_v19  ;;  %v297_v18 = vld [vmem:[%s2326_s10 + $0x3c0] sm:$0xff]  ;;  %v294_v19 = vld [vmem:[%s2326_s10 + $0x3a8] sm:$0xff] }
  0x58   : > { %695 = vmatprep.mubr.f32.mxu0 %v205_v20  ;;  %920 = vmatprep.mubr.f32.mxu1 %v207_v21  ;;  %v296_v20 = vld [vmem:[%s2326_s10 + $0x3b8] sm:$0xff]  ;;  %v531_v21 = vld [vmem:[%s3236_s1 + $0x210] sm:$0xff] }
  0x59   : > { %696 = vmatmul.mubr.f32.gmra.mxu0 %v204_v22  ;;  %921 = vmatmul.mubr.f32.gmra.mxu1 %v206_v23  ;;  %v563_v22 = vld [vmem:[%s3236_s1 + $0x310] sm:$0xff]  ;;  %v304_v23 = vld [vmem:[%s2326_s10 + $0x3f8] sm:$0xff] }
  0x5a   : > { %1072 = vmatprep.subr.mxu0 %v2051_v2  ;;  %1297 = vmatprep.subr.mxu1 %v2051_v2 }
  0x5b   : > { %1073 = vmatpush1.msra.mxu0 %v541_v24  ;;  %1298 = vmatpush1.msra.mxu1 %v573_v25  ;;  %v306_v24 = vld [vmem:[%s2326_s10 + $0x408] sm:$0xff]  ;;  %v303_v25 = vld [vmem:[%s2326_s10 + $0x3f0] sm:$0xff] }
  0x5c   : > { %700 = vmatprep.mubr.f32.mxu0 %v214_v26  ;;  %925 = vmatprep.mubr.f32.mxu1 %v216_v27  ;;  %v305_v26 = vld [vmem:[%s2326_s10 + $0x400] sm:$0xff]  ;;  %v530_v27 = vld [vmem:[%s3236_s1 + $0x208] sm:$0xff] }
  0x5d   : > { %701 = vmatmul.mubr.f32.gmra.mxu0 %v213_v28  ;;  %926 = vmatmul.mubr.f32.gmra.mxu1 %v215_v29  ;;  %v562_v28 = vld [vmem:[%s3236_s1 + $0x308] sm:$0xff]  ;;  %v313_v29 = vld [vmem:[%s2326_s10 + $0x440] sm:$0xff] }
  0x5e   : > { %1074 = vmatprep.subr.mxu0 %v2051_v2  ;;  %1299 = vmatprep.subr.mxu1 %v2051_v2 }
  0x5f   : > { %1075 = vmatpush1.msra.mxu0 %v540_v30  ;;  %1300 = vmatpush1.msra.mxu1 %v572_v31  ;;  %v315_v30 = vld [vmem:[%s2326_s10 + $0x450] sm:$0xff]  ;;  %v312_v31 = vld [vmem:[%s2326_s10 + $0x438] sm:$0xff] }
  0x60   : > { %705 = vmatprep.mubr.f32.mxu0 %v223_v32  ;;  %930 = vmatprep.mubr.f32.mxu1 %v225_v33  ;;  %v314_v32 = vld [vmem:[%s2326_s10 + $0x448] sm:$0xff]  ;;  %v529_v33 = vld [vmem:[%s3236_s1 + $0x200] sm:$0xff] }
  0x61   : > { %706 = vmatmul.mubr.f32.gmra.mxu0 %v222_v34  ;;  %931 = vmatmul.mubr.f32.gmra.mxu1 %v224_v35  ;;  %v561_v34 = vld [vmem:[%s3236_s1 + $0x300] sm:$0xff]  ;;  %v322_v35 = vld [vmem:[%s2326_s10 + $0x488] sm:$0xff] }
  0x62   : > { %1076 = vmatprep.subr.mxu0 %v2051_v2  ;;  %1301 = vmatprep.subr.mxu1 %v2051_v2 }
  0x63   : > { %1077 = vmatpush1.msra.mxu0 %v539_v36  ;;  %1302 = vmatpush1.msra.mxu1 %v571_v37  ;;  %v324_v36 = vld [vmem:[%s2326_s10 + $0x498] sm:$0xff]  ;;  %v321_v37 = vld [vmem:[%s2326_s10 + $0x480] sm:$0xff] }
  0x64   : > { %710 = vmatprep.mubr.f32.mxu0 %v232_v38  ;;  %935 = vmatprep.mubr.f32.mxu1 %v234_v39  ;;  %v323_v38 = vld [vmem:[%s2326_s10 + $0x490] sm:$0xff]  ;;  %v560_v39 = vld [vmem:[%s3236_s1 + $0x2f8] sm:$0xff] }
  0x65   : > { %711 = vmatmul.mubr.f32.gmra.mxu0 %v231_v40  ;;  %936 = vmatmul.mubr.f32.gmra.mxu1 %v233_v41  ;;  %v592_v40 = vld [vmem:[%s3236_s1 + $0x3f8] sm:$0xff]  ;;  %v331_v41 = vld [vmem:[%s2326_s10 + $0x4d0] sm:$0xff] }
  0x66   : > { %1078 = vmatprep.subr.mxu0 %v2051_v2  ;;  %1303 = vmatprep.subr.mxu1 %v2051_v2 }
  0x67   : > { %1079 = vmatpush1.msra.mxu0 %v538_v42  ;;  %1304 = vmatpush1.msra.mxu1 %v570_v43  ;;  %v333_v42 = vld [vmem:[%s2326_s10 + $0x4e0] sm:$0xff]  ;;  %v330_v43 = vld [vmem:[%s2326_s10 + $0x4c8] sm:$0xff] }
  0x68   : > { %715 = vmatprep.mubr.f32.mxu0 %v241_v44  ;;  %940 = vmatprep.mubr.f32.mxu1 %v243_v45  ;;  %v332_v44 = vld [vmem:[%s2326_s10 + $0x4d8] sm:$0xff]  ;;  %v559_v45 = vld [vmem:[%s3236_s1 + $0x2f0] sm:$0xff] }
  0x69   : > { %716 = vmatmul.mubr.f32.gmra.mxu0 %v240_v46  ;;  %941 = vmatmul.mubr.f32.gmra.mxu1 %v242_v47  ;;  %v591_v46 = vld [vmem:[%s3236_s1 + $0x3f0] sm:$0xff]  ;;  %v340_v47 = vld [vmem:[%s2326_s10 + $0x518] sm:$0xff] }
  0x6a   : > { %1080 = vmatprep.subr.mxu0 %v2051_v2  ;;  %1305 = vmatprep.subr.mxu1 %v2051_v2 }
  0x6b   : > { %1081 = vmatpush1.msra.mxu0 %v537_v48  ;;  %1306 = vmatpush1.msra.mxu1 %v569_v49  ;;  %v342_v48 = vld [vmem:[%s2326_s10 + $0x528] sm:$0xff]  ;;  %v339_v49 = vld [vmem:[%s2326_s10 + $0x510] sm:$0xff] }
  0x6c   : > { %720 = vmatprep.mubr.f32.mxu0 %v250_v50  ;;  %945 = vmatprep.mubr.f32.mxu1 %v252_v51  ;;  %v341_v50 = vld [vmem:[%s2326_s10 + $0x520] sm:$0xff]  ;;  %v558_v51 = vld [vmem:[%s3236_s1 + $0x2e8] sm:$0xff] }
  0x6d   : > { %721 = vmatmul.mubr.f32.gmra.mxu0 %v249_v52  ;;  %946 = vmatmul.mubr.f32.gmra.mxu1 %v251_v53  ;;  %v590_v52 = vld [vmem:[%s3236_s1 + $0x3e8] sm:$0xff]  ;;  %v349_v53 = vld [vmem:[%s2326_s10 + $0x560] sm:$0xff] }
  0x6e   : > { %1082 = vmatprep.subr.mxu0 %v2051_v2  ;;  %1307 = vmatprep.subr.mxu1 %v2051_v2 }
  0x6f   : > { %1083 = vmatpush1.msra.mxu0 %v536_v54  ;;  %1308 = vmatpush1.msra.mxu1 %v568_v55  ;;  %v351_v54 = vld [vmem:[%s2326_s10 + $0x570] sm:$0xff]  ;;  %v348_v55 = vld [vmem:[%s2326_s10 + $0x558] sm:$0xff] }
  0x70   : > { %725 = vmatprep.mubr.f32.mxu0 %v259_v56  ;;  %950 = vmatprep.mubr.f32.mxu1 %v261_v57  ;;  %v350_v56 = vld [vmem:[%s2326_s10 + $0x568] sm:$0xff]  ;;  %v557_v57 = vld [vmem:[%s3236_s1 + $0x2e0] sm:$0xff] }
  0x71   : > { %726 = vmatmul.mubr.f32.gmra.mxu0 %v258_v58  ;;  %951 = vmatmul.mubr.f32.gmra.mxu1 %v260_v59  ;;  %v589_v58 = vld [vmem:[%s3236_s1 + $0x3e0] sm:$0xff]  ;;  %v358_v59 = vld [vmem:[%s2326_s10 + $0x5a8] sm:$0xff] }
  0x72   : > { %1084 = vmatprep.subr.mxu0 %v2051_v2  ;;  %1309 = vmatprep.subr.mxu1 %v2051_v2 }
  0x73   : > { %1085 = vmatpush1.msra.mxu0 %v535_v60  ;;  %1310 = vmatpush1.msra.mxu1 %v567_v61  ;;  %v360_v60 = vld [vmem:[%s2326_s10 + $0x5b8] sm:$0xff]  ;;  %v357_v61 = vld [vmem:[%s2326_s10 + $0x5a0] sm:$0xff] }
  0x74   : > { %730 = vmatprep.mubr.f32.mxu0 %v268_v62  ;;  %955 = vmatprep.mubr.f32.mxu1 %v270_v63  ;;  %v359_v62 = vld [vmem:[%s2326_s10 + $0x5b0] sm:$0xff]  ;;  %v556_v63 = vld [vmem:[%s3236_s1 + $0x2d8] sm:$0xff] }
  0x75   : > { %731 = vmatmul.mubr.f32.gmra.mxu0 %v267_v0  ;;  %956 = vmatmul.mubr.f32.gmra.mxu1 %v269_v1  ;;  %v588_v0 = vld [vmem:[%s3236_s1 + $0x3d8] sm:$0xff]  ;;  %v367_v1 = vld [vmem:[%s2326_s10 + $0x5f0] sm:$0xff] }
  0x76   : > { %1086 = vmatprep.subr.mxu0 %v2051_v2  ;;  %1311 = vmatprep.subr.mxu1 %v2051_v2 }
  0x77   : > { %1087 = vmatpush1.msra.mxu0 %v534_v3  ;;  %1312 = vmatpush1.msra.mxu1 %v566_v4  ;;  %v369_v3 = vld [vmem:[%s2326_s10 + $0x600] sm:$0xff]  ;;  %v366_v4 = vld [vmem:[%s2326_s10 + $0x5e8] sm:$0xff] }
  0x78   : > { %735 = vmatprep.mubr.f32.mxu0 %v277_v5  ;;  %960 = vmatprep.mubr.f32.mxu1 %v279_v6  ;;  %v368_v5 = vld [vmem:[%s2326_s10 + $0x5f8] sm:$0xff]  ;;  %v555_v6 = vld [vmem:[%s3236_s1 + $0x2d0] sm:$0xff] }
  0x79   : > { %736 = vmatmul.mubr.f32.gmra.mxu0 %v276_v7  ;;  %961 = vmatmul.mubr.f32.gmra.mxu1 %v278_v8  ;;  %v587_v7 = vld [vmem:[%s3236_s1 + $0x3d0] sm:$0xff]  ;;  %v376_v8 = vld [vmem:[%s2326_s10 + $0x638] sm:$0xff] }
  0x7a   : > { %1088 = vmatprep.subr.mxu0 %v2051_v2  ;;  %1313 = vmatprep.subr.mxu1 %v2051_v2 }
  0x7b   : > { %1089 = vmatpush1.msra.mxu0 %v533_v9  ;;  %1314 = vmatpush1.msra.mxu1 %v565_v10  ;;  %v378_v9 = vld [vmem:[%s2326_s10 + $0x648] sm:$0xff]  ;;  %v375_v10 = vld [vmem:[%s2326_s10 + $0x630] sm:$0xff] }
  0x7c   : > { %740 = vmatprep.mubr.f32.mxu0 %v286_v11  ;;  %965 = vmatprep.mubr.f32.mxu1 %v288_v12  ;;  %v377_v11 = vld [vmem:[%s2326_s10 + $0x640] sm:$0xff]  ;;  %v554_v12 = vld [vmem:[%s3236_s1 + $0x2c8] sm:$0xff] }
  0x7d   : > { %741 = vmatmul.mubr.f32.gmra.mxu0 %v285_v13  ;;  %966 = vmatmul.mubr.f32.gmra.mxu1 %v287_v14  ;;  %v586_v13 = vld [vmem:[%s3236_s1 + $0x3c8] sm:$0xff]  ;;  %v385_v14 = vld [vmem:[%s2326_s10 + $0x680] sm:$0xff] }
  0x7e   : > { %1090 = vmatprep.subr.mxu0 %v2051_v2  ;;  %1315 = vmatprep.subr.mxu1 %v2051_v2 }
  0x7f   : > { %1091 = vmatpush1.msra.mxu0 %v532_v15  ;;  %1316 = vmatpush1.msra.mxu1 %v564_v16  ;;  %v387_v15 = vld [vmem:[%s2326_s10 + $0x690] sm:$0xff]  ;;  %v384_v16 = vld [vmem:[%s2326_s10 + $0x678] sm:$0xff] }
  0x80   : > { %745 = vmatprep.mubr.f32.mxu0 %v295_v17  ;;  %970 = vmatprep.mubr.f32.mxu1 %v297_v18  ;;  %v386_v17 = vld [vmem:[%s2326_s10 + $0x688] sm:$0xff]  ;;  %v553_v18 = vld [vmem:[%s3236_s1 + $0x2c0] sm:$0xff] }
  0x81   : > { %746 = vmatmul.mubr.f32.gmra.mxu0 %v294_v19  ;;  %971 = vmatmul.mubr.f32.gmra.mxu1 %v296_v20  ;;  %v585_v19 = vld [vmem:[%s3236_s1 + $0x3c0] sm:$0xff]  ;;  %v394_v20 = vld [vmem:[%s2326_s10 + $0x6c8] sm:$0xff] }
  0x82   : > { %1092 = vmatprep.subr.mxu0 %v2051_v2  ;;  %1317 = vmatprep.subr.mxu1 %v2051_v2 }
  0x83   : > { %1093 = vmatpush1.msra.mxu0 %v531_v21  ;;  %1318 = vmatpush1.msra.mxu1 %v563_v22  ;;  %v396_v21 = vld [vmem:[%s2326_s10 + $0x6d8] sm:$0xff]  ;;  %v393_v22 = vld [vmem:[%s2326_s10 + $0x6c0] sm:$0xff] }
  0x84   : > { %750 = vmatprep.mubr.f32.mxu0 %v304_v23  ;;  %975 = vmatprep.mubr.f32.mxu1 %v306_v24  ;;  %v395_v23 = vld [vmem:[%s2326_s10 + $0x6d0] sm:$0xff]  ;;  %v552_v24 = vld [vmem:[%s3236_s1 + $0x2b8] sm:$0xff] }
  0x85   : > { %751 = vmatmul.mubr.f32.gmra.mxu0 %v303_v25  ;;  %976 = vmatmul.mubr.f32.gmra.mxu1 %v305_v26  ;;  %v584_v25 = vld [vmem:[%s3236_s1 + $0x3b8] sm:$0xff]  ;;  %v403_v26 = vld [vmem:[%s2326_s10 + $0x710] sm:$0xff] }
  0x86   : > { %1094 = vmatprep.subr.mxu0 %v2051_v2  ;;  %1319 = vmatprep.subr.mxu1 %v2051_v2 }
  0x87   : > { %1095 = vmatpush1.msra.mxu0 %v530_v27  ;;  %1320 = vmatpush1.msra.mxu1 %v562_v28  ;;  %v405_v27 = vld [vmem:[%s2326_s10 + $0x720] sm:$0xff]  ;;  %v402_v28 = vld [vmem:[%s2326_s10 + $0x708] sm:$0xff] }
  0x88   : > { %755 = vmatprep.mubr.f32.mxu0 %v313_v29  ;;  %980 = vmatprep.mubr.f32.mxu1 %v315_v30  ;;  %v404_v29 = vld [vmem:[%s2326_s10 + $0x718] sm:$0xff]  ;;  %v551_v30 = vld [vmem:[%s3236_s1 + $0x2b0] sm:$0xff] }
  0x89   : > { %756 = vmatmul.mubr.f32.gmra.mxu0 %v312_v31  ;;  %981 = vmatmul.mubr.f32.gmra.mxu1 %v314_v32  ;;  %v583_v31 = vld [vmem:[%s3236_s1 + $0x3b0] sm:$0xff]  ;;  %v412_v32 = vld [vmem:[%s2326_s10 + $0x758] sm:$0xff] }
  0x8a   : > { %1096 = vmatprep.subr.mxu0 %v2051_v2  ;;  %1321 = vmatprep.subr.mxu1 %v2051_v2 }
  0x8b   : > { %1097 = vmatpush1.msra.mxu0 %v529_v33  ;;  %1322 = vmatpush1.msra.mxu1 %v561_v34  ;;  %v414_v33 = vld [vmem:[%s2326_s10 + $0x768] sm:$0xff]  ;;  %v411_v34 = vld [vmem:[%s2326_s10 + $0x750] sm:$0xff] }
  0x8c   : > { %760 = vmatprep.mubr.f32.mxu0 %v322_v35  ;;  %985 = vmatprep.mubr.f32.mxu1 %v324_v36  ;;  %v413_v35 = vld [vmem:[%s2326_s10 + $0x760] sm:$0xff]  ;;  %v550_v36 = vld [vmem:[%s3236_s1 + $0x2a8] sm:$0xff] }
  0x8d   : > { %761 = vmatmul.mubr.f32.gmra.mxu0 %v321_v37  ;;  %986 = vmatmul.mubr.f32.gmra.mxu1 %v323_v38  ;;  %v582_v37 = vld [vmem:[%s3236_s1 + $0x3a8] sm:$0xff]  ;;  %v421_v38 = vld [vmem:[%s2326_s10 + $0x7a0] sm:$0xff] }
  0x8e   : > { %1098 = vmatprep.subr.mxu0 %v2051_v2  ;;  %1323 = vmatprep.subr.mxu1 %v2051_v2 }
  0x8f   : > { %1099 = vmatpush2.msra.mxu0 %v560_v39  ;;  %1324 = vmatpush2.msra.mxu1 %v592_v40  ;;  %v423_v39 = vld [vmem:[%s2326_s10 + $0x7b0] sm:$0xff]  ;;  %v420_v40 = vld [vmem:[%s2326_s10 + $0x798] sm:$0xff] }
  0x90   : > { %765 = vmatprep.mubr.f32.mxu0 %v331_v41  ;;  %990 = vmatprep.mubr.f32.mxu1 %v333_v42  ;;  %v422_v41 = vld [vmem:[%s2326_s10 + $0x7a8] sm:$0xff]  ;;  %v549_v42 = vld [vmem:[%s3236_s1 + $0x2a0] sm:$0xff] }
  0x91   : > { %766 = vmatmul.mubr.f32.gmra.mxu0 %v330_v43  ;;  %991 = vmatmul.mubr.f32.gmra.mxu1 %v332_v44  ;;  %v581_v43 = vld [vmem:[%s3236_s1 + $0x3a0] sm:$0xff]  ;;  %v430_v44 = vld [vmem:[%s2326_s10 + $0x7e8] sm:$0xff] }
  0x92   : > { %1100 = vmatprep.subr.mxu0 %v2051_v2  ;;  %1325 = vmatprep.subr.mxu1 %v2051_v2 }
  0x93   : > { %1101 = vmatpush2.msra.mxu0 %v559_v45  ;;  %1326 = vmatpush2.msra.mxu1 %v591_v46  ;;  %v432_v45 = vld [vmem:[%s2326_s10 + $0x7f8] sm:$0xff]  ;;  %v429_v46 = vld [vmem:[%s2326_s10 + $0x7e0] sm:$0xff] }
  0x94   : > { %770 = vmatprep.mubr.f32.mxu0 %v340_v47  ;;  %995 = vmatprep.mubr.f32.mxu1 %v342_v48  ;;  %v431_v47 = vld [vmem:[%s2326_s10 + $0x7f0] sm:$0xff]  ;;  %v548_v48 = vld [vmem:[%s3236_s1 + $0x298] sm:$0xff] }
  0x95   : > { %771 = vmatmul.mubr.f32.gmra.mxu0 %v339_v49  ;;  %996 = vmatmul.mubr.f32.gmra.mxu1 %v341_v50  ;;  %v580_v49 = vld [vmem:[%s3236_s1 + $0x398] sm:$0xff]  ;;  %v439_v50 = vld [vmem:[%s2326_s10 + $0x830] sm:$0xff] }
  0x96   : > { %1102 = vmatprep.subr.mxu0 %v2051_v2  ;;  %1327 = vmatprep.subr.mxu1 %v2051_v2 }
  0x97   : > { %1103 = vmatpush2.msra.mxu0 %v558_v51  ;;  %1328 = vmatpush2.msra.mxu1 %v590_v52  ;;  %v441_v51 = vld [vmem:[%s2326_s10 + $0x840] sm:$0xff]  ;;  %v438_v52 = vld [vmem:[%s2326_s10 + $0x828] sm:$0xff] }
  0x98   : > { %775 = vmatprep.mubr.f32.mxu0 %v349_v53  ;;  %1000 = vmatprep.mubr.f32.mxu1 %v351_v54  ;;  %v440_v53 = vld [vmem:[%s2326_s10 + $0x838] sm:$0xff]  ;;  %v547_v54 = vld [vmem:[%s3236_s1 + $0x290] sm:$0xff] }
  0x99   : > { %776 = vmatmul.mubr.f32.gmra.mxu0 %v348_v55  ;;  %1001 = vmatmul.mubr.f32.gmra.mxu1 %v350_v56  ;;  %v579_v55 = vld [vmem:[%s3236_s1 + $0x390] sm:$0xff]  ;;  %v448_v56 = vld [vmem:[%s2326_s10 + $0x878] sm:$0xff] }
  0x9a   : > { %1104 = vmatprep.subr.mxu0 %v2051_v2  ;;  %1329 = vmatprep.subr.mxu1 %v2051_v2 }
  0x9b   : > { %1105 = vmatpush2.msra.mxu0 %v557_v57  ;;  %1330 = vmatpush2.msra.mxu1 %v589_v58  ;;  %v450_v57 = vld [vmem:[%s2326_s10 + $0x888] sm:$0xff]  ;;  %v447_v58 = vld [vmem:[%s2326_s10 + $0x870] sm:$0xff] }
  0x9c   : > { %780 = vmatprep.mubr.f32.mxu0 %v358_v59  ;;  %1005 = vmatprep.mubr.f32.mxu1 %v360_v60  ;;  %v449_v59 = vld [vmem:[%s2326_s10 + $0x880] sm:$0xff]  ;;  %v546_v60 = vld [vmem:[%s3236_s1 + $0x288] sm:$0xff] }
  0x9d   : > { %781 = vmatmul.mubr.f32.gmra.mxu0 %v357_v61  ;;  %1006 = vmatmul.mubr.f32.gmra.mxu1 %v359_v62  ;;  %v578_v61 = vld [vmem:[%s3236_s1 + $0x388] sm:$0xff]  ;;  %v457_v62 = vld [vmem:[%s2326_s10 + $0x8c0] sm:$0xff] }
  0x9e   : > { %1106 = vmatprep.subr.mxu0 %v2051_v2  ;;  %1331 = vmatprep.subr.mxu1 %v2051_v2 }
  0x9f   : > { %1107 = vmatpush2.msra.mxu0 %v556_v63  ;;  %1332 = vmatpush2.msra.mxu1 %v588_v0  ;;  %v459_v63 = vld [vmem:[%s2326_s10 + $0x8d0] sm:$0xff]  ;;  %v456_v0 = vld [vmem:[%s2326_s10 + $0x8b8] sm:$0xff] }
  0xa0   : > { %785 = vmatprep.mubr.f32.mxu0 %v367_v1  ;;  %1010 = vmatprep.mubr.f32.mxu1 %v369_v3  ;;  %v458_v1 = vld [vmem:[%s2326_s10 + $0x8c8] sm:$0xff]  ;;  %v545_v3 = vld [vmem:[%s3236_s1 + $0x280] sm:$0xff] }
  0xa1   : > { %786 = vmatmul.mubr.f32.gmra.mxu0 %v366_v4  ;;  %1011 = vmatmul.mubr.f32.gmra.mxu1 %v368_v5  ;;  %v577_v4 = vld [vmem:[%s3236_s1 + $0x380] sm:$0xff]  ;;  %v182_v5 = vld [vmem:[%s2326_s10 + $0x28] sm:$0xff] }
  0xa2   : > { %1108 = vmatprep.subr.mxu0 %v2051_v2  ;;  %1333 = vmatprep.subr.mxu1 %v2051_v2 }
  0xa3   : > { %1109 = vmatpush2.msra.mxu0 %v555_v6  ;;  %1334 = vmatpush2.msra.mxu1 %v587_v7  ;;  %v184_v6 = vld [vmem:[%s2326_s10 + $0x38] sm:$0xff]  ;;  %v181_v7 = vld [vmem:[%s2326_s10 + $0x20] sm:$0xff] }
  0xa4   : > { %790 = vmatprep.mubr.f32.mxu0 %v376_v8  ;;  %1015 = vmatprep.mubr.f32.mxu1 %v378_v9  ;;  %v183_v8 = vld [vmem:[%s2326_s10 + $0x30] sm:$0xff]  ;;  %v608_v9 = vld [vmem:[%s3236_s1 + $0x478] sm:$0xff] }
  0xa5   : > { %791 = vmatmul.mubr.f32.gmra.mxu0 %v375_v10  ;;  %1016 = vmatmul.mubr.f32.gmra.mxu1 %v377_v11  ;;  %v191_v10 = vld [vmem:[%s2326_s10 + $0x70] sm:$0xff]  ;;  %v193_v11 = vld [vmem:[%s2326_s10 + $0x80] sm:$0xff] }
  0xa6   : > { %1110 = vmatprep.subr.mxu0 %v2051_v2  ;;  %1335 = vmatprep.subr.mxu1 %v2051_v2 }
  0xa7   : > { %1111 = vmatpush2.msra.mxu0 %v554_v12  ;;  %1336 = vmatpush2.msra.mxu1 %v586_v13  ;;  %v192_v12 = vld [vmem:[%s2326_s10 + $0x78] sm:$0xff] }
  0xa8   : > { %795 = vmatprep.mubr.f32.mxu0 %v385_v14  ;;  %1020 = vmatprep.mubr.f32.mxu1 %v387_v15  ;;  %v200_v13 = vld [vmem:[%s2326_s10 + $0xb8] sm:$0xff]  ;;  %v202_v14 = vld [vmem:[%s2326_s10 + $0xc8] sm:$0xff]  ;;  %v607_v15 = vld [vmem:[%s3236_s1 + $0x470] sm:$0xff] }
  0xa9   : > { %796 = vmatmul.mubr.f32.gmra.mxu0 %v384_v16  ;;  %1021 = vmatmul.mubr.f32.gmra.mxu1 %v386_v17  ;;  %v199_v16 = vld [vmem:[%s2326_s10 + $0xb0] sm:$0xff]  ;;  %v201_v17 = vld [vmem:[%s2326_s10 + $0xc0] sm:$0xff] }
  0xaa   : > { %1112 = vmatprep.subr.mxu0 %v2051_v2  ;;  %1337 = vmatprep.subr.mxu1 %v2051_v2 }
  0xab   : > { %1113 = vmatpush2.msra.mxu0 %v553_v18  ;;  %1338 = vmatpush2.msra.mxu1 %v585_v19  ;;  %v209_v18 = vld [vmem:[%s2326_s10 + $0x100] sm:$0xff]  ;;  %v211_v19 = vld [vmem:[%s2326_s10 + $0x110] sm:$0xff] }
  0xac   : > { %800 = vmatprep.mubr.f32.mxu0 %v394_v20  ;;  %1025 = vmatprep.mubr.f32.mxu1 %v396_v21  ;;  %v606_v20 = vld [vmem:[%s3236_s1 + $0x468] sm:$0xff]  ;;  %v208_v21 = vld [vmem:[%s2326_s10 + $0xf8] sm:$0xff] }
  0xad   : > { %801 = vmatmul.mubr.f32.gmra.mxu0 %v393_v22  ;;  %1026 = vmatmul.mubr.f32.gmra.mxu1 %v395_v23  ;;  %v210_v22 = vld [vmem:[%s2326_s10 + $0x108] sm:$0xff] }
  0xae   : > { %1114 = vmatprep.subr.mxu0 %v2051_v2  ;;  %1339 = vmatprep.subr.mxu1 %v2051_v2  ;;  %v218_v23 = vld [vmem:[%s2326_s10 + $0x148] sm:$0xff] }
  0xaf   : > { %1115 = vmatpush2.msra.mxu0 %v552_v24  ;;  %1340 = vmatpush2.msra.mxu1 %v584_v25  ;;  %v220_v24 = vld [vmem:[%s2326_s10 + $0x158] sm:$0xff]  ;;  %v605_v25 = vld [vmem:[%s3236_s1 + $0x460] sm:$0xff] }
  0xb0   : > { %805 = vmatprep.mubr.f32.mxu0 %v403_v26  ;;  %1030 = vmatprep.mubr.f32.mxu1 %v405_v27  ;;  %v217_v26 = vld [vmem:[%s2326_s10 + $0x140] sm:$0xff]  ;;  %v219_v27 = vld [vmem:[%s2326_s10 + $0x150] sm:$0xff] }
  0xb1   : > { %806 = vmatmul.mubr.f32.gmra.mxu0 %v402_v28  ;;  %1031 = vmatmul.mubr.f32.gmra.mxu1 %v404_v29  ;;  %v227_v28 = vld [vmem:[%s2326_s10 + $0x190] sm:$0xff]  ;;  %v229_v29 = vld [vmem:[%s2326_s10 + $0x1a0] sm:$0xff] }
  0xb2   : > { %1116 = vmatprep.subr.mxu0 %v2051_v2  ;;  %1341 = vmatprep.subr.mxu1 %v2051_v2 }
  0xb3   : > { %1117 = vmatpush2.msra.mxu0 %v551_v30  ;;  %1342 = vmatpush2.msra.mxu1 %v583_v31  ;;  %v604_v30 = vld [vmem:[%s3236_s1 + $0x458] sm:$0xff]  ;;  %v226_v31 = vld [vmem:[%s2326_s10 + $0x188] sm:$0xff] }
  0xb4   : > { %810 = vmatprep.mubr.f32.mxu0 %v412_v32  ;;  %1035 = vmatprep.mubr.f32.mxu1 %v414_v33  ;;  %v228_v32 = vld [vmem:[%s2326_s10 + $0x198] sm:$0xff] }
  0xb5   : > { %811 = vmatmul.mubr.f32.gmra.mxu0 %v411_v34  ;;  %1036 = vmatmul.mubr.f32.gmra.mxu1 %v413_v35  ;;  %v236_v33 = vld [vmem:[%s2326_s10 + $0x1d8] sm:$0xff]  ;;  %v238_v34 = vld [vmem:[%s2326_s10 + $0x1e8] sm:$0xff]  ;;  %v603_v35 = vld [vmem:[%s3236_s1 + $0x450] sm:$0xff] }
  0xb6   : > { %1118 = vmatprep.subr.mxu0 %v2051_v2  ;;  %1343 = vmatprep.subr.mxu1 %v2051_v2 }
  0xb7   : > { %1119 = vmatpush2.msra.mxu0 %v550_v36  ;;  %1344 = vmatpush2.msra.mxu1 %v582_v37  ;;  %v235_v36 = vld [vmem:[%s2326_s10 + $0x1d0] sm:$0xff]  ;;  %v237_v37 = vld [vmem:[%s2326_s10 + $0x1e0] sm:$0xff] }
  0xb8   : > { %815 = vmatprep.mubr.f32.mxu0 %v421_v38  ;;  %1040 = vmatprep.mubr.f32.mxu1 %v423_v39  ;;  %v245_v38 = vld [vmem:[%s2326_s10 + $0x220] sm:$0xff]  ;;  %v247_v39 = vld [vmem:[%s2326_s10 + $0x230] sm:$0xff] }
  0xb9   : > { %816 = vmatmul.mubr.f32.gmra.mxu0 %v420_v40  ;;  %1041 = vmatmul.mubr.f32.gmra.mxu1 %v422_v41  ;;  %v602_v40 = vld [vmem:[%s3236_s1 + $0x448] sm:$0xff]  ;;  %v244_v41 = vld [vmem:[%s2326_s10 + $0x218] sm:$0xff] }
  0xba   : > { %1120 = vmatprep.subr.mxu0 %v2051_v2  ;;  %1345 = vmatprep.subr.mxu1 %v2051_v2 }
  0xbb   : > { %1121 = vmatpush2.msra.mxu0 %v549_v42  ;;  %1346 = vmatpush2.msra.mxu1 %v581_v43  ;;  %v246_v42 = vld [vmem:[%s2326_s10 + $0x228] sm:$0xff] }
  0xbc   : > { %820 = vmatprep.mubr.f32.mxu0 %v430_v44  ;;  %1045 = vmatprep.mubr.f32.mxu1 %v432_v45  ;;  %v254_v43 = vld [vmem:[%s2326_s10 + $0x268] sm:$0xff]  ;;  %v256_v44 = vld [vmem:[%s2326_s10 + $0x278] sm:$0xff]  ;;  %v601_v45 = vld [vmem:[%s3236_s1 + $0x440] sm:$0xff] }
  0xbd   : > { %821 = vmatmul.mubr.f32.gmra.mxu0 %v429_v46  ;;  %1046 = vmatmul.mubr.f32.gmra.mxu1 %v431_v47  ;;  %v253_v46 = vld [vmem:[%s2326_s10 + $0x260] sm:$0xff]  ;;  %v255_v47 = vld [vmem:[%s2326_s10 + $0x270] sm:$0xff] }
  0xbe   : > { %1122 = vmatprep.subr.mxu0 %v2051_v2  ;;  %1347 = vmatprep.subr.mxu1 %v2051_v2 }
  0xbf   : > { %1123 = vmatpush2.msra.mxu0 %v548_v48  ;;  %1348 = vmatpush2.msra.mxu1 %v580_v49  ;;  %v263_v48 = vld [vmem:[%s2326_s10 + $0x2b0] sm:$0xff]  ;;  %v265_v49 = vld [vmem:[%s2326_s10 + $0x2c0] sm:$0xff] }
  0xc0   : > { %825 = vmatprep.mubr.f32.mxu0 %v439_v50  ;;  %1050 = vmatprep.mubr.f32.mxu1 %v441_v51  ;;  %v600_v50 = vld [vmem:[%s3236_s1 + $0x438] sm:$0xff]  ;;  %v262_v51 = vld [vmem:[%s2326_s10 + $0x2a8] sm:$0xff] }
  0xc1   : > { %826 = vmatmul.mubr.f32.gmra.mxu0 %v438_v52  ;;  %1051 = vmatmul.mubr.f32.gmra.mxu1 %v440_v53  ;;  %v264_v52 = vld [vmem:[%s2326_s10 + $0x2b8] sm:$0xff] }
  0xc2   : > { %1124 = vmatprep.subr.mxu0 %v2051_v2  ;;  %1349 = vmatprep.subr.mxu1 %v2051_v2  ;;  %v272_v53 = vld [vmem:[%s2326_s10 + $0x2f8] sm:$0xff] }
  0xc3   : > { %1125 = vmatpush2.msra.mxu0 %v547_v54  ;;  %1350 = vmatpush2.msra.mxu1 %v579_v55  ;;  %v274_v54 = vld [vmem:[%s2326_s10 + $0x308] sm:$0xff]  ;;  %v599_v55 = vld [vmem:[%s3236_s1 + $0x430] sm:$0xff] }
  0xc4   : > { %830 = vmatprep.mubr.f32.mxu0 %v448_v56  ;;  %1055 = vmatprep.mubr.f32.mxu1 %v450_v57  ;;  %v271_v56 = vld [vmem:[%s2326_s10 + $0x2f0] sm:$0xff]  ;;  %v273_v57 = vld [vmem:[%s2326_s10 + $0x300] sm:$0xff] }
  0xc5   : > { %831 = vmatmul.mubr.f32.gmra.mxu0 %v447_v58  ;;  %1056 = vmatmul.mubr.f32.gmra.mxu1 %v449_v59  ;;  %v281_v58 = vld [vmem:[%s2326_s10 + $0x340] sm:$0xff]  ;;  %v283_v59 = vld [vmem:[%s2326_s10 + $0x350] sm:$0xff] }
  0xc6   : > { %1126 = vmatprep.subr.mxu0 %v2051_v2  ;;  %1351 = vmatprep.subr.mxu1 %v2051_v2 }
  0xc7   : > { %1127 = vmatpush2.msra.mxu0 %v546_v60  ;;  %1352 = vmatpush2.msra.mxu1 %v578_v61  ;;  %v598_v60 = vld [vmem:[%s3236_s1 + $0x428] sm:$0xff]  ;;  %v280_v61 = vld [vmem:[%s2326_s10 + $0x338] sm:$0xff] }
  0xc8   : > { %835 = vmatprep.mubr.f32.mxu0 %v457_v62  ;;  %1060 = vmatprep.mubr.f32.mxu1 %v459_v63  ;;  %v282_v62 = vld [vmem:[%s2326_s10 + $0x348] sm:$0xff] }
  0xc9   : > { %836 = vmatmul.mubr.f32.gmra.mxu0 %v456_v0  ;;  %1061 = vmatmul.mubr.f32.gmra.mxu1 %v458_v1  ;;  %v290_v63 = vld [vmem:[%s2326_s10 + $0x388] sm:$0xff]  ;;  %v292_v0 = vld [vmem:[%s2326_s10 + $0x398] sm:$0xff]  ;;  %v597_v1 = vld [vmem:[%s3236_s1 + $0x420] sm:$0xff] }
  0xca   : > { %1128 = vmatprep.subr.mxu0 %v2051_v2  ;;  %1353 = vmatprep.subr.mxu1 %v2051_v2  ;;  %v190_v2 = vld [vmem:[%s2326_s10 + $0x68] sm:$0xff] }
  0xcb   : > { %1129 = vmatpush2.msra.mxu0 %v545_v3  ;;  %1354 = vmatpush2.msra.mxu1 %v577_v4  ;;  %v289_v3 = vld [vmem:[%s2326_s10 + $0x380] sm:$0xff]  ;;  %v291_v4 = vld [vmem:[%s2326_s10 + $0x390] sm:$0xff] }
  0xcc   : > { %1130 = vmatprep.mubr.f32.mxu0 %v182_v5  ;;  %1355 = vmatprep.mubr.f32.mxu1 %v184_v6  ;;  %v299_v5 = vld [vmem:[%s2326_s10 + $0x3d0] sm:$0xff]  ;;  %v301_v6 = vld [vmem:[%s2326_s10 + $0x3e0] sm:$0xff] }
  0xcd   : > { %1131 = vmatmul.mubr.f32.vlgmr.msra.gmra.mxu0 %v181_v7  ;;  %1356 = vmatmul.mubr.f32.vlgmr.msra.gmra.mxu1 %v183_v8  ;;  %v596_v7 = vld [vmem:[%s3236_s1 + $0x418] sm:$0xff]  ;;  %v298_v8 = vld [vmem:[%s2326_s10 + $0x3c8] sm:$0xff] }
  0xce   : > { %1921 = vmatprep.subr.mxu0 %v608_v9  ;;  %2001 = vmatprep.subr.mxu1 %v608_v9 }
  0xcf   : > { %1922 = vmatpush3.msra.mxu0 %v608_v9  ;;  %2017 = vmatpush3.msra.mxu1 %v608_v9  ;;  %v300_v9 = vld [vmem:[%s2326_s10 + $0x3d8] sm:$0xff] }
  0xd0   : > { %1135 = vmatprep.mubr.f32.mxu0 %v191_v10  ;;  %1360 = vmatprep.mubr.f32.mxu1 %v193_v11  ;;  %v308_v10 = vld [vmem:[%s2326_s10 + $0x418] sm:$0xff]  ;;  %v310_v11 = vld [vmem:[%s2326_s10 + $0x428] sm:$0xff] }
  0xd1   : > { %1136 = vmatmul.mubr.f32.gmra.mxu0 %v190_v2  ;;  %1361 = vmatmul.mubr.f32.gmra.mxu1 %v192_v12  ;;  %v595_v2 = vld [vmem:[%s3236_s1 + $0x410] sm:$0xff] }
  0xd2   : > { %1140 = vmatprep.mubr.f32.mxu0 %v200_v13  ;;  %1365 = vmatprep.mubr.f32.mxu1 %v202_v14  ;;  %v307_v12 = vld [vmem:[%s2326_s10 + $0x410] sm:$0xff]  ;;  %v309_v13 = vld [vmem:[%s2326_s10 + $0x420] sm:$0xff] }
  0xd3   : > { %1923 = vmatprep.subr.mxu0 %v607_v15  ;;  %2002 = vmatprep.subr.mxu1 %v607_v15  ;;  %v317_v14 = vld [vmem:[%s2326_s10 + $0x460] sm:$0xff] }
  0xd4   : > { %1924 = vmatpush3.msra.mxu0 %v607_v15  ;;  %2018 = vmatpush3.msra.mxu1 %v607_v15  ;;  %v319_v15 = vld [vmem:[%s2326_s10 + $0x470] sm:$0xff] }
  0xd5   : > { %1141 = vmatmul.mubr.f32.gmra.mxu0 %v199_v16  ;;  %1366 = vmatmul.mubr.f32.gmra.mxu1 %v201_v17  ;;  %v594_v16 = vld [vmem:[%s3236_s1 + $0x408] sm:$0xff]  ;;  %v316_v17 = vld [vmem:[%s2326_s10 + $0x458] sm:$0xff] }
  0xd6   : > { %1145 = vmatprep.mubr.f32.mxu0 %v209_v18  ;;  %1370 = vmatprep.mubr.f32.mxu1 %v211_v19  ;;  %v318_v18 = vld [vmem:[%s2326_s10 + $0x468] sm:$0xff] }
  0xd7   : > { %1925 = vmatprep.subr.mxu0 %v606_v20  ;;  %2003 = vmatprep.subr.mxu1 %v606_v20  ;;  %v326_v19 = vld [vmem:[%s2326_s10 + $0x4a8] sm:$0xff] }
  0xd8   : > { %1926 = vmatpush3.msra.mxu0 %v606_v20  ;;  %2019 = vmatpush3.msra.mxu1 %v606_v20  ;;  %v328_v20 = vld [vmem:[%s2326_s10 + $0x4b8] sm:$0xff] }
  0xd9   : > { %1146 = vmatmul.mubr.f32.gmra.mxu0 %v208_v21  ;;  %1371 = vmatmul.mubr.f32.gmra.mxu1 %v210_v22  ;;  %v593_v21 = vld [vmem:[%s3236_s1 + $0x400] sm:$0xff] }
  0xda   : > { %1150 = vmatprep.mubr.f32.mxu0 %v218_v23  ;;  %1375 = vmatprep.mubr.f32.mxu1 %v220_v24  ;;  %v325_v22 = vld [vmem:[%s2326_s10 + $0x4a0] sm:$0xff]  ;;  %v327_v23 = vld [vmem:[%s2326_s10 + $0x4b0] sm:$0xff] }
  0xdb   : > { %1927 = vmatprep.subr.mxu0 %v605_v25  ;;  %2004 = vmatprep.subr.mxu1 %v605_v25  ;;  %v2849_v24 = vld [vmem:[%s3237_s2] ss:$0 sm:$0xff] }
  0xdc   : > { %1928 = vmatpush3.msra.mxu0 %v605_v25  ;;  %2020 = vmatpush3.msra.mxu1 %v605_v25  ;;  %v335_v25 = vld [vmem:[%s2326_s10 + $0x4f0] sm:$0xff] }
  0xdd   : > { %1151 = vmatmul.mubr.f32.gmra.mxu0 %v217_v26  ;;  %1376 = vmatmul.mubr.f32.gmra.mxu1 %v219_v27  ;;  %v337_v26 = vld [vmem:[%s2326_s10 + $0x500] sm:$0xff] }
  0xde   : > { %1155 = vmatprep.mubr.f32.mxu0 %v227_v28  ;;  %1380 = vmatprep.mubr.f32.mxu1 %v229_v29 }
  0xdf   : > { %1929 = vmatprep.subr.mxu0 %v604_v30  ;;  %2005 = vmatprep.subr.mxu1 %v604_v30 }
  0xe0   : > { %1930 = vmatpush3.msra.mxu0 %v604_v30  ;;  %2021 = vmatpush3.msra.mxu1 %v604_v30  ;;  %v334_v30 = vld [vmem:[%s2326_s10 + $0x4e8] sm:$0xff] }
  0xe1   : > { %1156 = vmatmul.mubr.f32.gmra.mxu0 %v226_v31  ;;  %1381 = vmatmul.mubr.f32.gmra.mxu1 %v228_v32  ;;  %v336_v31 = vld [vmem:[%s2326_s10 + $0x4f8] sm:$0xff] }
  0xe2   : > { %1160 = vmatprep.mubr.f32.mxu0 %v236_v33  ;;  %1385 = vmatprep.mubr.f32.mxu1 %v238_v34  ;;  %v344_v34 = vld [vmem:[%s2326_s10 + $0x538] sm:$0xff] }
  0xe3   : > { %1931 = vmatprep.subr.mxu0 %v603_v35  ;;  %2006 = vmatprep.subr.mxu1 %v603_v35 }
  0xe4   : > { %1932 = vmatpush3.msra.mxu0 %v603_v35  ;;  %2022 = vmatpush3.msra.mxu1 %v603_v35  ;;  %v346_v35 = vld [vmem:[%s2326_s10 + $0x548] sm:$0xff] }
  0xe5   : > { %1161 = vmatmul.mubr.f32.gmra.mxu0 %v235_v36  ;;  %1386 = vmatmul.mubr.f32.gmra.mxu1 %v237_v37 }
  0xe6   : > { %1165 = vmatprep.mubr.f32.mxu0 %v245_v38  ;;  %1390 = vmatprep.mubr.f32.mxu1 %v247_v39 }
  0xe7   : > { %1933 = vmatprep.subr.mxu0 %v602_v40  ;;  %2007 = vmatprep.subr.mxu1 %v602_v40 }
  0xe8   : > { %1934 = vmatpush3.msra.mxu0 %v602_v40  ;;  %2023 = vmatpush3.msra.mxu1 %v602_v40  ;;  %v343_v40 = vld [vmem:[%s2326_s10 + $0x530] sm:$0xff] }
  0xe9   : > { %1166 = vmatmul.mubr.f32.gmra.mxu0 %v244_v41  ;;  %1391 = vmatmul.mubr.f32.gmra.mxu1 %v246_v42  ;;  %v345_v41 = vld [vmem:[%s2326_s10 + $0x540] sm:$0xff] }
  0xea   : > { %1170 = vmatprep.mubr.f32.mxu0 %v254_v43  ;;  %1395 = vmatprep.mubr.f32.mxu1 %v256_v44  ;;  %v353_v44 = vld [vmem:[%s2326_s10 + $0x580] sm:$0xff] }
  0xeb   : > { %1935 = vmatprep.subr.mxu0 %v601_v45  ;;  %2008 = vmatprep.subr.mxu1 %v601_v45 }
  0xec   : > { %1936 = vmatpush3.msra.mxu0 %v601_v45  ;;  %2024 = vmatpush3.msra.mxu1 %v601_v45  ;;  %v355_v45 = vld [vmem:[%s2326_s10 + $0x590] sm:$0xff] }
  0xed   : > { %1171 = vmatmul.mubr.f32.gmra.mxu0 %v253_v46  ;;  %1396 = vmatmul.mubr.f32.gmra.mxu1 %v255_v47 }
  0xee   : > { %1175 = vmatprep.mubr.f32.mxu0 %v263_v48  ;;  %1400 = vmatprep.mubr.f32.mxu1 %v265_v49 }
  0xef   : > { %1937 = vmatprep.subr.mxu0 %v600_v50  ;;  %2009 = vmatprep.subr.mxu1 %v600_v50 }
  0xf0   : > { %1938 = vmatpush3.msra.mxu0 %v600_v50  ;;  %2025 = vmatpush3.msra.mxu1 %v600_v50  ;;  %v352_v50 = vld [vmem:[%s2326_s10 + $0x578] sm:$0xff] }
  0xf1   : > { %1176 = vmatmul.mubr.f32.gmra.mxu0 %v262_v51  ;;  %1401 = vmatmul.mubr.f32.gmra.mxu1 %v264_v52  ;;  %v354_v51 = vld [vmem:[%s2326_s10 + $0x588] sm:$0xff] }
  0xf2   : > { %1180 = vmatprep.mubr.f32.mxu0 %v272_v53  ;;  %1405 = vmatprep.mubr.f32.mxu1 %v274_v54  ;;  %v362_v54 = vld [vmem:[%s2326_s10 + $0x5c8] sm:$0xff] }
  0xf3   : > { %1939 = vmatprep.subr.mxu0 %v599_v55  ;;  %2010 = vmatprep.subr.mxu1 %v599_v55 }
  0xf4   : > { %1940 = vmatpush3.msra.mxu0 %v599_v55  ;;  %2026 = vmatpush3.msra.mxu1 %v599_v55  ;;  %v364_v55 = vld [vmem:[%s2326_s10 + $0x5d8] sm:$0xff] }
  0xf5   : > { %1181 = vmatmul.mubr.f32.gmra.mxu0 %v271_v56  ;;  %1406 = vmatmul.mubr.f32.gmra.mxu1 %v273_v57 }
  0xf6   : > { %1185 = vmatprep.mubr.f32.mxu0 %v281_v58  ;;  %1410 = vmatprep.mubr.f32.mxu1 %v283_v59 }
  0xf7   : > { %1941 = vmatprep.subr.mxu0 %v598_v60  ;;  %2011 = vmatprep.subr.mxu1 %v598_v60 }
  0xf8   : > { %1942 = vmatpush3.msra.mxu0 %v598_v60  ;;  %2027 = vmatpush3.msra.mxu1 %v598_v60  ;;  %v361_v60 = vld [vmem:[%s2326_s10 + $0x5c0] sm:$0xff] }
  0xf9   : > { %1186 = vmatmul.mubr.f32.gmra.mxu0 %v280_v61  ;;  %1411 = vmatmul.mubr.f32.gmra.mxu1 %v282_v62  ;;  %v363_v61 = vld [vmem:[%s2326_s10 + $0x5d0] sm:$0xff] }
  0xfa   : > { %1190 = vmatprep.mubr.f32.mxu0 %v290_v63  ;;  %1415 = vmatprep.mubr.f32.mxu1 %v292_v0  ;;  %v371_v0 = vld [vmem:[%s2326_s10 + $0x610] sm:$0xff] }
  0xfb   : > { %1943 = vmatprep.subr.mxu0 %v597_v1  ;;  %2012 = vmatprep.subr.mxu1 %v597_v1 }
  0xfc   : > { %1944 = vmatpush3.msra.mxu0 %v597_v1  ;;  %2028 = vmatpush3.msra.mxu1 %v597_v1  ;;  %v373_v1 = vld [vmem:[%s2326_s10 + $0x620] sm:$0xff] }
  0xfd   : > { %1191 = vmatmul.mubr.f32.gmra.mxu0 %v289_v3  ;;  %1416 = vmatmul.mubr.f32.gmra.mxu1 %v291_v4 }
  0xfe   : > { %1195 = vmatprep.mubr.f32.mxu0 %v299_v5  ;;  %1420 = vmatprep.mubr.f32.mxu1 %v301_v6 }
  0xff   : > { %1945 = vmatprep.subr.mxu0 %v596_v7  ;;  %2013 = vmatprep.subr.mxu1 %v596_v7 }
 0x100   : > { %1946 = vmatpush3.msra.mxu0 %v596_v7  ;;  %2029 = vmatpush3.msra.mxu1 %v596_v7  ;;  %v370_v7 = vld [vmem:[%s2326_s10 + $0x608] sm:$0xff] }
 0x101   : > { %1196 = vmatmul.mubr.f32.gmra.mxu0 %v298_v8  ;;  %1421 = vmatmul.mubr.f32.gmra.mxu1 %v300_v9  ;;  %v372_v8 = vld [vmem:[%s2326_s10 + $0x618] sm:$0xff] }
 0x102   : > { %1200 = vmatprep.mubr.f32.mxu0 %v308_v10  ;;  %1425 = vmatprep.mubr.f32.mxu1 %v310_v11  ;;  %v380_v11 = vld [vmem:[%s2326_s10 + $0x658] sm:$0xff] }
 0x103   : > { %1947 = vmatprep.subr.mxu0 %v595_v2  ;;  %2014 = vmatprep.subr.mxu1 %v595_v2 }
 0x104   : > { %1948 = vmatpush3.msra.mxu0 %v595_v2  ;;  %2030 = vmatpush3.msra.mxu1 %v595_v2  ;;  %v382_v2 = vld [vmem:[%s2326_s10 + $0x668] sm:$0xff] }
 0x105   : > { %1201 = vmatmul.mubr.f32.gmra.mxu0 %v307_v12  ;;  %1426 = vmatmul.mubr.f32.gmra.mxu1 %v309_v13 }
 0x106   : > { %1205 = vmatprep.mubr.f32.mxu0 %v317_v14  ;;  %1430 = vmatprep.mubr.f32.mxu1 %v319_v15 }
 0x107   : > { %1949 = vmatprep.subr.mxu0 %v594_v16  ;;  %2015 = vmatprep.subr.mxu1 %v594_v16 }
 0x108   : > { %1950 = vmatpush3.msra.mxu0 %v594_v16  ;;  %2031 = vmatpush3.msra.mxu1 %v594_v16  ;;  %v379_v16 = vld [vmem:[%s2326_s10 + $0x650] sm:$0xff] }
 0x109   : > { %1206 = vmatmul.mubr.f32.gmra.mxu0 %v316_v17  ;;  %1431 = vmatmul.mubr.f32.gmra.mxu1 %v318_v18  ;;  %v381_v17 = vld [vmem:[%s2326_s10 + $0x660] sm:$0xff] }
 0x10a   : > { %1210 = vmatprep.mubr.f32.mxu0 %v326_v19  ;;  %1435 = vmatprep.mubr.f32.mxu1 %v328_v20  ;;  %v389_v20 = vld [vmem:[%s2326_s10 + $0x6a0] sm:$0xff] }
 0x10b   : > { %1951 = vmatprep.subr.mxu0 %v593_v21  ;;  %2016 = vmatprep.subr.mxu1 %v593_v21 }
 0x10c   : > { %1952 = vmatpush3.msra.mxu0 %v593_v21  ;;  %2032 = vmatpush3.msra.mxu1 %v593_v21  ;;  %v391_v21 = vld [vmem:[%s2326_s10 + $0x6b0] sm:$0xff] }
 0x10d   : > { %v682_v27 = vpop.f32.mrf.mxu0  ;;  %v907_v28 = vpop.f32.mrf.mxu1  ;;  %1211 = vmatmul.mubr.f32.gmra.mxu0 %v325_v22  ;;  %1436 = vmatmul.mubr.f32.gmra.mxu1 %v327_v23 }
 0x10e   : > { %v683_v29 = vadd.f32 %v2849_v24, %v682_v27  ;;  %1215 = vmatprep.mubr.f32.mxu0 %v335_v25  ;;  %1440 = vmatprep.mubr.f32.mxu1 %v337_v26  ;;  %v388_v27 = vld [vmem:[%s2326_s10 + $0x698] sm:$0xff] }
 0x10f   : > { %v684_v32 = vpop.f32.mrf.mxu0  ;;  %v909_v33 = vpop.f32.mrf.mxu1 }
 0x110   : > { %v2858_v36 = vadd.f32 %v907_v28, %v683_v29  ;;  %v390_v28 = vld [vmem:[%s2326_s10 + $0x6a8] sm:$0xff]  ;;  %v400_v32 = vld [vmem:[%s2326_s10 + $0x6f8] sm:$0xff] }
 0x111   : > { %v687_v37 = vpop.f32.mrf.mxu0  ;;  %v912_v38 = vpop.f32.mrf.mxu1  ;;  %1216 = vmatmul.mubr.f32.gmra.mxu0 %v334_v30  ;;  %1441 = vmatmul.mubr.f32.gmra.mxu1 %v336_v31  ;;  %v398_v31 = vld [vmem:[%s2326_s10 + $0x6e8] sm:$0xff] }
 0x112   : > { %v688_v39 = vadd.f32 %v2849_v24, %v687_v37  ;;  %1220 = vmatprep.mubr.f32.mxu0 %v344_v34  ;;  %1445 = vmatprep.mubr.f32.mxu1 %v346_v35 }
 0x113   : > { %v689_v42 = vpop.f32.mrf.mxu0  ;;  %v914_v43 = vpop.f32.mrf.mxu1 }
 0x114   : > { %v2865_v46 = vadd.f32 %v912_v38, %v688_v39  ;;  %v397_v38 = vld [vmem:[%s2326_s10 + $0x6e0] sm:$0xff]  ;;  %v399_v39 = vld [vmem:[%s2326_s10 + $0x6f0] sm:$0xff] }
 0x115   : > { %v692_v47 = vpop.f32.mrf.mxu0  ;;  %v917_v48 = vpop.f32.mrf.mxu1  ;;  %1221 = vmatmul.mubr.f32.gmra.mxu0 %v343_v40  ;;  %1446 = vmatmul.mubr.f32.gmra.mxu1 %v345_v41  ;;  %v407_v42 = vld [vmem:[%s2326_s10 + $0x730] sm:$0xff]  ;;  %v409_v43 = vld [vmem:[%s2326_s10 + $0x740] sm:$0xff] }
 0x116   : > { %v693_v49 = vadd.f32 %v2849_v24, %v692_v47  ;;  %1225 = vmatprep.mubr.f32.mxu0 %v353_v44  ;;  %1450 = vmatprep.mubr.f32.mxu1 %v355_v45 }
 0x117   : > { %v694_v52 = vpop.f32.mrf.mxu0  ;;  %v919_v53 = vpop.f32.mrf.mxu1 }
 0x118   : > { %v2872_v56 = vadd.f32 %v917_v48, %v693_v49  ;;  %v406_v49 = vld [vmem:[%s2326_s10 + $0x728] sm:$0xff]  ;;  %v416_v53 = vld [vmem:[%s2326_s10 + $0x778] sm:$0xff] }
 0x119   : > { %v697_v57 = vpop.f32.mrf.mxu0  ;;  %v922_v58 = vpop.f32.mrf.mxu1  ;;  %1226 = vmatmul.mubr.f32.gmra.mxu0 %v352_v50  ;;  %1451 = vmatmul.mubr.f32.gmra.mxu1 %v354_v51  ;;  %v408_v50 = vld [vmem:[%s2326_s10 + $0x738] sm:$0xff] }
 0x11a   : > { %v698_v59 = vadd.f32 %v2849_v24, %v697_v57  ;;  %1230 = vmatprep.mubr.f32.mxu0 %v362_v54  ;;  %1455 = vmatprep.mubr.f32.mxu1 %v364_v55  ;;  %v418_v54 = vld [vmem:[%s2326_s10 + $0x788] sm:$0xff] }
 0x11b   : > { %v699_v62 = vpop.f32.mrf.mxu0  ;;  %v924_v63 = vpop.f32.mrf.mxu1 }
 0x11c   : > { %v2879_v3 = vadd.f32 %v922_v58, %v698_v59 }
 0x11d   : > { %v702_v4 = vpop.f32.mrf.mxu0  ;;  %v927_v5 = vpop.f32.mrf.mxu1  ;;  %1231 = vmatmul.mubr.f32.gmra.mxu0 %v361_v60  ;;  %1456 = vmatmul.mubr.f32.gmra.mxu1 %v363_v61  ;;  %v415_v60 = vld [vmem:[%s2326_s10 + $0x770] sm:$0xff]  ;;  %v417_v61 = vld [vmem:[%s2326_s10 + $0x780] sm:$0xff] }
 0x11e   : > { %v703_v6 = vadd.f32 %v2849_v24, %v702_v4  ;;  %1235 = vmatprep.mubr.f32.mxu0 %v371_v0  ;;  %1460 = vmatprep.mubr.f32.mxu1 %v373_v1  ;;  %v425_v0 = vld [vmem:[%s2326_s10 + $0x7c0] sm:$0xff]  ;;  %v427_v1 = vld [vmem:[%s2326_s10 + $0x7d0] sm:$0xff] }
 0x11f   : > { %v704_v9 = vpop.f32.mrf.mxu0  ;;  %v929_v10 = vpop.f32.mrf.mxu1 }
 0x120   : > { %v2886_v12 = vadd.f32 %v927_v5, %v703_v6  ;;  %v426_v9 = vld [vmem:[%s2326_s10 + $0x7c8] sm:$0xff] }
 0x121   : > { %v707_v13 = vpop.f32.mrf.mxu0  ;;  %v932_v14 = vpop.f32.mrf.mxu1  ;;  %1236 = vmatmul.mubr.f32.gmra.mxu0 %v370_v7  ;;  %1461 = vmatmul.mubr.f32.gmra.mxu1 %v372_v8  ;;  %v424_v8 = vld [vmem:[%s2326_s10 + $0x7b8] sm:$0xff] }
 0x122   : > { %v708_v15 = vadd.f32 %v2849_v24, %v707_v13  ;;  %1240 = vmatprep.mubr.f32.mxu0 %v380_v11  ;;  %1465 = vmatprep.mubr.f32.mxu1 %v382_v2  ;;  %v434_v2 = vld [vmem:[%s2326_s10 + $0x808] sm:$0xff]  ;;  %v436_v13 = vld [vmem:[%s2326_s10 + $0x818] sm:$0xff] }
 0x123   : > { %v709_v18 = vpop.f32.mrf.mxu0  ;;  %v934_v19 = vpop.f32.mrf.mxu1 }
 0x124   : > { %v2893_v22 = vadd.f32 %v932_v14, %v708_v15  ;;  %v433_v18 = vld [vmem:[%s2326_s10 + $0x800] sm:$0xff]  ;;  %v435_v19 = vld [vmem:[%s2326_s10 + $0x810] sm:$0xff] }
 0x125   : > { %v712_v23 = vpop.f32.mrf.mxu0  ;;  %v937_v25 = vpop.f32.mrf.mxu1  ;;  %1241 = vmatmul.mubr.f32.gmra.mxu0 %v379_v16  ;;  %1466 = vmatmul.mubr.f32.gmra.mxu1 %v381_v17 }
 0x126   : > { %v713_v26 = vadd.f32 %v2849_v24, %v712_v23  ;;  %1245 = vmatprep.mubr.f32.mxu0 %v389_v20  ;;  %1470 = vmatprep.mubr.f32.mxu1 %v391_v21  ;;  %v443_v23 = vld [vmem:[%s2326_s10 + $0x850] sm:$0xff] }
 0x127   : > { %v714_v29 = vpop.f32.mrf.mxu0  ;;  %v939_v30 = vpop.f32.mrf.mxu1 }
 0x128   : > { %v2900_v33 = vadd.f32 %v937_v25, %v713_v26  ;;  %v445_v25 = vld [vmem:[%s2326_s10 + $0x860] sm:$0xff]  ;;  %v442_v30 = vld [vmem:[%s2326_s10 + $0x848] sm:$0xff] }
 0x129   : > { %v717_v34 = vpop.f32.mrf.mxu0  ;;  %v942_v35 = vpop.f32.mrf.mxu1  ;;  %1246 = vmatmul.mubr.f32.gmra.mxu0 %v388_v27  ;;  %1471 = vmatmul.mubr.f32.gmra.mxu1 %v390_v28 }
 0x12a   : > { %v718_v37 = vadd.f32 %v2849_v24, %v717_v34  ;;  %1250 = vmatprep.mubr.f32.mxu0 %v398_v31  ;;  %1475 = vmatprep.mubr.f32.mxu1 %v400_v32  ;;  %v444_v31 = vld [vmem:[%s2326_s10 + $0x858] sm:$0xff] }
 0x12b   : > { %v719_v40 = vpop.f32.mrf.mxu0  ;;  %v944_v41 = vpop.f32.mrf.mxu1 }
 0x12c   : > { %v2907_v44 = vadd.f32 %v942_v35, %v718_v37  ;;  %v452_v35 = vld [vmem:[%s2326_s10 + $0x898] sm:$0xff]  ;;  %v454_v37 = vld [vmem:[%s2326_s10 + $0x8a8] sm:$0xff] }
 0x12d   : > { %v722_v45 = vpop.f32.mrf.mxu0  ;;  %v947_v47 = vpop.f32.mrf.mxu1  ;;  %1251 = vmatmul.mubr.f32.gmra.mxu0 %v397_v38  ;;  %1476 = vmatmul.mubr.f32.gmra.mxu1 %v399_v39 }
 0x12e   : > { %v723_v48 = vadd.f32 %v2849_v24, %v722_v45  ;;  %1255 = vmatprep.mubr.f32.mxu0 %v407_v42  ;;  %1480 = vmatprep.mubr.f32.mxu1 %v409_v43  ;;  %v451_v42 = vld [vmem:[%s2326_s10 + $0x890] sm:$0xff]  ;;  %v453_v43 = vld [vmem:[%s2326_s10 + $0x8a0] sm:$0xff] }
 0x12f   : > { %v724_v51 = vpop.f32.mrf.mxu0  ;;  %v949_v52 = vpop.f32.mrf.mxu1 }
 0x130   : > { %v2914_v55 = vadd.f32 %v947_v47, %v723_v48  ;;  %v461_v48 = vld [vmem:[%s2326_s10 + $0x8e0] sm:$0xff] }
 0x131   : > { %v727_v57 = vpop.f32.mrf.mxu0  ;;  %v952_v58 = vpop.f32.mrf.mxu1  ;;  %1256 = vmatmul.mubr.f32.gmra.mxu0 %v406_v49  ;;  %1481 = vmatmul.mubr.f32.gmra.mxu1 %v408_v50  ;;  %v463_v49 = vld [vmem:[%s2326_s10 + $0x8f0] sm:$0xff] }
 0x132   : > { %v728_v59 = vadd.f32 %v2849_v24, %v727_v57  ;;  %1260 = vmatprep.mubr.f32.mxu0 %v416_v53  ;;  %1485 = vmatprep.mubr.f32.mxu1 %v418_v54  ;;  %v460_v54 = vld [vmem:[%s2326_s10 + $0x8d8] sm:$0xff]  ;;  %v462_v57 = vld [vmem:[%s2326_s10 + $0x8e8] sm:$0xff] }
 0x133   : > { %v729_v62 = vpop.f32.mrf.mxu0  ;;  %v954_v63 = vpop.f32.mrf.mxu1 }
 0x134   : > { %v2921_v4 = vadd.f32 %v952_v58, %v728_v59 }
 0x135   : > { %v732_v5 = vpop.f32.mrf.mxu0  ;;  %v957_v6 = vpop.f32.mrf.mxu1  ;;  %1261 = vmatmul.mubr.f32.gmra.mxu0 %v415_v60  ;;  %1486 = vmatmul.mubr.f32.gmra.mxu1 %v417_v61  ;;  %v185_v60 = vld [vmem:[%s2326_s10 + $0x40] sm:$0xff] }
 0x136   : > { %v733_v7 = vadd.f32 %v2849_v24, %v732_v5  ;;  %1265 = vmatprep.mubr.f32.mxu0 %v425_v0  ;;  %1490 = vmatprep.mubr.f32.mxu1 %v427_v1  ;;  %v329_v61 = vld [vmem:[%s2326_s10 + $0x4c0] sm:$0xff]  ;;  %v194_v5 = vld [vmem:[%s2326_s10 + $0x88] sm:$0xff] }
 0x137   : > { %v734_v10 = vpop.f32.mrf.mxu0  ;;  %v959_v11 = vpop.f32.mrf.mxu1 }
 0x138   : > { %v2928_v14 = vadd.f32 %v957_v6, %v733_v7  ;;  %v338_v6 = vld [vmem:[%s2326_s10 + $0x508] sm:$0xff]  ;;  %v347_v10 = vld [vmem:[%s2326_s10 + $0x550] sm:$0xff] }
 0x139   : > { %v737_v15 = vpop.f32.mrf.mxu0  ;;  %v962_v16 = vpop.f32.mrf.mxu1  ;;  %1266 = vmatmul.mubr.f32.gmra.mxu0 %v424_v8  ;;  %1491 = vmatmul.mubr.f32.gmra.mxu1 %v426_v9  ;;  %v203_v9 = vld [vmem:[%s2326_s10 + $0xd0] sm:$0xff] }
 0x13a   : > { %v738_v17 = vadd.f32 %v2849_v24, %v737_v15  ;;  %1270 = vmatprep.mubr.f32.mxu0 %v434_v2  ;;  %1495 = vmatprep.mubr.f32.mxu1 %v436_v13 }
 0x13b   : > { %v739_v20 = vpop.f32.mrf.mxu0  ;;  %v964_v21 = vpop.f32.mrf.mxu1 }
 0x13c   : > { %v2935_v26 = vadd.f32 %v962_v16, %v738_v17  ;;  %v212_v16 = vld [vmem:[%s2326_s10 + $0x118] sm:$0xff]  ;;  %v221_v20 = vld [vmem:[%s2326_s10 + $0x160] sm:$0xff] }
 0x13d   : > { %v742_v27 = vpop.f32.mrf.mxu0  ;;  %v967_v28 = vpop.f32.mrf.mxu1  ;;  %1271 = vmatmul.mubr.f32.gmra.mxu0 %v433_v18  ;;  %1496 = vmatmul.mubr.f32.gmra.mxu1 %v435_v19  ;;  %v356_v17 = vld [vmem:[%s2326_s10 + $0x598] sm:$0xff]  ;;  %v365_v21 = vld [vmem:[%s2326_s10 + $0x5e0] sm:$0xff] }
 0x13e   : > { %v743_v29 = vadd.f32 %v2849_v24, %v742_v27  ;;  %1275 = vmatprep.mubr.f32.mxu0 %v443_v23  ;;  %1500 = vmatprep.mubr.f32.mxu1 %v445_v25 }
 0x13f   : > { %v744_v32 = vpop.f32.mrf.mxu0  ;;  %v969_v34 = vpop.f32.mrf.mxu1 }
 0x140   : > { %v2942_v38 = vadd.f32 %v967_v28, %v743_v29  ;;  %v230_v29 = vld [vmem:[%s2326_s10 + $0x1a8] sm:$0xff]  ;;  %v239_v34 = vld [vmem:[%s2326_s10 + $0x1f0] sm:$0xff] }
 0x141   : > { %v747_v39 = vpop.f32.mrf.mxu0  ;;  %v972_v40 = vpop.f32.mrf.mxu1  ;;  %1276 = vmatmul.mubr.f32.gmra.mxu0 %v442_v30  ;;  %1501 = vmatmul.mubr.f32.gmra.mxu1 %v444_v31  ;;  %v374_v30 = vld [vmem:[%s2326_s10 + $0x628] sm:$0xff] }
 0x142   : > { %v748_v41 = vadd.f32 %v2849_v24, %v747_v39  ;;  %1280 = vmatprep.mubr.f32.mxu0 %v452_v35  ;;  %1505 = vmatprep.mubr.f32.mxu1 %v454_v37  ;;  %v383_v35 = vld [vmem:[%s2326_s10 + $0x670] sm:$0xff] }
 0x143   : > { %v749_v45 = vpop.f32.mrf.mxu0  ;;  %v974_v47 = vpop.f32.mrf.mxu1 }
 0x144   : > { %v2949_v50 = vadd.f32 %v972_v40, %v748_v41 }
 0x145   : > { %v752_v51 = vpop.f32.mrf.mxu0  ;;  %v977_v52 = vpop.f32.mrf.mxu1  ;;  %1281 = vmatmul.mubr.f32.gmra.mxu0 %v451_v42  ;;  %1506 = vmatmul.mubr.f32.gmra.mxu1 %v453_v43  ;;  %v248_v42 = vld [vmem:[%s2326_s10 + $0x238] sm:$0xff] }
 0x146   : > { %v753_v53 = vadd.f32 %v2849_v24, %v752_v51  ;;  %1285 = vmatprep.mubr.f32.mxu0 %v461_v48  ;;  %1510 = vmatprep.mubr.f32.mxu1 %v463_v49  ;;  %v392_v43 = vld [vmem:[%s2326_s10 + $0x6b8] sm:$0xff]  ;;  %v257_v48 = vld [vmem:[%s2326_s10 + $0x280] sm:$0xff] }
 0x147   : > { %v754_v58 = vpop.f32.mrf.mxu0  ;;  %v979_v59 = vpop.f32.mrf.mxu1  ;;  %v401_v49 = vld [vmem:[%s2326_s10 + $0x700] sm:$0xff] }
 0x148   : > { %v2956_v62 = vadd.f32 %v977_v52, %v753_v53  ;;  %v410_v58 = vld [vmem:[%s2326_s10 + $0x748] sm:$0xff] }
 0x149   : > { %v757_v63 = vpop.f32.mrf.mxu0  ;;  %v982_v0 = vpop.f32.mrf.mxu1  ;;  %1286 = vmatmul.mubr.f32.gmra.mxu0 %v460_v54  ;;  %1511 = vmatmul.mubr.f32.gmra.mxu1 %v462_v57  ;;  %v266_v57 = vld [vmem:[%s2326_s10 + $0x2c8] sm:$0xff] }
 0x14a   : > { %v758_v1 = vadd.f32 %v2849_v24, %v757_v63  ;;  %1953 = vmatprep.mubr.f32.mxu0 %v185_v60  ;;  %1977 = vmatprep.mubr.f32.mxu1 %v329_v61  ;;  %v275_v61 = vld [vmem:[%s2326_s10 + $0x310] sm:$0xff] }
 0x14b   : > { %v759_v7 = vpop.f32.mrf.mxu0  ;;  %v984_v8 = vpop.f32.mrf.mxu1  ;;  %v419_v63 = vld [vmem:[%s2326_s10 + $0x790] sm:$0xff] }
 0x14c   : > { %v2963_v11 = vadd.f32 %v982_v0, %v758_v1  ;;  %v284_v7 = vld [vmem:[%s2326_s10 + $0x358] sm:$0xff] }
 0x14d   : > { %v762_v2 = vpop.f32.mrf.mxu0  ;;  %v987_v13 = vpop.f32.mrf.mxu1  ;;  %1954 = vmatmul.mubr.f32.vlgmr.msra.gmra.mxu0 %v194_v5  ;;  %1978 = vmatmul.mubr.f32.vlgmr.msra.gmra.mxu1 %v338_v6  ;;  %v428_v8 = vld [vmem:[%s2326_s10 + $0x7d8] sm:$0xff] }
 0x14e   : > { %v763_v15 = vadd.f32 %v2849_v24, %v762_v2  ;;  %1956 = vmatprep.mubr.f32.mxu0 %v203_v9  ;;  %1980 = vmatprep.mubr.f32.mxu1 %v347_v10  ;;  %v293_v2 = vld [vmem:[%s2326_s10 + $0x3a0] sm:$0xff] }
 0x14f   : > { %v764_v18 = vpop.f32.mrf.mxu0  ;;  %v989_v19 = vpop.f32.mrf.mxu1 }
 0x150   : > { %v2970_v23 = vadd.f32 %v987_v13, %v763_v15  ;;  %v437_v13 = vld [vmem:[%s2326_s10 + $0x820] sm:$0xff]  ;;  %v302_v19 = vld [vmem:[%s2326_s10 + $0x3e8] sm:$0xff] }
 0x151   : > { %v767_v25 = vpop.f32.mrf.mxu0  ;;  %v992_v27 = vpop.f32.mrf.mxu1  ;;  %1957 = vmatmul.mubr.f32.gmra.mxu0 %v212_v16  ;;  %1981 = vmatmul.mubr.f32.gmra.mxu1 %v356_v17 }
 0x152   : > { %v768_v28 = vadd.f32 %v2849_v24, %v767_v25  ;;  %1959 = vmatprep.mubr.f32.mxu0 %v221_v20  ;;  %1983 = vmatprep.mubr.f32.mxu1 %v365_v21  ;;  %v446_v20 = vld [vmem:[%s2326_s10 + $0x868] sm:$0xff] }
 0x153   : > { %v769_v31 = vpop.f32.mrf.mxu0  ;;  %v994_v32 = vpop.f32.mrf.mxu1 }
 0x154   : > { %v2977_v37 = vadd.f32 %v992_v27, %v768_v28  ;;  %v311_v27 = vld [vmem:[%s2326_s10 + $0x430] sm:$0xff] }
 0x155   : > { %v772_v39 = vpop.f32.mrf.mxu0  ;;  %v997_v40 = vpop.f32.mrf.mxu1  ;;  %1960 = vmatmul.mubr.f32.gmra.mxu0 %v230_v29  ;;  %1984 = vmatmul.mubr.f32.gmra.mxu1 %v374_v30  ;;  %v455_v28 = vld [vmem:[%s2326_s10 + $0x8b0] sm:$0xff] }
 0x156   : > { %v773_v41 = vadd.f32 %v2849_v24, %v772_v39  ;;  %1962 = vmatprep.mubr.f32.mxu0 %v239_v34  ;;  %1986 = vmatprep.mubr.f32.mxu1 %v383_v35  ;;  %v320_v34 = vld [vmem:[%s2326_s10 + $0x478] sm:$0xff] }
 0x157   : > { %v774_v45 = vpop.f32.mrf.mxu0  ;;  %v999_v47 = vpop.f32.mrf.mxu1  ;;  %v464_v35 = vld [vmem:[%s2326_s10 + $0x8f8] sm:$0xff]  ;;  %s1869_s10 = sshll.u32 %s3258_s4, 3 }
 0x158   : > { %v2984_v51 = vadd.f32 %v997_v40, %v773_v41  ;;  %s3147_s17 = scalar_lea.vmem %s3238_s3, %s1869_s10 }
 0x159   : > { %v777_v52 = vpop.f32.mrf.mxu0  ;;  %v1002_v53 = vpop.f32.mrf.mxu1  ;;  %1963 = vmatmul.mubr.f32.gmra.mxu0 %v248_v42  ;;  %1987 = vmatmul.mubr.f32.gmra.mxu1 %v392_v43 }
 0x15a   : > { %v778_v54 = vadd.f32 %v2849_v24, %v777_v52  ;;  %1965 = vmatprep.mubr.f32.mxu0 %v257_v48  ;;  %1989 = vmatprep.mubr.f32.mxu1 %v401_v49 }
 0x15b   : > { %v779_v59 = vpop.f32.mrf.mxu0  ;;  %v1004_v60 = vpop.f32.mrf.mxu1 }
 0x15c   : > { %v2991_v0 = vadd.f32 %v1002_v53, %v778_v54 }
 0x15d   : > { %v782_v1 = vpop.f32.mrf.mxu0  ;;  %v1007_v5 = vpop.f32.mrf.mxu1  ;;  %1966 = vmatmul.mubr.f32.gmra.mxu0 %v266_v57  ;;  %1990 = vmatmul.mubr.f32.gmra.mxu1 %v410_v58 }
 0x15e   : > { %v783_v6 = vadd.f32 %v2849_v24, %v782_v1  ;;  %1968 = vmatprep.mubr.f32.mxu0 %v275_v61  ;;  %1992 = vmatprep.mubr.f32.mxu1 %v419_v63 }
 0x15f   : > { %v784_v9 = vpop.f32.mrf.mxu0  ;;  %v1009_v10 = vpop.f32.mrf.mxu1 }
 0x160   : > { %v2998_v15 = vadd.f32 %v1007_v5, %v783_v6 }
 0x161   : > { %v787_v16 = vpop.f32.mrf.mxu0  ;;  %v1012_v17 = vpop.f32.mrf.mxu1  ;;  %1969 = vmatmul.mubr.f32.gmra.mxu0 %v284_v7  ;;  %1993 = vmatmul.mubr.f32.gmra.mxu1 %v428_v8 }
 0x162   : > { %v788_v18 = vadd.f32 %v2849_v24, %v787_v16  ;;  %1971 = vmatprep.mubr.f32.mxu0 %v293_v2  ;;  %1995 = vmatprep.mubr.f32.mxu1 %v437_v13 }
 0x163   : > { %v789_v21 = vpop.f32.mrf.mxu0  ;;  %v1014_v25 = vpop.f32.mrf.mxu1 }
 0x164   : > { %v3005_v29 = vadd.f32 %v1012_v17, %v788_v18 }
 0x165   : > { %v792_v30 = vpop.f32.mrf.mxu0  ;;  %v1017_v31 = vpop.f32.mrf.mxu1  ;;  %1972 = vmatmul.mubr.f32.gmra.mxu0 %v302_v19  ;;  %1996 = vmatmul.mubr.f32.gmra.mxu1 %v446_v20 }
 0x166   : > { %v793_v32 = vadd.f32 %v2849_v24, %v792_v30  ;;  %1974 = vmatprep.mubr.f32.mxu0 %v311_v27  ;;  %1998 = vmatprep.mubr.f32.mxu1 %v455_v28 }
 0x167   : > { %v794_v39 = vpop.f32.mrf.mxu0  ;;  %v1019_v40 = vpop.f32.mrf.mxu1 }
 0x168   : > { %v3010_v41 = vadd.f32 %v1017_v31, %v793_v32 }
 0x169   : > { %v797_v42 = vpop.f32.mrf.mxu0  ;;  %v1022_v43 = vpop.f32.mrf.mxu1  ;;  %1975 = vmatmul.mubr.f32.gmra.mxu0 %v320_v34  ;;  %1999 = vmatmul.mubr.f32.gmra.mxu1 %v464_v35 }
 0x16a   : > { %v798_v45 = vadd.f32 %v2849_v24, %v797_v42 }
 0x16b   : > { %v799_v47 = vpop.f32.mrf.mxu0  ;;  %v1024_v48 = vpop.f32.mrf.mxu1 }
 0x16c   : > { %v3013_v49 = vadd.f32 %v1022_v43, %v798_v45 }
 0x16d   : > { %v802_v52 = vpop.f32.mrf.mxu0  ;;  %v1027_v53 = vpop.f32.mrf.mxu1 }
 0x16e   : > { %v803_v54 = vadd.f32 %v2849_v24, %v802_v52 }
 0x16f   : > { %v804_v57 = vpop.f32.mrf.mxu0  ;;  %v1029_v58 = vpop.f32.mrf.mxu1 }
 0x170   : > { %v3016_v59 = vadd.f32 %v1027_v53, %v803_v54 }
 0x171   : > { %v807_v60 = vpop.f32.mrf.mxu0  ;;  %v1032_v61 = vpop.f32.mrf.mxu1 }
 0x172   : > { %v808_v63 = vadd.f32 %v2849_v24, %v807_v60 }
 0x173   : > { %v809_v1 = vpop.f32.mrf.mxu0  ;;  %v1034_v5 = vpop.f32.mrf.mxu1 }
 0x174   : > { %v3019_v6 = vadd.f32 %v1032_v61, %v808_v63 }
 0x175   : > { %v812_v7 = vpop.f32.mrf.mxu0  ;;  %v1037_v8 = vpop.f32.mrf.mxu1 }
 0x176   : > { %v813_v9 = vadd.f32 %v2849_v24, %v812_v7 }
 0x177   : > { %v814_v10 = vpop.f32.mrf.mxu0  ;;  %v1039_v2 = vpop.f32.mrf.mxu1 }
 0x178   : > { %v3022_v13 = vadd.f32 %v1037_v8, %v813_v9 }
 0x179   : > { %v817_v16 = vpop.f32.mrf.mxu0  ;;  %v1042_v17 = vpop.f32.mrf.mxu1 }
 0x17a   : > { %v818_v18 = vadd.f32 %v2849_v24, %v817_v16 }
 0x17b   : > { %v819_v19 = vpop.f32.mrf.mxu0  ;;  %v1044_v20 = vpop.f32.mrf.mxu1 }
 0x17c   : > { %v3025_v21 = vadd.f32 %v1042_v17, %v818_v18 }
 0x17d   : > { %v822_v25 = vpop.f32.mrf.mxu0  ;;  %v1047_v27 = vpop.f32.mrf.mxu1 }
 0x17e   : > { %v823_v28 = vadd.f32 %v2849_v24, %v822_v25 }
 0x17f   : > { %v824_v30 = vpop.f32.mrf.mxu0  ;;  %v1049_v31 = vpop.f32.mrf.mxu1 }
 0x180   : > { %v3028_v32 = vadd.f32 %v1047_v27, %v823_v28 }
 0x181   : > { %v827_v34 = vpop.f32.mrf.mxu0  ;;  %v1052_v35 = vpop.f32.mrf.mxu1 }
 0x182   : > { %v828_v39 = vadd.f32 %v2849_v24, %v827_v34 }
 0x183   : > { %v829_v40 = vpop.f32.mrf.mxu0  ;;  %v1054_v42 = vpop.f32.mrf.mxu1 }
 0x184   : > { %v3031_v43 = vadd.f32 %v1052_v35, %v828_v39 }
 0x185   : > { %v832_v45 = vpop.f32.mrf.mxu0  ;;  %v1057_v47 = vpop.f32.mrf.mxu1 }
 0x186   : > { %v833_v48 = vadd.f32 %v2849_v24, %v832_v45 }
 0x187   : > { %v834_v52 = vpop.f32.mrf.mxu0  ;;  %v1059_v53 = vpop.f32.mrf.mxu1 }
 0x188   : > { %v3034_v54 = vadd.f32 %v1057_v47, %v833_v48 }
 0x189   : > { %v837_v57 = vpop.f32.mrf.mxu0  ;;  %v1062_v58 = vpop.f32.mrf.mxu1 }
 0x18a   : > { %3239 = vst [vmem:[#allocation2_spill] sm:$0xff] %v3034_v54  ;;  %v838_v60 = vadd.f32 %v2849_v24, %v837_v57 }
 0x18b   : > { %v839_v61 = vpop.f32.mrf.mxu0  ;;  %v1064_v63 = vpop.f32.mrf.mxu1 }
 0x18c   : > { %v3037_v1 = vadd.f32 %v1062_v58, %v838_v60 }
 0x18d   : > { %v1132_v5 = vpop.f32.mrf.mxu0  ;;  %v1357_v7 = vpop.f32.mrf.mxu1 }
 0x18e   : > { %v1133_v8 = vadd.f32 %v1132_v5, %v2858_v36 }
 0x18f   : > { %v1134_v9 = vpop.f32.mrf.mxu0  ;;  %v1359_v10 = vpop.f32.mrf.mxu1 }
 0x190   : > { %v3040_v2 = vadd.f32 %v1357_v7, %v1133_v8 }
 0x191   : > { %v1137_v16 = vpop.f32.mrf.mxu0  ;;  %v1362_v17 = vpop.f32.mrf.mxu1 }
 0x192   : > { %v1138_v18 = vadd.f32 %v1137_v16, %v2865_v46 }
 0x193   : > { %v1139_v19 = vpop.f32.mrf.mxu0  ;;  %v1364_v20 = vpop.f32.mrf.mxu1 }
 0x194   : > { %v3043_v25 = vadd.f32 %v1362_v17, %v1138_v18 }
 0x195   : > { %v1142_v24 = vpop.f32.mrf.mxu0  ;;  %v1367_v27 = vpop.f32.mrf.mxu1 }
 0x196   : > { %v1143_v28 = vadd.f32 %v1142_v24, %v2872_v56 }
 0x197   : > { %v1144_v30 = vpop.f32.mrf.mxu0  ;;  %v1369_v31 = vpop.f32.mrf.mxu1 }
 0x198   : > { %v3046_v34 = vadd.f32 %v1367_v27, %v1143_v28 }
 0x199   : > { %v1147_v36 = vpop.f32.mrf.mxu0  ;;  %v1372_v35 = vpop.f32.mrf.mxu1 }
 0x19a   : > { %v1148_v39 = vadd.f32 %v1147_v36, %v2879_v3 }
 0x19b   : > { %v1149_v40 = vpop.f32.mrf.mxu0  ;;  %v1374_v42 = vpop.f32.mrf.mxu1 }
 0x19c   : > { %v3049_v45 = vadd.f32 %v1372_v35, %v1148_v39 }
 0x19d   : > { %v1152_v46 = vpop.f32.mrf.mxu0  ;;  %v1377_v47 = vpop.f32.mrf.mxu1 }
 0x19e   : > { %v1153_v48 = vadd.f32 %v1152_v46, %v2886_v12 }
 0x19f   : > { %v1154_v52 = vpop.f32.mrf.mxu0  ;;  %v1379_v53 = vpop.f32.mrf.mxu1 }
 0x1a0   : > { %v3052_v57 = vadd.f32 %v1377_v47, %v1153_v48 }
 0x1a1   : > { %v1157_v56 = vpop.f32.mrf.mxu0  ;;  %v1382_v58 = vpop.f32.mrf.mxu1 }
 0x1a2   : > { %v1158_v60 = vadd.f32 %v1157_v56, %v2893_v22 }
 0x1a3   : > { %v1159_v61 = vpop.f32.mrf.mxu0  ;;  %v1384_v63 = vpop.f32.mrf.mxu1 }
 0x1a4   : > { %v3055_v5 = vadd.f32 %v1382_v58, %v1158_v60 }
 0x1a5   : > { %v1162_v3 = vpop.f32.mrf.mxu0  ;;  %v1387_v7 = vpop.f32.mrf.mxu1 }
 0x1a6   : > { %v1163_v8 = vadd.f32 %v1162_v3, %v2900_v33 }
 0x1a7   : > { %v1164_v9 = vpop.f32.mrf.mxu0  ;;  %v1389_v10 = vpop.f32.mrf.mxu1 }
 0x1a8   : > { %v3058_v16 = vadd.f32 %v1387_v7, %v1163_v8 }
 0x1a9   : > { %v1167_v12 = vpop.f32.mrf.mxu0  ;;  %v1392_v17 = vpop.f32.mrf.mxu1 }
 0x1aa   : > { %v1168_v18 = vadd.f32 %v1167_v12, %v2907_v44 }
 0x1ab   : > { %v1169_v19 = vpop.f32.mrf.mxu0  ;;  %v1394_v20 = vpop.f32.mrf.mxu1 }
 0x1ac   : > { %v3061_v24 = vadd.f32 %v1392_v17, %v1168_v18 }
 0x1ad   : > { %v1172_v22 = vpop.f32.mrf.mxu0  ;;  %v1397_v27 = vpop.f32.mrf.mxu1 }
 0x1ae   : > { %v1173_v28 = vadd.f32 %v1172_v22, %v2914_v55 }
 0x1af   : > { %v1174_v30 = vpop.f32.mrf.mxu0  ;;  %v1399_v31 = vpop.f32.mrf.mxu1 }
 0x1b0   : > { %v3064_v36 = vadd.f32 %v1397_v27, %v1173_v28 }
 0x1b1   : > { %v1177_v33 = vpop.f32.mrf.mxu0  ;;  %v1402_v35 = vpop.f32.mrf.mxu1 }
 0x1b2   : > { %v1178_v39 = vadd.f32 %v1177_v33, %v2921_v4 }
 0x1b3   : > { %v1179_v40 = vpop.f32.mrf.mxu0  ;;  %v1404_v42 = vpop.f32.mrf.mxu1 }
 0x1b4   : > { %v3067_v46 = vadd.f32 %v1402_v35, %v1178_v39 }
 0x1b5   : > { %v1182_v44 = vpop.f32.mrf.mxu0  ;;  %v1407_v47 = vpop.f32.mrf.mxu1 }
 0x1b6   : > { %v1183_v48 = vadd.f32 %v1182_v44, %v2928_v14 }
 0x1b7   : > { %v1184_v52 = vpop.f32.mrf.mxu0  ;;  %v1409_v53 = vpop.f32.mrf.mxu1 }
 0x1b8   : > { %v3070_v56 = vadd.f32 %v1407_v47, %v1183_v48 }
 0x1b9   : > { %v1187_v55 = vpop.f32.mrf.mxu0  ;;  %v1412_v58 = vpop.f32.mrf.mxu1 }
 0x1ba   : > { %3240 = vst [vmem:[#allocation3_spill] sm:$0xff] %v3070_v56  ;;  %v1188_v60 = vadd.f32 %v1187_v55, %v2935_v26 }
 0x1bb   : > { %v1189_v61 = vpop.f32.mrf.mxu0  ;;  %v1414_v63 = vpop.f32.mrf.mxu1 }
 0x1bc   : > { %v3073_v3 = vadd.f32 %v1412_v58, %v1188_v60 }
 0x1bd   : > { %v1192_v4 = vpop.f32.mrf.mxu0  ;;  %v1417_v7 = vpop.f32.mrf.mxu1 }
 0x1be   : > { %v1193_v8 = vadd.f32 %v1192_v4, %v2942_v38 }
 0x1bf   : > { %v1194_v9 = vpop.f32.mrf.mxu0  ;;  %v1419_v10 = vpop.f32.mrf.mxu1 }
 0x1c0   : > { %v3076_v12 = vadd.f32 %v1417_v7, %v1193_v8 }
 0x1c1   : > { %v1197_v14 = vpop.f32.mrf.mxu0  ;;  %v1422_v17 = vpop.f32.mrf.mxu1 }
 0x1c2   : > { %3241 = vst [vmem:[#allocation4_spill] sm:$0xff] %v3076_v12  ;;  %v1198_v18 = vadd.f32 %v1197_v14, %v2949_v50 }
 0x1c3   : > { %v1199_v19 = vpop.f32.mrf.mxu0  ;;  %v1424_v20 = vpop.f32.mrf.mxu1 }
 0x1c4   : > { %v3079_v22 = vadd.f32 %v1422_v17, %v1198_v18 }
 0x1c5   : > { %v1202_v26 = vpop.f32.mrf.mxu0  ;;  %v1427_v27 = vpop.f32.mrf.mxu1 }
 0x1c6   : > { %3242 = vst [vmem:[#allocation5_spill] sm:$0xff] %v3079_v22  ;;  %v1203_v28 = vadd.f32 %v1202_v26, %v2956_v62 }
 0x1c7   : > { %v1204_v30 = vpop.f32.mrf.mxu0  ;;  %v1429_v31 = vpop.f32.mrf.mxu1 }
 0x1c8   : > { %v3082_v33 = vadd.f32 %v1427_v27, %v1203_v28 }
 0x1c9   : > { %v1207_v38 = vpop.f32.mrf.mxu0  ;;  %v1432_v35 = vpop.f32.mrf.mxu1 }
 0x1ca   : > { %3243 = vst [vmem:[#allocation6_spill] sm:$0xff] %v3082_v33  ;;  %v1208_v39 = vadd.f32 %v1207_v38, %v2963_v11 }
 0x1cb   : > { %v1209_v40 = vpop.f32.mrf.mxu0  ;;  %v1434_v42 = vpop.f32.mrf.mxu1 }
 0x1cc   : > { %v3085_v44 = vadd.f32 %v1432_v35, %v1208_v39 }
 0x1cd   : > { %v1212_v50 = vpop.f32.mrf.mxu0  ;;  %v1437_v47 = vpop.f32.mrf.mxu1 }
 0x1ce   : > { %3244 = vst [vmem:[#allocation7_spill] sm:$0xff] %v3085_v44  ;;  %v1213_v48 = vadd.f32 %v1212_v50, %v2970_v23 }
 0x1cf   : > { %v1214_v52 = vpop.f32.mrf.mxu0  ;;  %v1439_v53 = vpop.f32.mrf.mxu1 }
 0x1d0   : > { %v3088_v55 = vadd.f32 %v1437_v47, %v1213_v48 }
 0x1d1   : > { %v1217_v62 = vpop.f32.mrf.mxu0  ;;  %v1442_v58 = vpop.f32.mrf.mxu1 }
 0x1d3   : > { %v1219_v60 = vpop.f32.mrf.mxu0  ;;  %v1444_v61 = vpop.f32.mrf.mxu1 }
 0x1d5   : > { %v1222_v63 = vpop.f32.mrf.mxu0  ;;  %v3090_v4 = vpop.f32.mrf.mxu1 }
 0x1d7   : > { %v1224_v11 = vpop.f32.mrf.mxu0  ;;  %v1449_v7 = vpop.f32.mrf.mxu1 }
 0x1d9   : > { %v1227_v8 = vpop.f32.mrf.mxu0  ;;  %v1452_v9 = vpop.f32.mrf.mxu1 }
 0x1db   : > { %v1229_v10 = vpop.f32.mrf.mxu0  ;;  %v1454_v14 = vpop.f32.mrf.mxu1 }
 0x1dd   : > { %v3092_v17 = vpop.f32.mrf.mxu0  ;;  %v3094_v23 = vpop.f32.mrf.mxu1 }
 0x1df   : > { %v1234_v18 = vpop.f32.mrf.mxu0  ;;  %v1459_v19 = vpop.f32.mrf.mxu1 }
 0x1e1   : > { %v1237_v20 = vpop.f32.mrf.mxu0  ;;  %v3096_v26 = vpop.f32.mrf.mxu1 }
 0x1e3   : > { %v1239_v27 = vpop.f32.mrf.mxu0  ;;  %v1464_v28 = vpop.f32.mrf.mxu1 }
 0x1e5   : > { %v3098_v30 = vpop.f32.mrf.mxu0  ;;  %v3100_v31 = vpop.f32.mrf.mxu1 }
 0x1e7   : > { %v1244_v38 = vpop.f32.mrf.mxu0  ;;  %v1469_v35 = vpop.f32.mrf.mxu1 }
 0x1e9   : > { %v3102_v39 = vpop.f32.mrf.mxu0  ;;  %v3104_v40 = vpop.f32.mrf.mxu1 }
 0x1eb   : > { %v1249_v42 = vpop.f32.mrf.mxu0  ;;  %v1474_v50 = vpop.f32.mrf.mxu1 }
 0x1ed   : > { %v3106_v47 = vpop.f32.mrf.mxu0  ;;  %v3108_v48 = vpop.f32.mrf.mxu1 }
 0x1ef   : > { %v1254_v52 = vpop.f32.mrf.mxu0  ;;  %v1479_v53 = vpop.f32.mrf.mxu1 }
 0x1f1   : > { %v3110_v60 = vpop.f32.mrf.mxu0  ;;  %v3112_v61 = vpop.f32.mrf.mxu1 }
 0x1f3   : > { %v1259_v11 = vpop.f32.mrf.mxu0  ;;  %v1484_v7 = vpop.f32.mrf.mxu1 }
 0x1f5   : > { %v3114_v10 = vpop.f32.mrf.mxu0  ;;  %v3116_v14 = vpop.f32.mrf.mxu1 }
 0x1f7   : > { %v1264_v18 = vpop.f32.mrf.mxu0  ;;  %v1489_v19 = vpop.f32.mrf.mxu1 }
 0x1f9   : > { %v3118_v27 = vpop.f32.mrf.mxu0  ;;  %v3120_v28 = vpop.f32.mrf.mxu1 }
 0x1fb   : > { %v1269_v38 = vpop.f32.mrf.mxu0  ;;  %v1494_v35 = vpop.f32.mrf.mxu1 }
 0x1fc   : > { %v1218_v35 = vadd.f32 %v1217_v62, %v2977_v37  ;;  %v1238_v37 = vadd.f32 %v1237_v20, %v3005_v29  ;;  %v1233_v29 = vadd.f32 %v3092_v17, %v2998_v15 }
 0x1fd   : > { %v3122_v42 = vpop.f32.mrf.mxu0  ;;  %v3124_v50 = vpop.f32.mrf.mxu1 }
 0x1fe   : > { %3245 = vst [vmem:[#allocation8_spill] sm:$0xff] %v3124_v50  ;;  %v1443_v56 = vadd.f32 %v1442_v58, %v1218_v35 }
 0x1ff   : > { %v1274_v52 = vpop.f32.mrf.mxu0  ;;  %v1499_v53 = vpop.f32.mrf.mxu1 }
 0x200   : > { %v1228_v52 = vadd.f32 %v1227_v8, %v2991_v0 }
 0x201   : > { %v3126_v11 = vpop.f32.mrf.mxu0  ;;  %v3128_v7 = vpop.f32.mrf.mxu1 }
 0x203   : > { %v1279_v33 = vpop.f32.mrf.mxu0  ;;  %v1504_v18 = vpop.f32.mrf.mxu1 }
 0x204   : > { %v1223_v33 = vadd.f32 %v1222_v63, %v2984_v51 }
 0x205   : > { %v3130_v19 = vpop.f32.mrf.mxu0  ;;  %v3132_v44 = vpop.f32.mrf.mxu1 }
 0x206   : > { %3246 = vst [vmem:[#allocation9_spill] sm:$0xff] %v3130_v19  ;;  %3247 = vst [vmem:[#allocation10_spill] sm:$0xff] %v3132_v44 }
 0x207   : > { %v1284_v12 = vpop.f32.mrf.mxu0  ;;  %v1509_v38 = vpop.f32.mrf.mxu1 }
 0x208   : > { %v1453_v38 = vadd.f32 %v1452_v9, %v1228_v52 }
 0x209   : > { %v3135_v22 = vpop.f32.mrf.mxu0  ;;  %v3137_v54 = vpop.f32.mrf.mxu1 }
 0x20b   : > { %v1289_v53 = vpop.f32.mrf.mxu0  ;;  %v1514_v50 = vpop.f32.mrf.mxu1 }
 0x20d   : > { %v1955_v18 = vpop.f32.mrf.mxu0  ;;  %v1979_v19 = vpop.f32.mrf.mxu1 }
 0x20e   : > { %v1588_v44 = vadd.f32 %v1955_v18, %v3043_v25  ;;  %v1668_v12 = vadd.f32 %v1979_v19, %v1443_v56  ;;  %v1448_v56 = vadd.f32 %v3090_v4, %v1223_v33  ;;  %v1243_v33 = vadd.f32 %v3098_v30, %v3010_v41 }
 0x20f   : > { %v1582_v0 = vpop.f32.mrf.mxu0  ;;  %v1662_v62 = vpop.f32.mrf.mxu1 }
 0x210   : > { %v1742_v58 = vmax.f32 %v1588_v44, 0.0  ;;  %v1758_v8 = vmax.f32 %v1668_v12, 0.0  ;;  %v1583_v51 = vadd.f32 %v1582_v0, %v3040_v2  ;;  %v1663_v25 = vadd.f32 %v1662_v62, %v3088_v55 }
 0x211   : > { %v1958_v63 = vpop.f32.mrf.mxu0  ;;  %v1982_v9 = vpop.f32.mrf.mxu1  ;;  %v1463_v2 = vadd.f32 %v3096_v26, %v1238_v37  ;;  %v1248_v55 = vadd.f32 %v3102_v39, %v3013_v49  ;;  %v1258_v37 = vadd.f32 %v3110_v60, %v3019_v6 }
 0x212   : > { %1774 = vst [vmem:[%s3147_s17 + $0x8] sm:$0xff] %v1742_v58  ;;  %1790 = vst [vmem:[%s3147_s17 + $0x88] sm:$0xff] %v1758_v8  ;;  %v1741_v20 = vmax.f32 %v1583_v51, 0.0  ;;  %v1757_v50 = vmax.f32 %v1663_v25, 0.0  ;;  %v1598_v44 = vadd.f32 %v1958_v63, %v3049_v45  ;;  %v1678_v19 = vadd.f32 %v1982_v9, %v1453_v38 }
 0x213   : > { %v1592_v4 = vpop.f32.mrf.mxu0  ;;  %v1672_v35 = vpop.f32.mrf.mxu1  ;;  %v1458_v45 = vadd.f32 %v3094_v23, %v1233_v29  ;;  %v1253_v8 = vadd.f32 %v3106_v47, %v3016_v59  ;;  %v1268_v29 = vadd.f32 %v3118_v27, %v3025_v21 }
 0x214   : > { %1773 = vst [vmem:[%s3147_s17] sm:$0xff] %v1741_v20  ;;  %1789 = vst [vmem:[%s3147_s17 + $0x80] sm:$0xff] %v1757_v50  ;;  %v1744_v15 = vmax.f32 %v1598_v44, 0.0  ;;  %v1760_v17 = vmax.f32 %v1678_v19, 0.0  ;;  %v1593_v52 = vadd.f32 %v1592_v4, %v3046_v34  ;;  %v1673_v53 = vadd.f32 %v1672_v35, %v1448_v56 }
 0x215   : > { %v1961_v26 = vpop.f32.mrf.mxu0  ;;  %v1985_v18 = vpop.f32.mrf.mxu1  ;;  %v1473_v34 = vadd.f32 %v3104_v40, %v1248_v55  ;;  %v1263_v50 = vadd.f32 %v3114_v10, %v3022_v13  ;;  %v1278_v55 = vadd.f32 %v3126_v11, %v3031_v43 }
 0x216   : > { %1776 = vst [vmem:[%s3147_s17 + $0x18] sm:$0xff] %v1744_v15  ;;  %1792 = vst [vmem:[%s3147_s17 + $0x98] sm:$0xff] %v1760_v17  ;;  %v1743_v49 = vmax.f32 %v1593_v52, 0.0  ;;  %v1759_v39 = vmax.f32 %v1673_v53, 0.0  ;;  %v1608_v12 = vadd.f32 %v1961_v26, %v3055_v5  ;;  %v1688_v38 = vadd.f32 %v1985_v18, %v1463_v2  ;;  %v3248_v18 = vld [vmem:[#allocation3_spill] sm:$0xff] }
 0x217   : > { %v1602_v23 = vpop.f32.mrf.mxu0  ;;  %v1682_v0 = vpop.f32.mrf.mxu1  ;;  %v1468_v5 = vadd.f32 %v3100_v31, %v1243_v33  ;;  %v1273_v17 = vadd.f32 %v3122_v42, %v3028_v32  ;;  %v1288_v33 = vadd.f32 %v3135_v22, %v3037_v1 }
 0x218   : > { %1775 = vst [vmem:[%s3147_s17 + $0x10] sm:$0xff] %v1743_v49  ;;  %1791 = vst [vmem:[%s3147_s17 + $0x90] sm:$0xff] %v1759_v39  ;;  %v1746_v41 = vmax.f32 %v1608_v12, 0.0  ;;  %v1762_v30 = vmax.f32 %v1688_v38, 0.0  ;;  %v1603_v62 = vadd.f32 %v1602_v23, %v3052_v57  ;;  %v1683_v58 = vadd.f32 %v1682_v0, %v1458_v45  ;;  %v3250_v38 = vld [vmem:[#allocation2_spill] sm:$0xff]  ;;  %v3252_v0 = vld [vmem:[#allocation5_spill] sm:$0xff] }
 0x219   : > { %v1964_v40 = vpop.f32.mrf.mxu0  ;;  %v1988_v51 = vpop.f32.mrf.mxu1  ;;  %v1483_v57 = vadd.f32 %v3112_v61, %v1258_v37 }
 0x21a   : > { %1778 = vst [vmem:[%s3147_s17 + $0x28] sm:$0xff] %v1746_v41  ;;  %1794 = vst [vmem:[%s3147_s17 + $0xa8] sm:$0xff] %v1762_v30  ;;  %v1745_v6 = vmax.f32 %v1603_v62, 0.0  ;;  %v1761_v60 = vmax.f32 %v1683_v58, 0.0  ;;  %v1618_v25 = vadd.f32 %v1964_v40, %v3061_v24  ;;  %v1698_v56 = vadd.f32 %v1988_v51, %v1473_v34  ;;  %v3251_v34 = vld [vmem:[#allocation9_spill] sm:$0xff]  ;;  %v3253_v51 = vld [vmem:[#allocation4_spill] sm:$0xff] }
 0x21b   : > { %v1612_v31 = vpop.f32.mrf.mxu0  ;;  %v1692_v63 = vpop.f32.mrf.mxu1  ;;  %v1478_v24 = vadd.f32 %v3108_v48, %v1253_v8  ;;  %v1283_v37 = vadd.f32 %v3251_v34, %v3250_v38  ;;  %v1513_v62 = vadd.f32 %v3137_v54, %v1288_v33 }
 0x21c   : > { %1777 = vst [vmem:[%s3147_s17 + $0x20] sm:$0xff] %v1745_v6  ;;  %1793 = vst [vmem:[%s3147_s17 + $0xa0] sm:$0xff] %v1761_v60  ;;  %v1748_v59 = vmax.f32 %v1618_v25, 0.0  ;;  %v1764_v47 = vmax.f32 %v1698_v56, 0.0  ;;  %v1613_v9 = vadd.f32 %v1612_v31, %v3058_v16  ;;  %v1693_v20 = vadd.f32 %v1692_v63, %v1468_v5  ;;  %v3254_v25 = vld [vmem:[#allocation10_spill] sm:$0xff]  ;;  %v3255_v63 = vld [vmem:[#allocation7_spill] sm:$0xff] }
 0x21d   : > { %v1967_v61 = vpop.f32.mrf.mxu0  ;;  %v1991_v44 = vpop.f32.mrf.mxu1  ;;  %v1493_v16 = vadd.f32 %v3120_v28, %v1268_v29  ;;  %v1508_v56 = vadd.f32 %v3254_v25, %v1283_v37 }
 0x21e   : > { %1780 = vst [vmem:[%s3147_s17 + $0x38] sm:$0xff] %v1748_v59  ;;  %1796 = vst [vmem:[%s3147_s17 + $0xb8] sm:$0xff] %v1764_v47  ;;  %v1747_v21 = vmax.f32 %v1613_v9, 0.0  ;;  %v1763_v27 = vmax.f32 %v1693_v20, 0.0  ;;  %v1628_v19 = vadd.f32 %v1967_v61, %v3067_v46  ;;  %v1708_v2 = vadd.f32 %v1991_v44, %v1483_v57  ;;  %v3256_v61 = vld [vmem:[#allocation6_spill] sm:$0xff] }
 0x21f   : > { %v1622_v48 = vpop.f32.mrf.mxu0  ;;  %v1702_v4 = vpop.f32.mrf.mxu1  ;;  %v1488_v46 = vadd.f32 %v3116_v14, %v1263_v50 }
 0x220   : > { %1779 = vst [vmem:[%s3147_s17 + $0x30] sm:$0xff] %v1747_v21  ;;  %1795 = vst [vmem:[%s3147_s17 + $0xb0] sm:$0xff] %v1763_v27  ;;  %v1750_v13 = vmax.f32 %v1628_v19, 0.0  ;;  %v1766_v10 = vmax.f32 %v1708_v2, 0.0  ;;  %v1623_v35 = vadd.f32 %v1622_v48, %v3064_v36  ;;  %v1703_v15 = vadd.f32 %v1702_v4, %v1478_v24 }
 0x221   : > { %v1970_v28 = vpop.f32.mrf.mxu0  ;;  %v1994_v52 = vpop.f32.mrf.mxu1  ;;  %v1503_v36 = vadd.f32 %v3128_v7, %v1278_v55 }
 0x222   : > { %1782 = vst [vmem:[%s3147_s17 + $0x48] sm:$0xff] %v1750_v13  ;;  %1798 = vst [vmem:[%s3147_s17 + $0xc8] sm:$0xff] %v1766_v10  ;;  %v1749_v43 = vmax.f32 %v1623_v35, 0.0  ;;  %v1765_v11 = vmax.f32 %v1703_v15, 0.0  ;;  %v1638_v53 = vadd.f32 %v1970_v28, %v3073_v3  ;;  %v1718_v45 = vadd.f32 %v1994_v52, %v1493_v16  ;;  %v3249_v3 = vld [vmem:[#allocation8_spill] sm:$0xff] }
 0x223   : > { %v1632_v14 = vpop.f32.mrf.mxu0  ;;  %v1712_v26 = vpop.f32.mrf.mxu1  ;;  %v1498_v12 = vadd.f32 %v3249_v3, %v1273_v17 }
 0x224   : > { %1781 = vst [vmem:[%s3147_s17 + $0x40] sm:$0xff] %v1749_v43  ;;  %1797 = vst [vmem:[%s3147_s17 + $0xc0] sm:$0xff] %v1765_v11  ;;  %v1752_v32 = vmax.f32 %v1638_v53, 0.0  ;;  %v1768_v42 = vmax.f32 %v1718_v45, 0.0  ;;  %v1633_v49 = vadd.f32 %v1632_v14, %v3248_v18  ;;  %v1713_v39 = vadd.f32 %v1712_v26, %v1488_v46 }
 0x225   : > { %v1973_v7 = vpop.f32.mrf.mxu0  ;;  %v1997_v23 = vpop.f32.mrf.mxu1 }
 0x226   : > { %1784 = vst [vmem:[%s3147_s17 + $0x58] sm:$0xff] %v1752_v32  ;;  %1800 = vst [vmem:[%s3147_s17 + $0xd8] sm:$0xff] %v1768_v42  ;;  %v1751_v1 = vmax.f32 %v1633_v49, 0.0  ;;  %v1767_v22 = vmax.f32 %v1713_v39, 0.0  ;;  %v1648_v41 = vadd.f32 %v1973_v7, %v3252_v0  ;;  %v1728_v30 = vadd.f32 %v1997_v23, %v1503_v36 }
 0x227   : > { %v1642_v58 = vpop.f32.mrf.mxu0  ;;  %v1722_v5 = vpop.f32.mrf.mxu1 }
 0x228   : > { %1783 = vst [vmem:[%s3147_s17 + $0x50] sm:$0xff] %v1751_v1  ;;  %1799 = vst [vmem:[%s3147_s17 + $0xd0] sm:$0xff] %v1767_v22  ;;  %v1754_v8 = vmax.f32 %v1648_v41, 0.0  ;;  %v1770_v40 = vmax.f32 %v1728_v30, 0.0  ;;  %v1643_v6 = vadd.f32 %v1642_v58, %v3253_v51  ;;  %v1723_v60 = vadd.f32 %v1722_v5, %v1498_v12 }
 0x229   : > { %v1976_v57 = vpop.f32.mrf.mxu0  ;;  %v2000_v29 = vpop.f32.mrf.mxu1 }
 0x22a   : > { %1786 = vst [vmem:[%s3147_s17 + $0x68] sm:$0xff] %v1754_v8  ;;  %1802 = vst [vmem:[%s3147_s17 + $0xe8] sm:$0xff] %v1770_v40  ;;  %v1753_v54 = vmax.f32 %v1643_v6, 0.0  ;;  %v1769_v31 = vmax.f32 %v1723_v60, 0.0  ;;  %v1658_v59 = vadd.f32 %v1976_v57, %v3255_v63  ;;  %v1738_v47 = vadd.f32 %v2000_v29, %v1513_v62 }
 0x22b   : > { %v1652_v9 = vpop.f32.mrf.mxu0  ;;  %v1732_v20 = vpop.f32.mrf.mxu1 }
 0x22c   : > { %1785 = vst [vmem:[%s3147_s17 + $0x60] sm:$0xff] %v1753_v54  ;;  %1801 = vst [vmem:[%s3147_s17 + $0xe0] sm:$0xff] %v1769_v31  ;;  %v1756_v24 = vmax.f32 %v1658_v59, 0.0  ;;  %v1772_v50 = vmax.f32 %v1738_v47, 0.0  ;;  %v1653_v44 = vadd.f32 %v1652_v9, %v3256_v61  ;;  %v1733_v21 = vadd.f32 %v1732_v20, %v1508_v56 }
 0x22e   : > { %1788 = vst [vmem:[%s3147_s17 + $0x78] sm:$0xff] %v1756_v24  ;;  %1804 = vst [vmem:[%s3147_s17 + $0xf8] sm:$0xff] %v1772_v50  ;;  %v1755_v27 = vmax.f32 %v1653_v44, 0.0  ;;  %v1771_v19 = vmax.f32 %v1733_v21, 0.0 }
 0x230   : > { %1787 = vst [vmem:[%s3147_s17 + $0x70] sm:$0xff] %v1755_v27  ;;  %1803 = vst [vmem:[%s3147_s17 + $0xf0] sm:$0xff] %v1771_v19 }
 0x231 PF: > { %s13_s12 = sadd.s32 1, %s2049_s12  }
 0x232   : > { %p10_p4 = scmp.ge.s32.totalorder %s13_s12, 4  }
 0x234   :  { %12 = sbr.rel (!%p10_p4) target bundleno = 1 (0x1), region = 62 }

// kernel: cnn_forward_pallas.7
= control target key start
LH: loop header
LB: loop body
LE: loop exit
PB: predicated region body
PF: predicated region fallthrough
CT: control target
= control target key end

     0   :  { %s4271_s1 = inlined_call_operand.vmem [shape: f32[2048,128], index: 1, kind: input, shape index: {}]   ;;  %s4272_s0 = inlined_call_operand.vmem [shape: f32[128,2048], index: 0, kind: input, shape index: {}]   ;;  %s4273_s2 = inlined_call_operand.vmem [shape: f32[1,128], index: 2, kind: input, shape index: {}]   ;;  %s4274_s3 = inlined_call_operand.vmem [shape: f32[128,128], index: 3, kind: output, shape index: {}]  }
   0x1   :  { %v301_v0 = vld [vmem:[%s4271_s1 + $0xf8] sm:$0xff]  ;;  %v300_v3 = vld [vmem:[%s4271_s1 + $0xf0] sm:$0xff]  ;;  %v299_v7 = vld [vmem:[%s4271_s1 + $0xe8] sm:$0xff] }
   0x2   :  { %v285_v1 = vld [vmem:[%s4271_s1 + $0x78] sm:$0xff]  ;;  %1730 = vmatprep.subr.mxu0 %v301_v0  ;;  %v284_v5 = vld [vmem:[%s4271_s1 + $0x70] sm:$0xff]  ;;  %v283_v9 = vld [vmem:[%s4271_s1 + $0x68] sm:$0xff] }
   0x3   :  { %v333_v2 = vld [vmem:[%s4271_s1 + $0x1f8] sm:$0xff]  ;;  %1731 = vmatpush3.msra.mxu0 %v285_v1  ;;  %v332_v6 = vld [vmem:[%s4271_s1 + $0x1f0] sm:$0xff]  ;;  %v331_v10 = vld [vmem:[%s4271_s1 + $0x1e8] sm:$0xff] }
   0x4   :  { %1810 = vmatprep.subr.mxu1 %v333_v2  ;;  %v317_v4 = vld [vmem:[%s4271_s1 + $0x178] sm:$0xff]  ;;  %v316_v8 = vld [vmem:[%s4271_s1 + $0x170] sm:$0xff]  ;;  %1732 = vmatprep.subr.mxu0 %v300_v3  ;;  %v298_v11 = vld [vmem:[%s4271_s1 + $0xe0] sm:$0xff] }
   0x5   :  { %1811 = vmatpush3.msra.mxu1 %v317_v4  ;;  %1733 = vmatpush3.msra.mxu0 %v284_v5  ;;  %v315_v12 = vld [vmem:[%s4271_s1 + $0x168] sm:$0xff]  ;;  %v330_v13 = vld [vmem:[%s4271_s1 + $0x1e0] sm:$0xff]  ;;  %v297_v16 = vld [vmem:[%s4271_s1 + $0xd8] sm:$0xff] }
   0x6   :  { %1812 = vmatprep.subr.mxu1 %v332_v6  ;;  %1734 = vmatprep.subr.mxu0 %v299_v7  ;;  %v282_v14 = vld [vmem:[%s4271_s1 + $0x60] sm:$0xff]  ;;  %v329_v17 = vld [vmem:[%s4271_s1 + $0x1d8] sm:$0xff]  ;;  %v296_v20 = vld [vmem:[%s4271_s1 + $0xd0] sm:$0xff] }
   0x7   :  { %1813 = vmatpush3.msra.mxu1 %v316_v8  ;;  %v314_v15 = vld [vmem:[%s4271_s1 + $0x160] sm:$0xff]  ;;  %1735 = vmatpush3.msra.mxu0 %v283_v9  ;;  %v281_v18 = vld [vmem:[%s4271_s1 + $0x58] sm:$0xff]  ;;  %v328_v21 = vld [vmem:[%s4271_s1 + $0x1d0] sm:$0xff] }
   0x8   :  { %1814 = vmatprep.subr.mxu1 %v331_v10  ;;  %1736 = vmatprep.subr.mxu0 %v298_v11  ;;  %v313_v19 = vld [vmem:[%s4271_s1 + $0x158] sm:$0xff]  ;;  %v280_v22 = vld [vmem:[%s4271_s1 + $0x50] sm:$0xff]  ;;  %v295_v24 = vld [vmem:[%s4271_s1 + $0xc8] sm:$0xff] }
   0x9   :  { %1815 = vmatpush3.msra.mxu1 %v315_v12  ;;  %1737 = vmatpush3.msra.mxu0 %v282_v14  ;;  %v312_v23 = vld [vmem:[%s4271_s1 + $0x150] sm:$0xff]  ;;  %v327_v25 = vld [vmem:[%s4271_s1 + $0x1c8] sm:$0xff]  ;;  %v294_v28 = vld [vmem:[%s4271_s1 + $0xc0] sm:$0xff] }
   0xa   :  { %1816 = vmatprep.subr.mxu1 %v330_v13  ;;  %1738 = vmatprep.subr.mxu0 %v297_v16  ;;  %v279_v26 = vld [vmem:[%s4271_s1 + $0x48] sm:$0xff]  ;;  %v326_v29 = vld [vmem:[%s4271_s1 + $0x1c0] sm:$0xff]  ;;  %v293_v32 = vld [vmem:[%s4271_s1 + $0xb8] sm:$0xff] }
   0xb   :  { %1817 = vmatpush3.msra.mxu1 %v314_v15  ;;  %1739 = vmatpush3.msra.mxu0 %v281_v18  ;;  %v311_v27 = vld [vmem:[%s4271_s1 + $0x148] sm:$0xff]  ;;  %v278_v30 = vld [vmem:[%s4271_s1 + $0x40] sm:$0xff]  ;;  %v325_v33 = vld [vmem:[%s4271_s1 + $0x1b8] sm:$0xff] }
   0xc   :  { %1818 = vmatprep.subr.mxu1 %v329_v17  ;;  %1740 = vmatprep.subr.mxu0 %v296_v20  ;;  %v310_v31 = vld [vmem:[%s4271_s1 + $0x140] sm:$0xff]  ;;  %v277_v34 = vld [vmem:[%s4271_s1 + $0x38] sm:$0xff]  ;;  %v292_v36 = vld [vmem:[%s4271_s1 + $0xb0] sm:$0xff] }
   0xd   :  { %1819 = vmatpush3.msra.mxu1 %v313_v19  ;;  %1741 = vmatpush3.msra.mxu0 %v280_v22  ;;  %v309_v35 = vld [vmem:[%s4271_s1 + $0x138] sm:$0xff]  ;;  %v324_v37 = vld [vmem:[%s4271_s1 + $0x1b0] sm:$0xff]  ;;  %v291_v40 = vld [vmem:[%s4271_s1 + $0xa8] sm:$0xff] }
   0xe   :  { %1820 = vmatprep.subr.mxu1 %v328_v21  ;;  %1742 = vmatprep.subr.mxu0 %v295_v24  ;;  %v276_v38 = vld [vmem:[%s4271_s1 + $0x30] sm:$0xff]  ;;  %v323_v41 = vld [vmem:[%s4271_s1 + $0x1a8] sm:$0xff]  ;;  %v290_v44 = vld [vmem:[%s4271_s1 + $0xa0] sm:$0xff] }
   0xf   :  { %1821 = vmatpush3.msra.mxu1 %v312_v23  ;;  %1743 = vmatpush3.msra.mxu0 %v279_v26  ;;  %v308_v39 = vld [vmem:[%s4271_s1 + $0x130] sm:$0xff]  ;;  %v275_v42 = vld [vmem:[%s4271_s1 + $0x28] sm:$0xff]  ;;  %v322_v45 = vld [vmem:[%s4271_s1 + $0x1a0] sm:$0xff] }
  0x10   :  { %1822 = vmatprep.subr.mxu1 %v327_v25  ;;  %1744 = vmatprep.subr.mxu0 %v294_v28  ;;  %v307_v43 = vld [vmem:[%s4271_s1 + $0x128] sm:$0xff]  ;;  %v274_v46 = vld [vmem:[%s4271_s1 + $0x20] sm:$0xff]  ;;  %v289_v48 = vld [vmem:[%s4271_s1 + $0x98] sm:$0xff] }
  0x11   :  { %1823 = vmatpush3.msra.mxu1 %v311_v27  ;;  %1745 = vmatpush3.msra.mxu0 %v278_v30  ;;  %v306_v47 = vld [vmem:[%s4271_s1 + $0x120] sm:$0xff]  ;;  %v321_v49 = vld [vmem:[%s4271_s1 + $0x198] sm:$0xff]  ;;  %v288_v52 = vld [vmem:[%s4271_s1 + $0x90] sm:$0xff] }
  0x12   :  { %1824 = vmatprep.subr.mxu1 %v326_v29  ;;  %1746 = vmatprep.subr.mxu0 %v293_v32  ;;  %v273_v50 = vld [vmem:[%s4271_s1 + $0x18] sm:$0xff]  ;;  %v320_v53 = vld [vmem:[%s4271_s1 + $0x190] sm:$0xff]  ;;  %v287_v56 = vld [vmem:[%s4271_s1 + $0x88] sm:$0xff] }
  0x13   :  { %1825 = vmatpush3.msra.mxu1 %v310_v31  ;;  %1747 = vmatpush3.msra.mxu0 %v277_v34  ;;  %v305_v51 = vld [vmem:[%s4271_s1 + $0x118] sm:$0xff]  ;;  %v272_v54 = vld [vmem:[%s4271_s1 + $0x10] sm:$0xff]  ;;  %v319_v57 = vld [vmem:[%s4271_s1 + $0x188] sm:$0xff] }
  0x14   :  { %1826 = vmatprep.subr.mxu1 %v325_v33  ;;  %1748 = vmatprep.subr.mxu0 %v292_v36  ;;  %v304_v55 = vld [vmem:[%s4271_s1 + $0x110] sm:$0xff]  ;;  %v271_v58 = vld [vmem:[%s4271_s1 + $0x8] sm:$0xff]  ;;  %v286_v60 = vld [vmem:[%s4271_s1 + $0x80] sm:$0xff] }
  0x15   :  { %1827 = vmatpush3.msra.mxu1 %v309_v35  ;;  %1749 = vmatpush3.msra.mxu0 %v276_v38  ;;  %v303_v59 = vld [vmem:[%s4271_s1 + $0x108] sm:$0xff]  ;;  %v270_v62 = vld [vmem:[%s4271_s1] sm:$0xff]  ;;  %v17_v2 = vld [vmem:[%s4272_s0 + $0x18] sm:$0xff] }
  0x16   :  { %1828 = vmatprep.subr.mxu1 %v324_v37  ;;  %1750 = vmatprep.subr.mxu0 %v291_v40  ;;  %v15_v61 = vld [vmem:[%s4272_s0 + $0x8] sm:$0xff]  ;;  %v318_v63 = vld [vmem:[%s4271_s1 + $0x180] sm:$0xff]  ;;  %v365_v3 = vld [vmem:[%s4271_s1 + $0x2f8] sm:$0xff] }
  0x17   :  { %1829 = vmatpush3.msra.mxu1 %v308_v39  ;;  %1751 = vmatpush3.msra.mxu0 %v275_v42  ;;  %v14_v0 = vld [vmem:[%s4272_s0] sm:$0xff]  ;;  %v16_v4 = vld [vmem:[%s4272_s0 + $0x10] sm:$0xff]  ;;  %v349_v5 = vld [vmem:[%s4271_s1 + $0x278] sm:$0xff] }
  0x18   :  { %1830 = vmatprep.subr.mxu1 %v323_v41  ;;  %1752 = vmatprep.subr.mxu0 %v290_v44  ;;  %v302_v1 = vld [vmem:[%s4271_s1 + $0x100] sm:$0xff]  ;;  %v397_v6 = vld [vmem:[%s4271_s1 + $0x3f8] sm:$0xff]  ;;  %v31_v7 = vld [vmem:[%s4272_s0 + $0x88] sm:$0xff] }
  0x19   :  { %1831 = vmatpush3.msra.mxu1 %v307_v43  ;;  %1753 = vmatpush3.msra.mxu0 %v274_v46  ;;  %v381_v8 = vld [vmem:[%s4271_s1 + $0x378] sm:$0xff]  ;;  %v30_v9 = vld [vmem:[%s4272_s0 + $0x80] sm:$0xff]  ;;  %v364_v11 = vld [vmem:[%s4271_s1 + $0x2f0] sm:$0xff] }
  0x1a   :  { %1832 = vmatprep.subr.mxu1 %v322_v45  ;;  %1754 = vmatprep.subr.mxu0 %v289_v48  ;;  %v33_v10 = vld [vmem:[%s4272_s0 + $0x98] sm:$0xff]  ;;  %v32_v12 = vld [vmem:[%s4272_s0 + $0x90] sm:$0xff]  ;;  %v47_v15 = vld [vmem:[%s4272_s0 + $0x108] sm:$0xff] }
  0x1b   :  { %1833 = vmatpush3.msra.mxu1 %v306_v47  ;;  %1755 = vmatpush3.msra.mxu0 %v273_v50  ;;  %v348_v13 = vld [vmem:[%s4271_s1 + $0x270] sm:$0xff]  ;;  %v46_v17 = vld [vmem:[%s4272_s0 + $0x100] sm:$0xff]  ;;  %v49_v18 = vld [vmem:[%s4272_s0 + $0x118] sm:$0xff] }
  0x1c   :  { %1834 = vmatprep.subr.mxu1 %v321_v49  ;;  %1756 = vmatprep.subr.mxu0 %v288_v52  ;;  %v396_v14 = vld [vmem:[%s4271_s1 + $0x3f0] sm:$0xff]  ;;  %v363_v19 = vld [vmem:[%s4271_s1 + $0x2e8] sm:$0xff]  ;;  %v62_v25 = vld [vmem:[%s4272_s0 + $0x180] sm:$0xff] }
  0x1d   :  { %1835 = vmatpush3.msra.mxu1 %v305_v51  ;;  %1757 = vmatpush3.msra.mxu0 %v272_v54  ;;  %v380_v16 = vld [vmem:[%s4271_s1 + $0x370] sm:$0xff]  ;;  %v347_v21 = vld [vmem:[%s4271_s1 + $0x268] sm:$0xff]  ;;  %v65_v26 = vld [vmem:[%s4272_s0 + $0x198] sm:$0xff] }
  0x1e   :  { %1836 = vmatprep.subr.mxu1 %v320_v53  ;;  %1758 = vmatprep.subr.mxu0 %v287_v56  ;;  %v48_v20 = vld [vmem:[%s4272_s0 + $0x110] sm:$0xff]  ;;  %v395_v22 = vld [vmem:[%s4271_s1 + $0x3e8] sm:$0xff]  ;;  %v362_v27 = vld [vmem:[%s4271_s1 + $0x2e0] sm:$0xff] }
  0x1f   :  { %1837 = vmatpush3.msra.mxu1 %v304_v55  ;;  %1759 = vmatpush3.msra.mxu0 %v271_v58  ;;  %v63_v23 = vld [vmem:[%s4272_s0 + $0x188] sm:$0xff]  ;;  %v64_v28 = vld [vmem:[%s4272_s0 + $0x190] sm:$0xff]  ;;  %v346_v29 = vld [vmem:[%s4271_s1 + $0x260] sm:$0xff] }
  0x20   :  { %1838 = vmatprep.subr.mxu1 %v319_v57  ;;  %1760 = vmatprep.subr.mxu0 %v286_v60  ;;  %v379_v24 = vld [vmem:[%s4271_s1 + $0x368] sm:$0xff]  ;;  %v394_v30 = vld [vmem:[%s4271_s1 + $0x3e0] sm:$0xff]  ;;  %v81_v34 = vld [vmem:[%s4272_s0 + $0x218] sm:$0xff] }
  0x21   :  { %1839 = vmatpush3.msra.mxu1 %v303_v59  ;;  %597 = vmatprep.mubr.f32.mxu0 %v15_v61  ;;  %v79_v31 = vld [vmem:[%s4272_s0 + $0x208] sm:$0xff]  ;;  %v378_v32 = vld [vmem:[%s4271_s1 + $0x360] sm:$0xff]  ;;  %v361_v35 = vld [vmem:[%s4271_s1 + $0x2d8] sm:$0xff] }
  0x22   :  { %1761 = vmatpush3.msra.mxu0 %v270_v62  ;;  %1840 = vmatprep.subr.mxu1 %v318_v63  ;;  %v78_v33 = vld [vmem:[%s4272_s0 + $0x200] sm:$0xff]  ;;  %v80_v36 = vld [vmem:[%s4272_s0 + $0x210] sm:$0xff]  ;;  %v345_v37 = vld [vmem:[%s4271_s1 + $0x258] sm:$0xff] }
  0x23   :  { %598 = vmatmul.mubr.f32.vlgmr.msra.gmra.mxu0 %v14_v0  ;;  %1841 = vmatpush3.msra.mxu1 %v302_v1  ;;  %v393_v38 = vld [vmem:[%s4271_s1 + $0x3d8] sm:$0xff]  ;;  %v95_v39 = vld [vmem:[%s4272_s0 + $0x288] sm:$0xff]  ;;  %v94_v41 = vld [vmem:[%s4272_s0 + $0x280] sm:$0xff] }
  0x24   :  { %742 = vmatprep.mubr.f32.mxu1 %v17_v2  ;;  %1890 = vmatprep.subr.mxu0 %v365_v3  ;;  %v377_v40 = vld [vmem:[%s4271_s1 + $0x358] sm:$0xff]  ;;  %v360_v43 = vld [vmem:[%s4271_s1 + $0x2d0] sm:$0xff]  ;;  %v111_v47 = vld [vmem:[%s4272_s0 + $0x308] sm:$0xff] }
  0x25   :  { %743 = vmatmul.mubr.f32.vlgmr.msra.gmra.mxu1 %v16_v4  ;;  %1891 = vmatpush3.msra.mxu0 %v349_v5  ;;  %v97_v42 = vld [vmem:[%s4272_s0 + $0x298] sm:$0xff]  ;;  %v96_v44 = vld [vmem:[%s4272_s0 + $0x290] sm:$0xff]  ;;  %v110_v49 = vld [vmem:[%s4272_s0 + $0x300] sm:$0xff] }
  0x26   :  { %1970 = vmatprep.subr.mxu1 %v397_v6  ;;  %602 = vmatprep.mubr.f32.mxu0 %v31_v7  ;;  %v344_v45 = vld [vmem:[%s4271_s1 + $0x250] sm:$0xff]  ;;  %v113_v50 = vld [vmem:[%s4272_s0 + $0x318] sm:$0xff]  ;;  %v359_v51 = vld [vmem:[%s4271_s1 + $0x2c8] sm:$0xff] }
  0x27   :  { %1971 = vmatpush3.msra.mxu1 %v381_v8  ;;  %603 = vmatmul.mubr.f32.gmra.mxu0 %v30_v9  ;;  %v392_v46 = vld [vmem:[%s4271_s1 + $0x3d0] sm:$0xff]  ;;  %v343_v53 = vld [vmem:[%s4271_s1 + $0x248] sm:$0xff]  ;;  %v126_v57 = vld [vmem:[%s4272_s0 + $0x380] sm:$0xff] }
  0x28   :  { %747 = vmatprep.mubr.f32.mxu1 %v33_v10  ;;  %1892 = vmatprep.subr.mxu0 %v364_v11  ;;  %v376_v48 = vld [vmem:[%s4271_s1 + $0x350] sm:$0xff]  ;;  %v391_v54 = vld [vmem:[%s4271_s1 + $0x3c8] sm:$0xff]  ;;  %v129_v58 = vld [vmem:[%s4272_s0 + $0x398] sm:$0xff] }
  0x29   :  { %748 = vmatmul.mubr.f32.gmra.mxu1 %v32_v12  ;;  %1893 = vmatpush3.msra.mxu0 %v348_v13  ;;  %v112_v52 = vld [vmem:[%s4272_s0 + $0x310] sm:$0xff]  ;;  %v127_v55 = vld [vmem:[%s4272_s0 + $0x388] sm:$0xff]  ;;  %v358_v59 = vld [vmem:[%s4271_s1 + $0x2c0] sm:$0xff] }
  0x2a   :  { %1972 = vmatprep.subr.mxu1 %v396_v14  ;;  %607 = vmatprep.mubr.f32.mxu0 %v47_v15  ;;  %v375_v56 = vld [vmem:[%s4271_s1 + $0x348] sm:$0xff]  ;;  %v128_v60 = vld [vmem:[%s4272_s0 + $0x390] sm:$0xff]  ;;  %v342_v61 = vld [vmem:[%s4271_s1 + $0x240] sm:$0xff] }
  0x2b   :  { %1973 = vmatpush3.msra.mxu1 %v380_v16  ;;  %608 = vmatmul.mubr.f32.gmra.mxu0 %v46_v17  ;;  %v390_v62 = vld [vmem:[%s4271_s1 + $0x3c0] sm:$0xff]  ;;  %v143_v63 = vld [vmem:[%s4272_s0 + $0x408] sm:$0xff]  ;;  %v145_v2 = vld [vmem:[%s4272_s0 + $0x418] sm:$0xff] }
  0x2c   :  { %752 = vmatprep.mubr.f32.mxu1 %v49_v18  ;;  %1894 = vmatprep.subr.mxu0 %v363_v19  ;;  %v374_v0 = vld [vmem:[%s4271_s1 + $0x340] sm:$0xff]  ;;  %v357_v3 = vld [vmem:[%s4271_s1 + $0x2b8] sm:$0xff]  ;;  %v144_v4 = vld [vmem:[%s4272_s0 + $0x410] sm:$0xff] }
  0x2d   :  { %753 = vmatmul.mubr.f32.gmra.mxu1 %v48_v20  ;;  %1895 = vmatpush3.msra.mxu0 %v347_v21  ;;  %v142_v1 = vld [vmem:[%s4272_s0 + $0x400] sm:$0xff]  ;;  %v341_v5 = vld [vmem:[%s4271_s1 + $0x238] sm:$0xff]  ;;  %v159_v7 = vld [vmem:[%s4272_s0 + $0x488] sm:$0xff] }
  0x2e   :  { %1974 = vmatprep.subr.mxu1 %v395_v22  ;;  %612 = vmatprep.mubr.f32.mxu0 %v63_v23  ;;  %v389_v6 = vld [vmem:[%s4271_s1 + $0x3b8] sm:$0xff]  ;;  %v158_v9 = vld [vmem:[%s4272_s0 + $0x480] sm:$0xff]  ;;  %v356_v11 = vld [vmem:[%s4271_s1 + $0x2b0] sm:$0xff] }
  0x2f   :  { %1975 = vmatpush3.msra.mxu1 %v379_v24  ;;  %613 = vmatmul.mubr.f32.gmra.mxu0 %v62_v25  ;;  %v373_v8 = vld [vmem:[%s4271_s1 + $0x338] sm:$0xff]  ;;  %v160_v12 = vld [vmem:[%s4272_s0 + $0x490] sm:$0xff]  ;;  %v175_v15 = vld [vmem:[%s4272_s0 + $0x508] sm:$0xff] }
  0x30   :  { %757 = vmatprep.mubr.f32.mxu1 %v65_v26  ;;  %1896 = vmatprep.subr.mxu0 %v362_v27  ;;  %v161_v10 = vld [vmem:[%s4272_s0 + $0x498] sm:$0xff]  ;;  %v340_v13 = vld [vmem:[%s4271_s1 + $0x230] sm:$0xff]  ;;  %v174_v17 = vld [vmem:[%s4272_s0 + $0x500] sm:$0xff] }
  0x31   :  { %758 = vmatmul.mubr.f32.gmra.mxu1 %v64_v28  ;;  %1897 = vmatpush3.msra.mxu0 %v346_v29  ;;  %v388_v14 = vld [vmem:[%s4271_s1 + $0x3b0] sm:$0xff]  ;;  %v177_v18 = vld [vmem:[%s4272_s0 + $0x518] sm:$0xff]  ;;  %v355_v19 = vld [vmem:[%s4271_s1 + $0x2a8] sm:$0xff] }
  0x32   :  { %1976 = vmatprep.subr.mxu1 %v394_v30  ;;  %617 = vmatprep.mubr.f32.mxu0 %v79_v31  ;;  %v372_v16 = vld [vmem:[%s4271_s1 + $0x330] sm:$0xff]  ;;  %v339_v21 = vld [vmem:[%s4271_s1 + $0x228] sm:$0xff]  ;;  %v190_v25 = vld [vmem:[%s4272_s0 + $0x580] sm:$0xff] }
  0x33   :  { %1977 = vmatpush3.msra.mxu1 %v378_v32  ;;  %618 = vmatmul.mubr.f32.gmra.mxu0 %v78_v33  ;;  %v176_v20 = vld [vmem:[%s4272_s0 + $0x510] sm:$0xff]  ;;  %v387_v22 = vld [vmem:[%s4271_s1 + $0x3a8] sm:$0xff]  ;;  %v193_v26 = vld [vmem:[%s4272_s0 + $0x598] sm:$0xff] }
  0x34   :  { %762 = vmatprep.mubr.f32.mxu1 %v81_v34  ;;  %1898 = vmatprep.subr.mxu0 %v361_v35  ;;  %v191_v23 = vld [vmem:[%s4272_s0 + $0x588] sm:$0xff]  ;;  %v354_v27 = vld [vmem:[%s4271_s1 + $0x2a0] sm:$0xff]  ;;  %v192_v28 = vld [vmem:[%s4272_s0 + $0x590] sm:$0xff] }
  0x35   :  { %763 = vmatmul.mubr.f32.gmra.mxu1 %v80_v36  ;;  %1899 = vmatpush3.msra.mxu0 %v345_v37  ;;  %v371_v24 = vld [vmem:[%s4271_s1 + $0x328] sm:$0xff]  ;;  %v338_v29 = vld [vmem:[%s4271_s1 + $0x220] sm:$0xff]  ;;  %v209_v34 = vld [vmem:[%s4272_s0 + $0x618] sm:$0xff] }
  0x36   :  { %1978 = vmatprep.subr.mxu1 %v393_v38  ;;  %622 = vmatprep.mubr.f32.mxu0 %v95_v39  ;;  %v386_v30 = vld [vmem:[%s4271_s1 + $0x3a0] sm:$0xff]  ;;  %v207_v31 = vld [vmem:[%s4272_s0 + $0x608] sm:$0xff]  ;;  %v353_v35 = vld [vmem:[%s4271_s1 + $0x298] sm:$0xff] }
  0x37   :  { %1979 = vmatpush3.msra.mxu1 %v377_v40  ;;  %623 = vmatmul.mubr.f32.gmra.mxu0 %v94_v41  ;;  %v370_v32 = vld [vmem:[%s4271_s1 + $0x320] sm:$0xff]  ;;  %v208_v36 = vld [vmem:[%s4272_s0 + $0x610] sm:$0xff]  ;;  %v337_v37 = vld [vmem:[%s4271_s1 + $0x218] sm:$0xff] }
  0x38   :  { %767 = vmatprep.mubr.f32.mxu1 %v97_v42  ;;  %1900 = vmatprep.subr.mxu0 %v360_v43  ;;  %v206_v33 = vld [vmem:[%s4272_s0 + $0x600] sm:$0xff]  ;;  %v385_v38 = vld [vmem:[%s4271_s1 + $0x398] sm:$0xff]  ;;  %v223_v39 = vld [vmem:[%s4272_s0 + $0x688] sm:$0xff] }
  0x39   :  { %768 = vmatmul.mubr.f32.gmra.mxu1 %v96_v44  ;;  %1901 = vmatpush3.msra.mxu0 %v344_v45  ;;  %v369_v40 = vld [vmem:[%s4271_s1 + $0x318] sm:$0xff]  ;;  %v222_v41 = vld [vmem:[%s4272_s0 + $0x680] sm:$0xff]  ;;  %v352_v43 = vld [vmem:[%s4271_s1 + $0x290] sm:$0xff] }
  0x3a   :  { %1980 = vmatprep.subr.mxu1 %v392_v46  ;;  %627 = vmatprep.mubr.f32.mxu0 %v111_v47  ;;  %v225_v42 = vld [vmem:[%s4272_s0 + $0x698] sm:$0xff]  ;;  %v224_v44 = vld [vmem:[%s4272_s0 + $0x690] sm:$0xff]  ;;  %v239_v47 = vld [vmem:[%s4272_s0 + $0x708] sm:$0xff] }
  0x3b   :  { %1981 = vmatpush3.msra.mxu1 %v376_v48  ;;  %628 = vmatmul.mubr.f32.gmra.mxu0 %v110_v49  ;;  %v336_v45 = vld [vmem:[%s4271_s1 + $0x210] sm:$0xff]  ;;  %v238_v49 = vld [vmem:[%s4272_s0 + $0x700] sm:$0xff] }
  0x3c   :  { %772 = vmatprep.mubr.f32.mxu1 %v113_v50  ;;  %1902 = vmatprep.subr.mxu0 %v359_v51  ;;  %v384_v46 = vld [vmem:[%s4271_s1 + $0x390] sm:$0xff]  ;;  %v241_v50 = vld [vmem:[%s4272_s0 + $0x718] sm:$0xff]  ;;  %v351_v51 = vld [vmem:[%s4271_s1 + $0x288] sm:$0xff] }
  0x3d   :  { %773 = vmatmul.mubr.f32.gmra.mxu1 %v112_v52  ;;  %1903 = vmatpush3.msra.mxu0 %v343_v53  ;;  %v368_v48 = vld [vmem:[%s4271_s1 + $0x310] sm:$0xff]  ;;  %v335_v53 = vld [vmem:[%s4271_s1 + $0x208] sm:$0xff] }
  0x3e   :  { %1982 = vmatprep.subr.mxu1 %v391_v54  ;;  %632 = vmatprep.mubr.f32.mxu0 %v127_v55  ;;  %v240_v52 = vld [vmem:[%s4272_s0 + $0x710] sm:$0xff]  ;;  %v383_v54 = vld [vmem:[%s4271_s1 + $0x388] sm:$0xff] }
  0x3f   :  { %1983 = vmatpush3.msra.mxu1 %v375_v56  ;;  %633 = vmatmul.mubr.f32.gmra.mxu0 %v126_v57  ;;  %v255_v55 = vld [vmem:[%s4272_s0 + $0x788] sm:$0xff]  ;;  %v254_v57 = vld [vmem:[%s4272_s0 + $0x780] sm:$0xff] }
  0x40   :  { %777 = vmatprep.mubr.f32.mxu1 %v129_v58  ;;  %1904 = vmatprep.subr.mxu0 %v358_v59  ;;  %v367_v56 = vld [vmem:[%s4271_s1 + $0x308] sm:$0xff]  ;;  %v257_v58 = vld [vmem:[%s4272_s0 + $0x798] sm:$0xff]  ;;  %v350_v59 = vld [vmem:[%s4271_s1 + $0x280] sm:$0xff] }
  0x41   :  { %778 = vmatmul.mubr.f32.gmra.mxu1 %v128_v60  ;;  %1905 = vmatpush3.msra.mxu0 %v342_v61  ;;  %v256_v60 = vld [vmem:[%s4272_s0 + $0x790] sm:$0xff]  ;;  %v334_v61 = vld [vmem:[%s4271_s1 + $0x200] sm:$0xff] }
  0x42   :  { %1984 = vmatprep.subr.mxu1 %v390_v62  ;;  %637 = vmatprep.mubr.f32.mxu0 %v143_v63  ;;  %v382_v62 = vld [vmem:[%s4271_s1 + $0x380] sm:$0xff]  ;;  %v19_v63 = vld [vmem:[%s4272_s0 + $0x28] sm:$0xff] }
  0x43   :  { %1985 = vmatpush3.msra.mxu1 %v374_v0  ;;  %638 = vmatmul.mubr.f32.gmra.mxu0 %v142_v1  ;;  %v366_v0 = vld [vmem:[%s4271_s1 + $0x300] sm:$0xff] }
  0x44   :  { %782 = vmatprep.mubr.f32.mxu1 %v145_v2  ;;  %1906 = vmatprep.subr.mxu0 %v357_v3  ;;  %v18_v1 = vld [vmem:[%s4272_s0 + $0x20] sm:$0xff]  ;;  %v21_v2 = vld [vmem:[%s4272_s0 + $0x38] sm:$0xff] }
  0x45   :  { %783 = vmatmul.mubr.f32.gmra.mxu1 %v144_v4  ;;  %1907 = vmatpush3.msra.mxu0 %v341_v5  ;;  %v429_v3 = vld [vmem:[%s4271_s1 + $0x4f8] sm:$0xff]  ;;  %v20_v4 = vld [vmem:[%s4272_s0 + $0x30] sm:$0xff] }
  0x46   :  { %1986 = vmatprep.subr.mxu1 %v389_v6  ;;  %642 = vmatprep.mubr.f32.mxu0 %v159_v7  ;;  %v413_v5 = vld [vmem:[%s4271_s1 + $0x478] sm:$0xff]  ;;  %v35_v7 = vld [vmem:[%s4272_s0 + $0xa8] sm:$0xff] }
  0x47   :  { %1987 = vmatpush3.msra.mxu1 %v373_v8  ;;  %643 = vmatmul.mubr.f32.gmra.mxu0 %v158_v9  ;;  %v461_v6 = vld [vmem:[%s4271_s1 + $0x5f8] sm:$0xff]  ;;  %v34_v9 = vld [vmem:[%s4272_s0 + $0xa0] sm:$0xff] }
  0x48   :  { %787 = vmatprep.mubr.f32.mxu1 %v161_v10  ;;  %1908 = vmatprep.subr.mxu0 %v356_v11  ;;  %v445_v8 = vld [vmem:[%s4271_s1 + $0x578] sm:$0xff]  ;;  %v428_v11 = vld [vmem:[%s4271_s1 + $0x4f0] sm:$0xff] }
  0x49   :  { %788 = vmatmul.mubr.f32.gmra.mxu1 %v160_v12  ;;  %1909 = vmatpush3.msra.mxu0 %v340_v13  ;;  %v37_v10 = vld [vmem:[%s4272_s0 + $0xb8] sm:$0xff]  ;;  %v36_v12 = vld [vmem:[%s4272_s0 + $0xb0] sm:$0xff] }
  0x4a   :  { %1988 = vmatprep.subr.mxu1 %v388_v14  ;;  %647 = vmatprep.mubr.f32.mxu0 %v175_v15  ;;  %v412_v13 = vld [vmem:[%s4271_s1 + $0x470] sm:$0xff]  ;;  %v51_v15 = vld [vmem:[%s4272_s0 + $0x128] sm:$0xff] }
  0x4b   :  { %1989 = vmatpush3.msra.mxu1 %v372_v16  ;;  %648 = vmatmul.mubr.f32.gmra.mxu0 %v174_v17  ;;  %v460_v14 = vld [vmem:[%s4271_s1 + $0x5f0] sm:$0xff]  ;;  %v50_v17 = vld [vmem:[%s4272_s0 + $0x120] sm:$0xff] }
  0x4c   :  { %792 = vmatprep.mubr.f32.mxu1 %v177_v18  ;;  %1910 = vmatprep.subr.mxu0 %v355_v19  ;;  %v444_v16 = vld [vmem:[%s4271_s1 + $0x570] sm:$0xff]  ;;  %v53_v18 = vld [vmem:[%s4272_s0 + $0x138] sm:$0xff]  ;;  %v427_v19 = vld [vmem:[%s4271_s1 + $0x4e8] sm:$0xff] }
  0x4d   :  { %793 = vmatmul.mubr.f32.gmra.mxu1 %v176_v20  ;;  %1911 = vmatpush3.msra.mxu0 %v339_v21  ;;  %v52_v20 = vld [vmem:[%s4272_s0 + $0x130] sm:$0xff]  ;;  %v411_v21 = vld [vmem:[%s4271_s1 + $0x468] sm:$0xff] }
  0x4e   :  { %1990 = vmatprep.subr.mxu1 %v387_v22  ;;  %652 = vmatprep.mubr.f32.mxu0 %v191_v23  ;;  %v459_v22 = vld [vmem:[%s4271_s1 + $0x5e8] sm:$0xff] }
  0x4f   :  { %1991 = vmatpush3.msra.mxu1 %v371_v24  ;;  %653 = vmatmul.mubr.f32.gmra.mxu0 %v190_v25  ;;  %v67_v23 = vld [vmem:[%s4272_s0 + $0x1a8] sm:$0xff]  ;;  %v66_v25 = vld [vmem:[%s4272_s0 + $0x1a0] sm:$0xff] }
  0x50   :  { %797 = vmatprep.mubr.f32.mxu1 %v193_v26  ;;  %1912 = vmatprep.subr.mxu0 %v354_v27  ;;  %v443_v24 = vld [vmem:[%s4271_s1 + $0x568] sm:$0xff]  ;;  %v69_v26 = vld [vmem:[%s4272_s0 + $0x1b8] sm:$0xff]  ;;  %v426_v27 = vld [vmem:[%s4271_s1 + $0x4e0] sm:$0xff] }
  0x51   :  { %798 = vmatmul.mubr.f32.gmra.mxu1 %v192_v28  ;;  %1913 = vmatpush3.msra.mxu0 %v338_v29  ;;  %v68_v28 = vld [vmem:[%s4272_s0 + $0x1b0] sm:$0xff]  ;;  %v410_v29 = vld [vmem:[%s4271_s1 + $0x460] sm:$0xff] }
  0x52   :  { %1992 = vmatprep.subr.mxu1 %v386_v30  ;;  %657 = vmatprep.mubr.f32.mxu0 %v207_v31  ;;  %v458_v30 = vld [vmem:[%s4271_s1 + $0x5e0] sm:$0xff]  ;;  %v83_v31 = vld [vmem:[%s4272_s0 + $0x228] sm:$0xff] }
  0x53   :  { %1993 = vmatpush3.msra.mxu1 %v370_v32  ;;  %658 = vmatmul.mubr.f32.gmra.mxu0 %v206_v33  ;;  %v442_v32 = vld [vmem:[%s4271_s1 + $0x560] sm:$0xff] }
  0x54   :  { %802 = vmatprep.mubr.f32.mxu1 %v209_v34  ;;  %1914 = vmatprep.subr.mxu0 %v353_v35  ;;  %v82_v33 = vld [vmem:[%s4272_s0 + $0x220] sm:$0xff]  ;;  %v85_v34 = vld [vmem:[%s4272_s0 + $0x238] sm:$0xff] }
  0x55   :  { %803 = vmatmul.mubr.f32.gmra.mxu1 %v208_v36  ;;  %1915 = vmatpush3.msra.mxu0 %v337_v37  ;;  %v425_v35 = vld [vmem:[%s4271_s1 + $0x4d8] sm:$0xff]  ;;  %v84_v36 = vld [vmem:[%s4272_s0 + $0x230] sm:$0xff] }
  0x56   :  { %1994 = vmatprep.subr.mxu1 %v385_v38  ;;  %662 = vmatprep.mubr.f32.mxu0 %v223_v39  ;;  %v409_v37 = vld [vmem:[%s4271_s1 + $0x458] sm:$0xff]  ;;  %v99_v39 = vld [vmem:[%s4272_s0 + $0x2a8] sm:$0xff] }
  0x57   :  { %1995 = vmatpush3.msra.mxu1 %v369_v40  ;;  %663 = vmatmul.mubr.f32.gmra.mxu0 %v222_v41  ;;  %v457_v38 = vld [vmem:[%s4271_s1 + $0x5d8] sm:$0xff]  ;;  %v98_v41 = vld [vmem:[%s4272_s0 + $0x2a0] sm:$0xff] }
  0x58   :  { %807 = vmatprep.mubr.f32.mxu1 %v225_v42  ;;  %1916 = vmatprep.subr.mxu0 %v352_v43  ;;  %v441_v40 = vld [vmem:[%s4271_s1 + $0x558] sm:$0xff]  ;;  %v424_v43 = vld [vmem:[%s4271_s1 + $0x4d0] sm:$0xff] }
  0x59   :  { %808 = vmatmul.mubr.f32.gmra.mxu1 %v224_v44  ;;  %1917 = vmatpush3.msra.mxu0 %v336_v45  ;;  %v101_v42 = vld [vmem:[%s4272_s0 + $0x2b8] sm:$0xff]  ;;  %v100_v44 = vld [vmem:[%s4272_s0 + $0x2b0] sm:$0xff] }
  0x5a   :  { %1996 = vmatprep.subr.mxu1 %v384_v46  ;;  %667 = vmatprep.mubr.f32.mxu0 %v239_v47  ;;  %v408_v45 = vld [vmem:[%s4271_s1 + $0x450] sm:$0xff]  ;;  %v115_v47 = vld [vmem:[%s4272_s0 + $0x328] sm:$0xff] }
  0x5b   :  { %1997 = vmatpush3.msra.mxu1 %v368_v48  ;;  %668 = vmatmul.mubr.f32.gmra.mxu0 %v238_v49  ;;  %v456_v46 = vld [vmem:[%s4271_s1 + $0x5d0] sm:$0xff]  ;;  %v114_v49 = vld [vmem:[%s4272_s0 + $0x320] sm:$0xff] }
  0x5c   :  { %812 = vmatprep.mubr.f32.mxu1 %v241_v50  ;;  %1918 = vmatprep.subr.mxu0 %v351_v51  ;;  %v440_v48 = vld [vmem:[%s4271_s1 + $0x550] sm:$0xff]  ;;  %v117_v50 = vld [vmem:[%s4272_s0 + $0x338] sm:$0xff]  ;;  %v423_v51 = vld [vmem:[%s4271_s1 + $0x4c8] sm:$0xff] }
  0x5d   :  { %813 = vmatmul.mubr.f32.gmra.mxu1 %v240_v52  ;;  %1919 = vmatpush3.msra.mxu0 %v335_v53  ;;  %v116_v52 = vld [vmem:[%s4272_s0 + $0x330] sm:$0xff]  ;;  %v407_v53 = vld [vmem:[%s4271_s1 + $0x448] sm:$0xff] }
  0x5e   :  { %1998 = vmatprep.subr.mxu1 %v383_v54  ;;  %672 = vmatprep.mubr.f32.mxu0 %v255_v55  ;;  %v455_v54 = vld [vmem:[%s4271_s1 + $0x5c8] sm:$0xff] }
  0x5f   :  { %1999 = vmatpush3.msra.mxu1 %v367_v56  ;;  %673 = vmatmul.mubr.f32.gmra.mxu0 %v254_v57  ;;  %v131_v55 = vld [vmem:[%s4272_s0 + $0x3a8] sm:$0xff]  ;;  %v130_v57 = vld [vmem:[%s4272_s0 + $0x3a0] sm:$0xff] }
  0x60   :  { %817 = vmatprep.mubr.f32.mxu1 %v257_v58  ;;  %1920 = vmatprep.subr.mxu0 %v350_v59  ;;  %v439_v56 = vld [vmem:[%s4271_s1 + $0x548] sm:$0xff]  ;;  %v133_v58 = vld [vmem:[%s4272_s0 + $0x3b8] sm:$0xff]  ;;  %v422_v59 = vld [vmem:[%s4271_s1 + $0x4c0] sm:$0xff] }
  0x61   :  { %818 = vmatmul.mubr.f32.gmra.mxu1 %v256_v60  ;;  %1921 = vmatpush3.msra.mxu0 %v334_v61  ;;  %v132_v60 = vld [vmem:[%s4272_s0 + $0x3b0] sm:$0xff]  ;;  %v406_v61 = vld [vmem:[%s4271_s1 + $0x440] sm:$0xff] }
  0x62   :  { %2000 = vmatprep.subr.mxu1 %v382_v62  ;;  %887 = vmatprep.mubr.f32.mxu0 %v19_v63  ;;  %v454_v62 = vld [vmem:[%s4271_s1 + $0x5c0] sm:$0xff]  ;;  %v147_v63 = vld [vmem:[%s4272_s0 + $0x428] sm:$0xff] }
  0x63   :  { %2001 = vmatpush3.msra.mxu1 %v366_v0  ;;  %888 = vmatmul.mubr.f32.vlgmr.msra.gmra.mxu0 %v18_v1  ;;  %v438_v0 = vld [vmem:[%s4271_s1 + $0x540] sm:$0xff] }
  0x64   :  { %1032 = vmatprep.mubr.f32.mxu1 %v21_v2  ;;  %2050 = vmatprep.subr.mxu0 %v429_v3  ;;  %v146_v1 = vld [vmem:[%s4272_s0 + $0x420] sm:$0xff]  ;;  %v149_v2 = vld [vmem:[%s4272_s0 + $0x438] sm:$0xff] }
  0x65   :  { %1033 = vmatmul.mubr.f32.vlgmr.msra.gmra.mxu1 %v20_v4  ;;  %2051 = vmatpush3.msra.mxu0 %v413_v5  ;;  %v421_v3 = vld [vmem:[%s4271_s1 + $0x4b8] sm:$0xff]  ;;  %v148_v4 = vld [vmem:[%s4272_s0 + $0x430] sm:$0xff] }
  0x66   :  { %2130 = vmatprep.subr.mxu1 %v461_v6  ;;  %892 = vmatprep.mubr.f32.mxu0 %v35_v7  ;;  %v405_v5 = vld [vmem:[%s4271_s1 + $0x438] sm:$0xff]  ;;  %v163_v7 = vld [vmem:[%s4272_s0 + $0x4a8] sm:$0xff] }
  0x67   :  { %2131 = vmatpush3.msra.mxu1 %v445_v8  ;;  %893 = vmatmul.mubr.f32.gmra.mxu0 %v34_v9  ;;  %v453_v6 = vld [vmem:[%s4271_s1 + $0x5b8] sm:$0xff]  ;;  %v162_v9 = vld [vmem:[%s4272_s0 + $0x4a0] sm:$0xff] }
  0x68   :  { %1037 = vmatprep.mubr.f32.mxu1 %v37_v10  ;;  %2052 = vmatprep.subr.mxu0 %v428_v11  ;;  %v437_v8 = vld [vmem:[%s4271_s1 + $0x538] sm:$0xff]  ;;  %v420_v11 = vld [vmem:[%s4271_s1 + $0x4b0] sm:$0xff] }
  0x69   :  { %1038 = vmatmul.mubr.f32.gmra.mxu1 %v36_v12  ;;  %2053 = vmatpush3.msra.mxu0 %v412_v13  ;;  %v165_v10 = vld [vmem:[%s4272_s0 + $0x4b8] sm:$0xff]  ;;  %v164_v12 = vld [vmem:[%s4272_s0 + $0x4b0] sm:$0xff] }
  0x6a   :  { %2132 = vmatprep.subr.mxu1 %v460_v14  ;;  %897 = vmatprep.mubr.f32.mxu0 %v51_v15  ;;  %v404_v13 = vld [vmem:[%s4271_s1 + $0x430] sm:$0xff]  ;;  %v179_v15 = vld [vmem:[%s4272_s0 + $0x528] sm:$0xff] }
  0x6b   :  { %2133 = vmatpush3.msra.mxu1 %v444_v16  ;;  %898 = vmatmul.mubr.f32.gmra.mxu0 %v50_v17  ;;  %v452_v14 = vld [vmem:[%s4271_s1 + $0x5b0] sm:$0xff]  ;;  %v178_v17 = vld [vmem:[%s4272_s0 + $0x520] sm:$0xff] }
  0x6c   :  { %1042 = vmatprep.mubr.f32.mxu1 %v53_v18  ;;  %2054 = vmatprep.subr.mxu0 %v427_v19  ;;  %v436_v16 = vld [vmem:[%s4271_s1 + $0x530] sm:$0xff]  ;;  %v181_v18 = vld [vmem:[%s4272_s0 + $0x538] sm:$0xff]  ;;  %v419_v19 = vld [vmem:[%s4271_s1 + $0x4a8] sm:$0xff] }
  0x6d   :  { %1043 = vmatmul.mubr.f32.gmra.mxu1 %v52_v20  ;;  %2055 = vmatpush3.msra.mxu0 %v411_v21  ;;  %v180_v20 = vld [vmem:[%s4272_s0 + $0x530] sm:$0xff]  ;;  %v403_v21 = vld [vmem:[%s4271_s1 + $0x428] sm:$0xff] }
  0x6e   :  { %2134 = vmatprep.subr.mxu1 %v459_v22  ;;  %902 = vmatprep.mubr.f32.mxu0 %v67_v23  ;;  %v451_v22 = vld [vmem:[%s4271_s1 + $0x5a8] sm:$0xff] }
  0x6f   :  { %2135 = vmatpush3.msra.mxu1 %v443_v24  ;;  %903 = vmatmul.mubr.f32.gmra.mxu0 %v66_v25  ;;  %v195_v23 = vld [vmem:[%s4272_s0 + $0x5a8] sm:$0xff]  ;;  %v194_v25 = vld [vmem:[%s4272_s0 + $0x5a0] sm:$0xff] }
  0x70   :  { %1047 = vmatprep.mubr.f32.mxu1 %v69_v26  ;;  %2056 = vmatprep.subr.mxu0 %v426_v27  ;;  %v435_v24 = vld [vmem:[%s4271_s1 + $0x528] sm:$0xff]  ;;  %v197_v26 = vld [vmem:[%s4272_s0 + $0x5b8] sm:$0xff]  ;;  %v418_v27 = vld [vmem:[%s4271_s1 + $0x4a0] sm:$0xff] }
  0x71   :  { %1048 = vmatmul.mubr.f32.gmra.mxu1 %v68_v28  ;;  %2057 = vmatpush3.msra.mxu0 %v410_v29  ;;  %v196_v28 = vld [vmem:[%s4272_s0 + $0x5b0] sm:$0xff]  ;;  %v402_v29 = vld [vmem:[%s4271_s1 + $0x420] sm:$0xff] }
  0x72   :  { %2136 = vmatprep.subr.mxu1 %v458_v30  ;;  %907 = vmatprep.mubr.f32.mxu0 %v83_v31  ;;  %v450_v30 = vld [vmem:[%s4271_s1 + $0x5a0] sm:$0xff]  ;;  %v211_v31 = vld [vmem:[%s4272_s0 + $0x628] sm:$0xff] }
  0x73   :  { %2137 = vmatpush3.msra.mxu1 %v442_v32  ;;  %908 = vmatmul.mubr.f32.gmra.mxu0 %v82_v33  ;;  %v434_v32 = vld [vmem:[%s4271_s1 + $0x520] sm:$0xff] }
  0x74   :  { %1052 = vmatprep.mubr.f32.mxu1 %v85_v34  ;;  %2058 = vmatprep.subr.mxu0 %v425_v35  ;;  %v210_v33 = vld [vmem:[%s4272_s0 + $0x620] sm:$0xff]  ;;  %v213_v34 = vld [vmem:[%s4272_s0 + $0x638] sm:$0xff] }
  0x75   :  { %1053 = vmatmul.mubr.f32.gmra.mxu1 %v84_v36  ;;  %2059 = vmatpush3.msra.mxu0 %v409_v37  ;;  %v417_v35 = vld [vmem:[%s4271_s1 + $0x498] sm:$0xff]  ;;  %v212_v36 = vld [vmem:[%s4272_s0 + $0x630] sm:$0xff] }
  0x76   :  { %2138 = vmatprep.subr.mxu1 %v457_v38  ;;  %912 = vmatprep.mubr.f32.mxu0 %v99_v39  ;;  %v401_v37 = vld [vmem:[%s4271_s1 + $0x418] sm:$0xff]  ;;  %v227_v39 = vld [vmem:[%s4272_s0 + $0x6a8] sm:$0xff] }
  0x77   :  { %2139 = vmatpush3.msra.mxu1 %v441_v40  ;;  %913 = vmatmul.mubr.f32.gmra.mxu0 %v98_v41  ;;  %v449_v38 = vld [vmem:[%s4271_s1 + $0x598] sm:$0xff]  ;;  %v226_v41 = vld [vmem:[%s4272_s0 + $0x6a0] sm:$0xff] }
  0x78   :  { %1057 = vmatprep.mubr.f32.mxu1 %v101_v42  ;;  %2060 = vmatprep.subr.mxu0 %v424_v43  ;;  %v433_v40 = vld [vmem:[%s4271_s1 + $0x518] sm:$0xff]  ;;  %v416_v43 = vld [vmem:[%s4271_s1 + $0x490] sm:$0xff] }
  0x79   :  { %1058 = vmatmul.mubr.f32.gmra.mxu1 %v100_v44  ;;  %2061 = vmatpush3.msra.mxu0 %v408_v45  ;;  %v229_v42 = vld [vmem:[%s4272_s0 + $0x6b8] sm:$0xff]  ;;  %v228_v44 = vld [vmem:[%s4272_s0 + $0x6b0] sm:$0xff] }
  0x7a   :  { %2140 = vmatprep.subr.mxu1 %v456_v46  ;;  %917 = vmatprep.mubr.f32.mxu0 %v115_v47  ;;  %v400_v45 = vld [vmem:[%s4271_s1 + $0x410] sm:$0xff]  ;;  %v243_v47 = vld [vmem:[%s4272_s0 + $0x728] sm:$0xff] }
  0x7b   :  { %2141 = vmatpush3.msra.mxu1 %v440_v48  ;;  %918 = vmatmul.mubr.f32.gmra.mxu0 %v114_v49  ;;  %v448_v46 = vld [vmem:[%s4271_s1 + $0x590] sm:$0xff]  ;;  %v242_v49 = vld [vmem:[%s4272_s0 + $0x720] sm:$0xff] }
  0x7c   :  { %1062 = vmatprep.mubr.f32.mxu1 %v117_v50  ;;  %2062 = vmatprep.subr.mxu0 %v423_v51  ;;  %v432_v48 = vld [vmem:[%s4271_s1 + $0x510] sm:$0xff]  ;;  %v245_v50 = vld [vmem:[%s4272_s0 + $0x738] sm:$0xff]  ;;  %v415_v51 = vld [vmem:[%s4271_s1 + $0x488] sm:$0xff] }
  0x7d   :  { %1063 = vmatmul.mubr.f32.gmra.mxu1 %v116_v52  ;;  %2063 = vmatpush3.msra.mxu0 %v407_v53  ;;  %v244_v52 = vld [vmem:[%s4272_s0 + $0x730] sm:$0xff]  ;;  %v399_v53 = vld [vmem:[%s4271_s1 + $0x408] sm:$0xff] }
  0x7e   :  { %2142 = vmatprep.subr.mxu1 %v455_v54  ;;  %922 = vmatprep.mubr.f32.mxu0 %v131_v55  ;;  %v447_v54 = vld [vmem:[%s4271_s1 + $0x588] sm:$0xff] }
  0x7f   :  { %2143 = vmatpush3.msra.mxu1 %v439_v56  ;;  %923 = vmatmul.mubr.f32.gmra.mxu0 %v130_v57  ;;  %v259_v55 = vld [vmem:[%s4272_s0 + $0x7a8] sm:$0xff]  ;;  %v258_v57 = vld [vmem:[%s4272_s0 + $0x7a0] sm:$0xff] }
  0x80   :  { %1067 = vmatprep.mubr.f32.mxu1 %v133_v58  ;;  %2064 = vmatprep.subr.mxu0 %v422_v59  ;;  %v431_v56 = vld [vmem:[%s4271_s1 + $0x508] sm:$0xff]  ;;  %v261_v58 = vld [vmem:[%s4272_s0 + $0x7b8] sm:$0xff]  ;;  %v414_v59 = vld [vmem:[%s4271_s1 + $0x480] sm:$0xff] }
  0x81   :  { %1068 = vmatmul.mubr.f32.gmra.mxu1 %v132_v60  ;;  %2065 = vmatpush3.msra.mxu0 %v406_v61  ;;  %v260_v60 = vld [vmem:[%s4272_s0 + $0x7b0] sm:$0xff]  ;;  %v398_v61 = vld [vmem:[%s4271_s1 + $0x400] sm:$0xff] }
  0x82   :  { %2144 = vmatprep.subr.mxu1 %v454_v62  ;;  %927 = vmatprep.mubr.f32.mxu0 %v147_v63  ;;  %v446_v62 = vld [vmem:[%s4271_s1 + $0x580] sm:$0xff]  ;;  %v23_v63 = vld [vmem:[%s4272_s0 + $0x48] sm:$0xff] }
  0x83   :  { %2145 = vmatpush3.msra.mxu1 %v438_v0  ;;  %928 = vmatmul.mubr.f32.gmra.mxu0 %v146_v1  ;;  %v430_v0 = vld [vmem:[%s4271_s1 + $0x500] sm:$0xff] }
  0x84   :  { %1072 = vmatprep.mubr.f32.mxu1 %v149_v2  ;;  %2066 = vmatprep.subr.mxu0 %v421_v3  ;;  %v22_v1 = vld [vmem:[%s4272_s0 + $0x40] sm:$0xff]  ;;  %v25_v2 = vld [vmem:[%s4272_s0 + $0x58] sm:$0xff] }
  0x85   :  { %1073 = vmatmul.mubr.f32.gmra.mxu1 %v148_v4  ;;  %2067 = vmatpush3.msra.mxu0 %v405_v5  ;;  %v493_v3 = vld [vmem:[%s4271_s1 + $0x6f8] sm:$0xff]  ;;  %v24_v4 = vld [vmem:[%s4272_s0 + $0x50] sm:$0xff] }
  0x86   :  { %2146 = vmatprep.subr.mxu1 %v453_v6  ;;  %932 = vmatprep.mubr.f32.mxu0 %v163_v7  ;;  %v477_v5 = vld [vmem:[%s4271_s1 + $0x678] sm:$0xff]  ;;  %v39_v7 = vld [vmem:[%s4272_s0 + $0xc8] sm:$0xff] }
  0x87   :  { %2147 = vmatpush3.msra.mxu1 %v437_v8  ;;  %933 = vmatmul.mubr.f32.gmra.mxu0 %v162_v9  ;;  %v525_v6 = vld [vmem:[%s4271_s1 + $0x7f8] sm:$0xff]  ;;  %v38_v9 = vld [vmem:[%s4272_s0 + $0xc0] sm:$0xff] }
  0x88   :  { %1077 = vmatprep.mubr.f32.mxu1 %v165_v10  ;;  %2068 = vmatprep.subr.mxu0 %v420_v11  ;;  %v509_v8 = vld [vmem:[%s4271_s1 + $0x778] sm:$0xff]  ;;  %v492_v11 = vld [vmem:[%s4271_s1 + $0x6f0] sm:$0xff] }
  0x89   :  { %1078 = vmatmul.mubr.f32.gmra.mxu1 %v164_v12  ;;  %2069 = vmatpush3.msra.mxu0 %v404_v13  ;;  %v41_v10 = vld [vmem:[%s4272_s0 + $0xd8] sm:$0xff]  ;;  %v40_v12 = vld [vmem:[%s4272_s0 + $0xd0] sm:$0xff] }
  0x8a   :  { %2148 = vmatprep.subr.mxu1 %v452_v14  ;;  %937 = vmatprep.mubr.f32.mxu0 %v179_v15  ;;  %v476_v13 = vld [vmem:[%s4271_s1 + $0x670] sm:$0xff]  ;;  %v55_v15 = vld [vmem:[%s4272_s0 + $0x148] sm:$0xff] }
  0x8b   :  { %2149 = vmatpush3.msra.mxu1 %v436_v16  ;;  %938 = vmatmul.mubr.f32.gmra.mxu0 %v178_v17  ;;  %v524_v14 = vld [vmem:[%s4271_s1 + $0x7f0] sm:$0xff]  ;;  %v54_v17 = vld [vmem:[%s4272_s0 + $0x140] sm:$0xff] }
  0x8c   :  { %1082 = vmatprep.mubr.f32.mxu1 %v181_v18  ;;  %2070 = vmatprep.subr.mxu0 %v419_v19  ;;  %v508_v16 = vld [vmem:[%s4271_s1 + $0x770] sm:$0xff]  ;;  %v57_v18 = vld [vmem:[%s4272_s0 + $0x158] sm:$0xff]  ;;  %v491_v19 = vld [vmem:[%s4271_s1 + $0x6e8] sm:$0xff] }
  0x8d   :  { %1083 = vmatmul.mubr.f32.gmra.mxu1 %v180_v20  ;;  %2071 = vmatpush3.msra.mxu0 %v403_v21  ;;  %v56_v20 = vld [vmem:[%s4272_s0 + $0x150] sm:$0xff]  ;;  %v475_v21 = vld [vmem:[%s4271_s1 + $0x668] sm:$0xff] }
  0x8e   :  { %2150 = vmatprep.subr.mxu1 %v451_v22  ;;  %942 = vmatprep.mubr.f32.mxu0 %v195_v23  ;;  %v523_v22 = vld [vmem:[%s4271_s1 + $0x7e8] sm:$0xff] }
  0x8f   :  { %2151 = vmatpush3.msra.mxu1 %v435_v24  ;;  %943 = vmatmul.mubr.f32.gmra.mxu0 %v194_v25  ;;  %v71_v23 = vld [vmem:[%s4272_s0 + $0x1c8] sm:$0xff]  ;;  %v70_v25 = vld [vmem:[%s4272_s0 + $0x1c0] sm:$0xff] }
  0x90   :  { %1087 = vmatprep.mubr.f32.mxu1 %v197_v26  ;;  %2072 = vmatprep.subr.mxu0 %v418_v27  ;;  %v507_v24 = vld [vmem:[%s4271_s1 + $0x768] sm:$0xff]  ;;  %v73_v26 = vld [vmem:[%s4272_s0 + $0x1d8] sm:$0xff]  ;;  %v490_v27 = vld [vmem:[%s4271_s1 + $0x6e0] sm:$0xff] }
  0x91   :  { %1088 = vmatmul.mubr.f32.gmra.mxu1 %v196_v28  ;;  %2073 = vmatpush3.msra.mxu0 %v402_v29  ;;  %v72_v28 = vld [vmem:[%s4272_s0 + $0x1d0] sm:$0xff]  ;;  %v474_v29 = vld [vmem:[%s4271_s1 + $0x660] sm:$0xff] }
  0x92   :  { %2152 = vmatprep.subr.mxu1 %v450_v30  ;;  %947 = vmatprep.mubr.f32.mxu0 %v211_v31  ;;  %v522_v30 = vld [vmem:[%s4271_s1 + $0x7e0] sm:$0xff]  ;;  %v87_v31 = vld [vmem:[%s4272_s0 + $0x248] sm:$0xff] }
  0x93   :  { %2153 = vmatpush3.msra.mxu1 %v434_v32  ;;  %948 = vmatmul.mubr.f32.gmra.mxu0 %v210_v33  ;;  %v506_v32 = vld [vmem:[%s4271_s1 + $0x760] sm:$0xff] }
  0x94   :  { %1092 = vmatprep.mubr.f32.mxu1 %v213_v34  ;;  %2074 = vmatprep.subr.mxu0 %v417_v35  ;;  %v86_v33 = vld [vmem:[%s4272_s0 + $0x240] sm:$0xff]  ;;  %v89_v34 = vld [vmem:[%s4272_s0 + $0x258] sm:$0xff] }
  0x95   :  { %1093 = vmatmul.mubr.f32.gmra.mxu1 %v212_v36  ;;  %2075 = vmatpush3.msra.mxu0 %v401_v37  ;;  %v489_v35 = vld [vmem:[%s4271_s1 + $0x6d8] sm:$0xff]  ;;  %v88_v36 = vld [vmem:[%s4272_s0 + $0x250] sm:$0xff] }
  0x96   :  { %2154 = vmatprep.subr.mxu1 %v449_v38  ;;  %952 = vmatprep.mubr.f32.mxu0 %v227_v39  ;;  %v473_v37 = vld [vmem:[%s4271_s1 + $0x658] sm:$0xff]  ;;  %v103_v39 = vld [vmem:[%s4272_s0 + $0x2c8] sm:$0xff] }
  0x97   :  { %2155 = vmatpush3.msra.mxu1 %v433_v40  ;;  %953 = vmatmul.mubr.f32.gmra.mxu0 %v226_v41  ;;  %v521_v38 = vld [vmem:[%s4271_s1 + $0x7d8] sm:$0xff]  ;;  %v102_v41 = vld [vmem:[%s4272_s0 + $0x2c0] sm:$0xff] }
  0x98   :  { %1097 = vmatprep.mubr.f32.mxu1 %v229_v42  ;;  %2076 = vmatprep.subr.mxu0 %v416_v43  ;;  %v505_v40 = vld [vmem:[%s4271_s1 + $0x758] sm:$0xff]  ;;  %v488_v43 = vld [vmem:[%s4271_s1 + $0x6d0] sm:$0xff] }
  0x99   :  { %1098 = vmatmul.mubr.f32.gmra.mxu1 %v228_v44  ;;  %2077 = vmatpush3.msra.mxu0 %v400_v45  ;;  %v105_v42 = vld [vmem:[%s4272_s0 + $0x2d8] sm:$0xff]  ;;  %v104_v44 = vld [vmem:[%s4272_s0 + $0x2d0] sm:$0xff] }
  0x9a   :  { %2156 = vmatprep.subr.mxu1 %v448_v46  ;;  %957 = vmatprep.mubr.f32.mxu0 %v243_v47  ;;  %v472_v45 = vld [vmem:[%s4271_s1 + $0x650] sm:$0xff]  ;;  %v119_v47 = vld [vmem:[%s4272_s0 + $0x348] sm:$0xff] }
  0x9b   :  { %2157 = vmatpush3.msra.mxu1 %v432_v48  ;;  %958 = vmatmul.mubr.f32.gmra.mxu0 %v242_v49  ;;  %v520_v46 = vld [vmem:[%s4271_s1 + $0x7d0] sm:$0xff]  ;;  %v118_v49 = vld [vmem:[%s4272_s0 + $0x340] sm:$0xff] }
  0x9c   :  { %1102 = vmatprep.mubr.f32.mxu1 %v245_v50  ;;  %2078 = vmatprep.subr.mxu0 %v415_v51  ;;  %v504_v48 = vld [vmem:[%s4271_s1 + $0x750] sm:$0xff]  ;;  %v121_v50 = vld [vmem:[%s4272_s0 + $0x358] sm:$0xff]  ;;  %v487_v51 = vld [vmem:[%s4271_s1 + $0x6c8] sm:$0xff] }
  0x9d   :  { %1103 = vmatmul.mubr.f32.gmra.mxu1 %v244_v52  ;;  %2079 = vmatpush3.msra.mxu0 %v399_v53  ;;  %v120_v52 = vld [vmem:[%s4272_s0 + $0x350] sm:$0xff]  ;;  %v471_v53 = vld [vmem:[%s4271_s1 + $0x648] sm:$0xff] }
  0x9e   :  { %2158 = vmatprep.subr.mxu1 %v447_v54  ;;  %962 = vmatprep.mubr.f32.mxu0 %v259_v55  ;;  %v519_v54 = vld [vmem:[%s4271_s1 + $0x7c8] sm:$0xff] }
  0x9f   :  { %2159 = vmatpush3.msra.mxu1 %v431_v56  ;;  %963 = vmatmul.mubr.f32.gmra.mxu0 %v258_v57  ;;  %v135_v55 = vld [vmem:[%s4272_s0 + $0x3c8] sm:$0xff]  ;;  %v134_v57 = vld [vmem:[%s4272_s0 + $0x3c0] sm:$0xff] }
  0xa0   :  { %1107 = vmatprep.mubr.f32.mxu1 %v261_v58  ;;  %2080 = vmatprep.subr.mxu0 %v414_v59  ;;  %v503_v56 = vld [vmem:[%s4271_s1 + $0x748] sm:$0xff]  ;;  %v137_v58 = vld [vmem:[%s4272_s0 + $0x3d8] sm:$0xff]  ;;  %v486_v59 = vld [vmem:[%s4271_s1 + $0x6c0] sm:$0xff] }
  0xa1   :  { %1108 = vmatmul.mubr.f32.gmra.mxu1 %v260_v60  ;;  %2081 = vmatpush3.msra.mxu0 %v398_v61  ;;  %v136_v60 = vld [vmem:[%s4272_s0 + $0x3d0] sm:$0xff]  ;;  %v470_v61 = vld [vmem:[%s4271_s1 + $0x640] sm:$0xff] }
  0xa2   :  { %2160 = vmatprep.subr.mxu1 %v446_v62  ;;  %1177 = vmatprep.mubr.f32.mxu0 %v23_v63  ;;  %v518_v62 = vld [vmem:[%s4271_s1 + $0x7c0] sm:$0xff]  ;;  %v151_v63 = vld [vmem:[%s4272_s0 + $0x448] sm:$0xff] }
  0xa3   :  { %2161 = vmatpush3.msra.mxu1 %v430_v0  ;;  %1178 = vmatmul.mubr.f32.vlgmr.msra.gmra.mxu0 %v22_v1  ;;  %v502_v0 = vld [vmem:[%s4271_s1 + $0x740] sm:$0xff] }
  0xa4   :  { %1322 = vmatprep.mubr.f32.mxu1 %v25_v2  ;;  %2210 = vmatprep.subr.mxu0 %v493_v3  ;;  %v150_v1 = vld [vmem:[%s4272_s0 + $0x440] sm:$0xff]  ;;  %v153_v2 = vld [vmem:[%s4272_s0 + $0x458] sm:$0xff] }
  0xa5   :  { %1323 = vmatmul.mubr.f32.vlgmr.msra.gmra.mxu1 %v24_v4  ;;  %2211 = vmatpush3.msra.mxu0 %v477_v5  ;;  %v485_v3 = vld [vmem:[%s4271_s1 + $0x6b8] sm:$0xff]  ;;  %v152_v4 = vld [vmem:[%s4272_s0 + $0x450] sm:$0xff] }
  0xa6   :  { %2290 = vmatprep.subr.mxu1 %v525_v6  ;;  %1182 = vmatprep.mubr.f32.mxu0 %v39_v7  ;;  %v469_v5 = vld [vmem:[%s4271_s1 + $0x638] sm:$0xff]  ;;  %v167_v7 = vld [vmem:[%s4272_s0 + $0x4c8] sm:$0xff] }
  0xa7   :  { %2291 = vmatpush3.msra.mxu1 %v509_v8  ;;  %1183 = vmatmul.mubr.f32.gmra.mxu0 %v38_v9  ;;  %v517_v6 = vld [vmem:[%s4271_s1 + $0x7b8] sm:$0xff]  ;;  %v166_v9 = vld [vmem:[%s4272_s0 + $0x4c0] sm:$0xff] }
  0xa8   :  { %1327 = vmatprep.mubr.f32.mxu1 %v41_v10  ;;  %2212 = vmatprep.subr.mxu0 %v492_v11  ;;  %v501_v8 = vld [vmem:[%s4271_s1 + $0x738] sm:$0xff]  ;;  %v484_v11 = vld [vmem:[%s4271_s1 + $0x6b0] sm:$0xff] }
  0xa9   :  { %1328 = vmatmul.mubr.f32.gmra.mxu1 %v40_v12  ;;  %2213 = vmatpush3.msra.mxu0 %v476_v13  ;;  %v169_v10 = vld [vmem:[%s4272_s0 + $0x4d8] sm:$0xff]  ;;  %v168_v12 = vld [vmem:[%s4272_s0 + $0x4d0] sm:$0xff] }
  0xaa   :  { %2292 = vmatprep.subr.mxu1 %v524_v14  ;;  %1187 = vmatprep.mubr.f32.mxu0 %v55_v15  ;;  %v468_v13 = vld [vmem:[%s4271_s1 + $0x630] sm:$0xff]  ;;  %v183_v15 = vld [vmem:[%s4272_s0 + $0x548] sm:$0xff] }
  0xab   :  { %2293 = vmatpush3.msra.mxu1 %v508_v16  ;;  %1188 = vmatmul.mubr.f32.gmra.mxu0 %v54_v17  ;;  %v516_v14 = vld [vmem:[%s4271_s1 + $0x7b0] sm:$0xff]  ;;  %v182_v17 = vld [vmem:[%s4272_s0 + $0x540] sm:$0xff] }
  0xac   :  { %1332 = vmatprep.mubr.f32.mxu1 %v57_v18  ;;  %2214 = vmatprep.subr.mxu0 %v491_v19  ;;  %v500_v16 = vld [vmem:[%s4271_s1 + $0x730] sm:$0xff]  ;;  %v185_v18 = vld [vmem:[%s4272_s0 + $0x558] sm:$0xff]  ;;  %v483_v19 = vld [vmem:[%s4271_s1 + $0x6a8] sm:$0xff] }
  0xad   :  { %1333 = vmatmul.mubr.f32.gmra.mxu1 %v56_v20  ;;  %2215 = vmatpush3.msra.mxu0 %v475_v21  ;;  %v184_v20 = vld [vmem:[%s4272_s0 + $0x550] sm:$0xff]  ;;  %v467_v21 = vld [vmem:[%s4271_s1 + $0x628] sm:$0xff] }
  0xae   :  { %2294 = vmatprep.subr.mxu1 %v523_v22  ;;  %1192 = vmatprep.mubr.f32.mxu0 %v71_v23  ;;  %v515_v22 = vld [vmem:[%s4271_s1 + $0x7a8] sm:$0xff] }
  0xaf   :  { %2295 = vmatpush3.msra.mxu1 %v507_v24  ;;  %1193 = vmatmul.mubr.f32.gmra.mxu0 %v70_v25  ;;  %v199_v23 = vld [vmem:[%s4272_s0 + $0x5c8] sm:$0xff]  ;;  %v198_v25 = vld [vmem:[%s4272_s0 + $0x5c0] sm:$0xff] }
  0xb0   :  { %1337 = vmatprep.mubr.f32.mxu1 %v73_v26  ;;  %2216 = vmatprep.subr.mxu0 %v490_v27  ;;  %v499_v24 = vld [vmem:[%s4271_s1 + $0x728] sm:$0xff]  ;;  %v201_v26 = vld [vmem:[%s4272_s0 + $0x5d8] sm:$0xff]  ;;  %v482_v27 = vld [vmem:[%s4271_s1 + $0x6a0] sm:$0xff] }
  0xb1   :  { %1338 = vmatmul.mubr.f32.gmra.mxu1 %v72_v28  ;;  %2217 = vmatpush3.msra.mxu0 %v474_v29  ;;  %v200_v28 = vld [vmem:[%s4272_s0 + $0x5d0] sm:$0xff]  ;;  %v466_v29 = vld [vmem:[%s4271_s1 + $0x620] sm:$0xff] }
  0xb2   :  { %2296 = vmatprep.subr.mxu1 %v522_v30  ;;  %1197 = vmatprep.mubr.f32.mxu0 %v87_v31  ;;  %v514_v30 = vld [vmem:[%s4271_s1 + $0x7a0] sm:$0xff]  ;;  %v215_v31 = vld [vmem:[%s4272_s0 + $0x648] sm:$0xff] }
  0xb3   :  { %2297 = vmatpush3.msra.mxu1 %v506_v32  ;;  %1198 = vmatmul.mubr.f32.gmra.mxu0 %v86_v33  ;;  %v498_v32 = vld [vmem:[%s4271_s1 + $0x720] sm:$0xff] }
  0xb4   :  { %1342 = vmatprep.mubr.f32.mxu1 %v89_v34  ;;  %2218 = vmatprep.subr.mxu0 %v489_v35  ;;  %v214_v33 = vld [vmem:[%s4272_s0 + $0x640] sm:$0xff]  ;;  %v217_v34 = vld [vmem:[%s4272_s0 + $0x658] sm:$0xff] }
  0xb5   :  { %1343 = vmatmul.mubr.f32.gmra.mxu1 %v88_v36  ;;  %2219 = vmatpush3.msra.mxu0 %v473_v37  ;;  %v481_v35 = vld [vmem:[%s4271_s1 + $0x698] sm:$0xff]  ;;  %v216_v36 = vld [vmem:[%s4272_s0 + $0x650] sm:$0xff] }
  0xb6   :  { %2298 = vmatprep.subr.mxu1 %v521_v38  ;;  %1202 = vmatprep.mubr.f32.mxu0 %v103_v39  ;;  %v465_v37 = vld [vmem:[%s4271_s1 + $0x618] sm:$0xff]  ;;  %v231_v39 = vld [vmem:[%s4272_s0 + $0x6c8] sm:$0xff] }
  0xb7   :  { %2299 = vmatpush3.msra.mxu1 %v505_v40  ;;  %1203 = vmatmul.mubr.f32.gmra.mxu0 %v102_v41  ;;  %v513_v38 = vld [vmem:[%s4271_s1 + $0x798] sm:$0xff]  ;;  %v230_v41 = vld [vmem:[%s4272_s0 + $0x6c0] sm:$0xff] }
  0xb8   :  { %1347 = vmatprep.mubr.f32.mxu1 %v105_v42  ;;  %2220 = vmatprep.subr.mxu0 %v488_v43  ;;  %v497_v40 = vld [vmem:[%s4271_s1 + $0x718] sm:$0xff]  ;;  %v480_v43 = vld [vmem:[%s4271_s1 + $0x690] sm:$0xff] }
  0xb9   :  { %1348 = vmatmul.mubr.f32.gmra.mxu1 %v104_v44  ;;  %2221 = vmatpush3.msra.mxu0 %v472_v45  ;;  %v233_v42 = vld [vmem:[%s4272_s0 + $0x6d8] sm:$0xff]  ;;  %v232_v44 = vld [vmem:[%s4272_s0 + $0x6d0] sm:$0xff] }
  0xba   :  { %2300 = vmatprep.subr.mxu1 %v520_v46  ;;  %1207 = vmatprep.mubr.f32.mxu0 %v119_v47  ;;  %v464_v45 = vld [vmem:[%s4271_s1 + $0x610] sm:$0xff]  ;;  %v247_v47 = vld [vmem:[%s4272_s0 + $0x748] sm:$0xff] }
  0xbb   :  { %2301 = vmatpush3.msra.mxu1 %v504_v48  ;;  %1208 = vmatmul.mubr.f32.gmra.mxu0 %v118_v49  ;;  %v512_v46 = vld [vmem:[%s4271_s1 + $0x790] sm:$0xff]  ;;  %v246_v49 = vld [vmem:[%s4272_s0 + $0x740] sm:$0xff] }
  0xbc   :  { %1352 = vmatprep.mubr.f32.mxu1 %v121_v50  ;;  %2222 = vmatprep.subr.mxu0 %v487_v51  ;;  %v496_v48 = vld [vmem:[%s4271_s1 + $0x710] sm:$0xff]  ;;  %v249_v50 = vld [vmem:[%s4272_s0 + $0x758] sm:$0xff]  ;;  %v479_v51 = vld [vmem:[%s4271_s1 + $0x688] sm:$0xff] }
  0xbd   :  { %1353 = vmatmul.mubr.f32.gmra.mxu1 %v120_v52  ;;  %2223 = vmatpush3.msra.mxu0 %v471_v53  ;;  %v248_v52 = vld [vmem:[%s4272_s0 + $0x750] sm:$0xff]  ;;  %v463_v53 = vld [vmem:[%s4271_s1 + $0x608] sm:$0xff] }
  0xbe   :  { %2302 = vmatprep.subr.mxu1 %v519_v54  ;;  %1212 = vmatprep.mubr.f32.mxu0 %v135_v55  ;;  %v511_v54 = vld [vmem:[%s4271_s1 + $0x788] sm:$0xff] }
  0xbf   :  { %2303 = vmatpush3.msra.mxu1 %v503_v56  ;;  %1213 = vmatmul.mubr.f32.gmra.mxu0 %v134_v57  ;;  %v263_v55 = vld [vmem:[%s4272_s0 + $0x7c8] sm:$0xff]  ;;  %v262_v57 = vld [vmem:[%s4272_s0 + $0x7c0] sm:$0xff] }
  0xc0   :  { %1357 = vmatprep.mubr.f32.mxu1 %v137_v58  ;;  %2224 = vmatprep.subr.mxu0 %v486_v59  ;;  %v495_v56 = vld [vmem:[%s4271_s1 + $0x708] sm:$0xff]  ;;  %v265_v58 = vld [vmem:[%s4272_s0 + $0x7d8] sm:$0xff]  ;;  %v478_v59 = vld [vmem:[%s4271_s1 + $0x680] sm:$0xff] }
  0xc1   :  { %1358 = vmatmul.mubr.f32.gmra.mxu1 %v136_v60  ;;  %2225 = vmatpush3.msra.mxu0 %v470_v61  ;;  %v264_v60 = vld [vmem:[%s4272_s0 + $0x7d0] sm:$0xff]  ;;  %v462_v61 = vld [vmem:[%s4271_s1 + $0x600] sm:$0xff] }
  0xc2   :  { %2304 = vmatprep.subr.mxu1 %v518_v62  ;;  %1217 = vmatprep.mubr.f32.mxu0 %v151_v63  ;;  %v510_v62 = vld [vmem:[%s4271_s1 + $0x780] sm:$0xff]  ;;  %v27_v63 = vld [vmem:[%s4272_s0 + $0x68] sm:$0xff] }
  0xc3   :  { %2305 = vmatpush3.msra.mxu1 %v502_v0  ;;  %1218 = vmatmul.mubr.f32.gmra.mxu0 %v150_v1  ;;  %v494_v0 = vld [vmem:[%s4271_s1 + $0x700] sm:$0xff] }
  0xc4   :  { %1362 = vmatprep.mubr.f32.mxu1 %v153_v2  ;;  %2226 = vmatprep.subr.mxu0 %v485_v3  ;;  %v26_v1 = vld [vmem:[%s4272_s0 + $0x60] sm:$0xff]  ;;  %v29_v2 = vld [vmem:[%s4272_s0 + $0x78] sm:$0xff]  ;;  %v43_v3 = vld [vmem:[%s4272_s0 + $0xe8] sm:$0xff] }
  0xc5   :  { %1363 = vmatmul.mubr.f32.gmra.mxu1 %v152_v4  ;;  %2227 = vmatpush3.msra.mxu0 %v469_v5  ;;  %v28_v4 = vld [vmem:[%s4272_s0 + $0x70] sm:$0xff] }
  0xc6   :  { %2306 = vmatprep.subr.mxu1 %v517_v6  ;;  %1222 = vmatprep.mubr.f32.mxu0 %v167_v7  ;;  %v45_v6 = vld [vmem:[%s4272_s0 + $0xf8] sm:$0xff]  ;;  %v42_v7 = vld [vmem:[%s4272_s0 + $0xe0] sm:$0xff] }
  0xc7   :  { %2307 = vmatpush3.msra.mxu1 %v501_v8  ;;  %1223 = vmatmul.mubr.f32.gmra.mxu0 %v166_v9  ;;  %v3758_v9 = vld [vmem:[%s4273_s2] ss:$0 sm:$0xff] }
  0xc8   :  { %1367 = vmatprep.mubr.f32.mxu1 %v169_v10  ;;  %2228 = vmatprep.subr.mxu0 %v484_v11  ;;  %v59_v11 = vld [vmem:[%s4272_s0 + $0x168] sm:$0xff] }
  0xc9   :  { %1368 = vmatmul.mubr.f32.gmra.mxu1 %v168_v12  ;;  %2229 = vmatpush3.msra.mxu0 %v468_v13  ;;  %v44_v13 = vld [vmem:[%s4272_s0 + $0xf0] sm:$0xff] }
  0xca   :  { %2308 = vmatprep.subr.mxu1 %v516_v14  ;;  %1227 = vmatprep.mubr.f32.mxu0 %v183_v15 }
  0xcb   :  { %2309 = vmatpush3.msra.mxu1 %v500_v16  ;;  %1228 = vmatmul.mubr.f32.gmra.mxu0 %v182_v17  ;;  %v61_v16 = vld [vmem:[%s4272_s0 + $0x178] sm:$0xff] }
  0xcc   :  { %1372 = vmatprep.mubr.f32.mxu1 %v185_v18  ;;  %2230 = vmatprep.subr.mxu0 %v483_v19  ;;  %v58_v19 = vld [vmem:[%s4272_s0 + $0x160] sm:$0xff] }
  0xcd   :  { %1373 = vmatmul.mubr.f32.gmra.mxu1 %v184_v20  ;;  %2231 = vmatpush3.msra.mxu0 %v467_v21 }
  0xce   :  { %2310 = vmatprep.subr.mxu1 %v515_v22  ;;  %1232 = vmatprep.mubr.f32.mxu0 %v199_v23  ;;  %v75_v22 = vld [vmem:[%s4272_s0 + $0x1e8] sm:$0xff] }
  0xcf   :  { %2311 = vmatpush3.msra.mxu1 %v499_v24  ;;  %1233 = vmatmul.mubr.f32.gmra.mxu0 %v198_v25  ;;  %v60_v25 = vld [vmem:[%s4272_s0 + $0x170] sm:$0xff] }
  0xd0   :  { %1377 = vmatprep.mubr.f32.mxu1 %v201_v26  ;;  %2232 = vmatprep.subr.mxu0 %v482_v27 }
  0xd1   :  { %1378 = vmatmul.mubr.f32.gmra.mxu1 %v200_v28  ;;  %2233 = vmatpush3.msra.mxu0 %v466_v29  ;;  %v77_v28 = vld [vmem:[%s4272_s0 + $0x1f8] sm:$0xff] }
  0xd2   :  { %2312 = vmatprep.subr.mxu1 %v514_v30  ;;  %1237 = vmatprep.mubr.f32.mxu0 %v215_v31  ;;  %v74_v31 = vld [vmem:[%s4272_s0 + $0x1e0] sm:$0xff] }
  0xd3   :  { %2313 = vmatpush3.msra.mxu1 %v498_v32  ;;  %1238 = vmatmul.mubr.f32.gmra.mxu0 %v214_v33 }
  0xd4   :  { %1382 = vmatprep.mubr.f32.mxu1 %v217_v34  ;;  %2234 = vmatprep.subr.mxu0 %v481_v35  ;;  %v91_v34 = vld [vmem:[%s4272_s0 + $0x268] sm:$0xff] }
  0xd5   :  { %1383 = vmatmul.mubr.f32.gmra.mxu1 %v216_v36  ;;  %2235 = vmatpush3.msra.mxu0 %v465_v37  ;;  %v76_v37 = vld [vmem:[%s4272_s0 + $0x1f0] sm:$0xff] }
  0xd6   :  { %2314 = vmatprep.subr.mxu1 %v513_v38  ;;  %1242 = vmatprep.mubr.f32.mxu0 %v231_v39 }
  0xd7   :  { %2315 = vmatpush3.msra.mxu1 %v497_v40  ;;  %1243 = vmatmul.mubr.f32.gmra.mxu0 %v230_v41  ;;  %v93_v40 = vld [vmem:[%s4272_s0 + $0x278] sm:$0xff] }
  0xd8   :  { %1387 = vmatprep.mubr.f32.mxu1 %v233_v42  ;;  %2236 = vmatprep.subr.mxu0 %v480_v43  ;;  %v90_v43 = vld [vmem:[%s4272_s0 + $0x260] sm:$0xff] }
  0xd9   :  { %1388 = vmatmul.mubr.f32.gmra.mxu1 %v232_v44  ;;  %2237 = vmatpush3.msra.mxu0 %v464_v45 }
  0xda   :  { %2316 = vmatprep.subr.mxu1 %v512_v46  ;;  %1247 = vmatprep.mubr.f32.mxu0 %v247_v47  ;;  %v107_v46 = vld [vmem:[%s4272_s0 + $0x2e8] sm:$0xff] }
  0xdb   :  { %2317 = vmatpush3.msra.mxu1 %v496_v48  ;;  %1248 = vmatmul.mubr.f32.gmra.mxu0 %v246_v49  ;;  %v92_v49 = vld [vmem:[%s4272_s0 + $0x270] sm:$0xff] }
  0xdc   :  { %1392 = vmatprep.mubr.f32.mxu1 %v249_v50  ;;  %2238 = vmatprep.subr.mxu0 %v479_v51 }
  0xdd   :  { %1393 = vmatmul.mubr.f32.gmra.mxu1 %v248_v52  ;;  %2239 = vmatpush3.msra.mxu0 %v463_v53  ;;  %v109_v52 = vld [vmem:[%s4272_s0 + $0x2f8] sm:$0xff] }
  0xde   :  { %2318 = vmatprep.subr.mxu1 %v511_v54  ;;  %1252 = vmatprep.mubr.f32.mxu0 %v263_v55  ;;  %v106_v55 = vld [vmem:[%s4272_s0 + $0x2e0] sm:$0xff] }
  0xdf   :  { %2319 = vmatpush3.msra.mxu1 %v495_v56  ;;  %1253 = vmatmul.mubr.f32.gmra.mxu0 %v262_v57 }
  0xe0   :  { %1397 = vmatprep.mubr.f32.mxu1 %v265_v58  ;;  %2240 = vmatprep.subr.mxu0 %v478_v59  ;;  %v123_v58 = vld [vmem:[%s4272_s0 + $0x368] sm:$0xff] }
  0xe1   :  { %1398 = vmatmul.mubr.f32.gmra.mxu1 %v264_v60  ;;  %2241 = vmatpush3.msra.mxu0 %v462_v61  ;;  %v108_v61 = vld [vmem:[%s4272_s0 + $0x2f0] sm:$0xff] }
  0xe2   :  { %2320 = vmatprep.subr.mxu1 %v510_v62  ;;  %1467 = vmatprep.mubr.f32.mxu0 %v27_v63 }
  0xe3   :  { %2321 = vmatpush3.msra.mxu1 %v494_v0  ;;  %v1762_v5 = vpop.f32.mrf.mxu0  ;;  %1468 = vmatmul.mubr.f32.vlgmr.msra.gmra.mxu0 %v26_v1  ;;  %v125_v0 = vld [vmem:[%s4272_s0 + $0x378] sm:$0xff] }
  0xe4   :  { %1612 = vmatprep.mubr.f32.mxu1 %v29_v2  ;;  %1472 = vmatprep.mubr.f32.mxu0 %v43_v3  ;;  %v122_v3 = vld [vmem:[%s4272_s0 + $0x360] sm:$0xff] }
  0xe5   :  { %v1842_v8 = vpop.f32.mrf.mxu1  ;;  %1613 = vmatmul.mubr.f32.vlgmr.msra.gmra.mxu1 %v28_v4  ;;  %v1763_v10 = vpop.f32.mrf.mxu0 }
  0xe6   :  { %v1764_v12 = vadd.f32 %v1763_v10, %v1762_v5  ;;  %1617 = vmatprep.mubr.f32.mxu1 %v45_v6  ;;  %v139_v6 = vld [vmem:[%s4272_s0 + $0x3e8] sm:$0xff]  ;;  %v124_v10 = vld [vmem:[%s4272_s0 + $0x370] sm:$0xff] }
  0xe7   :  { %v1843_v14 = vpop.f32.mrf.mxu1  ;;  %v1765_v15 = vpop.f32.mrf.mxu0  ;;  %1473 = vmatmul.mubr.f32.gmra.mxu0 %v42_v7 }
  0xe8   :  { %v600_v17 = vadd.f32 %v1764_v12, %v3758_v9  ;;  %v1844_v18 = vadd.f32 %v1843_v14, %v1842_v8  ;;  %1477 = vmatprep.mubr.f32.mxu0 %v59_v11 }
  0xe9   :  { %v1845_v20 = vpop.f32.mrf.mxu1  ;;  %1618 = vmatmul.mubr.f32.gmra.mxu1 %v44_v13  ;;  %v1766_v21 = vpop.f32.mrf.mxu0  ;;  %v141_v13 = vld [vmem:[%s4272_s0 + $0x3f8] sm:$0xff] }
  0xea   :  { %v3776_v23 = vadd.f32 %v1844_v18, %v600_v17  ;;  %v1767_v24 = vadd.f32 %v1766_v21, %v1765_v15  ;;  %1622 = vmatprep.mubr.f32.mxu1 %v61_v16  ;;  %v138_v16 = vld [vmem:[%s4272_s0 + $0x3e0] sm:$0xff] }
  0xeb   :  { %v1846_v26 = vpop.f32.mrf.mxu1  ;;  %v1768_v27 = vpop.f32.mrf.mxu0  ;;  %1478 = vmatmul.mubr.f32.gmra.mxu0 %v58_v19  ;;  %v155_v19 = vld [vmem:[%s4272_s0 + $0x468] sm:$0xff] }
  0xec   :  { %v605_v29 = vadd.f32 %v1767_v24, %v3758_v9  ;;  %v1847_v30 = vadd.f32 %v1846_v26, %v1845_v20  ;;  %1482 = vmatprep.mubr.f32.mxu0 %v75_v22  ;;  %v140_v22 = vld [vmem:[%s4272_s0 + $0x3f0] sm:$0xff]  ;;  %v157_v26 = vld [vmem:[%s4272_s0 + $0x478] sm:$0xff] }
  0xed   :  { %v1848_v32 = vpop.f32.mrf.mxu1  ;;  %1623 = vmatmul.mubr.f32.gmra.mxu1 %v60_v25  ;;  %v1769_v33 = vpop.f32.mrf.mxu0 }
  0xee   :  { %v3791_v35 = vadd.f32 %v1847_v30, %v605_v29  ;;  %v1770_v36 = vadd.f32 %v1769_v33, %v1768_v27  ;;  %1627 = vmatprep.mubr.f32.mxu1 %v77_v28  ;;  %v154_v29 = vld [vmem:[%s4272_s0 + $0x460] sm:$0xff] }
  0xef   :  { %v1849_v38 = vpop.f32.mrf.mxu1  ;;  %v1771_v39 = vpop.f32.mrf.mxu0  ;;  %1483 = vmatmul.mubr.f32.gmra.mxu0 %v74_v31 }
  0xf0   :  { %v610_v41 = vadd.f32 %v1770_v36, %v3758_v9  ;;  %v1850_v42 = vadd.f32 %v1849_v38, %v1848_v32  ;;  %1487 = vmatprep.mubr.f32.mxu0 %v91_v34  ;;  %v171_v32 = vld [vmem:[%s4272_s0 + $0x4e8] sm:$0xff]  ;;  %v156_v36 = vld [vmem:[%s4272_s0 + $0x470] sm:$0xff] }
  0xf1   :  { %v1851_v44 = vpop.f32.mrf.mxu1  ;;  %1628 = vmatmul.mubr.f32.gmra.mxu1 %v76_v37  ;;  %v1772_v45 = vpop.f32.mrf.mxu0 }
  0xf2   :  { %v3806_v47 = vadd.f32 %v1850_v42, %v610_v41  ;;  %v1773_v48 = vadd.f32 %v1772_v45, %v1771_v39  ;;  %1632 = vmatprep.mubr.f32.mxu1 %v93_v40  ;;  %v173_v39 = vld [vmem:[%s4272_s0 + $0x4f8] sm:$0xff]  ;;  %v170_v42 = vld [vmem:[%s4272_s0 + $0x4e0] sm:$0xff]  ;;  %v187_v45 = vld [vmem:[%s4272_s0 + $0x568] sm:$0xff] }
  0xf3   :  { %v1852_v50 = vpop.f32.mrf.mxu1  ;;  %v1774_v51 = vpop.f32.mrf.mxu0  ;;  %1488 = vmatmul.mubr.f32.gmra.mxu0 %v90_v43 }
  0xf4   :  { %v615_v53 = vadd.f32 %v1773_v48, %v3758_v9  ;;  %v1853_v54 = vadd.f32 %v1852_v50, %v1851_v44  ;;  %1492 = vmatprep.mubr.f32.mxu0 %v107_v46 }
  0xf5   :  { %v1854_v56 = vpop.f32.mrf.mxu1  ;;  %1633 = vmatmul.mubr.f32.gmra.mxu1 %v92_v49  ;;  %v1775_v57 = vpop.f32.mrf.mxu0  ;;  %v172_v49 = vld [vmem:[%s4272_s0 + $0x4f0] sm:$0xff] }
  0xf6   :  { %v3821_v59 = vadd.f32 %v1853_v54, %v615_v53  ;;  %v1776_v60 = vadd.f32 %v1775_v57, %v1774_v51  ;;  %1637 = vmatprep.mubr.f32.mxu1 %v109_v52  ;;  %v189_v52 = vld [vmem:[%s4272_s0 + $0x578] sm:$0xff] }
  0xf7   :  { %v1855_v62 = vpop.f32.mrf.mxu1  ;;  %v1777_v63 = vpop.f32.mrf.mxu0  ;;  %1493 = vmatmul.mubr.f32.gmra.mxu0 %v106_v55  ;;  %v186_v55 = vld [vmem:[%s4272_s0 + $0x560] sm:$0xff] }
  0xf8   :  { %v620_v1 = vadd.f32 %v1776_v60, %v3758_v9  ;;  %v1856_v2 = vadd.f32 %v1855_v62, %v1854_v56  ;;  %1497 = vmatprep.mubr.f32.mxu0 %v123_v58  ;;  %v203_v58 = vld [vmem:[%s4272_s0 + $0x5e8] sm:$0xff]  ;;  %v188_v62 = vld [vmem:[%s4272_s0 + $0x570] sm:$0xff] }
  0xf9   :  { %v1857_v4 = vpop.f32.mrf.mxu1  ;;  %1638 = vmatmul.mubr.f32.gmra.mxu1 %v108_v61  ;;  %v1778_v5 = vpop.f32.mrf.mxu0 }
  0xfa   :  { %v3836_v7 = vadd.f32 %v1856_v2, %v620_v1  ;;  %v1779_v8 = vadd.f32 %v1778_v5, %v1777_v63  ;;  %1642 = vmatprep.mubr.f32.mxu1 %v125_v0  ;;  %v205_v1 = vld [vmem:[%s4272_s0 + $0x5f8] sm:$0xff] }
  0xfb   :  { %v1858_v11 = vpop.f32.mrf.mxu1  ;;  %v1780_v12 = vpop.f32.mrf.mxu0  ;;  %1498 = vmatmul.mubr.f32.gmra.mxu0 %v122_v3 }
  0xfc   :  { %v625_v14 = vadd.f32 %v1779_v8, %v3758_v9  ;;  %v1859_v15 = vadd.f32 %v1858_v11, %v1857_v4  ;;  %1502 = vmatprep.mubr.f32.mxu0 %v139_v6  ;;  %v202_v4 = vld [vmem:[%s4272_s0 + $0x5e0] sm:$0xff]  ;;  %v219_v8 = vld [vmem:[%s4272_s0 + $0x668] sm:$0xff] }
  0xfd   :  { %v1860_v17 = vpop.f32.mrf.mxu1  ;;  %1643 = vmatmul.mubr.f32.gmra.mxu1 %v124_v10  ;;  %v1781_v18 = vpop.f32.mrf.mxu0 }
  0xfe   :  { %v3851_v20 = vadd.f32 %v1859_v15, %v625_v14  ;;  %v1782_v21 = vadd.f32 %v1781_v18, %v1780_v12  ;;  %1647 = vmatprep.mubr.f32.mxu1 %v141_v13  ;;  %v204_v12 = vld [vmem:[%s4272_s0 + $0x5f0] sm:$0xff]  ;;  %v221_v15 = vld [vmem:[%s4272_s0 + $0x678] sm:$0xff]  ;;  %v218_v18 = vld [vmem:[%s4272_s0 + $0x660] sm:$0xff] }
  0xff   :  { %v1861_v24 = vpop.f32.mrf.mxu1  ;;  %v1783_v25 = vpop.f32.mrf.mxu0  ;;  %1503 = vmatmul.mubr.f32.gmra.mxu0 %v138_v16 }
 0x100   :  { %v630_v27 = vadd.f32 %v1782_v21, %v3758_v9  ;;  %v1862_v28 = vadd.f32 %v1861_v24, %v1860_v17  ;;  %1507 = vmatprep.mubr.f32.mxu0 %v155_v19 }
 0x101   :  { %v1863_v30 = vpop.f32.mrf.mxu1  ;;  %1648 = vmatmul.mubr.f32.gmra.mxu1 %v140_v22  ;;  %v1784_v31 = vpop.f32.mrf.mxu0  ;;  %v235_v22 = vld [vmem:[%s4272_s0 + $0x6e8] sm:$0xff] }
 0x102   :  { %v3866_v33 = vadd.f32 %v1862_v28, %v630_v27  ;;  %v1785_v34 = vadd.f32 %v1784_v31, %v1783_v25  ;;  %1652 = vmatprep.mubr.f32.mxu1 %v157_v26  ;;  %v220_v26 = vld [vmem:[%s4272_s0 + $0x670] sm:$0xff] }
 0x103   :  { %v1864_v37 = vpop.f32.mrf.mxu1  ;;  %v1786_v38 = vpop.f32.mrf.mxu0  ;;  %1508 = vmatmul.mubr.f32.gmra.mxu0 %v154_v29  ;;  %v237_v29 = vld [vmem:[%s4272_s0 + $0x6f8] sm:$0xff] }
 0x104   :  { %v635_v40 = vadd.f32 %v1785_v34, %v3758_v9  ;;  %v1865_v41 = vadd.f32 %v1864_v37, %v1863_v30  ;;  %1512 = vmatprep.mubr.f32.mxu0 %v171_v32  ;;  %v234_v32 = vld [vmem:[%s4272_s0 + $0x6e0] sm:$0xff]  ;;  %v251_v37 = vld [vmem:[%s4272_s0 + $0x768] sm:$0xff] }
 0x105   :  { %v1866_v43 = vpop.f32.mrf.mxu1  ;;  %1653 = vmatmul.mubr.f32.gmra.mxu1 %v156_v36  ;;  %v1787_v44 = vpop.f32.mrf.mxu0 }
 0x106   :  { %v3881_v46 = vadd.f32 %v1865_v41, %v635_v40  ;;  %v1788_v48 = vadd.f32 %v1787_v44, %v1786_v38  ;;  %1657 = vmatprep.mubr.f32.mxu1 %v173_v39  ;;  %v236_v40 = vld [vmem:[%s4272_s0 + $0x6f0] sm:$0xff] }
 0x107   :  { %v1867_v50 = vpop.f32.mrf.mxu1  ;;  %v1789_v51 = vpop.f32.mrf.mxu0  ;;  %1513 = vmatmul.mubr.f32.gmra.mxu0 %v170_v42 }
 0x108   :  { %v640_v53 = vadd.f32 %v1788_v48, %v3758_v9  ;;  %v1868_v54 = vadd.f32 %v1867_v50, %v1866_v43  ;;  %1517 = vmatprep.mubr.f32.mxu0 %v187_v45  ;;  %v253_v43 = vld [vmem:[%s4272_s0 + $0x778] sm:$0xff]  ;;  %v250_v48 = vld [vmem:[%s4272_s0 + $0x760] sm:$0xff] }
 0x109   :  { %v1869_v56 = vpop.f32.mrf.mxu1  ;;  %1658 = vmatmul.mubr.f32.gmra.mxu1 %v172_v49  ;;  %v1790_v57 = vpop.f32.mrf.mxu0 }
 0x10a   :  { %v3896_v60 = vadd.f32 %v1868_v54, %v640_v53  ;;  %v1791_v61 = vadd.f32 %v1790_v57, %v1789_v51  ;;  %1662 = vmatprep.mubr.f32.mxu1 %v189_v52  ;;  %v267_v51 = vld [vmem:[%s4272_s0 + $0x7e8] sm:$0xff]  ;;  %v252_v54 = vld [vmem:[%s4272_s0 + $0x770] sm:$0xff]  ;;  %v269_v57 = vld [vmem:[%s4272_s0 + $0x7f8] sm:$0xff] }
 0x10b   :  { %v1870_v63 = vpop.f32.mrf.mxu1  ;;  %v1792_v0 = vpop.f32.mrf.mxu0  ;;  %1518 = vmatmul.mubr.f32.gmra.mxu0 %v186_v55 }
 0x10c   :  { %v645_v2 = vadd.f32 %v1791_v61, %v3758_v9  ;;  %v1871_v3 = vadd.f32 %v1870_v63, %v1869_v56  ;;  %1522 = vmatprep.mubr.f32.mxu0 %v203_v58 }
 0x10d   :  { %v1872_v5 = vpop.f32.mrf.mxu1  ;;  %1663 = vmatmul.mubr.f32.gmra.mxu1 %v188_v62  ;;  %v1793_v6 = vpop.f32.mrf.mxu0  ;;  %v266_v62 = vld [vmem:[%s4272_s0 + $0x7e0] sm:$0xff] }
 0x10e   :  { %v3911_v10 = vadd.f32 %v1871_v3, %v645_v2  ;;  %v1794_v11 = vadd.f32 %v1793_v6, %v1792_v0  ;;  %1667 = vmatprep.mubr.f32.mxu1 %v205_v1  ;;  %v268_v3 = vld [vmem:[%s4272_s0 + $0x7f0] sm:$0xff] }
 0x10f   :  { %v1873_v13 = vpop.f32.mrf.mxu1  ;;  %v1795_v14 = vpop.f32.mrf.mxu0  ;;  %1523 = vmatmul.mubr.f32.gmra.mxu0 %v202_v4 }
 0x110   :  { %v650_v16 = vadd.f32 %v1794_v11, %v3758_v9  ;;  %v1874_v17 = vadd.f32 %v1873_v13, %v1872_v5  ;;  %1527 = vmatprep.mubr.f32.mxu0 %v219_v8 }
 0x111   :  { %v1875_v19 = vpop.f32.mrf.mxu1  ;;  %1668 = vmatmul.mubr.f32.gmra.mxu1 %v204_v12  ;;  %v1796_v21 = vpop.f32.mrf.mxu0 }
 0x112   :  { %v3926_v24 = vadd.f32 %v1874_v17, %v650_v16  ;;  %v1797_v25 = vadd.f32 %v1796_v21, %v1795_v14  ;;  %1672 = vmatprep.mubr.f32.mxu1 %v221_v15 }
 0x113   :  { %v1876_v27 = vpop.f32.mrf.mxu1  ;;  %v1798_v28 = vpop.f32.mrf.mxu0  ;;  %1528 = vmatmul.mubr.f32.gmra.mxu0 %v218_v18 }
 0x114   :  { %v655_v30 = vadd.f32 %v1797_v25, %v3758_v9  ;;  %v1877_v31 = vadd.f32 %v1876_v27, %v1875_v19  ;;  %1532 = vmatprep.mubr.f32.mxu0 %v235_v22 }
 0x115   :  { %v1878_v34 = vpop.f32.mrf.mxu1  ;;  %1673 = vmatmul.mubr.f32.gmra.mxu1 %v220_v26  ;;  %v1799_v36 = vpop.f32.mrf.mxu0 }
 0x116   :  { %v3941_v38 = vadd.f32 %v1877_v31, %v655_v30  ;;  %v1800_v39 = vadd.f32 %v1799_v36, %v1798_v28  ;;  %1677 = vmatprep.mubr.f32.mxu1 %v237_v29 }
 0x117   :  { %v1879_v41 = vpop.f32.mrf.mxu1  ;;  %v1801_v42 = vpop.f32.mrf.mxu0  ;;  %1533 = vmatmul.mubr.f32.gmra.mxu0 %v234_v32 }
 0x118   :  { %v660_v44 = vadd.f32 %v1800_v39, %v3758_v9  ;;  %v1880_v45 = vadd.f32 %v1879_v41, %v1878_v34  ;;  %1537 = vmatprep.mubr.f32.mxu0 %v251_v37 }
 0x119   :  { %v1881_v49 = vpop.f32.mrf.mxu1  ;;  %1678 = vmatmul.mubr.f32.gmra.mxu1 %v236_v40  ;;  %v1802_v50 = vpop.f32.mrf.mxu0 }
 0x11a   :  { %v3956_v52 = vadd.f32 %v1880_v45, %v660_v44  ;;  %v1803_v53 = vadd.f32 %v1802_v50, %v1801_v42  ;;  %1682 = vmatprep.mubr.f32.mxu1 %v253_v43 }
 0x11b   :  { %v1882_v55 = vpop.f32.mrf.mxu1  ;;  %v1804_v56 = vpop.f32.mrf.mxu0  ;;  %1538 = vmatmul.mubr.f32.gmra.mxu0 %v250_v48 }
 0x11c   :  { %v665_v58 = vadd.f32 %v1803_v53, %v3758_v9  ;;  %v1883_v61 = vadd.f32 %v1882_v55, %v1881_v49  ;;  %1542 = vmatprep.mubr.f32.mxu0 %v267_v51 }
 0x11d   :  { %v1884_v63 = vpop.f32.mrf.mxu1  ;;  %1683 = vmatmul.mubr.f32.gmra.mxu1 %v252_v54  ;;  %v1805_v0 = vpop.f32.mrf.mxu0 }
 0x11e   :  { %v3968_v1 = vadd.f32 %v1883_v61, %v665_v58  ;;  %v1806_v2 = vadd.f32 %v1805_v0, %v1804_v56  ;;  %1687 = vmatprep.mubr.f32.mxu1 %v269_v57 }
 0x11f   :  { %v1885_v4 = vpop.f32.mrf.mxu1  ;;  %v1807_v5 = vpop.f32.mrf.mxu0  ;;  %1543 = vmatmul.mubr.f32.gmra.mxu0 %v266_v62 }
 0x120   :  { %v670_v6 = vadd.f32 %v1806_v2, %v3758_v9  ;;  %v1886_v8 = vadd.f32 %v1885_v4, %v1884_v63 }
 0x121   :  { %v1887_v11 = vpop.f32.mrf.mxu1  ;;  %1688 = vmatmul.mubr.f32.gmra.mxu1 %v268_v3  ;;  %v1808_v12 = vpop.f32.mrf.mxu0 }
 0x122   :  { %v3974_v13 = vadd.f32 %v1886_v8, %v670_v6  ;;  %v1809_v14 = vadd.f32 %v1808_v12, %v1807_v5 }
 0x123   :  { %v1888_v15 = vpop.f32.mrf.mxu1  ;;  %v1922_v16 = vpop.f32.mrf.mxu0 }
 0x124   :  { %v675_v17 = vadd.f32 %v1809_v14, %v3758_v9  ;;  %v1889_v18 = vadd.f32 %v1888_v15, %v1887_v11 }
 0x125   :  { %v2002_v19 = vpop.f32.mrf.mxu1  ;;  %v1923_v21 = vpop.f32.mrf.mxu0 }
 0x126   :  { %v3977_v22 = vadd.f32 %v1889_v18, %v675_v17  ;;  %v1924_v25 = vadd.f32 %v1923_v21, %v1922_v16 }
 0x127   :  { %v2003_v26 = vpop.f32.mrf.mxu1  ;;  %v1925_v27 = vpop.f32.mrf.mxu0 }
 0x128   :  { %v890_v28 = vadd.f32 %v1924_v25, %v3776_v23  ;;  %v2004_v29 = vadd.f32 %v2003_v26, %v2002_v19 }
 0x129   :  { %v2005_v30 = vpop.f32.mrf.mxu1  ;;  %v1926_v31 = vpop.f32.mrf.mxu0 }
 0x12a   :  { %v3980_v32 = vadd.f32 %v2004_v29, %v890_v28  ;;  %v1927_v34 = vadd.f32 %v1926_v31, %v1925_v27 }
 0x12b   :  { %v2006_v36 = vpop.f32.mrf.mxu1  ;;  %v1928_v37 = vpop.f32.mrf.mxu0 }
 0x12c   :  { %v895_v9 = vadd.f32 %v1927_v34, %v3791_v35  ;;  %v2007_v39 = vadd.f32 %v2006_v36, %v2005_v30 }
 0x12d   :  { %v2008_v40 = vpop.f32.mrf.mxu1  ;;  %v1929_v41 = vpop.f32.mrf.mxu0 }
 0x12e   :  { %v3983_v42 = vadd.f32 %v2007_v39, %v895_v9  ;;  %v1930_v43 = vadd.f32 %v1929_v41, %v1928_v37 }
 0x12f   :  { %v2009_v44 = vpop.f32.mrf.mxu1  ;;  %v1931_v45 = vpop.f32.mrf.mxu0 }
 0x130   :  { %v900_v23 = vadd.f32 %v1930_v43, %v3806_v47  ;;  %v2010_v48 = vadd.f32 %v2009_v44, %v2008_v40 }
 0x131   :  { %v2011_v49 = vpop.f32.mrf.mxu1  ;;  %v1932_v50 = vpop.f32.mrf.mxu0 }
 0x132   :  { %v3986_v51 = vadd.f32 %v2010_v48, %v900_v23  ;;  %v1933_v53 = vadd.f32 %v1932_v50, %v1931_v45 }
 0x133   :  { %v2012_v54 = vpop.f32.mrf.mxu1  ;;  %v1934_v55 = vpop.f32.mrf.mxu0 }
 0x134   :  { %v905_v35 = vadd.f32 %v1933_v53, %v3821_v59  ;;  %v2013_v56 = vadd.f32 %v2012_v54, %v2011_v49 }
 0x135   :  { %v2014_v57 = vpop.f32.mrf.mxu1  ;;  %v1935_v58 = vpop.f32.mrf.mxu0 }
 0x136   :  { %v3989_v61 = vadd.f32 %v2013_v56, %v905_v35  ;;  %v1936_v62 = vadd.f32 %v1935_v58, %v1934_v55 }
 0x137   :  { %v2015_v63 = vpop.f32.mrf.mxu1  ;;  %v1937_v0 = vpop.f32.mrf.mxu0 }
 0x138   :  { %v910_v47 = vadd.f32 %v1936_v62, %v3836_v7  ;;  %v2016_v2 = vadd.f32 %v2015_v63, %v2014_v57 }
 0x139   :  { %v2017_v3 = vpop.f32.mrf.mxu1  ;;  %v1938_v4 = vpop.f32.mrf.mxu0 }
 0x13a   :  { %v3992_v5 = vadd.f32 %v2016_v2, %v910_v47  ;;  %v1939_v6 = vadd.f32 %v1938_v4, %v1937_v0 }
 0x13b   :  { %v2018_v8 = vpop.f32.mrf.mxu1  ;;  %v1940_v11 = vpop.f32.mrf.mxu0 }
 0x13c   :  { %v915_v59 = vadd.f32 %v1939_v6, %v3851_v20  ;;  %v2019_v12 = vadd.f32 %v2018_v8, %v2017_v3 }
 0x13d   :  { %v2020_v14 = vpop.f32.mrf.mxu1  ;;  %v1941_v15 = vpop.f32.mrf.mxu0 }
 0x13e   :  { %v3995_v16 = vadd.f32 %v2019_v12, %v915_v59  ;;  %v1942_v17 = vadd.f32 %v1941_v15, %v1940_v11 }
 0x13f   :  { %v2021_v18 = vpop.f32.mrf.mxu1  ;;  %v1943_v19 = vpop.f32.mrf.mxu0 }
 0x140   :  { %v920_v7 = vadd.f32 %v1942_v17, %v3866_v33  ;;  %v2022_v21 = vadd.f32 %v2021_v18, %v2020_v14 }
 0x141   :  { %v2023_v25 = vpop.f32.mrf.mxu1  ;;  %v1944_v26 = vpop.f32.mrf.mxu0 }
 0x142   :  { %v3998_v27 = vadd.f32 %v2022_v21, %v920_v7  ;;  %v1945_v28 = vadd.f32 %v1944_v26, %v1943_v19 }
 0x143   :  { %v2024_v29 = vpop.f32.mrf.mxu1  ;;  %v1946_v30 = vpop.f32.mrf.mxu0 }
 0x144   :  { %v925_v20 = vadd.f32 %v1945_v28, %v3881_v46  ;;  %v2025_v31 = vadd.f32 %v2024_v29, %v2023_v25 }
 0x145   :  { %v2026_v34 = vpop.f32.mrf.mxu1  ;;  %v1947_v36 = vpop.f32.mrf.mxu0 }
 0x146   :  { %v4001_v37 = vadd.f32 %v2025_v31, %v925_v20  ;;  %v1948_v9 = vadd.f32 %v1947_v36, %v1946_v30 }
 0x147   :  { %v2027_v39 = vpop.f32.mrf.mxu1  ;;  %v1949_v40 = vpop.f32.mrf.mxu0 }
 0x148   :  { %v930_v33 = vadd.f32 %v1948_v9, %v3896_v60  ;;  %v2028_v41 = vadd.f32 %v2027_v39, %v2026_v34 }
 0x149   :  { %v2029_v43 = vpop.f32.mrf.mxu1  ;;  %v1950_v44 = vpop.f32.mrf.mxu0 }
 0x14a   :  { %v4004_v45 = vadd.f32 %v2028_v41, %v930_v33  ;;  %v1951_v23 = vadd.f32 %v1950_v44, %v1949_v40 }
 0x14b   :  { %v2030_v48 = vpop.f32.mrf.mxu1  ;;  %v1952_v49 = vpop.f32.mrf.mxu0 }
 0x14c   :  { %v935_v46 = vadd.f32 %v1951_v23, %v3911_v10  ;;  %v2031_v50 = vadd.f32 %v2030_v48, %v2029_v43 }
 0x14d   :  { %v2032_v53 = vpop.f32.mrf.mxu1  ;;  %v1953_v54 = vpop.f32.mrf.mxu0 }
 0x14e   :  { %v4007_v55 = vadd.f32 %v2031_v50, %v935_v46  ;;  %v1954_v35 = vadd.f32 %v1953_v54, %v1952_v49 }
 0x14f   :  { %v2033_v56 = vpop.f32.mrf.mxu1  ;;  %v1955_v57 = vpop.f32.mrf.mxu0 }
 0x150   :  { %v940_v60 = vadd.f32 %v1954_v35, %v3926_v24  ;;  %v2034_v58 = vadd.f32 %v2033_v56, %v2032_v53 }
 0x151   :  { %v2035_v62 = vpop.f32.mrf.mxu1  ;;  %v1956_v63 = vpop.f32.mrf.mxu0 }
 0x152   :  { %v4010_v0 = vadd.f32 %v2034_v58, %v940_v60  ;;  %v1957_v47 = vadd.f32 %v1956_v63, %v1955_v57 }
 0x153   :  { %v2036_v2 = vpop.f32.mrf.mxu1  ;;  %v1958_v3 = vpop.f32.mrf.mxu0 }
 0x154   :  { %4275 = vst [vmem:[#allocation2_spill] sm:$0xff] %v4010_v0  ;;  %v945_v10 = vadd.f32 %v1957_v47, %v3941_v38  ;;  %v2037_v4 = vadd.f32 %v2036_v2, %v2035_v62 }
 0x155   :  { %v2038_v6 = vpop.f32.mrf.mxu1  ;;  %v1959_v8 = vpop.f32.mrf.mxu0 }
 0x156   :  { %v4013_v11 = vadd.f32 %v2037_v4, %v945_v10  ;;  %v1960_v59 = vadd.f32 %v1959_v8, %v1958_v3 }
 0x157   :  { %v2039_v12 = vpop.f32.mrf.mxu1  ;;  %v1961_v14 = vpop.f32.mrf.mxu0 }
 0x158   :  { %4276 = vst [vmem:[#allocation3_spill] sm:$0xff] %v4013_v11  ;;  %v950_v24 = vadd.f32 %v1960_v59, %v3956_v52  ;;  %v2040_v15 = vadd.f32 %v2039_v12, %v2038_v6 }
 0x159   :  { %v2041_v17 = vpop.f32.mrf.mxu1  ;;  %v1962_v18 = vpop.f32.mrf.mxu0 }
 0x15a   :  { %v4016_v19 = vadd.f32 %v2040_v15, %v950_v24  ;;  %v1963_v7 = vadd.f32 %v1962_v18, %v1961_v14 }
 0x15b   :  { %v2042_v21 = vpop.f32.mrf.mxu1  ;;  %v1964_v25 = vpop.f32.mrf.mxu0 }
 0x15c   :  { %4277 = vst [vmem:[#allocation4_spill] sm:$0xff] %v4016_v19  ;;  %v955_v38 = vadd.f32 %v1963_v7, %v3968_v1  ;;  %v2043_v26 = vadd.f32 %v2042_v21, %v2041_v17 }
 0x15d   :  { %v2044_v28 = vpop.f32.mrf.mxu1  ;;  %v1965_v29 = vpop.f32.mrf.mxu0 }
 0x15e   :  { %v4019_v30 = vadd.f32 %v2043_v26, %v955_v38  ;;  %v1966_v20 = vadd.f32 %v1965_v29, %v1964_v25 }
 0x15f   :  { %v2045_v31 = vpop.f32.mrf.mxu1  ;;  %v1967_v34 = vpop.f32.mrf.mxu0 }
 0x160   :  { %4278 = vst [vmem:[#allocation5_spill] sm:$0xff] %v4019_v30  ;;  %v960_v52 = vadd.f32 %v1966_v20, %v3974_v13  ;;  %v2046_v36 = vadd.f32 %v2045_v31, %v2044_v28 }
 0x161   :  { %v2047_v9 = vpop.f32.mrf.mxu1  ;;  %v1968_v39 = vpop.f32.mrf.mxu0 }
 0x162   :  { %v4022_v40 = vadd.f32 %v2046_v36, %v960_v52  ;;  %v1969_v33 = vadd.f32 %v1968_v39, %v1967_v34 }
 0x163   :  { %v2048_v41 = vpop.f32.mrf.mxu1  ;;  %v2082_v43 = vpop.f32.mrf.mxu0 }
 0x164   :  { %4279 = vst [vmem:[#allocation6_spill] sm:$0xff] %v4022_v40  ;;  %v965_v1 = vadd.f32 %v1969_v33, %v3977_v22  ;;  %v2049_v44 = vadd.f32 %v2048_v41, %v2047_v9 }
 0x165   :  { %v4025_v23 = vpop.f32.mrf.mxu1  ;;  %v2083_v48 = vpop.f32.mrf.mxu0 }
 0x166   :  { %v4027_v49 = vadd.f32 %v2049_v44, %v965_v1 }
 0x167   :  { %v4029_v46 = vpop.f32.mrf.mxu1  ;;  %v2085_v50 = vpop.f32.mrf.mxu0 }
 0x168   :  { %4280 = vst [vmem:[#allocation7_spill] sm:$0xff] %v4027_v49 }
 0x169   :  { %v4031_v13 = vpop.f32.mrf.mxu1  ;;  %v2086_v53 = vpop.f32.mrf.mxu0 }
 0x16b   :  { %v4033_v54 = vpop.f32.mrf.mxu1  ;;  %v4035_v35 = vpop.f32.mrf.mxu0 }
 0x16d   :  { %v4037_v56 = vpop.f32.mrf.mxu1  ;;  %v4039_v57 = vpop.f32.mrf.mxu0 }
 0x16f   :  { %v4041_v22 = vpop.f32.mrf.mxu1  ;;  %v4043_v60 = vpop.f32.mrf.mxu0 }
 0x171   :  { %v4045_v58 = vpop.f32.mrf.mxu1  ;;  %v4047_v62 = vpop.f32.mrf.mxu0 }
 0x173   :  { %v4049_v63 = vpop.f32.mrf.mxu1  ;;  %v4051_v47 = vpop.f32.mrf.mxu0 }
 0x175   :  { %v4053_v2 = vpop.f32.mrf.mxu1  ;;  %v4055_v3 = vpop.f32.mrf.mxu0 }
 0x177   :  { %v4057_v10 = vpop.f32.mrf.mxu1  ;;  %v4059_v4 = vpop.f32.mrf.mxu0 }
 0x179   :  { %v4061_v6 = vpop.f32.mrf.mxu1  ;;  %v4063_v8 = vpop.f32.mrf.mxu0 }
 0x17b   :  { %v4065_v59 = vpop.f32.mrf.mxu1  ;;  %v4067_v12 = vpop.f32.mrf.mxu0 }
 0x17d   :  { %v4069_v14 = vpop.f32.mrf.mxu1  ;;  %v4071_v24 = vpop.f32.mrf.mxu0 }
 0x17f   :  { %v4073_v15 = vpop.f32.mrf.mxu1  ;;  %v4075_v17 = vpop.f32.mrf.mxu0 }
 0x181   :  { %v4077_v18 = vpop.f32.mrf.mxu1  ;;  %v4079_v7 = vpop.f32.mrf.mxu0 }
 0x183   :  { %v4081_v21 = vpop.f32.mrf.mxu1  ;;  %v4083_v25 = vpop.f32.mrf.mxu0 }
 0x185   :  { %v4085_v38 = vpop.f32.mrf.mxu1  ;;  %v4087_v26 = vpop.f32.mrf.mxu0 }
 0x187   :  { %v4089_v28 = vpop.f32.mrf.mxu1  ;;  %v4091_v29 = vpop.f32.mrf.mxu0 }
 0x189   :  { %v4093_v20 = vpop.f32.mrf.mxu1  ;;  %v4095_v31 = vpop.f32.mrf.mxu0 }
 0x18b   :  { %v4097_v34 = vpop.f32.mrf.mxu1  ;;  %v4099_v52 = vpop.f32.mrf.mxu0 }
 0x18c   :  { %4281 = vst [vmem:[#allocation8_spill] sm:$0xff] %v4097_v34 }
 0x18d   :  { %v4101_v36 = vpop.f32.mrf.mxu1  ;;  %v4103_v9 = vpop.f32.mrf.mxu0 }
 0x18e   :  { %4282 = vst [vmem:[#allocation9_spill] sm:$0xff] %v4101_v36 }
 0x18f   :  { %v4105_v39 = vpop.f32.mrf.mxu1  ;;  %v4107_v33 = vpop.f32.mrf.mxu0 }
 0x190   :  { %4283 = vst [vmem:[#allocation10_spill] sm:$0xff] %v4105_v39  ;;  %4284 = vst [vmem:[#allocation11_spill] sm:$0xff] %v4107_v33 }
 0x191   :  { %v4109_v41 = vpop.f32.mrf.mxu1  ;;  %v4111_v1 = vpop.f32.mrf.mxu0 }
 0x192   :  { %4285 = vst [vmem:[#allocation12_spill] sm:$0xff] %v4109_v41  ;;  %4286 = vst [vmem:[#allocation13_spill] sm:$0xff] %v4111_v1 }
 0x193   :  { %v4113_v44 = vpop.f32.mrf.mxu1  ;;  %v4115_v49 = vpop.f32.mrf.mxu0 }
 0x194   :  { %4287 = vst [vmem:[#allocation14_spill] sm:$0xff] %v4113_v44  ;;  %4288 = vst [vmem:[#allocation15_spill] sm:$0xff] %v4115_v49  ;;  %v2084_v49 = vadd.f32 %v2083_v48, %v2082_v43 }
 0x195   :  { %v4117_v40 = vpop.f32.mrf.mxu1  ;;  %v4119_v30 = vpop.f32.mrf.mxu0 }
 0x196   :  { %4289 = vst [vmem:[#allocation16_spill] sm:$0xff] %v4117_v40  ;;  %4290 = vst [vmem:[#allocation17_spill] sm:$0xff] %v4119_v30 }
 0x197   :  { %v4121_v19 = vpop.f32.mrf.mxu1  ;;  %v4123_v11 = vpop.f32.mrf.mxu0 }
 0x198   :  { %4291 = vst [vmem:[#allocation18_spill] sm:$0xff] %v4121_v19  ;;  %4292 = vst [vmem:[#allocation19_spill] sm:$0xff] %v4123_v11  ;;  %v2087_v19 = vadd.f32 %v2086_v53, %v2085_v50  ;;  %v2090_v50 = vadd.f32 %v4039_v57, %v4035_v35  ;;  %v2170_v57 = vadd.f32 %v4041_v22, %v4037_v56 }
 0x199   :  { %v4125_v36 = vpop.f32.mrf.mxu1  ;;  %v4127_v39 = vpop.f32.mrf.mxu0 }
 0x19a   :  { %4293 = vst [vmem:[#allocation20_spill] sm:$0xff] %v4125_v36  ;;  %4294 = vst [vmem:[#allocation21_spill] sm:$0xff] %v4127_v39  ;;  %v1180_v36 = vadd.f32 %v2084_v49, %v3980_v32 }
 0x19b   :  { %v4129_v33 = vpop.f32.mrf.mxu1  ;;  %v4131_v41 = vpop.f32.mrf.mxu0 }
 0x19c   :  { %4295 = vst [vmem:[#allocation22_spill] sm:$0xff] %v4129_v33  ;;  %4296 = vst [vmem:[#allocation23_spill] sm:$0xff] %v4131_v41 }
 0x19d   :  { %v4133_v1 = vpop.f32.mrf.mxu1  ;;  %v4135_v44 = vpop.f32.mrf.mxu0 }
 0x19e   :  { %4297 = vst [vmem:[#allocation24_spill] sm:$0xff] %v4133_v1  ;;  %4298 = vst [vmem:[#allocation25_spill] sm:$0xff] %v4135_v44  ;;  %v2164_v1 = vadd.f32 %v4029_v46, %v4025_v23  ;;  %v1185_v44 = vadd.f32 %v2087_v19, %v3983_v42  ;;  %v1190_v23 = vadd.f32 %v2090_v50, %v3986_v51 }
 0x19f   :  { %v4137_v40 = vpop.f32.mrf.mxu1  ;;  %v4139_v30 = vpop.f32.mrf.mxu0  ;;  %v2093_v42 = vadd.f32 %v4047_v62, %v4043_v60 }
 0x1a0   :  { %4299 = vst [vmem:[#allocation26_spill] sm:$0xff] %v4137_v40  ;;  %4300 = vst [vmem:[#allocation27_spill] sm:$0xff] %v4139_v30  ;;  %v1325_v40 = vadd.f32 %v2164_v1, %v1180_v36  ;;  %v1335_v1 = vadd.f32 %v2170_v57, %v1190_v23 }
 0x1a1   :  { %v4141_v0 = vpop.f32.mrf.mxu1  ;;  %v4143_v11 = vpop.f32.mrf.mxu0  ;;  %v1195_v51 = vadd.f32 %v2093_v42, %v3989_v61  ;;  %v2099_v61 = vadd.f32 %v4063_v8, %v4059_v4  ;;  %v2102_v4 = vadd.f32 %v4071_v24, %v4067_v12 }
 0x1a2   :  { %4301 = vst [vmem:[#allocation28_spill] sm:$0xff] %v4141_v0  ;;  %4302 = vst [vmem:[#allocation29_spill] sm:$0xff] %v4143_v11  ;;  %v2167_v0 = vadd.f32 %v4033_v54, %v4031_v13 }
 0x1a3   :  { %v4146_v39 = vpop.f32.mrf.mxu1  ;;  %v2242_v33 = vpop.f32.mrf.mxu0  ;;  %v1210_v24 = vadd.f32 %v2102_v4, %v3998_v27  ;;  %v2108_v27 = vadd.f32 %v4087_v26, %v4083_v25  ;;  %v2111_v25 = vadd.f32 %v4095_v31, %v4091_v29 }
 0x1a4   :  { %4303 = vst [vmem:[#allocation30_spill] sm:$0xff] %v4146_v39  ;;  %v1330_v30 = vadd.f32 %v2167_v0, %v1185_v44  ;;  %v2096_v0 = vadd.f32 %v4055_v3, %v4051_v47 }
 0x1a5   :  { %v2322_v43 = vpop.f32.mrf.mxu1  ;;  %v2243_v48 = vpop.f32.mrf.mxu0  ;;  %v1225_v31 = vadd.f32 %v2111_v25, %v4007_v55  ;;  %v4306_v55 = vld [vmem:[#allocation11_spill] sm:$0xff] }
 0x1a6   :  { %v2244_v53 = vadd.f32 %v2243_v48, %v2242_v33  ;;  %v1200_v47 = vadd.f32 %v2096_v0, %v3992_v5 }
 0x1a7   :  { %v2323_v11 = vpop.f32.mrf.mxu1  ;;  %v2245_v32 = vpop.f32.mrf.mxu0 }
 0x1a8   :  { %v1470_v49 = vadd.f32 %v2244_v53, %v1325_v40  ;;  %v2324_v39 = vadd.f32 %v2323_v11, %v2322_v43 }
 0x1a9   :  { %v2325_v41 = vpop.f32.mrf.mxu1  ;;  %v2246_v34 = vpop.f32.mrf.mxu0 }
 0x1aa   :  { %v1615_v19 = vadd.f32 %v2324_v39, %v1470_v49  ;;  %v2247_v46 = vadd.f32 %v2246_v34, %v2245_v32 }
 0x1ab   :  { %v2326_v36 = vpop.f32.mrf.mxu1  ;;  %v2248_v35 = vpop.f32.mrf.mxu0 }
 0x1ac   :  { %v1693_v13 = vmax.f32 %v1615_v19, 0.0  ;;  %v1475_v54 = vadd.f32 %v2247_v46, %v1330_v30  ;;  %v2327_v33 = vadd.f32 %v2326_v36, %v2325_v41  ;;  %v2173_v30 = vadd.f32 %v4049_v63, %v4045_v58 }
 0x1ad   :  { %v2328_v11 = vpop.f32.mrf.mxu1  ;;  %v2249_v40 = vpop.f32.mrf.mxu0  ;;  %v2176_v58 = vadd.f32 %v4057_v10, %v4053_v2  ;;  %v1205_v46 = vadd.f32 %v2099_v61, %v3995_v16  ;;  %v2105_v16 = vadd.f32 %v4079_v7, %v4075_v17  ;;  %v1220_v61 = vadd.f32 %v2108_v27, %v4004_v45 }
 0x1ae   :  { %1709 = vst [vmem:[%s4274_s3] sm:$0xff] %v1693_v13  ;;  %v1620_v60 = vadd.f32 %v2327_v33, %v1475_v54  ;;  %v2250_v62 = vadd.f32 %v2249_v40, %v2248_v35  ;;  %v1340_v43 = vadd.f32 %v2173_v30, %v1195_v51  ;;  %v2179_v35 = vadd.f32 %v4065_v59, %v4061_v6 }
 0x1af   :  { %v2329_v34 = vpop.f32.mrf.mxu1  ;;  %v2251_v39 = vpop.f32.mrf.mxu0  ;;  %v1345_v23 = vadd.f32 %v2176_v58, %v1200_v47  ;;  %v2182_v6 = vadd.f32 %v4073_v15, %v4069_v14  ;;  %v1215_v17 = vadd.f32 %v2105_v16, %v4001_v37  ;;  %v2185_v14 = vadd.f32 %v4081_v21, %v4077_v18  ;;  %v4308_v16 = vld [vmem:[#allocation9_spill] sm:$0xff] }
 0x1b0   :  { %v1694_v56 = vmax.f32 %v1620_v60, 0.0  ;;  %v1480_v22 = vadd.f32 %v2250_v62, %v1335_v1  ;;  %v2330_v41 = vadd.f32 %v2329_v34, %v2328_v11  ;;  %v1350_v12 = vadd.f32 %v2179_v35, %v1205_v46  ;;  %v4307_v35 = vld [vmem:[#allocation13_spill] sm:$0xff] }
 0x1b1   :  { %v2331_v3 = vpop.f32.mrf.mxu1  ;;  %v2252_v44 = vpop.f32.mrf.mxu0  ;;  %v2114_v45 = vadd.f32 %v4103_v9, %v4099_v52  ;;  %v4305_v52 = vld [vmem:[#allocation2_spill] sm:$0xff] }
 0x1b2   :  { %1710 = vst [vmem:[%s4274_s3 + $0x8] sm:$0xff] %v1694_v56  ;;  %v1625_v48 = vadd.f32 %v2330_v41, %v1480_v22  ;;  %v2253_v50 = vadd.f32 %v2252_v44, %v2251_v39  ;;  %v1355_v39 = vadd.f32 %v2182_v6, %v1210_v24 }
 0x1b3   :  { %v2332_v63 = vpop.f32.mrf.mxu1  ;;  %v2254_v53 = vpop.f32.mrf.mxu0  ;;  %v1230_v9 = vadd.f32 %v2114_v45, %v4305_v52  ;;  %v4323_v52 = vld [vmem:[#allocation20_spill] sm:$0xff] }
 0x1b4   :  { %v1695_v32 = vmax.f32 %v1625_v48, 0.0  ;;  %v1485_v49 = vadd.f32 %v2253_v50, %v1340_v43  ;;  %v2333_v5 = vadd.f32 %v2332_v63, %v2331_v3  ;;  %v1360_v3 = vadd.f32 %v2185_v14, %v1215_v17  ;;  %v4312_v17 = vld [vmem:[#allocation17_spill] sm:$0xff]  ;;  %v4314_v14 = vld [vmem:[#allocation14_spill] sm:$0xff] }
 0x1b5   :  { %v2334_v42 = vpop.f32.mrf.mxu1  ;;  %v2255_v19 = vpop.f32.mrf.mxu0  ;;  %v2188_v50 = vadd.f32 %v4089_v28, %v4085_v38  ;;  %v4304_v38 = vld [vmem:[#allocation8_spill] sm:$0xff] }
 0x1b6   :  { %1711 = vst [vmem:[%s4274_s3 + $0x10] sm:$0xff] %v1695_v32  ;;  %v1630_v8 = vadd.f32 %v2333_v5, %v1485_v49  ;;  %v2256_v36 = vadd.f32 %v2255_v19, %v2254_v53  ;;  %v2191_v28 = vadd.f32 %v4304_v38, %v4093_v20  ;;  %v4321_v38 = vld [vmem:[#allocation23_spill] sm:$0xff] }
 0x1b7   :  { %v2335_v2 = vpop.f32.mrf.mxu1  ;;  %v2257_v10 = vpop.f32.mrf.mxu0  ;;  %v1365_v29 = vadd.f32 %v2188_v50, %v1220_v61 }
 0x1b8   :  { %v1696_v57 = vmax.f32 %v1630_v8, 0.0  ;;  %v1490_v13 = vadd.f32 %v2256_v36, %v1345_v23  ;;  %v2336_v54 = vadd.f32 %v2335_v2, %v2334_v42 }
 0x1b9   :  { %v2337_v33 = vpop.f32.mrf.mxu1  ;;  %v2258_v0 = vpop.f32.mrf.mxu0 }
 0x1ba   :  { %1712 = vst [vmem:[%s4274_s3 + $0x18] sm:$0xff] %v1696_v57  ;;  %v1635_v11 = vadd.f32 %v2336_v54, %v1490_v13  ;;  %v2259_v40 = vadd.f32 %v2258_v0, %v2257_v10  ;;  %v1370_v10 = vadd.f32 %v2191_v28, %v1225_v31  ;;  %v2117_v57 = vadd.f32 %v4307_v35, %v4306_v55  ;;  %v4320_v31 = vld [vmem:[#allocation5_spill] sm:$0xff] }
 0x1bb   :  { %v2338_v1 = vpop.f32.mrf.mxu1  ;;  %v2260_v51 = vpop.f32.mrf.mxu0  ;;  %v4322_v28 = vld [vmem:[#allocation25_spill] sm:$0xff] }
 0x1bc   :  { %v1697_v59 = vmax.f32 %v1635_v11, 0.0  ;;  %v1495_v60 = vadd.f32 %v2259_v40, %v1350_v12  ;;  %v2339_v62 = vadd.f32 %v2338_v1, %v2337_v33  ;;  %v4309_v33 = vld [vmem:[#allocation10_spill] sm:$0xff] }
 0x1bd   :  { %v2340_v7 = vpop.f32.mrf.mxu1  ;;  %v2261_v34 = vpop.f32.mrf.mxu0  ;;  %v2194_v20 = vadd.f32 %v4309_v33, %v4308_v16  ;;  %v4325_v33 = vld [vmem:[#allocation6_spill] sm:$0xff] }
 0x1be   :  { %1713 = vst [vmem:[%s4274_s3 + $0x20] sm:$0xff] %v1697_v59  ;;  %v1640_v30 = vadd.f32 %v2339_v62, %v1495_v60  ;;  %v2262_v56 = vadd.f32 %v2261_v34, %v2260_v51  ;;  %v4310_v59 = vld [vmem:[#allocation3_spill] sm:$0xff] }
 0x1bf   :  { %v2341_v15 = vpop.f32.mrf.mxu1  ;;  %v2263_v22 = vpop.f32.mrf.mxu0  ;;  %v1375_v1 = vadd.f32 %v2194_v20, %v1230_v9  ;;  %v1235_v60 = vadd.f32 %v2117_v57, %v4310_v59  ;;  %v4311_v62 = vld [vmem:[#allocation15_spill] sm:$0xff]  ;;  %v4324_v9 = vld [vmem:[#allocation22_spill] sm:$0xff] }
 0x1c0   :  { %v1698_v41 = vmax.f32 %v1640_v30, 0.0  ;;  %v1500_v47 = vadd.f32 %v2262_v56, %v1355_v39  ;;  %v2342_v37 = vadd.f32 %v2341_v15, %v2340_v7  ;;  %v2120_v7 = vadd.f32 %v4312_v17, %v4311_v62  ;;  %v4313_v56 = vld [vmem:[#allocation12_spill] sm:$0xff]  ;;  %v4329_v59 = vld [vmem:[#allocation26_spill] sm:$0xff] }
 0x1c1   :  { %v2343_v44 = vpop.f32.mrf.mxu1  ;;  %v2264_v43 = vpop.f32.mrf.mxu0  ;;  %v2197_v15 = vadd.f32 %v4314_v14, %v4313_v56 }
 0x1c2   :  { %1714 = vst [vmem:[%s4274_s3 + $0x28] sm:$0xff] %v1698_v41  ;;  %v1645_v26 = vadd.f32 %v2342_v37, %v1500_v47  ;;  %v2265_v48 = vadd.f32 %v2264_v43, %v2263_v22  ;;  %v4315_v37 = vld [vmem:[#allocation19_spill] sm:$0xff] }
 0x1c3   :  { %v2344_v18 = vpop.f32.mrf.mxu1  ;;  %v2266_v21 = vpop.f32.mrf.mxu0  ;;  %v1380_v25 = vadd.f32 %v2197_v15, %v1235_v60 }
 0x1c4   :  { %v1699_v58 = vmax.f32 %v1645_v26, 0.0  ;;  %v1505_v63 = vadd.f32 %v2265_v48, %v1360_v3  ;;  %v2345_v53 = vadd.f32 %v2344_v18, %v2343_v44  ;;  %v4316_v3 = vld [vmem:[#allocation21_spill] sm:$0xff]  ;;  %v4317_v26 = vld [vmem:[#allocation4_spill] sm:$0xff] }
 0x1c5   :  { %v2346_v32 = vpop.f32.mrf.mxu1  ;;  %v2267_v49 = vpop.f32.mrf.mxu0  ;;  %v2123_v44 = vadd.f32 %v4316_v3, %v4315_v37  ;;  %v1240_v48 = vadd.f32 %v2120_v7, %v4317_v26  ;;  %v4332_v37 = vld [vmem:[#allocation30_spill] sm:$0xff] }
 0x1c6   :  { %1715 = vst [vmem:[%s4274_s3 + $0x30] sm:$0xff] %v1699_v58  ;;  %v1650_v5 = vadd.f32 %v2345_v53, %v1505_v63  ;;  %v2268_v23 = vadd.f32 %v2267_v49, %v2266_v21  ;;  %v4318_v63 = vld [vmem:[#allocation16_spill] sm:$0xff]  ;;  %v4319_v53 = vld [vmem:[#allocation18_spill] sm:$0xff] }
 0x1c7   :  { %v2347_v42 = vpop.f32.mrf.mxu1  ;;  %v2269_v19 = vpop.f32.mrf.mxu0  ;;  %v2200_v45 = vadd.f32 %v4319_v53, %v4318_v63 }
 0x1c8   :  { %v1700_v46 = vmax.f32 %v1650_v5, 0.0  ;;  %v1510_v4 = vadd.f32 %v2268_v23, %v1365_v29  ;;  %v2348_v8 = vadd.f32 %v2347_v42, %v2346_v32  ;;  %v1245_v5 = vadd.f32 %v2123_v44, %v4320_v31 }
 0x1c9   :  { %v2349_v36 = vpop.f32.mrf.mxu1  ;;  %v2270_v2 = vpop.f32.mrf.mxu0 }
 0x1ca   :  { %1716 = vst [vmem:[%s4274_s3 + $0x38] sm:$0xff] %v1700_v46  ;;  %v1655_v13 = vadd.f32 %v2348_v8, %v1510_v4  ;;  %v2271_v54 = vadd.f32 %v2270_v2, %v2269_v19  ;;  %v1385_v19 = vadd.f32 %v2200_v45, %v1240_v48  ;;  %v2126_v46 = vadd.f32 %v4322_v28, %v4321_v38 }
 0x1cb   :  { %v2350_v0 = vpop.f32.mrf.mxu1  ;;  %v2272_v12 = vpop.f32.mrf.mxu0 }
 0x1cc   :  { %v1701_v24 = vmax.f32 %v1655_v13, 0.0  ;;  %v1515_v11 = vadd.f32 %v2271_v54, %v1370_v10  ;;  %v2351_v40 = vadd.f32 %v2350_v0, %v2349_v36  ;;  %v2203_v36 = vadd.f32 %v4324_v9, %v4323_v52  ;;  %v4326_v0 = vld [vmem:[#allocation27_spill] sm:$0xff] }
 0x1cd   :  { %v2352_v51 = vpop.f32.mrf.mxu1  ;;  %v2273_v6 = vpop.f32.mrf.mxu0  ;;  %v1250_v20 = vadd.f32 %v2126_v46, %v4325_v33 }
 0x1ce   :  { %1717 = vst [vmem:[%s4274_s3 + $0x40] sm:$0xff] %v1701_v24  ;;  %v1660_v34 = vadd.f32 %v2351_v40, %v1515_v11  ;;  %v2274_v39 = vadd.f32 %v2273_v6, %v2272_v12  ;;  %v1390_v13 = vadd.f32 %v2203_v36, %v1245_v5  ;;  %v4327_v12 = vld [vmem:[#allocation29_spill] sm:$0xff]  ;;  %v4328_v6 = vld [vmem:[#allocation24_spill] sm:$0xff] }
 0x1cf   :  { %v2353_v27 = vpop.f32.mrf.mxu1  ;;  %v2275_v30 = vpop.f32.mrf.mxu0  ;;  %v2129_v24 = vadd.f32 %v4327_v12, %v4326_v0  ;;  %v2206_v60 = vadd.f32 %v4329_v59, %v4328_v6 }
 0x1d0   :  { %v1702_v22 = vmax.f32 %v1660_v34, 0.0  ;;  %v1520_v41 = vadd.f32 %v2274_v39, %v1375_v1  ;;  %v2354_v47 = vadd.f32 %v2353_v27, %v2352_v51 }
 0x1d1   :  { %v2355_v43 = vpop.f32.mrf.mxu1  ;;  %v2276_v61 = vpop.f32.mrf.mxu0  ;;  %v1395_v27 = vadd.f32 %v2206_v60, %v1250_v20 }
 0x1d2   :  { %1718 = vst [vmem:[%s4274_s3 + $0x48] sm:$0xff] %v1702_v22  ;;  %v1665_v18 = vadd.f32 %v2354_v47, %v1520_v41  ;;  %v2277_v21 = vadd.f32 %v2276_v61, %v2275_v30  ;;  %v4330_v30 = vld [vmem:[#allocation7_spill] sm:$0xff]  ;;  %v4331_v47 = vld [vmem:[#allocation28_spill] sm:$0xff] }
 0x1d3   :  { %v2356_v50 = vpop.f32.mrf.mxu1  ;;  %v2278_v58 = vpop.f32.mrf.mxu0  ;;  %v1255_v56 = vadd.f32 %v2129_v24, %v4330_v30  ;;  %v2209_v3 = vadd.f32 %v4332_v37, %v4331_v47 }
 0x1d4   :  { %v1703_v32 = vmax.f32 %v1665_v18, 0.0  ;;  %v1525_v49 = vadd.f32 %v2277_v21, %v1380_v25  ;;  %v2357_v29 = vadd.f32 %v2356_v50, %v2355_v43 }
 0x1d5   :  { %v2358_v23 = vpop.f32.mrf.mxu1  ;;  %v2279_v42 = vpop.f32.mrf.mxu0  ;;  %v1400_v48 = vadd.f32 %v2209_v3, %v1255_v56 }
 0x1d6   :  { %1719 = vst [vmem:[%s4274_s3 + $0x50] sm:$0xff] %v1703_v32  ;;  %v1670_v4 = vadd.f32 %v2357_v29, %v1525_v49  ;;  %v2280_v8 = vadd.f32 %v2279_v42, %v2278_v58 }
 0x1d7   :  { %v2359_v2 = vpop.f32.mrf.mxu1  ;;  %v2281_v10 = vpop.f32.mrf.mxu0 }
 0x1d8   :  { %v1704_v55 = vmax.f32 %v1670_v4, 0.0  ;;  %v1530_v35 = vadd.f32 %v2280_v8, %v1385_v19  ;;  %v2360_v57 = vadd.f32 %v2359_v2, %v2358_v23 }
 0x1d9   :  { %v2361_v54 = vpop.f32.mrf.mxu1  ;;  %v2282_v16 = vpop.f32.mrf.mxu0 }
 0x1da   :  { %1720 = vst [vmem:[%s4274_s3 + $0x58] sm:$0xff] %v1704_v55  ;;  %v1675_v11 = vadd.f32 %v2360_v57, %v1530_v35  ;;  %v2283_v40 = vadd.f32 %v2282_v16, %v2281_v10 }
 0x1db   :  { %v2362_v1 = vpop.f32.mrf.mxu1  ;;  %v2284_v51 = vpop.f32.mrf.mxu0 }
 0x1dc   :  { %v1705_v62 = vmax.f32 %v1675_v11, 0.0  ;;  %v1535_v17 = vadd.f32 %v2283_v40, %v1390_v13  ;;  %v2363_v7 = vadd.f32 %v2362_v1, %v2361_v54 }
 0x1dd   :  { %v2364_v34 = vpop.f32.mrf.mxu1  ;;  %v2285_v39 = vpop.f32.mrf.mxu0 }
 0x1de   :  { %1721 = vst [vmem:[%s4274_s3 + $0x60] sm:$0xff] %v1705_v62  ;;  %v1680_v14 = vadd.f32 %v2363_v7, %v1535_v17  ;;  %v2286_v15 = vadd.f32 %v2285_v39, %v2284_v51 }
 0x1df   :  { %v2365_v22 = vpop.f32.mrf.mxu1  ;;  %v2287_v41 = vpop.f32.mrf.mxu0 }
 0x1e0   :  { %v1706_v44 = vmax.f32 %v1680_v14, 0.0  ;;  %v1540_v43 = vadd.f32 %v2286_v15, %v1395_v27  ;;  %v2366_v61 = vadd.f32 %v2365_v22, %v2364_v34 }
 0x1e1   :  { %v2367_v25 = vpop.f32.mrf.mxu1  ;;  %v2288_v26 = vpop.f32.mrf.mxu0 }
 0x1e2   :  { %1722 = vst [vmem:[%s4274_s3 + $0x68] sm:$0xff] %v1706_v44  ;;  %v1685_v18 = vadd.f32 %v2366_v61, %v1540_v43  ;;  %v2289_v21 = vadd.f32 %v2288_v26, %v2287_v41 }
 0x1e3   :  { %v2368_v50 = vpop.f32.mrf.mxu1 }
 0x1e4   :  { %v1707_v58 = vmax.f32 %v1685_v18, 0.0  ;;  %v1545_v63 = vadd.f32 %v2289_v21, %v1400_v48  ;;  %v2369_v53 = vadd.f32 %v2368_v50, %v2367_v25 }
 0x1e6   :  { %1723 = vst [vmem:[%s4274_s3 + $0x70] sm:$0xff] %v1707_v58  ;;  %v1690_v45 = vadd.f32 %v2369_v53, %v1545_v63 }
 0x1e8   :  { %v1708_v32 = vmax.f32 %v1690_v45, 0.0 }
 0x1ea   :  { %1724 = vst [vmem:[%s4274_s3 + $0x78] sm:$0xff] %v1708_v32 }

// kernel: cnn_forward_pallas.8
= control target key start
LH: loop header
LB: loop body
LE: loop exit
PB: predicated region body
PF: predicated region fallthrough
CT: control target
= control target key end

     0   :  { %s2387_s1 = inlined_call_operand.vmem [shape: f32[2048,128], index: 1, kind: input, shape index: {}]   ;;  %s2388_s0 = inlined_call_operand.vmem [shape: f32[32,2048], index: 0, kind: input, shape index: {}]   ;;  %s2389_s2 = inlined_call_operand.vmem [shape: f32[1,128], index: 2, kind: input, shape index: {}]   ;;  %s2390_s3 = inlined_call_operand.vmem [shape: f32[32,128], index: 3, kind: output, shape index: {}]  }
   0x1   :  { %v109_v0 = vld [vmem:[%s2387_s1 + $0xf8] sm:$0xff]  ;;  %v108_v4 = vld [vmem:[%s2387_s1 + $0xf0] sm:$0xff]  ;;  %v107_v8 = vld [vmem:[%s2387_s1 + $0xe8] sm:$0xff] }
   0x2   :  { %v141_v1 = vld [vmem:[%s2387_s1 + $0x1f8] sm:$0xff]  ;;  %1034 = vmatprep.subr.mxu0 %v109_v0  ;;  %v140_v5 = vld [vmem:[%s2387_s1 + $0x1f0] sm:$0xff]  ;;  %v139_v9 = vld [vmem:[%s2387_s1 + $0x1e8] sm:$0xff] }
   0x3   :  { %v93_v2 = vld [vmem:[%s2387_s1 + $0x78] sm:$0xff]  ;;  %1078 = vmatprep.subr.mxu1 %v141_v1  ;;  %v92_v6 = vld [vmem:[%s2387_s1 + $0x70] sm:$0xff]  ;;  %v91_v10 = vld [vmem:[%s2387_s1 + $0x68] sm:$0xff] }
   0x4   :  { %v125_v3 = vld [vmem:[%s2387_s1 + $0x178] sm:$0xff]  ;;  %1035 = vmatpush3.msra.mxu0 %v93_v2  ;;  %v124_v7 = vld [vmem:[%s2387_s1 + $0x170] sm:$0xff]  ;;  %v123_v11 = vld [vmem:[%s2387_s1 + $0x168] sm:$0xff] }
   0x5   :  { %1079 = vmatpush3.msra.mxu1 %v125_v3  ;;  %1036 = vmatprep.subr.mxu0 %v108_v4  ;;  %v106_v12 = vld [vmem:[%s2387_s1 + $0xe0] sm:$0xff]  ;;  %v105_v16 = vld [vmem:[%s2387_s1 + $0xd8] sm:$0xff]  ;;  %v104_v20 = vld [vmem:[%s2387_s1 + $0xd0] sm:$0xff] }
   0x6   :  { %1080 = vmatprep.subr.mxu1 %v140_v5  ;;  %1037 = vmatpush3.msra.mxu0 %v92_v6  ;;  %v138_v13 = vld [vmem:[%s2387_s1 + $0x1e0] sm:$0xff]  ;;  %v137_v17 = vld [vmem:[%s2387_s1 + $0x1d8] sm:$0xff]  ;;  %v136_v21 = vld [vmem:[%s2387_s1 + $0x1d0] sm:$0xff] }
   0x7   :  { %1081 = vmatpush3.msra.mxu1 %v124_v7  ;;  %1038 = vmatprep.subr.mxu0 %v107_v8  ;;  %v90_v14 = vld [vmem:[%s2387_s1 + $0x60] sm:$0xff]  ;;  %v89_v18 = vld [vmem:[%s2387_s1 + $0x58] sm:$0xff]  ;;  %v88_v22 = vld [vmem:[%s2387_s1 + $0x50] sm:$0xff] }
   0x8   :  { %1082 = vmatprep.subr.mxu1 %v139_v9  ;;  %v122_v15 = vld [vmem:[%s2387_s1 + $0x160] sm:$0xff]  ;;  %1039 = vmatpush3.msra.mxu0 %v91_v10  ;;  %v121_v19 = vld [vmem:[%s2387_s1 + $0x158] sm:$0xff]  ;;  %v120_v23 = vld [vmem:[%s2387_s1 + $0x150] sm:$0xff] }
   0x9   :  { %1083 = vmatpush3.msra.mxu1 %v123_v11  ;;  %1040 = vmatprep.subr.mxu0 %v106_v12  ;;  %v103_v24 = vld [vmem:[%s2387_s1 + $0xc8] sm:$0xff]  ;;  %v102_v28 = vld [vmem:[%s2387_s1 + $0xc0] sm:$0xff]  ;;  %v101_v32 = vld [vmem:[%s2387_s1 + $0xb8] sm:$0xff] }
   0xa   :  { %1084 = vmatprep.subr.mxu1 %v138_v13  ;;  %1041 = vmatpush3.msra.mxu0 %v90_v14  ;;  %v135_v25 = vld [vmem:[%s2387_s1 + $0x1c8] sm:$0xff]  ;;  %v134_v29 = vld [vmem:[%s2387_s1 + $0x1c0] sm:$0xff]  ;;  %v133_v33 = vld [vmem:[%s2387_s1 + $0x1b8] sm:$0xff] }
   0xb   :  { %1085 = vmatpush3.msra.mxu1 %v122_v15  ;;  %1042 = vmatprep.subr.mxu0 %v105_v16  ;;  %v87_v26 = vld [vmem:[%s2387_s1 + $0x48] sm:$0xff]  ;;  %v86_v30 = vld [vmem:[%s2387_s1 + $0x40] sm:$0xff]  ;;  %v85_v34 = vld [vmem:[%s2387_s1 + $0x38] sm:$0xff] }
   0xc   :  { %1086 = vmatprep.subr.mxu1 %v137_v17  ;;  %1043 = vmatpush3.msra.mxu0 %v89_v18  ;;  %v119_v27 = vld [vmem:[%s2387_s1 + $0x148] sm:$0xff]  ;;  %v118_v31 = vld [vmem:[%s2387_s1 + $0x140] sm:$0xff]  ;;  %v117_v35 = vld [vmem:[%s2387_s1 + $0x138] sm:$0xff] }
   0xd   :  { %1087 = vmatpush3.msra.mxu1 %v121_v19  ;;  %1044 = vmatprep.subr.mxu0 %v104_v20  ;;  %v100_v36 = vld [vmem:[%s2387_s1 + $0xb0] sm:$0xff]  ;;  %v99_v40 = vld [vmem:[%s2387_s1 + $0xa8] sm:$0xff]  ;;  %v98_v44 = vld [vmem:[%s2387_s1 + $0xa0] sm:$0xff] }
   0xe   :  { %1088 = vmatprep.subr.mxu1 %v136_v21  ;;  %1045 = vmatpush3.msra.mxu0 %v88_v22  ;;  %v132_v37 = vld [vmem:[%s2387_s1 + $0x1b0] sm:$0xff]  ;;  %v131_v41 = vld [vmem:[%s2387_s1 + $0x1a8] sm:$0xff]  ;;  %v130_v45 = vld [vmem:[%s2387_s1 + $0x1a0] sm:$0xff] }
   0xf   :  { %1089 = vmatpush3.msra.mxu1 %v120_v23  ;;  %1046 = vmatprep.subr.mxu0 %v103_v24  ;;  %v84_v38 = vld [vmem:[%s2387_s1 + $0x30] sm:$0xff]  ;;  %v83_v42 = vld [vmem:[%s2387_s1 + $0x28] sm:$0xff]  ;;  %v82_v46 = vld [vmem:[%s2387_s1 + $0x20] sm:$0xff] }
  0x10   :  { %1090 = vmatprep.subr.mxu1 %v135_v25  ;;  %1047 = vmatpush3.msra.mxu0 %v87_v26  ;;  %v116_v39 = vld [vmem:[%s2387_s1 + $0x130] sm:$0xff]  ;;  %v115_v43 = vld [vmem:[%s2387_s1 + $0x128] sm:$0xff]  ;;  %v114_v47 = vld [vmem:[%s2387_s1 + $0x120] sm:$0xff] }
  0x11   :  { %1091 = vmatpush3.msra.mxu1 %v119_v27  ;;  %1048 = vmatprep.subr.mxu0 %v102_v28  ;;  %v97_v48 = vld [vmem:[%s2387_s1 + $0x98] sm:$0xff]  ;;  %v96_v52 = vld [vmem:[%s2387_s1 + $0x90] sm:$0xff]  ;;  %v95_v56 = vld [vmem:[%s2387_s1 + $0x88] sm:$0xff] }
  0x12   :  { %1092 = vmatprep.subr.mxu1 %v134_v29  ;;  %1049 = vmatpush3.msra.mxu0 %v86_v30  ;;  %v129_v49 = vld [vmem:[%s2387_s1 + $0x198] sm:$0xff]  ;;  %v128_v53 = vld [vmem:[%s2387_s1 + $0x190] sm:$0xff]  ;;  %v127_v57 = vld [vmem:[%s2387_s1 + $0x188] sm:$0xff] }
  0x13   :  { %1093 = vmatpush3.msra.mxu1 %v118_v31  ;;  %1050 = vmatprep.subr.mxu0 %v101_v32  ;;  %v81_v50 = vld [vmem:[%s2387_s1 + $0x18] sm:$0xff]  ;;  %v80_v54 = vld [vmem:[%s2387_s1 + $0x10] sm:$0xff]  ;;  %v79_v58 = vld [vmem:[%s2387_s1 + $0x8] sm:$0xff] }
  0x14   :  { %1094 = vmatprep.subr.mxu1 %v133_v33  ;;  %1051 = vmatpush3.msra.mxu0 %v85_v34  ;;  %v113_v51 = vld [vmem:[%s2387_s1 + $0x118] sm:$0xff]  ;;  %v112_v55 = vld [vmem:[%s2387_s1 + $0x110] sm:$0xff]  ;;  %v111_v59 = vld [vmem:[%s2387_s1 + $0x108] sm:$0xff] }
  0x15   :  { %1095 = vmatpush3.msra.mxu1 %v117_v35  ;;  %1052 = vmatprep.subr.mxu0 %v100_v36  ;;  %v94_v60 = vld [vmem:[%s2387_s1 + $0x80] sm:$0xff]  ;;  %v15_v63 = vld [vmem:[%s2388_s0 + $0x8] sm:$0xff]  ;;  %v17_v2 = vld [vmem:[%s2388_s0 + $0x18] sm:$0xff] }
  0x16   :  { %1096 = vmatprep.subr.mxu1 %v132_v37  ;;  %1053 = vmatpush3.msra.mxu0 %v84_v38  ;;  %v126_v61 = vld [vmem:[%s2387_s1 + $0x180] sm:$0xff]  ;;  %v173_v3 = vld [vmem:[%s2387_s1 + $0x2f8] sm:$0xff]  ;;  %v16_v5 = vld [vmem:[%s2388_s0 + $0x10] sm:$0xff] }
  0x17   :  { %1097 = vmatpush3.msra.mxu1 %v116_v39  ;;  %1054 = vmatprep.subr.mxu0 %v99_v40  ;;  %v78_v62 = vld [vmem:[%s2387_s1] sm:$0xff]  ;;  %v205_v4 = vld [vmem:[%s2387_s1 + $0x3f8] sm:$0xff]  ;;  %v172_v8 = vld [vmem:[%s2387_s1 + $0x2f0] sm:$0xff] }
  0x18   :  { %1098 = vmatprep.subr.mxu1 %v131_v41  ;;  %1055 = vmatpush3.msra.mxu0 %v83_v42  ;;  %v110_v0 = vld [vmem:[%s2387_s1 + $0x100] sm:$0xff]  ;;  %v157_v6 = vld [vmem:[%s2387_s1 + $0x278] sm:$0xff]  ;;  %v204_v9 = vld [vmem:[%s2387_s1 + $0x3f0] sm:$0xff] }
  0x19   :  { %1099 = vmatpush3.msra.mxu1 %v115_v43  ;;  %1056 = vmatprep.subr.mxu0 %v98_v44  ;;  %v14_v1 = vld [vmem:[%s2388_s0] sm:$0xff]  ;;  %v189_v7 = vld [vmem:[%s2387_s1 + $0x378] sm:$0xff]  ;;  %v156_v10 = vld [vmem:[%s2387_s1 + $0x270] sm:$0xff] }
  0x1a   :  { %1100 = vmatprep.subr.mxu1 %v130_v45  ;;  %1057 = vmatpush3.msra.mxu0 %v82_v46  ;;  %v188_v11 = vld [vmem:[%s2387_s1 + $0x370] sm:$0xff]  ;;  %v171_v12 = vld [vmem:[%s2387_s1 + $0x2e8] sm:$0xff]  ;;  %v170_v16 = vld [vmem:[%s2387_s1 + $0x2e0] sm:$0xff] }
  0x1b   :  { %1101 = vmatpush3.msra.mxu1 %v114_v47  ;;  %1058 = vmatprep.subr.mxu0 %v97_v48  ;;  %v203_v13 = vld [vmem:[%s2387_s1 + $0x3e8] sm:$0xff]  ;;  %v202_v17 = vld [vmem:[%s2387_s1 + $0x3e0] sm:$0xff]  ;;  %v169_v20 = vld [vmem:[%s2387_s1 + $0x2d8] sm:$0xff] }
  0x1c   :  { %1102 = vmatprep.subr.mxu1 %v129_v49  ;;  %1059 = vmatpush3.msra.mxu0 %v81_v50  ;;  %v155_v14 = vld [vmem:[%s2387_s1 + $0x268] sm:$0xff]  ;;  %v154_v18 = vld [vmem:[%s2387_s1 + $0x260] sm:$0xff]  ;;  %v201_v21 = vld [vmem:[%s2387_s1 + $0x3d8] sm:$0xff] }
  0x1d   :  { %1103 = vmatpush3.msra.mxu1 %v113_v51  ;;  %1060 = vmatprep.subr.mxu0 %v96_v52  ;;  %v187_v15 = vld [vmem:[%s2387_s1 + $0x368] sm:$0xff]  ;;  %v186_v19 = vld [vmem:[%s2387_s1 + $0x360] sm:$0xff]  ;;  %v153_v22 = vld [vmem:[%s2387_s1 + $0x258] sm:$0xff] }
  0x1e   :  { %1104 = vmatprep.subr.mxu1 %v128_v53  ;;  %1061 = vmatpush3.msra.mxu0 %v80_v54  ;;  %v185_v23 = vld [vmem:[%s2387_s1 + $0x358] sm:$0xff]  ;;  %v168_v24 = vld [vmem:[%s2387_s1 + $0x2d0] sm:$0xff]  ;;  %v167_v28 = vld [vmem:[%s2387_s1 + $0x2c8] sm:$0xff] }
  0x1f   :  { %1105 = vmatpush3.msra.mxu1 %v112_v55  ;;  %1062 = vmatprep.subr.mxu0 %v95_v56  ;;  %v200_v25 = vld [vmem:[%s2387_s1 + $0x3d0] sm:$0xff]  ;;  %v199_v29 = vld [vmem:[%s2387_s1 + $0x3c8] sm:$0xff]  ;;  %v166_v32 = vld [vmem:[%s2387_s1 + $0x2c0] sm:$0xff] }
  0x20   :  { %1106 = vmatprep.subr.mxu1 %v127_v57  ;;  %1063 = vmatpush3.msra.mxu0 %v79_v58  ;;  %v152_v26 = vld [vmem:[%s2387_s1 + $0x250] sm:$0xff]  ;;  %v151_v30 = vld [vmem:[%s2387_s1 + $0x248] sm:$0xff]  ;;  %v198_v33 = vld [vmem:[%s2387_s1 + $0x3c0] sm:$0xff] }
  0x21   :  { %1107 = vmatpush3.msra.mxu1 %v111_v59  ;;  %1064 = vmatprep.subr.mxu0 %v94_v60  ;;  %v184_v27 = vld [vmem:[%s2387_s1 + $0x350] sm:$0xff]  ;;  %v183_v31 = vld [vmem:[%s2387_s1 + $0x348] sm:$0xff]  ;;  %v150_v34 = vld [vmem:[%s2387_s1 + $0x240] sm:$0xff] }
  0x22   :  { %1108 = vmatprep.subr.mxu1 %v126_v61  ;;  %1065 = vmatpush3.msra.mxu0 %v78_v62  ;;  %v182_v35 = vld [vmem:[%s2387_s1 + $0x340] sm:$0xff]  ;;  %v165_v36 = vld [vmem:[%s2387_s1 + $0x2b8] sm:$0xff]  ;;  %v31_v40 = vld [vmem:[%s2388_s0 + $0x88] sm:$0xff] }
  0x23   :  { %405 = vmatprep.mubr.f32.mxu0 %v15_v63  ;;  %1109 = vmatpush3.msra.mxu1 %v110_v0  ;;  %v197_v37 = vld [vmem:[%s2387_s1 + $0x3b8] sm:$0xff]  ;;  %v164_v41 = vld [vmem:[%s2387_s1 + $0x2b0] sm:$0xff]  ;;  %v30_v43 = vld [vmem:[%s2388_s0 + $0x80] sm:$0xff] }
  0x24   :  { %406 = vmatmul.mubr.f32.vlgmr.msra.gmra.mxu0 %v14_v1  ;;  %490 = vmatprep.mubr.f32.mxu1 %v17_v2  ;;  %v149_v38 = vld [vmem:[%s2387_s1 + $0x238] sm:$0xff]  ;;  %v196_v42 = vld [vmem:[%s2387_s1 + $0x3b0] sm:$0xff]  ;;  %v163_v47 = vld [vmem:[%s2387_s1 + $0x2a8] sm:$0xff] }
  0x25   :  { %1122 = vmatprep.subr.mxu0 %v173_v3  ;;  %1166 = vmatprep.subr.mxu1 %v205_v4  ;;  %v181_v39 = vld [vmem:[%s2387_s1 + $0x338] sm:$0xff]  ;;  %v148_v44 = vld [vmem:[%s2387_s1 + $0x230] sm:$0xff]  ;;  %v195_v48 = vld [vmem:[%s2387_s1 + $0x3a8] sm:$0xff] }
  0x26   :  { %491 = vmatmul.mubr.f32.vlgmr.msra.gmra.mxu1 %v16_v5  ;;  %1123 = vmatpush3.msra.mxu0 %v157_v6  ;;  %v180_v45 = vld [vmem:[%s2387_s1 + $0x330] sm:$0xff]  ;;  %v33_v46 = vld [vmem:[%s2388_s0 + $0x98] sm:$0xff]  ;;  %v147_v50 = vld [vmem:[%s2387_s1 + $0x228] sm:$0xff] }
  0x27   :  { %1167 = vmatpush3.msra.mxu1 %v189_v7  ;;  %1124 = vmatprep.subr.mxu0 %v172_v8  ;;  %v32_v49 = vld [vmem:[%s2388_s0 + $0x90] sm:$0xff]  ;;  %v179_v51 = vld [vmem:[%s2387_s1 + $0x328] sm:$0xff]  ;;  %v162_v53 = vld [vmem:[%s2387_s1 + $0x2a0] sm:$0xff] }
  0x28   :  { %1168 = vmatprep.subr.mxu1 %v204_v9  ;;  %1125 = vmatpush3.msra.mxu0 %v156_v10  ;;  %v47_v52 = vld [vmem:[%s2388_s0 + $0x108] sm:$0xff]  ;;  %v194_v54 = vld [vmem:[%s2387_s1 + $0x3a0] sm:$0xff]  ;;  %v49_v58 = vld [vmem:[%s2388_s0 + $0x118] sm:$0xff] }
  0x29   :  { %1169 = vmatpush3.msra.mxu1 %v188_v11  ;;  %1126 = vmatprep.subr.mxu0 %v171_v12  ;;  %v46_v55 = vld [vmem:[%s2388_s0 + $0x100] sm:$0xff]  ;;  %v161_v59 = vld [vmem:[%s2387_s1 + $0x298] sm:$0xff]  ;;  %v48_v61 = vld [vmem:[%s2388_s0 + $0x110] sm:$0xff] }
  0x2a   :  { %1170 = vmatprep.subr.mxu1 %v203_v13  ;;  %1127 = vmatpush3.msra.mxu0 %v155_v14  ;;  %v146_v56 = vld [vmem:[%s2387_s1 + $0x220] sm:$0xff]  ;;  %v193_v60 = vld [vmem:[%s2387_s1 + $0x398] sm:$0xff]  ;;  %v63_v0 = vld [vmem:[%s2388_s0 + $0x188] sm:$0xff] }
  0x2b   :  { %1171 = vmatpush3.msra.mxu1 %v187_v15  ;;  %1128 = vmatprep.subr.mxu0 %v170_v16  ;;  %v178_v57 = vld [vmem:[%s2387_s1 + $0x320] sm:$0xff]  ;;  %v145_v62 = vld [vmem:[%s2387_s1 + $0x218] sm:$0xff]  ;;  %v160_v1 = vld [vmem:[%s2387_s1 + $0x290] sm:$0xff] }
  0x2c   :  { %1172 = vmatprep.subr.mxu1 %v202_v17  ;;  %1129 = vmatpush3.msra.mxu0 %v154_v18  ;;  %v177_v63 = vld [vmem:[%s2387_s1 + $0x318] sm:$0xff]  ;;  %v192_v2 = vld [vmem:[%s2387_s1 + $0x390] sm:$0xff]  ;;  %v62_v3 = vld [vmem:[%s2388_s0 + $0x180] sm:$0xff] }
  0x2d   :  { %1173 = vmatpush3.msra.mxu1 %v186_v19  ;;  %1130 = vmatprep.subr.mxu0 %v169_v20  ;;  %v144_v4 = vld [vmem:[%s2387_s1 + $0x210] sm:$0xff]  ;;  %v65_v6 = vld [vmem:[%s2388_s0 + $0x198] sm:$0xff]  ;;  %v159_v7 = vld [vmem:[%s2387_s1 + $0x288] sm:$0xff] }
  0x2e   :  { %1174 = vmatprep.subr.mxu1 %v201_v21  ;;  %1131 = vmatpush3.msra.mxu0 %v153_v22  ;;  %v176_v5 = vld [vmem:[%s2387_s1 + $0x310] sm:$0xff]  ;;  %v191_v8 = vld [vmem:[%s2387_s1 + $0x388] sm:$0xff]  ;;  %v158_v12 = vld [vmem:[%s2387_s1 + $0x280] sm:$0xff] }
  0x2f   :  { %1175 = vmatpush3.msra.mxu1 %v185_v23  ;;  %1132 = vmatprep.subr.mxu0 %v168_v24  ;;  %v64_v9 = vld [vmem:[%s2388_s0 + $0x190] sm:$0xff]  ;;  %v143_v10 = vld [vmem:[%s2387_s1 + $0x208] sm:$0xff]  ;;  %v190_v13 = vld [vmem:[%s2387_s1 + $0x380] sm:$0xff] }
  0x30   :  { %1176 = vmatprep.subr.mxu1 %v200_v25  ;;  %1133 = vmatpush3.msra.mxu0 %v152_v26  ;;  %v175_v11 = vld [vmem:[%s2387_s1 + $0x308] sm:$0xff]  ;;  %v142_v14 = vld [vmem:[%s2387_s1 + $0x200] sm:$0xff]  ;;  %v21_v18 = vld [vmem:[%s2388_s0 + $0x38] sm:$0xff] }
  0x31   :  { %1177 = vmatpush3.msra.mxu1 %v184_v27  ;;  %1134 = vmatprep.subr.mxu0 %v167_v28  ;;  %v19_v15 = vld [vmem:[%s2388_s0 + $0x28] sm:$0xff]  ;;  %v174_v16 = vld [vmem:[%s2387_s1 + $0x300] sm:$0xff]  ;;  %v237_v19 = vld [vmem:[%s2387_s1 + $0x4f8] sm:$0xff] }
  0x32   :  { %1178 = vmatprep.subr.mxu1 %v199_v29  ;;  %1135 = vmatpush3.msra.mxu0 %v151_v30  ;;  %v18_v17 = vld [vmem:[%s2388_s0 + $0x20] sm:$0xff]  ;;  %v269_v20 = vld [vmem:[%s2387_s1 + $0x5f8] sm:$0xff]  ;;  %v20_v21 = vld [vmem:[%s2388_s0 + $0x30] sm:$0xff] }
  0x33   :  { %1179 = vmatpush3.msra.mxu1 %v183_v31  ;;  %1136 = vmatprep.subr.mxu0 %v166_v32  ;;  %v221_v22 = vld [vmem:[%s2387_s1 + $0x478] sm:$0xff]  ;;  %v236_v24 = vld [vmem:[%s2387_s1 + $0x4f0] sm:$0xff]  ;;  %v35_v26 = vld [vmem:[%s2388_s0 + $0xa8] sm:$0xff] }
  0x34   :  { %1180 = vmatprep.subr.mxu1 %v198_v33  ;;  %1137 = vmatpush3.msra.mxu0 %v150_v34  ;;  %v253_v23 = vld [vmem:[%s2387_s1 + $0x578] sm:$0xff]  ;;  %v268_v25 = vld [vmem:[%s2387_s1 + $0x5f0] sm:$0xff]  ;;  %v34_v29 = vld [vmem:[%s2388_s0 + $0xa0] sm:$0xff] }
  0x35   :  { %1181 = vmatpush3.msra.mxu1 %v182_v35  ;;  %1138 = vmatprep.subr.mxu0 %v165_v36  ;;  %v220_v27 = vld [vmem:[%s2387_s1 + $0x470] sm:$0xff]  ;;  %v235_v30 = vld [vmem:[%s2387_s1 + $0x4e8] sm:$0xff]  ;;  %v37_v32 = vld [vmem:[%s2388_s0 + $0xb8] sm:$0xff] }
  0x36   :  { %1182 = vmatprep.subr.mxu1 %v197_v37  ;;  %1139 = vmatpush3.msra.mxu0 %v149_v38  ;;  %v252_v28 = vld [vmem:[%s2387_s1 + $0x570] sm:$0xff]  ;;  %v267_v31 = vld [vmem:[%s2387_s1 + $0x5e8] sm:$0xff]  ;;  %v234_v35 = vld [vmem:[%s2387_s1 + $0x4e0] sm:$0xff] }
  0x37   :  { %1183 = vmatpush3.msra.mxu1 %v181_v39  ;;  %410 = vmatprep.mubr.f32.mxu0 %v31_v40  ;;  %v219_v33 = vld [vmem:[%s2387_s1 + $0x468] sm:$0xff]  ;;  %v36_v36 = vld [vmem:[%s2388_s0 + $0xb0] sm:$0xff]  ;;  %v266_v37 = vld [vmem:[%s2387_s1 + $0x5e0] sm:$0xff] }
  0x38   :  { %1140 = vmatprep.subr.mxu0 %v164_v41  ;;  %1184 = vmatprep.subr.mxu1 %v196_v42  ;;  %v251_v34 = vld [vmem:[%s2387_s1 + $0x568] sm:$0xff]  ;;  %v218_v39 = vld [vmem:[%s2387_s1 + $0x460] sm:$0xff]  ;;  %v233_v42 = vld [vmem:[%s2387_s1 + $0x4d8] sm:$0xff] }
  0x39   :  { %411 = vmatmul.mubr.f32.gmra.mxu0 %v30_v43  ;;  %1185 = vmatpush3.msra.mxu1 %v180_v45  ;;  %v51_v38 = vld [vmem:[%s2388_s0 + $0x128] sm:$0xff]  ;;  %v250_v40 = vld [vmem:[%s2387_s1 + $0x560] sm:$0xff]  ;;  %v265_v43 = vld [vmem:[%s2387_s1 + $0x5d8] sm:$0xff] }
  0x3a   :  { %1141 = vmatpush3.msra.mxu0 %v148_v44  ;;  %495 = vmatprep.mubr.f32.mxu1 %v33_v46  ;;  %v50_v41 = vld [vmem:[%s2388_s0 + $0x120] sm:$0xff]  ;;  %v53_v44 = vld [vmem:[%s2388_s0 + $0x138] sm:$0xff] }
  0x3b   :  { %1142 = vmatprep.subr.mxu0 %v163_v47  ;;  %1186 = vmatprep.subr.mxu1 %v195_v48  ;;  %v217_v45 = vld [vmem:[%s2387_s1 + $0x458] sm:$0xff]  ;;  %v232_v47 = vld [vmem:[%s2387_s1 + $0x4d0] sm:$0xff] }
  0x3c   :  { %496 = vmatmul.mubr.f32.gmra.mxu1 %v32_v49  ;;  %1143 = vmatpush3.msra.mxu0 %v147_v50  ;;  %v249_v46 = vld [vmem:[%s2387_s1 + $0x558] sm:$0xff]  ;;  %v52_v48 = vld [vmem:[%s2388_s0 + $0x130] sm:$0xff]  ;;  %v67_v50 = vld [vmem:[%s2388_s0 + $0x1a8] sm:$0xff] }
  0x3d   :  { %1187 = vmatpush3.msra.mxu1 %v179_v51  ;;  %415 = vmatprep.mubr.f32.mxu0 %v47_v52  ;;  %v264_v49 = vld [vmem:[%s2387_s1 + $0x5d0] sm:$0xff] }
  0x3e   :  { %1144 = vmatprep.subr.mxu0 %v162_v53  ;;  %1188 = vmatprep.subr.mxu1 %v194_v54  ;;  %v216_v51 = vld [vmem:[%s2387_s1 + $0x450] sm:$0xff]  ;;  %v66_v53 = vld [vmem:[%s2388_s0 + $0x1a0] sm:$0xff]  ;;  %v231_v54 = vld [vmem:[%s2387_s1 + $0x4c8] sm:$0xff] }
  0x3f   :  { %416 = vmatmul.mubr.f32.gmra.mxu0 %v46_v55  ;;  %1189 = vmatpush3.msra.mxu1 %v178_v57  ;;  %v248_v52 = vld [vmem:[%s2387_s1 + $0x550] sm:$0xff]  ;;  %v263_v55 = vld [vmem:[%s2387_s1 + $0x5c8] sm:$0xff] }
  0x40   :  { %1145 = vmatpush3.msra.mxu0 %v146_v56  ;;  %500 = vmatprep.mubr.f32.mxu1 %v49_v58  ;;  %v69_v56 = vld [vmem:[%s2388_s0 + $0x1b8] sm:$0xff]  ;;  %v215_v57 = vld [vmem:[%s2387_s1 + $0x448] sm:$0xff] }
  0x41   :  { %1146 = vmatprep.subr.mxu0 %v161_v59  ;;  %1190 = vmatprep.subr.mxu1 %v193_v60  ;;  %v247_v58 = vld [vmem:[%s2387_s1 + $0x548] sm:$0xff]  ;;  %v230_v59 = vld [vmem:[%s2387_s1 + $0x4c0] sm:$0xff]  ;;  %v68_v60 = vld [vmem:[%s2388_s0 + $0x1b0] sm:$0xff] }
  0x42   :  { %501 = vmatmul.mubr.f32.gmra.mxu1 %v48_v61  ;;  %1147 = vmatpush3.msra.mxu0 %v145_v62  ;;  %v262_v61 = vld [vmem:[%s2387_s1 + $0x5c0] sm:$0xff] }
  0x43   :  { %1191 = vmatpush3.msra.mxu1 %v177_v63  ;;  %420 = vmatprep.mubr.f32.mxu0 %v63_v0  ;;  %v214_v62 = vld [vmem:[%s2387_s1 + $0x440] sm:$0xff]  ;;  %v229_v0 = vld [vmem:[%s2387_s1 + $0x4b8] sm:$0xff] }
  0x44   :  { %1148 = vmatprep.subr.mxu0 %v160_v1  ;;  %1192 = vmatprep.subr.mxu1 %v192_v2  ;;  %v246_v63 = vld [vmem:[%s2387_s1 + $0x540] sm:$0xff]  ;;  %v261_v1 = vld [vmem:[%s2387_s1 + $0x5b8] sm:$0xff] }
  0x45   :  { %421 = vmatmul.mubr.f32.gmra.mxu0 %v62_v3  ;;  %1193 = vmatpush3.msra.mxu1 %v176_v5  ;;  %v213_v2 = vld [vmem:[%s2387_s1 + $0x438] sm:$0xff]  ;;  %v260_v5 = vld [vmem:[%s2387_s1 + $0x5b0] sm:$0xff] }
  0x46   :  { %1149 = vmatpush3.msra.mxu0 %v144_v4  ;;  %505 = vmatprep.mubr.f32.mxu1 %v65_v6  ;;  %v245_v3 = vld [vmem:[%s2387_s1 + $0x538] sm:$0xff]  ;;  %v228_v4 = vld [vmem:[%s2387_s1 + $0x4b0] sm:$0xff] }
  0x47   :  { %1150 = vmatprep.subr.mxu0 %v159_v7  ;;  %1194 = vmatprep.subr.mxu1 %v191_v8  ;;  %v212_v6 = vld [vmem:[%s2387_s1 + $0x430] sm:$0xff]  ;;  %v227_v8 = vld [vmem:[%s2387_s1 + $0x4a8] sm:$0xff] }
  0x48   :  { %506 = vmatmul.mubr.f32.gmra.mxu1 %v64_v9  ;;  %1151 = vmatpush3.msra.mxu0 %v143_v10  ;;  %v244_v7 = vld [vmem:[%s2387_s1 + $0x530] sm:$0xff]  ;;  %v259_v9 = vld [vmem:[%s2387_s1 + $0x5a8] sm:$0xff] }
  0x49   :  { %1195 = vmatpush3.msra.mxu1 %v175_v11  ;;  %1152 = vmatprep.subr.mxu0 %v158_v12  ;;  %v211_v10 = vld [vmem:[%s2387_s1 + $0x428] sm:$0xff]  ;;  %v226_v12 = vld [vmem:[%s2387_s1 + $0x4a0] sm:$0xff] }
  0x4a   :  { %1196 = vmatprep.subr.mxu1 %v190_v13  ;;  %1153 = vmatpush3.msra.mxu0 %v142_v14  ;;  %v243_v11 = vld [vmem:[%s2387_s1 + $0x528] sm:$0xff]  ;;  %v258_v13 = vld [vmem:[%s2387_s1 + $0x5a0] sm:$0xff] }
  0x4b   :  { %575 = vmatprep.mubr.f32.mxu0 %v19_v15  ;;  %1197 = vmatpush3.msra.mxu1 %v174_v16  ;;  %v210_v14 = vld [vmem:[%s2387_s1 + $0x420] sm:$0xff]  ;;  %v225_v16 = vld [vmem:[%s2387_s1 + $0x498] sm:$0xff] }
  0x4c   :  { %576 = vmatmul.mubr.f32.vlgmr.msra.gmra.mxu0 %v18_v17  ;;  %660 = vmatprep.mubr.f32.mxu1 %v21_v18  ;;  %v242_v15 = vld [vmem:[%s2387_s1 + $0x520] sm:$0xff]  ;;  %v257_v17 = vld [vmem:[%s2387_s1 + $0x598] sm:$0xff] }
  0x4d   :  { %1210 = vmatprep.subr.mxu0 %v237_v19  ;;  %1254 = vmatprep.subr.mxu1 %v269_v20  ;;  %v209_v18 = vld [vmem:[%s2387_s1 + $0x418] sm:$0xff]  ;;  %v224_v20 = vld [vmem:[%s2387_s1 + $0x490] sm:$0xff] }
  0x4e   :  { %661 = vmatmul.mubr.f32.vlgmr.msra.gmra.mxu1 %v20_v21  ;;  %1211 = vmatpush3.msra.mxu0 %v221_v22  ;;  %v241_v19 = vld [vmem:[%s2387_s1 + $0x518] sm:$0xff]  ;;  %v256_v21 = vld [vmem:[%s2387_s1 + $0x590] sm:$0xff] }
  0x4f   :  { %1255 = vmatpush3.msra.mxu1 %v253_v23  ;;  %1212 = vmatprep.subr.mxu0 %v236_v24  ;;  %v208_v22 = vld [vmem:[%s2387_s1 + $0x410] sm:$0xff]  ;;  %v223_v24 = vld [vmem:[%s2387_s1 + $0x488] sm:$0xff] }
  0x50   :  { %1256 = vmatprep.subr.mxu1 %v268_v25  ;;  %580 = vmatprep.mubr.f32.mxu0 %v35_v26  ;;  %v240_v23 = vld [vmem:[%s2387_s1 + $0x510] sm:$0xff]  ;;  %v255_v25 = vld [vmem:[%s2387_s1 + $0x588] sm:$0xff] }
  0x51   :  { %1213 = vmatpush3.msra.mxu0 %v220_v27  ;;  %1257 = vmatpush3.msra.mxu1 %v252_v28  ;;  %v207_v26 = vld [vmem:[%s2387_s1 + $0x408] sm:$0xff]  ;;  %v222_v28 = vld [vmem:[%s2387_s1 + $0x480] sm:$0xff] }
  0x52   :  { %581 = vmatmul.mubr.f32.gmra.mxu0 %v34_v29  ;;  %1214 = vmatprep.subr.mxu0 %v235_v30  ;;  %v239_v27 = vld [vmem:[%s2387_s1 + $0x508] sm:$0xff]  ;;  %v254_v29 = vld [vmem:[%s2387_s1 + $0x580] sm:$0xff] }
  0x53   :  { %1258 = vmatprep.subr.mxu1 %v267_v31  ;;  %665 = vmatprep.mubr.f32.mxu1 %v37_v32  ;;  %v206_v30 = vld [vmem:[%s2387_s1 + $0x400] sm:$0xff]  ;;  %v23_v31 = vld [vmem:[%s2388_s0 + $0x48] sm:$0xff] }
  0x54   :  { %1215 = vmatpush3.msra.mxu0 %v219_v33  ;;  %1259 = vmatpush3.msra.mxu1 %v251_v34  ;;  %v238_v32 = vld [vmem:[%s2387_s1 + $0x500] sm:$0xff]  ;;  %v25_v34 = vld [vmem:[%s2388_s0 + $0x58] sm:$0xff] }
  0x55   :  { %1216 = vmatprep.subr.mxu0 %v234_v35  ;;  %666 = vmatmul.mubr.f32.gmra.mxu1 %v36_v36  ;;  %v22_v33 = vld [vmem:[%s2388_s0 + $0x40] sm:$0xff]  ;;  %v301_v35 = vld [vmem:[%s2387_s1 + $0x6f8] sm:$0xff] }
  0x56   :  { %1260 = vmatprep.subr.mxu1 %v266_v37  ;;  %585 = vmatprep.mubr.f32.mxu0 %v51_v38  ;;  %v333_v36 = vld [vmem:[%s2387_s1 + $0x7f8] sm:$0xff]  ;;  %v24_v37 = vld [vmem:[%s2388_s0 + $0x50] sm:$0xff] }
  0x57   :  { %1217 = vmatpush3.msra.mxu0 %v218_v39  ;;  %1261 = vmatpush3.msra.mxu1 %v250_v40  ;;  %v285_v38 = vld [vmem:[%s2387_s1 + $0x678] sm:$0xff]  ;;  %v300_v40 = vld [vmem:[%s2387_s1 + $0x6f0] sm:$0xff] }
  0x58   :  { %586 = vmatmul.mubr.f32.gmra.mxu0 %v50_v41  ;;  %1218 = vmatprep.subr.mxu0 %v233_v42  ;;  %v317_v39 = vld [vmem:[%s2387_s1 + $0x778] sm:$0xff]  ;;  %v332_v41 = vld [vmem:[%s2387_s1 + $0x7f0] sm:$0xff]  ;;  %v39_v42 = vld [vmem:[%s2388_s0 + $0xc8] sm:$0xff] }
  0x59   :  { %1262 = vmatprep.subr.mxu1 %v265_v43  ;;  %670 = vmatprep.mubr.f32.mxu1 %v53_v44  ;;  %v284_v43 = vld [vmem:[%s2387_s1 + $0x670] sm:$0xff] }
  0x5a   :  { %1219 = vmatpush3.msra.mxu0 %v217_v45  ;;  %1263 = vmatpush3.msra.mxu1 %v249_v46  ;;  %v316_v44 = vld [vmem:[%s2387_s1 + $0x770] sm:$0xff]  ;;  %v38_v45 = vld [vmem:[%s2388_s0 + $0xc0] sm:$0xff]  ;;  %v299_v46 = vld [vmem:[%s2387_s1 + $0x6e8] sm:$0xff] }
  0x5b   :  { %1220 = vmatprep.subr.mxu0 %v232_v47  ;;  %671 = vmatmul.mubr.f32.gmra.mxu1 %v52_v48  ;;  %v331_v47 = vld [vmem:[%s2387_s1 + $0x7e8] sm:$0xff]  ;;  %v41_v48 = vld [vmem:[%s2388_s0 + $0xd8] sm:$0xff] }
  0x5c   :  { %1264 = vmatprep.subr.mxu1 %v264_v49  ;;  %590 = vmatprep.mubr.f32.mxu0 %v67_v50  ;;  %v283_v49 = vld [vmem:[%s2387_s1 + $0x668] sm:$0xff] }
  0x5d   :  { %1221 = vmatpush3.msra.mxu0 %v216_v51  ;;  %1265 = vmatpush3.msra.mxu1 %v248_v52  ;;  %v315_v50 = vld [vmem:[%s2387_s1 + $0x768] sm:$0xff]  ;;  %v298_v51 = vld [vmem:[%s2387_s1 + $0x6e0] sm:$0xff]  ;;  %v40_v52 = vld [vmem:[%s2388_s0 + $0xd0] sm:$0xff] }
  0x5e   :  { %591 = vmatmul.mubr.f32.gmra.mxu0 %v66_v53  ;;  %1222 = vmatprep.subr.mxu0 %v231_v54  ;;  %v330_v53 = vld [vmem:[%s2387_s1 + $0x7e0] sm:$0xff]  ;;  %v55_v54 = vld [vmem:[%s2388_s0 + $0x148] sm:$0xff] }
  0x5f   :  { %1266 = vmatprep.subr.mxu1 %v263_v55  ;;  %675 = vmatprep.mubr.f32.mxu1 %v69_v56  ;;  %v282_v55 = vld [vmem:[%s2387_s1 + $0x660] sm:$0xff] }
  0x60   :  { %1223 = vmatpush3.msra.mxu0 %v215_v57  ;;  %1267 = vmatpush3.msra.mxu1 %v247_v58  ;;  %v314_v56 = vld [vmem:[%s2387_s1 + $0x760] sm:$0xff]  ;;  %v297_v58 = vld [vmem:[%s2387_s1 + $0x6d8] sm:$0xff] }
  0x61   :  { %1224 = vmatprep.subr.mxu0 %v230_v59  ;;  %676 = vmatmul.mubr.f32.gmra.mxu1 %v68_v60  ;;  %v54_v57 = vld [vmem:[%s2388_s0 + $0x140] sm:$0xff]  ;;  %v329_v59 = vld [vmem:[%s2387_s1 + $0x7d8] sm:$0xff] }
  0x62   :  { %1268 = vmatprep.subr.mxu1 %v262_v61  ;;  %1225 = vmatpush3.msra.mxu0 %v214_v62  ;;  %v57_v60 = vld [vmem:[%s2388_s0 + $0x158] sm:$0xff] }
  0x63   :  { %1269 = vmatpush3.msra.mxu1 %v246_v63  ;;  %1226 = vmatprep.subr.mxu0 %v229_v0  ;;  %v281_v61 = vld [vmem:[%s2387_s1 + $0x658] sm:$0xff]  ;;  %v296_v63 = vld [vmem:[%s2387_s1 + $0x6d0] sm:$0xff] }
  0x64   :  { %1270 = vmatprep.subr.mxu1 %v261_v1  ;;  %1227 = vmatpush3.msra.mxu0 %v213_v2  ;;  %v313_v62 = vld [vmem:[%s2387_s1 + $0x758] sm:$0xff]  ;;  %v56_v0 = vld [vmem:[%s2388_s0 + $0x150] sm:$0xff]  ;;  %v71_v2 = vld [vmem:[%s2388_s0 + $0x1c8] sm:$0xff] }
  0x65   :  { %1271 = vmatpush3.msra.mxu1 %v245_v3  ;;  %1228 = vmatprep.subr.mxu0 %v228_v4  ;;  %v328_v1 = vld [vmem:[%s2387_s1 + $0x7d0] sm:$0xff] }
  0x66   :  { %1272 = vmatprep.subr.mxu1 %v260_v5  ;;  %1229 = vmatpush3.msra.mxu0 %v212_v6  ;;  %v280_v3 = vld [vmem:[%s2387_s1 + $0x650] sm:$0xff]  ;;  %v70_v5 = vld [vmem:[%s2388_s0 + $0x1c0] sm:$0xff]  ;;  %v295_v6 = vld [vmem:[%s2387_s1 + $0x6c8] sm:$0xff] }
  0x67   :  { %1273 = vmatpush3.msra.mxu1 %v244_v7  ;;  %1230 = vmatprep.subr.mxu0 %v227_v8  ;;  %v312_v4 = vld [vmem:[%s2387_s1 + $0x750] sm:$0xff]  ;;  %v327_v7 = vld [vmem:[%s2387_s1 + $0x7c8] sm:$0xff]  ;;  %v73_v8 = vld [vmem:[%s2388_s0 + $0x1d8] sm:$0xff] }
  0x68   :  { %1274 = vmatprep.subr.mxu1 %v259_v9  ;;  %1231 = vmatpush3.msra.mxu0 %v211_v10  ;;  %v279_v9 = vld [vmem:[%s2387_s1 + $0x648] sm:$0xff] }
  0x69   :  { %1275 = vmatpush3.msra.mxu1 %v243_v11  ;;  %1232 = vmatprep.subr.mxu0 %v226_v12  ;;  %v311_v10 = vld [vmem:[%s2387_s1 + $0x748] sm:$0xff]  ;;  %v294_v11 = vld [vmem:[%s2387_s1 + $0x6c0] sm:$0xff]  ;;  %v72_v12 = vld [vmem:[%s2388_s0 + $0x1d0] sm:$0xff] }
  0x6a   :  { %1276 = vmatprep.subr.mxu1 %v258_v13  ;;  %1233 = vmatpush3.msra.mxu0 %v210_v14  ;;  %v326_v13 = vld [vmem:[%s2387_s1 + $0x7c0] sm:$0xff] }
  0x6b   :  { %1277 = vmatpush3.msra.mxu1 %v242_v15  ;;  %1234 = vmatprep.subr.mxu0 %v225_v16  ;;  %v278_v14 = vld [vmem:[%s2387_s1 + $0x640] sm:$0xff]  ;;  %v293_v16 = vld [vmem:[%s2387_s1 + $0x6b8] sm:$0xff] }
  0x6c   :  { %1278 = vmatprep.subr.mxu1 %v257_v17  ;;  %1235 = vmatpush3.msra.mxu0 %v209_v18  ;;  %v310_v15 = vld [vmem:[%s2387_s1 + $0x740] sm:$0xff]  ;;  %v325_v17 = vld [vmem:[%s2387_s1 + $0x7b8] sm:$0xff] }
  0x6d   :  { %1279 = vmatpush3.msra.mxu1 %v241_v19  ;;  %1236 = vmatprep.subr.mxu0 %v224_v20  ;;  %v277_v18 = vld [vmem:[%s2387_s1 + $0x638] sm:$0xff]  ;;  %v292_v20 = vld [vmem:[%s2387_s1 + $0x6b0] sm:$0xff] }
  0x6e   :  { %1280 = vmatprep.subr.mxu1 %v256_v21  ;;  %1237 = vmatpush3.msra.mxu0 %v208_v22  ;;  %v309_v19 = vld [vmem:[%s2387_s1 + $0x738] sm:$0xff]  ;;  %v324_v21 = vld [vmem:[%s2387_s1 + $0x7b0] sm:$0xff] }
  0x6f   :  { %1281 = vmatpush3.msra.mxu1 %v240_v23  ;;  %1238 = vmatprep.subr.mxu0 %v223_v24  ;;  %v276_v22 = vld [vmem:[%s2387_s1 + $0x630] sm:$0xff]  ;;  %v291_v24 = vld [vmem:[%s2387_s1 + $0x6a8] sm:$0xff] }
  0x70   :  { %1282 = vmatprep.subr.mxu1 %v255_v25  ;;  %1239 = vmatpush3.msra.mxu0 %v207_v26  ;;  %v308_v23 = vld [vmem:[%s2387_s1 + $0x730] sm:$0xff]  ;;  %v323_v25 = vld [vmem:[%s2387_s1 + $0x7a8] sm:$0xff] }
  0x71   :  { %1283 = vmatpush3.msra.mxu1 %v239_v27  ;;  %1240 = vmatprep.subr.mxu0 %v222_v28  ;;  %v275_v26 = vld [vmem:[%s2387_s1 + $0x628] sm:$0xff]  ;;  %v290_v28 = vld [vmem:[%s2387_s1 + $0x6a0] sm:$0xff] }
  0x72   :  { %1284 = vmatprep.subr.mxu1 %v254_v29  ;;  %1241 = vmatpush3.msra.mxu0 %v206_v30  ;;  %v307_v27 = vld [vmem:[%s2387_s1 + $0x728] sm:$0xff]  ;;  %v322_v29 = vld [vmem:[%s2387_s1 + $0x7a0] sm:$0xff] }
  0x73   :  { %745 = vmatprep.mubr.f32.mxu0 %v23_v31  ;;  %1285 = vmatpush3.msra.mxu1 %v238_v32  ;;  %v274_v30 = vld [vmem:[%s2387_s1 + $0x620] sm:$0xff]  ;;  %v289_v32 = vld [vmem:[%s2387_s1 + $0x698] sm:$0xff] }
  0x74   :  { %746 = vmatmul.mubr.f32.vlgmr.msra.gmra.mxu0 %v22_v33  ;;  %830 = vmatprep.mubr.f32.mxu1 %v25_v34  ;;  %v306_v31 = vld [vmem:[%s2387_s1 + $0x720] sm:$0xff]  ;;  %v321_v33 = vld [vmem:[%s2387_s1 + $0x798] sm:$0xff] }
  0x75   :  { %1298 = vmatprep.subr.mxu0 %v301_v35  ;;  %1342 = vmatprep.subr.mxu1 %v333_v36  ;;  %v273_v34 = vld [vmem:[%s2387_s1 + $0x618] sm:$0xff]  ;;  %v288_v36 = vld [vmem:[%s2387_s1 + $0x690] sm:$0xff] }
  0x76   :  { %831 = vmatmul.mubr.f32.vlgmr.msra.gmra.mxu1 %v24_v37  ;;  %1299 = vmatpush3.msra.mxu0 %v285_v38  ;;  %v305_v35 = vld [vmem:[%s2387_s1 + $0x718] sm:$0xff]  ;;  %v320_v37 = vld [vmem:[%s2387_s1 + $0x790] sm:$0xff] }
  0x77   :  { %1343 = vmatpush3.msra.mxu1 %v317_v39  ;;  %1300 = vmatprep.subr.mxu0 %v300_v40  ;;  %v272_v38 = vld [vmem:[%s2387_s1 + $0x610] sm:$0xff]  ;;  %v287_v40 = vld [vmem:[%s2387_s1 + $0x688] sm:$0xff] }
  0x78   :  { %1344 = vmatprep.subr.mxu1 %v332_v41  ;;  %750 = vmatprep.mubr.f32.mxu0 %v39_v42  ;;  %v304_v39 = vld [vmem:[%s2387_s1 + $0x710] sm:$0xff]  ;;  %v319_v41 = vld [vmem:[%s2387_s1 + $0x788] sm:$0xff] }
  0x79   :  { %1301 = vmatpush3.msra.mxu0 %v284_v43  ;;  %1345 = vmatpush3.msra.mxu1 %v316_v44  ;;  %v271_v42 = vld [vmem:[%s2387_s1 + $0x608] sm:$0xff]  ;;  %v286_v44 = vld [vmem:[%s2387_s1 + $0x680] sm:$0xff] }
  0x7a   :  { %751 = vmatmul.mubr.f32.gmra.mxu0 %v38_v45  ;;  %1302 = vmatprep.subr.mxu0 %v299_v46  ;;  %v303_v43 = vld [vmem:[%s2387_s1 + $0x708] sm:$0xff]  ;;  %v318_v45 = vld [vmem:[%s2387_s1 + $0x780] sm:$0xff] }
  0x7b   :  { %1346 = vmatprep.subr.mxu1 %v331_v47  ;;  %835 = vmatprep.mubr.f32.mxu1 %v41_v48  ;;  %v270_v46 = vld [vmem:[%s2387_s1 + $0x600] sm:$0xff]  ;;  %v27_v47 = vld [vmem:[%s2388_s0 + $0x68] sm:$0xff] }
  0x7c   :  { %1303 = vmatpush3.msra.mxu0 %v283_v49  ;;  %1347 = vmatpush3.msra.mxu1 %v315_v50  ;;  %v302_v48 = vld [vmem:[%s2387_s1 + $0x700] sm:$0xff]  ;;  %v29_v49 = vld [vmem:[%s2388_s0 + $0x78] sm:$0xff] }
  0x7d   :  { %1304 = vmatprep.subr.mxu0 %v298_v51  ;;  %836 = vmatmul.mubr.f32.gmra.mxu1 %v40_v52  ;;  %v26_v50 = vld [vmem:[%s2388_s0 + $0x60] sm:$0xff]  ;;  %v28_v51 = vld [vmem:[%s2388_s0 + $0x70] sm:$0xff]  ;;  %v43_v52 = vld [vmem:[%s2388_s0 + $0xe8] sm:$0xff] }
  0x7e   :  { %1348 = vmatprep.subr.mxu1 %v330_v53  ;;  %755 = vmatprep.mubr.f32.mxu0 %v55_v54  ;;  %v45_v53 = vld [vmem:[%s2388_s0 + $0xf8] sm:$0xff]  ;;  %v42_v54 = vld [vmem:[%s2388_s0 + $0xe0] sm:$0xff] }
  0x7f   :  { %1305 = vmatpush3.msra.mxu0 %v282_v55  ;;  %1349 = vmatpush3.msra.mxu1 %v314_v56  ;;  %v44_v55 = vld [vmem:[%s2388_s0 + $0xf0] sm:$0xff]  ;;  %v59_v56 = vld [vmem:[%s2388_s0 + $0x168] sm:$0xff] }
  0x80   :  { %756 = vmatmul.mubr.f32.gmra.mxu0 %v54_v57  ;;  %1306 = vmatprep.subr.mxu0 %v297_v58  ;;  %v61_v57 = vld [vmem:[%s2388_s0 + $0x178] sm:$0xff]  ;;  %v58_v58 = vld [vmem:[%s2388_s0 + $0x160] sm:$0xff] }
  0x81   :  { %1350 = vmatprep.subr.mxu1 %v329_v59  ;;  %840 = vmatprep.mubr.f32.mxu1 %v57_v60  ;;  %v60_v59 = vld [vmem:[%s2388_s0 + $0x170] sm:$0xff]  ;;  %v75_v60 = vld [vmem:[%s2388_s0 + $0x1e8] sm:$0xff] }
  0x82   :  { %1307 = vmatpush3.msra.mxu0 %v281_v61  ;;  %1351 = vmatpush3.msra.mxu1 %v313_v62  ;;  %v77_v61 = vld [vmem:[%s2388_s0 + $0x1f8] sm:$0xff]  ;;  %v74_v62 = vld [vmem:[%s2388_s0 + $0x1e0] sm:$0xff] }
  0x83   :  { %1308 = vmatprep.subr.mxu0 %v296_v63  ;;  %841 = vmatmul.mubr.f32.gmra.mxu1 %v56_v0  ;;  %v76_v63 = vld [vmem:[%s2388_s0 + $0x1f0] sm:$0xff] }
  0x84   :  { %1352 = vmatprep.subr.mxu1 %v328_v1  ;;  %760 = vmatprep.mubr.f32.mxu0 %v71_v2 }
  0x85   :  { %1309 = vmatpush3.msra.mxu0 %v280_v3  ;;  %1353 = vmatpush3.msra.mxu1 %v312_v4 }
  0x86   :  { %761 = vmatmul.mubr.f32.gmra.mxu0 %v70_v5  ;;  %1310 = vmatprep.subr.mxu0 %v295_v6 }
  0x87   :  { %1354 = vmatprep.subr.mxu1 %v327_v7  ;;  %845 = vmatprep.mubr.f32.mxu1 %v73_v8 }
  0x88   :  { %1311 = vmatpush3.msra.mxu0 %v279_v9  ;;  %1355 = vmatpush3.msra.mxu1 %v311_v10 }
  0x89   :  { %1312 = vmatprep.subr.mxu0 %v294_v11  ;;  %846 = vmatmul.mubr.f32.gmra.mxu1 %v72_v12 }
  0x8a   :  { %1356 = vmatprep.subr.mxu1 %v326_v13  ;;  %1313 = vmatpush3.msra.mxu0 %v278_v14 }
  0x8b   :  { %1357 = vmatpush3.msra.mxu1 %v310_v15  ;;  %1314 = vmatprep.subr.mxu0 %v293_v16 }
  0x8c   :  { %1358 = vmatprep.subr.mxu1 %v325_v17  ;;  %1315 = vmatpush3.msra.mxu0 %v277_v18 }
  0x8d   :  { %1359 = vmatpush3.msra.mxu1 %v309_v19  ;;  %1316 = vmatprep.subr.mxu0 %v292_v20 }
  0x8e   :  { %1360 = vmatprep.subr.mxu1 %v324_v21  ;;  %1317 = vmatpush3.msra.mxu0 %v276_v22 }
  0x8f   :  { %1361 = vmatpush3.msra.mxu1 %v308_v23  ;;  %1318 = vmatprep.subr.mxu0 %v291_v24 }
  0x90   :  { %1362 = vmatprep.subr.mxu1 %v323_v25  ;;  %1319 = vmatpush3.msra.mxu0 %v275_v26 }
  0x91   :  { %1363 = vmatpush3.msra.mxu1 %v307_v27  ;;  %1320 = vmatprep.subr.mxu0 %v290_v28 }
  0x92   :  { %1364 = vmatprep.subr.mxu1 %v322_v29  ;;  %1321 = vmatpush3.msra.mxu0 %v274_v30 }
  0x93   :  { %1365 = vmatpush3.msra.mxu1 %v306_v31  ;;  %1322 = vmatprep.subr.mxu0 %v289_v32 }
  0x94   :  { %1366 = vmatprep.subr.mxu1 %v321_v33  ;;  %1323 = vmatpush3.msra.mxu0 %v273_v34 }
  0x95   :  { %1367 = vmatpush3.msra.mxu1 %v305_v35  ;;  %1324 = vmatprep.subr.mxu0 %v288_v36 }
  0x96   :  { %1368 = vmatprep.subr.mxu1 %v320_v37  ;;  %1325 = vmatpush3.msra.mxu0 %v272_v38 }
  0x97   :  { %1369 = vmatpush3.msra.mxu1 %v304_v39  ;;  %1326 = vmatprep.subr.mxu0 %v287_v40 }
  0x98   :  { %1370 = vmatprep.subr.mxu1 %v319_v41  ;;  %1327 = vmatpush3.msra.mxu0 %v271_v42  ;;  %v1033_v41 = vld [vmem:[%s2389_s2] ss:$0 sm:$0xff] }
  0x99   :  { %1371 = vmatpush3.msra.mxu1 %v303_v43  ;;  %1328 = vmatprep.subr.mxu0 %v286_v44 }
  0x9a   :  { %1372 = vmatprep.subr.mxu1 %v318_v45  ;;  %1329 = vmatpush3.msra.mxu0 %v270_v46 }
  0x9b   :  { %915 = vmatprep.mubr.f32.mxu0 %v27_v47  ;;  %1373 = vmatpush3.msra.mxu1 %v302_v48 }
  0x9c   :  { %1000 = vmatprep.mubr.f32.mxu1 %v29_v49  ;;  %916 = vmatmul.mubr.f32.vlgmr.msra.gmra.mxu0 %v26_v50 }
  0x9d   :  { %1001 = vmatmul.mubr.f32.vlgmr.msra.gmra.mxu1 %v28_v51  ;;  %920 = vmatprep.mubr.f32.mxu0 %v43_v52 }
  0x9e   :  { %1005 = vmatprep.mubr.f32.mxu1 %v45_v53 }
  0xa0   :  { %921 = vmatmul.mubr.f32.gmra.mxu0 %v42_v54 }
  0xa1   :  { %1006 = vmatmul.mubr.f32.gmra.mxu1 %v44_v55  ;;  %925 = vmatprep.mubr.f32.mxu0 %v59_v56 }
  0xa2   :  { %1010 = vmatprep.mubr.f32.mxu1 %v61_v57 }
  0xa4   :  { %926 = vmatmul.mubr.f32.gmra.mxu0 %v58_v58 }
  0xa5   :  { %1011 = vmatmul.mubr.f32.gmra.mxu1 %v60_v59  ;;  %930 = vmatprep.mubr.f32.mxu0 %v75_v60 }
  0xa6   :  { %1015 = vmatprep.mubr.f32.mxu1 %v77_v61 }
  0xa8   :  { %931 = vmatmul.mubr.f32.gmra.mxu0 %v74_v62 }
  0xa9   :  { %1016 = vmatmul.mubr.f32.gmra.mxu1 %v76_v63 }
  0xe4   :  { %v1066_v0 = vpop.f32.mrf.mxu0 }
  0xe6   :  { %v1110_v1 = vpop.f32.mrf.mxu1  ;;  %v1067_v2 = vpop.f32.mrf.mxu0 }
  0xe7   :  { %v1068_v40 = vadd.f32 %v1067_v2, %v1066_v0 }
  0xe8   :  { %v1111_v3 = vpop.f32.mrf.mxu1 }
  0xe9   :  { %v408_v44 = vadd.f32 %v1068_v40, %v1033_v41  ;;  %v1112_v45 = vadd.f32 %v1111_v3, %v1110_v1 }
  0xeb   :  { %v493_v51 = vadd.f32 %v1112_v45, %v408_v44 }
  0xf9   :  { %v1069_v4 = vpop.f32.mrf.mxu0 }
  0xfb   :  { %v1070_v6 = vpop.f32.mrf.mxu0 }
  0xfc   :  { %v1113_v5 = vpop.f32.mrf.mxu1  ;;  %v1071_v46 = vadd.f32 %v1070_v6, %v1069_v4 }
  0xfe   :  { %v1114_v7 = vpop.f32.mrf.mxu1  ;;  %v413_v52 = vadd.f32 %v1071_v46, %v1033_v41 }
  0xff   :  { %v1072_v8 = vpop.f32.mrf.mxu0  ;;  %v1115_v53 = vadd.f32 %v1114_v7, %v1113_v5 }
 0x101   :  { %v1073_v10 = vpop.f32.mrf.mxu0  ;;  %v498_v62 = vadd.f32 %v1115_v53, %v413_v52 }
 0x102   :  { %v1116_v9 = vpop.f32.mrf.mxu1  ;;  %v1074_v48 = vadd.f32 %v1073_v10, %v1072_v8 }
 0x104   :  { %v1117_v11 = vpop.f32.mrf.mxu1  ;;  %v418_v57 = vadd.f32 %v1074_v48, %v1033_v41 }
 0x105   :  { %v1075_v12 = vpop.f32.mrf.mxu0  ;;  %v1118_v58 = vadd.f32 %v1117_v11, %v1116_v9 }
 0x107   :  { %v1076_v14 = vpop.f32.mrf.mxu0  ;;  %v503_v4 = vadd.f32 %v1118_v58, %v418_v57 }
 0x108   :  { %v1119_v13 = vpop.f32.mrf.mxu1  ;;  %v1077_v59 = vadd.f32 %v1076_v14, %v1075_v12 }
 0x10a   :  { %v1120_v15 = vpop.f32.mrf.mxu1  ;;  %v423_v6 = vadd.f32 %v1077_v59, %v1033_v41 }
 0x10b   :  { %v1121_v8 = vadd.f32 %v1120_v15, %v1119_v13 }
 0x10c   :  { %v1154_v16 = vpop.f32.mrf.mxu0 }
 0x10e   :  { %v1198_v17 = vpop.f32.mrf.mxu1  ;;  %v1155_v18 = vpop.f32.mrf.mxu0 }
 0x10f   :  { %v1156_v47 = vadd.f32 %v1155_v18, %v1154_v16 }
 0x110   :  { %v1199_v19 = vpop.f32.mrf.mxu1 }
 0x111   :  { %v578_v54 = vadd.f32 %v1156_v47, %v493_v51  ;;  %v1200_v55 = vadd.f32 %v1199_v19, %v1198_v17 }
 0x112   :  { %v1157_v20 = vpop.f32.mrf.mxu0 }
 0x113   :  { %v663_v1 = vadd.f32 %v1200_v55, %v578_v54 }
 0x114   :  { %v1158_v22 = vpop.f32.mrf.mxu0 }
 0x115   :  { %v1201_v21 = vpop.f32.mrf.mxu1  ;;  %v1159_v56 = vadd.f32 %v1158_v22, %v1157_v20  ;;  %v508_v20 = vadd.f32 %v1121_v8, %v423_v6 }
 0x117   :  { %v1202_v23 = vpop.f32.mrf.mxu1  ;;  %v583_v2 = vadd.f32 %v1159_v56, %v498_v62 }
 0x118   :  { %v1160_v24 = vpop.f32.mrf.mxu0  ;;  %v1203_v3 = vadd.f32 %v1202_v23, %v1201_v21 }
 0x11a   :  { %v1161_v26 = vpop.f32.mrf.mxu0  ;;  %v668_v12 = vadd.f32 %v1203_v3, %v583_v2 }
 0x11b   :  { %v1204_v25 = vpop.f32.mrf.mxu1  ;;  %v1162_v0 = vadd.f32 %v1161_v26, %v1160_v24 }
 0x11d   :  { %v1205_v27 = vpop.f32.mrf.mxu1  ;;  %v588_v18 = vadd.f32 %v1162_v0, %v503_v4 }
 0x11e   :  { %v1163_v28 = vpop.f32.mrf.mxu0  ;;  %v1206_v19 = vadd.f32 %v1205_v27, %v1204_v25 }
 0x120   :  { %v1164_v30 = vpop.f32.mrf.mxu0  ;;  %v673_v13 = vadd.f32 %v1206_v19, %v588_v18 }
 0x121   :  { %v2366_v29 = vpop.f32.mrf.mxu1  ;;  %v1165_v14 = vadd.f32 %v1164_v30, %v1163_v28 }
 0x123   :  { %v2368_v31 = vpop.f32.mrf.mxu1  ;;  %v593_v41 = vadd.f32 %v1165_v14, %v508_v20 }
 0x134   :  { %v1242_v32 = vpop.f32.mrf.mxu0 }
 0x136   :  { %v1286_v33 = vpop.f32.mrf.mxu1  ;;  %v1243_v34 = vpop.f32.mrf.mxu0 }
 0x137   :  { %v1244_v63 = vadd.f32 %v1243_v34, %v1242_v32 }
 0x138   :  { %v1287_v35 = vpop.f32.mrf.mxu1 }
 0x139   :  { %v748_v5 = vadd.f32 %v1244_v63, %v663_v1  ;;  %v1288_v7 = vadd.f32 %v1287_v35, %v1286_v33  ;;  %v1209_v33 = vadd.f32 %v2368_v31, %v2366_v29 }
 0x13a   :  { %v1245_v36 = vpop.f32.mrf.mxu0 }
 0x13b   :  { %v833_v32 = vadd.f32 %v1288_v7, %v748_v5 }
 0x13c   :  { %v1246_v38 = vpop.f32.mrf.mxu0 }
 0x13d   :  { %v1289_v37 = vpop.f32.mrf.mxu1  ;;  %v1247_v17 = vadd.f32 %v1246_v38, %v1245_v36 }
 0x13f   :  { %v1290_v39 = vpop.f32.mrf.mxu1  ;;  %v753_v21 = vadd.f32 %v1247_v17, %v668_v12 }
 0x140   :  { %v1248_v42 = vpop.f32.mrf.mxu0  ;;  %v1291_v23 = vadd.f32 %v1290_v39, %v1289_v37  ;;  %v678_v39 = vadd.f32 %v1209_v33, %v593_v41 }
 0x142   :  { %v1249_v49 = vpop.f32.mrf.mxu0  ;;  %v838_v38 = vadd.f32 %v1291_v23, %v753_v21 }
 0x143   :  { %v1292_v43 = vpop.f32.mrf.mxu1  ;;  %v1250_v22 = vadd.f32 %v1249_v49, %v1248_v42 }
 0x145   :  { %v1293_v50 = vpop.f32.mrf.mxu1  ;;  %v758_v35 = vadd.f32 %v1250_v22, %v673_v13 }
 0x146   :  { %v1251_v60 = vpop.f32.mrf.mxu0  ;;  %v1294_v36 = vadd.f32 %v1293_v50, %v1292_v43 }
 0x148   :  { %v1252_v10 = vpop.f32.mrf.mxu0  ;;  %v843_v51 = vadd.f32 %v1294_v36, %v758_v35 }
 0x149   :  { %v1295_v61 = vpop.f32.mrf.mxu1  ;;  %v1253_v42 = vadd.f32 %v1252_v10, %v1251_v60 }
 0x14b   :  { %v1296_v16 = vpop.f32.mrf.mxu1  ;;  %v763_v29 = vadd.f32 %v1253_v42, %v678_v39 }
 0x14c   :  { %v1297_v31 = vadd.f32 %v1296_v16, %v1295_v61 }
 0x14e   :  { %v848_v62 = vadd.f32 %v1297_v31, %v763_v29 }
 0x15c   :  { %v1330_v9 = vpop.f32.mrf.mxu0 }
 0x15d   :  { %v1374_v11 = vpop.f32.mrf.mxu1 }
 0x15e   :  { %v1331_v24 = vpop.f32.mrf.mxu0 }
 0x15f   :  { %v1375_v26 = vpop.f32.mrf.mxu1  ;;  %v1332_v34 = vadd.f32 %v1331_v24, %v1330_v9 }
 0x160   :  { %v1333_v15 = vpop.f32.mrf.mxu0  ;;  %v1376_v27 = vadd.f32 %v1375_v26, %v1374_v11 }
 0x161   :  { %v1377_v40 = vpop.f32.mrf.mxu1  ;;  %v918_v25 = vadd.f32 %v1332_v34, %v833_v32 }
 0x162   :  { %v1334_v28 = vpop.f32.mrf.mxu0 }
 0x163   :  { %v1378_v30 = vpop.f32.mrf.mxu1  ;;  %v1003_v44 = vadd.f32 %v1376_v27, %v918_v25  ;;  %v1335_v45 = vadd.f32 %v1334_v28, %v1333_v15 }
 0x164   :  { %v1336_v46 = vpop.f32.mrf.mxu0  ;;  %v1379_v49 = vadd.f32 %v1378_v30, %v1377_v40 }
 0x165   :  { %v1380_v37 = vpop.f32.mrf.mxu1  ;;  %v1021_v47 = vmax.f32 %v1003_v44, 0.0  ;;  %v923_v48 = vadd.f32 %v1335_v45, %v838_v38 }
 0x166   :  { %v1337_v52 = vpop.f32.mrf.mxu0 }
 0x167   :  { %v1381_v53 = vpop.f32.mrf.mxu1  ;;  %1025 = vst [vmem:[%s2390_s3] sm:$0xff] %v1021_v47  ;;  %v1008_v43 = vadd.f32 %v1379_v49, %v923_v48  ;;  %v1338_v50 = vadd.f32 %v1337_v52, %v1336_v46 }
 0x168   :  { %v1339_v54 = vpop.f32.mrf.mxu0  ;;  %v1382_v58 = vadd.f32 %v1381_v53, %v1380_v37 }
 0x169   :  { %v1383_v55 = vpop.f32.mrf.mxu1  ;;  %v1022_v56 = vmax.f32 %v1008_v43, 0.0  ;;  %v928_v57 = vadd.f32 %v1338_v50, %v843_v51 }
 0x16a   :  { %v1340_v59 = vpop.f32.mrf.mxu0 }
 0x16b   :  { %v1384_v60 = vpop.f32.mrf.mxu1  ;;  %1026 = vst [vmem:[%s2390_s3 + $0x8] sm:$0xff] %v1022_v56  ;;  %v1013_v63 = vadd.f32 %v1382_v58, %v928_v57  ;;  %v1341_v61 = vadd.f32 %v1340_v59, %v1339_v54 }
 0x16c   :  { %v1385_v2 = vadd.f32 %v1384_v60, %v1383_v55 }
 0x16d   :  { %v1023_v0 = vmax.f32 %v1013_v63, 0.0  ;;  %v933_v1 = vadd.f32 %v1341_v61, %v848_v62 }
 0x16f   :  { %1027 = vst [vmem:[%s2390_s3 + $0x10] sm:$0xff] %v1023_v0  ;;  %v1018_v3 = vadd.f32 %v1385_v2, %v933_v1 }
 0x171   :  { %v1024_v4 = vmax.f32 %v1018_v3, 0.0 }
 0x173   :  { %1028 = vst [vmem:[%s2390_s3 + $0x18] sm:$0xff] %v1024_v4 }

// kernel: cnn_forward_pallas.9
= control target key start
LH: loop header
LB: loop body
LE: loop exit
PB: predicated region body
PF: predicated region fallthrough
CT: control target
= control target key end

     0   :  { %vm1295_vm0 = vmmov 0   ;;  %s2199_s1 = inlined_call_operand.vmem [shape: f32[2048,128], index: 1, kind: input, shape index: {}]   ;;  %s2200_s0 = inlined_call_operand.vmem [shape: f32[8,2048], index: 0, kind: input, shape index: {}]   ;;  %s2201_s3 = inlined_call_operand.vmem [shape: f32[128,128], index: 3, kind: input, shape index: {}]   ;;  %s2202_s2 = inlined_call_operand.vmem [shape: f32[1,128], index: 2, kind: input, shape index: {}]   ;;  %s2203_s4 = inlined_call_operand.vmem [shape: f32[1,128], index: 4, kind: input, shape index: {}]   ;;  %s2204_s5 = inlined_call_operand.vmem [shape: f32[8,128], index: 5, kind: output, shape index: {}]  }
   0x1   :  { %v67_v0 = vld [vmem:[%s2199_s1 + $0xf8] sm:$0xff]  ;;  %v66_v4 = vld [vmem:[%s2199_s1 + $0xf0] sm:$0xff]  ;;  %v65_v8 = vld [vmem:[%s2199_s1 + $0xe8] sm:$0xff] }
   0x2   :  { %v99_v1 = vld [vmem:[%s2199_s1 + $0x1f8] sm:$0xff]  ;;  %960 = vmatprep.subr.mxu0 %v67_v0  ;;  %v98_v5 = vld [vmem:[%s2199_s1 + $0x1f0] sm:$0xff]  ;;  %v97_v9 = vld [vmem:[%s2199_s1 + $0x1e8] sm:$0xff] }
   0x3   :  { %v51_v2 = vld [vmem:[%s2199_s1 + $0x78] sm:$0xff]  ;;  %995 = vmatprep.subr.mxu1 %v99_v1  ;;  %v50_v6 = vld [vmem:[%s2199_s1 + $0x70] sm:$0xff]  ;;  %v49_v10 = vld [vmem:[%s2199_s1 + $0x68] sm:$0xff] }
   0x4   :  { %v83_v3 = vld [vmem:[%s2199_s1 + $0x178] sm:$0xff]  ;;  %961 = vmatpush3.msra.mxu0 %v51_v2  ;;  %v82_v7 = vld [vmem:[%s2199_s1 + $0x170] sm:$0xff]  ;;  %v81_v11 = vld [vmem:[%s2199_s1 + $0x168] sm:$0xff] }
   0x5   :  { %996 = vmatpush3.msra.mxu1 %v83_v3  ;;  %962 = vmatprep.subr.mxu0 %v66_v4  ;;  %v64_v12 = vld [vmem:[%s2199_s1 + $0xe0] sm:$0xff]  ;;  %v63_v16 = vld [vmem:[%s2199_s1 + $0xd8] sm:$0xff]  ;;  %v62_v20 = vld [vmem:[%s2199_s1 + $0xd0] sm:$0xff] }
   0x6   :  { %997 = vmatprep.subr.mxu1 %v98_v5  ;;  %963 = vmatpush3.msra.mxu0 %v50_v6  ;;  %v96_v13 = vld [vmem:[%s2199_s1 + $0x1e0] sm:$0xff]  ;;  %v95_v17 = vld [vmem:[%s2199_s1 + $0x1d8] sm:$0xff]  ;;  %v94_v21 = vld [vmem:[%s2199_s1 + $0x1d0] sm:$0xff] }
   0x7   :  { %998 = vmatpush3.msra.mxu1 %v82_v7  ;;  %964 = vmatprep.subr.mxu0 %v65_v8  ;;  %v48_v14 = vld [vmem:[%s2199_s1 + $0x60] sm:$0xff]  ;;  %v47_v18 = vld [vmem:[%s2199_s1 + $0x58] sm:$0xff]  ;;  %v46_v22 = vld [vmem:[%s2199_s1 + $0x50] sm:$0xff] }
   0x8   :  { %999 = vmatprep.subr.mxu1 %v97_v9  ;;  %v80_v15 = vld [vmem:[%s2199_s1 + $0x160] sm:$0xff]  ;;  %965 = vmatpush3.msra.mxu0 %v49_v10  ;;  %v79_v19 = vld [vmem:[%s2199_s1 + $0x158] sm:$0xff]  ;;  %v78_v23 = vld [vmem:[%s2199_s1 + $0x150] sm:$0xff] }
   0x9   :  { %1000 = vmatpush3.msra.mxu1 %v81_v11  ;;  %966 = vmatprep.subr.mxu0 %v64_v12  ;;  %v61_v24 = vld [vmem:[%s2199_s1 + $0xc8] sm:$0xff]  ;;  %v60_v28 = vld [vmem:[%s2199_s1 + $0xc0] sm:$0xff]  ;;  %v59_v32 = vld [vmem:[%s2199_s1 + $0xb8] sm:$0xff] }
   0xa   :  { %1001 = vmatprep.subr.mxu1 %v96_v13  ;;  %967 = vmatpush3.msra.mxu0 %v48_v14  ;;  %v93_v25 = vld [vmem:[%s2199_s1 + $0x1c8] sm:$0xff]  ;;  %v92_v29 = vld [vmem:[%s2199_s1 + $0x1c0] sm:$0xff]  ;;  %v91_v33 = vld [vmem:[%s2199_s1 + $0x1b8] sm:$0xff] }
   0xb   :  { %1002 = vmatpush3.msra.mxu1 %v80_v15  ;;  %968 = vmatprep.subr.mxu0 %v63_v16  ;;  %v45_v26 = vld [vmem:[%s2199_s1 + $0x48] sm:$0xff]  ;;  %v44_v30 = vld [vmem:[%s2199_s1 + $0x40] sm:$0xff]  ;;  %v43_v34 = vld [vmem:[%s2199_s1 + $0x38] sm:$0xff] }
   0xc   :  { %1003 = vmatprep.subr.mxu1 %v95_v17  ;;  %969 = vmatpush3.msra.mxu0 %v47_v18  ;;  %v77_v27 = vld [vmem:[%s2199_s1 + $0x148] sm:$0xff]  ;;  %v76_v31 = vld [vmem:[%s2199_s1 + $0x140] sm:$0xff]  ;;  %v75_v35 = vld [vmem:[%s2199_s1 + $0x138] sm:$0xff] }
   0xd   :  { %1004 = vmatpush3.msra.mxu1 %v79_v19  ;;  %970 = vmatprep.subr.mxu0 %v62_v20  ;;  %v58_v36 = vld [vmem:[%s2199_s1 + $0xb0] sm:$0xff]  ;;  %v57_v40 = vld [vmem:[%s2199_s1 + $0xa8] sm:$0xff]  ;;  %v56_v44 = vld [vmem:[%s2199_s1 + $0xa0] sm:$0xff] }
   0xe   :  { %1005 = vmatprep.subr.mxu1 %v94_v21  ;;  %971 = vmatpush3.msra.mxu0 %v46_v22  ;;  %v90_v37 = vld [vmem:[%s2199_s1 + $0x1b0] sm:$0xff]  ;;  %v89_v41 = vld [vmem:[%s2199_s1 + $0x1a8] sm:$0xff]  ;;  %v88_v45 = vld [vmem:[%s2199_s1 + $0x1a0] sm:$0xff] }
   0xf   :  { %1006 = vmatpush3.msra.mxu1 %v78_v23  ;;  %972 = vmatprep.subr.mxu0 %v61_v24  ;;  %v42_v38 = vld [vmem:[%s2199_s1 + $0x30] sm:$0xff]  ;;  %v41_v42 = vld [vmem:[%s2199_s1 + $0x28] sm:$0xff]  ;;  %v40_v46 = vld [vmem:[%s2199_s1 + $0x20] sm:$0xff] }
  0x10   :  { %1007 = vmatprep.subr.mxu1 %v93_v25  ;;  %973 = vmatpush3.msra.mxu0 %v45_v26  ;;  %v74_v39 = vld [vmem:[%s2199_s1 + $0x130] sm:$0xff]  ;;  %v73_v43 = vld [vmem:[%s2199_s1 + $0x128] sm:$0xff]  ;;  %v72_v47 = vld [vmem:[%s2199_s1 + $0x120] sm:$0xff] }
  0x11   :  { %1008 = vmatpush3.msra.mxu1 %v77_v27  ;;  %974 = vmatprep.subr.mxu0 %v60_v28  ;;  %v55_v48 = vld [vmem:[%s2199_s1 + $0x98] sm:$0xff]  ;;  %v54_v52 = vld [vmem:[%s2199_s1 + $0x90] sm:$0xff]  ;;  %v53_v56 = vld [vmem:[%s2199_s1 + $0x88] sm:$0xff] }
  0x12   :  { %1009 = vmatprep.subr.mxu1 %v92_v29  ;;  %975 = vmatpush3.msra.mxu0 %v44_v30  ;;  %v87_v49 = vld [vmem:[%s2199_s1 + $0x198] sm:$0xff]  ;;  %v86_v53 = vld [vmem:[%s2199_s1 + $0x190] sm:$0xff]  ;;  %v85_v57 = vld [vmem:[%s2199_s1 + $0x188] sm:$0xff] }
  0x13   :  { %1010 = vmatpush3.msra.mxu1 %v76_v31  ;;  %976 = vmatprep.subr.mxu0 %v59_v32  ;;  %v39_v50 = vld [vmem:[%s2199_s1 + $0x18] sm:$0xff]  ;;  %v38_v54 = vld [vmem:[%s2199_s1 + $0x10] sm:$0xff]  ;;  %v37_v58 = vld [vmem:[%s2199_s1 + $0x8] sm:$0xff] }
  0x14   :  { %1011 = vmatprep.subr.mxu1 %v91_v33  ;;  %977 = vmatpush3.msra.mxu0 %v43_v34  ;;  %v71_v51 = vld [vmem:[%s2199_s1 + $0x118] sm:$0xff]  ;;  %v70_v55 = vld [vmem:[%s2199_s1 + $0x110] sm:$0xff]  ;;  %v69_v59 = vld [vmem:[%s2199_s1 + $0x108] sm:$0xff] }
  0x15   :  { %1012 = vmatpush3.msra.mxu1 %v75_v35  ;;  %978 = vmatprep.subr.mxu0 %v58_v36  ;;  %v52_v60 = vld [vmem:[%s2199_s1 + $0x80] sm:$0xff]  ;;  %v21_v63 = vld [vmem:[%s2200_s0 + $0x8] sm:$0xff]  ;;  %v23_v2 = vld [vmem:[%s2200_s0 + $0x18] sm:$0xff] }
  0x16   :  { %1013 = vmatprep.subr.mxu1 %v90_v37  ;;  %979 = vmatpush3.msra.mxu0 %v42_v38  ;;  %v84_v61 = vld [vmem:[%s2199_s1 + $0x180] sm:$0xff]  ;;  %v131_v3 = vld [vmem:[%s2199_s1 + $0x2f8] sm:$0xff]  ;;  %v22_v5 = vld [vmem:[%s2200_s0 + $0x10] sm:$0xff] }
  0x17   :  { %1014 = vmatpush3.msra.mxu1 %v74_v39  ;;  %980 = vmatprep.subr.mxu0 %v57_v40  ;;  %v36_v62 = vld [vmem:[%s2199_s1] sm:$0xff]  ;;  %v163_v4 = vld [vmem:[%s2199_s1 + $0x3f8] sm:$0xff]  ;;  %v130_v8 = vld [vmem:[%s2199_s1 + $0x2f0] sm:$0xff] }
  0x18   :  { %1015 = vmatprep.subr.mxu1 %v89_v41  ;;  %981 = vmatpush3.msra.mxu0 %v41_v42  ;;  %v68_v0 = vld [vmem:[%s2199_s1 + $0x100] sm:$0xff]  ;;  %v115_v6 = vld [vmem:[%s2199_s1 + $0x278] sm:$0xff]  ;;  %v162_v9 = vld [vmem:[%s2199_s1 + $0x3f0] sm:$0xff] }
  0x19   :  { %1016 = vmatpush3.msra.mxu1 %v73_v43  ;;  %982 = vmatprep.subr.mxu0 %v56_v44  ;;  %v20_v1 = vld [vmem:[%s2200_s0] sm:$0xff]  ;;  %v147_v7 = vld [vmem:[%s2199_s1 + $0x378] sm:$0xff]  ;;  %v114_v10 = vld [vmem:[%s2199_s1 + $0x270] sm:$0xff] }
  0x1a   :  { %1017 = vmatprep.subr.mxu1 %v88_v45  ;;  %983 = vmatpush3.msra.mxu0 %v40_v46  ;;  %v146_v11 = vld [vmem:[%s2199_s1 + $0x370] sm:$0xff]  ;;  %v129_v12 = vld [vmem:[%s2199_s1 + $0x2e8] sm:$0xff]  ;;  %v128_v16 = vld [vmem:[%s2199_s1 + $0x2e0] sm:$0xff] }
  0x1b   :  { %1018 = vmatpush3.msra.mxu1 %v72_v47  ;;  %984 = vmatprep.subr.mxu0 %v55_v48  ;;  %v161_v13 = vld [vmem:[%s2199_s1 + $0x3e8] sm:$0xff]  ;;  %v160_v17 = vld [vmem:[%s2199_s1 + $0x3e0] sm:$0xff]  ;;  %v127_v20 = vld [vmem:[%s2199_s1 + $0x2d8] sm:$0xff] }
  0x1c   :  { %1019 = vmatprep.subr.mxu1 %v87_v49  ;;  %985 = vmatpush3.msra.mxu0 %v39_v50  ;;  %v113_v14 = vld [vmem:[%s2199_s1 + $0x268] sm:$0xff]  ;;  %v112_v18 = vld [vmem:[%s2199_s1 + $0x260] sm:$0xff]  ;;  %v159_v21 = vld [vmem:[%s2199_s1 + $0x3d8] sm:$0xff] }
  0x1d   :  { %1020 = vmatpush3.msra.mxu1 %v71_v51  ;;  %986 = vmatprep.subr.mxu0 %v54_v52  ;;  %v145_v15 = vld [vmem:[%s2199_s1 + $0x368] sm:$0xff]  ;;  %v144_v19 = vld [vmem:[%s2199_s1 + $0x360] sm:$0xff]  ;;  %v111_v22 = vld [vmem:[%s2199_s1 + $0x258] sm:$0xff] }
  0x1e   :  { %1021 = vmatprep.subr.mxu1 %v86_v53  ;;  %987 = vmatpush3.msra.mxu0 %v38_v54  ;;  %v143_v23 = vld [vmem:[%s2199_s1 + $0x358] sm:$0xff]  ;;  %v126_v24 = vld [vmem:[%s2199_s1 + $0x2d0] sm:$0xff]  ;;  %v125_v28 = vld [vmem:[%s2199_s1 + $0x2c8] sm:$0xff] }
  0x1f   :  { %1022 = vmatpush3.msra.mxu1 %v70_v55  ;;  %988 = vmatprep.subr.mxu0 %v53_v56  ;;  %v158_v25 = vld [vmem:[%s2199_s1 + $0x3d0] sm:$0xff]  ;;  %v157_v29 = vld [vmem:[%s2199_s1 + $0x3c8] sm:$0xff]  ;;  %v124_v32 = vld [vmem:[%s2199_s1 + $0x2c0] sm:$0xff] }
  0x20   :  { %1023 = vmatprep.subr.mxu1 %v85_v57  ;;  %989 = vmatpush3.msra.mxu0 %v37_v58  ;;  %v110_v26 = vld [vmem:[%s2199_s1 + $0x250] sm:$0xff]  ;;  %v109_v30 = vld [vmem:[%s2199_s1 + $0x248] sm:$0xff]  ;;  %v156_v33 = vld [vmem:[%s2199_s1 + $0x3c0] sm:$0xff] }
  0x21   :  { %1024 = vmatpush3.msra.mxu1 %v69_v59  ;;  %990 = vmatprep.subr.mxu0 %v52_v60  ;;  %v142_v27 = vld [vmem:[%s2199_s1 + $0x350] sm:$0xff]  ;;  %v141_v31 = vld [vmem:[%s2199_s1 + $0x348] sm:$0xff]  ;;  %v108_v34 = vld [vmem:[%s2199_s1 + $0x240] sm:$0xff] }
  0x22   :  { %1025 = vmatprep.subr.mxu1 %v84_v61  ;;  %991 = vmatpush3.msra.mxu0 %v36_v62  ;;  %v140_v35 = vld [vmem:[%s2199_s1 + $0x340] sm:$0xff]  ;;  %v123_v36 = vld [vmem:[%s2199_s1 + $0x2b8] sm:$0xff]  ;;  %v122_v40 = vld [vmem:[%s2199_s1 + $0x2b0] sm:$0xff] }
  0x23   :  { %363 = vmatprep.mubr.f32.mxu0 %v21_v63  ;;  %1026 = vmatpush3.msra.mxu1 %v68_v0  ;;  %v155_v37 = vld [vmem:[%s2199_s1 + $0x3b8] sm:$0xff]  ;;  %v154_v41 = vld [vmem:[%s2199_s1 + $0x3b0] sm:$0xff]  ;;  %v121_v44 = vld [vmem:[%s2199_s1 + $0x2a8] sm:$0xff] }
  0x24   :  { %364 = vmatmul.mubr.f32.vlgmr.msra.gmra.mxu0 %v20_v1  ;;  %433 = vmatprep.mubr.f32.mxu1 %v23_v2  ;;  %v107_v38 = vld [vmem:[%s2199_s1 + $0x238] sm:$0xff]  ;;  %v106_v42 = vld [vmem:[%s2199_s1 + $0x230] sm:$0xff]  ;;  %v153_v45 = vld [vmem:[%s2199_s1 + $0x3a8] sm:$0xff] }
  0x25   :  { %1030 = vmatprep.subr.mxu0 %v131_v3  ;;  %1065 = vmatprep.subr.mxu1 %v163_v4  ;;  %v139_v39 = vld [vmem:[%s2199_s1 + $0x338] sm:$0xff]  ;;  %v138_v43 = vld [vmem:[%s2199_s1 + $0x330] sm:$0xff]  ;;  %v105_v46 = vld [vmem:[%s2199_s1 + $0x228] sm:$0xff] }
  0x26   :  { %434 = vmatmul.mubr.f32.vlgmr.msra.gmra.mxu1 %v22_v5  ;;  %1031 = vmatpush3.msra.mxu0 %v115_v6  ;;  %v137_v47 = vld [vmem:[%s2199_s1 + $0x328] sm:$0xff]  ;;  %v120_v48 = vld [vmem:[%s2199_s1 + $0x2a0] sm:$0xff]  ;;  %v119_v52 = vld [vmem:[%s2199_s1 + $0x298] sm:$0xff] }
  0x27   :  { %1066 = vmatpush3.msra.mxu1 %v147_v7  ;;  %1032 = vmatprep.subr.mxu0 %v130_v8  ;;  %v152_v49 = vld [vmem:[%s2199_s1 + $0x3a0] sm:$0xff]  ;;  %v151_v53 = vld [vmem:[%s2199_s1 + $0x398] sm:$0xff]  ;;  %v118_v56 = vld [vmem:[%s2199_s1 + $0x290] sm:$0xff] }
  0x28   :  { %1067 = vmatprep.subr.mxu1 %v162_v9  ;;  %1033 = vmatpush3.msra.mxu0 %v114_v10  ;;  %v104_v50 = vld [vmem:[%s2199_s1 + $0x220] sm:$0xff]  ;;  %v103_v54 = vld [vmem:[%s2199_s1 + $0x218] sm:$0xff]  ;;  %v150_v57 = vld [vmem:[%s2199_s1 + $0x390] sm:$0xff] }
  0x29   :  { %1068 = vmatpush3.msra.mxu1 %v146_v11  ;;  %1034 = vmatprep.subr.mxu0 %v129_v12  ;;  %v136_v51 = vld [vmem:[%s2199_s1 + $0x320] sm:$0xff]  ;;  %v135_v55 = vld [vmem:[%s2199_s1 + $0x318] sm:$0xff]  ;;  %v102_v58 = vld [vmem:[%s2199_s1 + $0x210] sm:$0xff] }
  0x2a   :  { %1069 = vmatprep.subr.mxu1 %v161_v13  ;;  %1035 = vmatpush3.msra.mxu0 %v113_v14  ;;  %v134_v59 = vld [vmem:[%s2199_s1 + $0x310] sm:$0xff]  ;;  %v117_v60 = vld [vmem:[%s2199_s1 + $0x288] sm:$0xff]  ;;  %v116_v0 = vld [vmem:[%s2199_s1 + $0x280] sm:$0xff] }
  0x2b   :  { %1070 = vmatpush3.msra.mxu1 %v145_v15  ;;  %1036 = vmatprep.subr.mxu0 %v128_v16  ;;  %v149_v61 = vld [vmem:[%s2199_s1 + $0x388] sm:$0xff]  ;;  %v148_v1 = vld [vmem:[%s2199_s1 + $0x380] sm:$0xff]  ;;  %v27_v6 = vld [vmem:[%s2200_s0 + $0x38] sm:$0xff] }
  0x2c   :  { %1071 = vmatprep.subr.mxu1 %v160_v17  ;;  %1037 = vmatpush3.msra.mxu0 %v112_v18  ;;  %v101_v62 = vld [vmem:[%s2199_s1 + $0x208] sm:$0xff]  ;;  %v100_v2 = vld [vmem:[%s2199_s1 + $0x200] sm:$0xff]  ;;  %v195_v7 = vld [vmem:[%s2199_s1 + $0x4f8] sm:$0xff] }
  0x2d   :  { %1072 = vmatpush3.msra.mxu1 %v144_v19  ;;  %1038 = vmatprep.subr.mxu0 %v127_v20  ;;  %v133_v63 = vld [vmem:[%s2199_s1 + $0x308] sm:$0xff]  ;;  %v132_v4 = vld [vmem:[%s2199_s1 + $0x300] sm:$0xff]  ;;  %v227_v8 = vld [vmem:[%s2199_s1 + $0x5f8] sm:$0xff] }
  0x2e   :  { %1073 = vmatprep.subr.mxu1 %v159_v21  ;;  %1039 = vmatpush3.msra.mxu0 %v111_v22  ;;  %v25_v3 = vld [vmem:[%s2200_s0 + $0x28] sm:$0xff]  ;;  %v24_v5 = vld [vmem:[%s2200_s0 + $0x20] sm:$0xff]  ;;  %v26_v9 = vld [vmem:[%s2200_s0 + $0x30] sm:$0xff] }
  0x2f   :  { %1074 = vmatpush3.msra.mxu1 %v143_v23  ;;  %1040 = vmatprep.subr.mxu0 %v126_v24  ;;  %v179_v10 = vld [vmem:[%s2199_s1 + $0x478] sm:$0xff]  ;;  %v194_v12 = vld [vmem:[%s2199_s1 + $0x4f0] sm:$0xff]  ;;  %v193_v16 = vld [vmem:[%s2199_s1 + $0x4e8] sm:$0xff] }
  0x30   :  { %1075 = vmatprep.subr.mxu1 %v158_v25  ;;  %1041 = vmatpush3.msra.mxu0 %v110_v26  ;;  %v211_v11 = vld [vmem:[%s2199_s1 + $0x578] sm:$0xff]  ;;  %v226_v13 = vld [vmem:[%s2199_s1 + $0x5f0] sm:$0xff]  ;;  %v225_v17 = vld [vmem:[%s2199_s1 + $0x5e8] sm:$0xff] }
  0x31   :  { %1076 = vmatpush3.msra.mxu1 %v142_v27  ;;  %1042 = vmatprep.subr.mxu0 %v125_v28  ;;  %v178_v14 = vld [vmem:[%s2199_s1 + $0x470] sm:$0xff]  ;;  %v177_v18 = vld [vmem:[%s2199_s1 + $0x468] sm:$0xff]  ;;  %v192_v20 = vld [vmem:[%s2199_s1 + $0x4e0] sm:$0xff] }
  0x32   :  { %1077 = vmatprep.subr.mxu1 %v157_v29  ;;  %1043 = vmatpush3.msra.mxu0 %v109_v30  ;;  %v210_v15 = vld [vmem:[%s2199_s1 + $0x570] sm:$0xff]  ;;  %v209_v19 = vld [vmem:[%s2199_s1 + $0x568] sm:$0xff]  ;;  %v224_v21 = vld [vmem:[%s2199_s1 + $0x5e0] sm:$0xff] }
  0x33   :  { %1078 = vmatpush3.msra.mxu1 %v141_v31  ;;  %1044 = vmatprep.subr.mxu0 %v124_v32  ;;  %v176_v22 = vld [vmem:[%s2199_s1 + $0x460] sm:$0xff]  ;;  %v191_v24 = vld [vmem:[%s2199_s1 + $0x4d8] sm:$0xff]  ;;  %v190_v28 = vld [vmem:[%s2199_s1 + $0x4d0] sm:$0xff] }
  0x34   :  { %1079 = vmatprep.subr.mxu1 %v156_v33  ;;  %1045 = vmatpush3.msra.mxu0 %v108_v34  ;;  %v208_v23 = vld [vmem:[%s2199_s1 + $0x560] sm:$0xff]  ;;  %v223_v25 = vld [vmem:[%s2199_s1 + $0x5d8] sm:$0xff]  ;;  %v222_v29 = vld [vmem:[%s2199_s1 + $0x5d0] sm:$0xff] }
  0x35   :  { %1080 = vmatpush3.msra.mxu1 %v140_v35  ;;  %1046 = vmatprep.subr.mxu0 %v123_v36  ;;  %v175_v26 = vld [vmem:[%s2199_s1 + $0x458] sm:$0xff]  ;;  %v174_v30 = vld [vmem:[%s2199_s1 + $0x450] sm:$0xff]  ;;  %v189_v32 = vld [vmem:[%s2199_s1 + $0x4c8] sm:$0xff] }
  0x36   :  { %1081 = vmatprep.subr.mxu1 %v155_v37  ;;  %1047 = vmatpush3.msra.mxu0 %v107_v38  ;;  %v207_v27 = vld [vmem:[%s2199_s1 + $0x558] sm:$0xff]  ;;  %v206_v31 = vld [vmem:[%s2199_s1 + $0x550] sm:$0xff]  ;;  %v221_v33 = vld [vmem:[%s2199_s1 + $0x5c8] sm:$0xff] }
  0x37   :  { %1082 = vmatpush3.msra.mxu1 %v139_v39  ;;  %1048 = vmatprep.subr.mxu0 %v122_v40  ;;  %v173_v34 = vld [vmem:[%s2199_s1 + $0x448] sm:$0xff]  ;;  %v188_v36 = vld [vmem:[%s2199_s1 + $0x4c0] sm:$0xff]  ;;  %v187_v40 = vld [vmem:[%s2199_s1 + $0x4b8] sm:$0xff] }
  0x38   :  { %1083 = vmatprep.subr.mxu1 %v154_v41  ;;  %1049 = vmatpush3.msra.mxu0 %v106_v42  ;;  %v205_v35 = vld [vmem:[%s2199_s1 + $0x548] sm:$0xff]  ;;  %v220_v37 = vld [vmem:[%s2199_s1 + $0x5c0] sm:$0xff]  ;;  %v219_v41 = vld [vmem:[%s2199_s1 + $0x5b8] sm:$0xff] }
  0x39   :  { %1084 = vmatpush3.msra.mxu1 %v138_v43  ;;  %1050 = vmatprep.subr.mxu0 %v121_v44  ;;  %v172_v38 = vld [vmem:[%s2199_s1 + $0x440] sm:$0xff]  ;;  %v171_v42 = vld [vmem:[%s2199_s1 + $0x438] sm:$0xff]  ;;  %v186_v44 = vld [vmem:[%s2199_s1 + $0x4b0] sm:$0xff] }
  0x3a   :  { %1085 = vmatprep.subr.mxu1 %v153_v45  ;;  %1051 = vmatpush3.msra.mxu0 %v105_v46  ;;  %v204_v39 = vld [vmem:[%s2199_s1 + $0x540] sm:$0xff]  ;;  %v203_v43 = vld [vmem:[%s2199_s1 + $0x538] sm:$0xff]  ;;  %v218_v45 = vld [vmem:[%s2199_s1 + $0x5b0] sm:$0xff] }
  0x3b   :  { %1086 = vmatpush3.msra.mxu1 %v137_v47  ;;  %1052 = vmatprep.subr.mxu0 %v120_v48  ;;  %v170_v46 = vld [vmem:[%s2199_s1 + $0x430] sm:$0xff]  ;;  %v185_v48 = vld [vmem:[%s2199_s1 + $0x4a8] sm:$0xff] }
  0x3c   :  { %1087 = vmatprep.subr.mxu1 %v152_v49  ;;  %1053 = vmatpush3.msra.mxu0 %v104_v50  ;;  %v202_v47 = vld [vmem:[%s2199_s1 + $0x530] sm:$0xff]  ;;  %v217_v49 = vld [vmem:[%s2199_s1 + $0x5a8] sm:$0xff] }
  0x3d   :  { %1088 = vmatpush3.msra.mxu1 %v136_v51  ;;  %1054 = vmatprep.subr.mxu0 %v119_v52  ;;  %v169_v50 = vld [vmem:[%s2199_s1 + $0x428] sm:$0xff]  ;;  %v184_v52 = vld [vmem:[%s2199_s1 + $0x4a0] sm:$0xff] }
  0x3e   :  { %1089 = vmatprep.subr.mxu1 %v151_v53  ;;  %1055 = vmatpush3.msra.mxu0 %v103_v54  ;;  %v201_v51 = vld [vmem:[%s2199_s1 + $0x528] sm:$0xff]  ;;  %v216_v53 = vld [vmem:[%s2199_s1 + $0x5a0] sm:$0xff] }
  0x3f   :  { %1090 = vmatpush3.msra.mxu1 %v135_v55  ;;  %1056 = vmatprep.subr.mxu0 %v118_v56  ;;  %v168_v54 = vld [vmem:[%s2199_s1 + $0x420] sm:$0xff]  ;;  %v183_v56 = vld [vmem:[%s2199_s1 + $0x498] sm:$0xff] }
  0x40   :  { %1091 = vmatprep.subr.mxu1 %v150_v57  ;;  %1057 = vmatpush3.msra.mxu0 %v102_v58  ;;  %v200_v55 = vld [vmem:[%s2199_s1 + $0x520] sm:$0xff]  ;;  %v215_v57 = vld [vmem:[%s2199_s1 + $0x598] sm:$0xff] }
  0x41   :  { %1092 = vmatpush3.msra.mxu1 %v134_v59  ;;  %1058 = vmatprep.subr.mxu0 %v117_v60  ;;  %v167_v58 = vld [vmem:[%s2199_s1 + $0x418] sm:$0xff]  ;;  %v182_v60 = vld [vmem:[%s2199_s1 + $0x490] sm:$0xff] }
  0x42   :  { %1093 = vmatprep.subr.mxu1 %v149_v61  ;;  %1059 = vmatpush3.msra.mxu0 %v101_v62  ;;  %v199_v59 = vld [vmem:[%s2199_s1 + $0x518] sm:$0xff]  ;;  %v214_v61 = vld [vmem:[%s2199_s1 + $0x590] sm:$0xff] }
  0x43   :  { %1094 = vmatpush3.msra.mxu1 %v133_v63  ;;  %1060 = vmatprep.subr.mxu0 %v116_v0  ;;  %v166_v62 = vld [vmem:[%s2199_s1 + $0x410] sm:$0xff]  ;;  %v181_v0 = vld [vmem:[%s2199_s1 + $0x488] sm:$0xff] }
  0x44   :  { %1095 = vmatprep.subr.mxu1 %v148_v1  ;;  %1061 = vmatpush3.msra.mxu0 %v100_v2  ;;  %v198_v63 = vld [vmem:[%s2199_s1 + $0x510] sm:$0xff]  ;;  %v213_v1 = vld [vmem:[%s2199_s1 + $0x588] sm:$0xff] }
  0x45   :  { %503 = vmatprep.mubr.f32.mxu0 %v25_v3  ;;  %1096 = vmatpush3.msra.mxu1 %v132_v4  ;;  %v165_v2 = vld [vmem:[%s2199_s1 + $0x408] sm:$0xff]  ;;  %v180_v4 = vld [vmem:[%s2199_s1 + $0x480] sm:$0xff] }
  0x46   :  { %504 = vmatmul.mubr.f32.vlgmr.msra.gmra.mxu0 %v24_v5  ;;  %573 = vmatprep.mubr.f32.mxu1 %v27_v6  ;;  %v197_v3 = vld [vmem:[%s2199_s1 + $0x508] sm:$0xff]  ;;  %v212_v5 = vld [vmem:[%s2199_s1 + $0x580] sm:$0xff] }
  0x47   :  { %1100 = vmatprep.subr.mxu0 %v195_v7  ;;  %1135 = vmatprep.subr.mxu1 %v227_v8  ;;  %v164_v6 = vld [vmem:[%s2199_s1 + $0x400] sm:$0xff]  ;;  %v29_v7 = vld [vmem:[%s2200_s0 + $0x48] sm:$0xff] }
  0x48   :  { %574 = vmatmul.mubr.f32.vlgmr.msra.gmra.mxu1 %v26_v9  ;;  %1101 = vmatpush3.msra.mxu0 %v179_v10  ;;  %v196_v8 = vld [vmem:[%s2199_s1 + $0x500] sm:$0xff]  ;;  %v31_v10 = vld [vmem:[%s2200_s0 + $0x58] sm:$0xff] }
  0x49   :  { %1136 = vmatpush3.msra.mxu1 %v211_v11  ;;  %1102 = vmatprep.subr.mxu0 %v194_v12  ;;  %v28_v9 = vld [vmem:[%s2200_s0 + $0x40] sm:$0xff]  ;;  %v259_v11 = vld [vmem:[%s2199_s1 + $0x6f8] sm:$0xff] }
  0x4a   :  { %1137 = vmatprep.subr.mxu1 %v226_v13  ;;  %1103 = vmatpush3.msra.mxu0 %v178_v14  ;;  %v291_v12 = vld [vmem:[%s2199_s1 + $0x7f8] sm:$0xff]  ;;  %v30_v13 = vld [vmem:[%s2200_s0 + $0x50] sm:$0xff] }
  0x4b   :  { %1138 = vmatpush3.msra.mxu1 %v210_v15  ;;  %1104 = vmatprep.subr.mxu0 %v193_v16  ;;  %v243_v14 = vld [vmem:[%s2199_s1 + $0x678] sm:$0xff]  ;;  %v258_v16 = vld [vmem:[%s2199_s1 + $0x6f0] sm:$0xff] }
  0x4c   :  { %1139 = vmatprep.subr.mxu1 %v225_v17  ;;  %1105 = vmatpush3.msra.mxu0 %v177_v18  ;;  %v275_v15 = vld [vmem:[%s2199_s1 + $0x778] sm:$0xff]  ;;  %v290_v17 = vld [vmem:[%s2199_s1 + $0x7f0] sm:$0xff] }
  0x4d   :  { %1140 = vmatpush3.msra.mxu1 %v209_v19  ;;  %1106 = vmatprep.subr.mxu0 %v192_v20  ;;  %v242_v18 = vld [vmem:[%s2199_s1 + $0x670] sm:$0xff]  ;;  %v257_v20 = vld [vmem:[%s2199_s1 + $0x6e8] sm:$0xff] }
  0x4e   :  { %1141 = vmatprep.subr.mxu1 %v224_v21  ;;  %1107 = vmatpush3.msra.mxu0 %v176_v22  ;;  %v274_v19 = vld [vmem:[%s2199_s1 + $0x770] sm:$0xff]  ;;  %v289_v21 = vld [vmem:[%s2199_s1 + $0x7e8] sm:$0xff] }
  0x4f   :  { %1142 = vmatpush3.msra.mxu1 %v208_v23  ;;  %1108 = vmatprep.subr.mxu0 %v191_v24  ;;  %v241_v22 = vld [vmem:[%s2199_s1 + $0x668] sm:$0xff]  ;;  %v256_v24 = vld [vmem:[%s2199_s1 + $0x6e0] sm:$0xff] }
  0x50   :  { %1143 = vmatprep.subr.mxu1 %v223_v25  ;;  %1109 = vmatpush3.msra.mxu0 %v175_v26  ;;  %v273_v23 = vld [vmem:[%s2199_s1 + $0x768] sm:$0xff]  ;;  %v288_v25 = vld [vmem:[%s2199_s1 + $0x7e0] sm:$0xff] }
  0x51   :  { %1144 = vmatpush3.msra.mxu1 %v207_v27  ;;  %1110 = vmatprep.subr.mxu0 %v190_v28  ;;  %v240_v26 = vld [vmem:[%s2199_s1 + $0x660] sm:$0xff]  ;;  %v255_v28 = vld [vmem:[%s2199_s1 + $0x6d8] sm:$0xff] }
  0x52   :  { %1145 = vmatprep.subr.mxu1 %v222_v29  ;;  %1111 = vmatpush3.msra.mxu0 %v174_v30  ;;  %v272_v27 = vld [vmem:[%s2199_s1 + $0x760] sm:$0xff]  ;;  %v287_v29 = vld [vmem:[%s2199_s1 + $0x7d8] sm:$0xff] }
  0x53   :  { %1146 = vmatpush3.msra.mxu1 %v206_v31  ;;  %1112 = vmatprep.subr.mxu0 %v189_v32  ;;  %v239_v30 = vld [vmem:[%s2199_s1 + $0x658] sm:$0xff]  ;;  %v254_v32 = vld [vmem:[%s2199_s1 + $0x6d0] sm:$0xff] }
  0x54   :  { %1147 = vmatprep.subr.mxu1 %v221_v33  ;;  %1113 = vmatpush3.msra.mxu0 %v173_v34  ;;  %v271_v31 = vld [vmem:[%s2199_s1 + $0x758] sm:$0xff]  ;;  %v286_v33 = vld [vmem:[%s2199_s1 + $0x7d0] sm:$0xff] }
  0x55   :  { %1148 = vmatpush3.msra.mxu1 %v205_v35  ;;  %1114 = vmatprep.subr.mxu0 %v188_v36  ;;  %v238_v34 = vld [vmem:[%s2199_s1 + $0x650] sm:$0xff]  ;;  %v253_v36 = vld [vmem:[%s2199_s1 + $0x6c8] sm:$0xff] }
  0x56   :  { %1149 = vmatprep.subr.mxu1 %v220_v37  ;;  %1115 = vmatpush3.msra.mxu0 %v172_v38  ;;  %v270_v35 = vld [vmem:[%s2199_s1 + $0x750] sm:$0xff]  ;;  %v285_v37 = vld [vmem:[%s2199_s1 + $0x7c8] sm:$0xff] }
  0x57   :  { %1150 = vmatpush3.msra.mxu1 %v204_v39  ;;  %1116 = vmatprep.subr.mxu0 %v187_v40  ;;  %v237_v38 = vld [vmem:[%s2199_s1 + $0x648] sm:$0xff]  ;;  %v252_v40 = vld [vmem:[%s2199_s1 + $0x6c0] sm:$0xff] }
  0x58   :  { %1151 = vmatprep.subr.mxu1 %v219_v41  ;;  %1117 = vmatpush3.msra.mxu0 %v171_v42  ;;  %v269_v39 = vld [vmem:[%s2199_s1 + $0x748] sm:$0xff]  ;;  %v284_v41 = vld [vmem:[%s2199_s1 + $0x7c0] sm:$0xff] }
  0x59   :  { %1152 = vmatpush3.msra.mxu1 %v203_v43  ;;  %1118 = vmatprep.subr.mxu0 %v186_v44  ;;  %v236_v42 = vld [vmem:[%s2199_s1 + $0x640] sm:$0xff]  ;;  %v251_v44 = vld [vmem:[%s2199_s1 + $0x6b8] sm:$0xff] }
  0x5a   :  { %1153 = vmatprep.subr.mxu1 %v218_v45  ;;  %1119 = vmatpush3.msra.mxu0 %v170_v46  ;;  %v268_v43 = vld [vmem:[%s2199_s1 + $0x740] sm:$0xff]  ;;  %v283_v45 = vld [vmem:[%s2199_s1 + $0x7b8] sm:$0xff] }
  0x5b   :  { %1154 = vmatpush3.msra.mxu1 %v202_v47  ;;  %1120 = vmatprep.subr.mxu0 %v185_v48  ;;  %v235_v46 = vld [vmem:[%s2199_s1 + $0x638] sm:$0xff]  ;;  %v250_v48 = vld [vmem:[%s2199_s1 + $0x6b0] sm:$0xff] }
  0x5c   :  { %1155 = vmatprep.subr.mxu1 %v217_v49  ;;  %1121 = vmatpush3.msra.mxu0 %v169_v50  ;;  %v267_v47 = vld [vmem:[%s2199_s1 + $0x738] sm:$0xff]  ;;  %v282_v49 = vld [vmem:[%s2199_s1 + $0x7b0] sm:$0xff] }
  0x5d   :  { %1156 = vmatpush3.msra.mxu1 %v201_v51  ;;  %1122 = vmatprep.subr.mxu0 %v184_v52  ;;  %v234_v50 = vld [vmem:[%s2199_s1 + $0x630] sm:$0xff]  ;;  %v249_v52 = vld [vmem:[%s2199_s1 + $0x6a8] sm:$0xff] }
  0x5e   :  { %1157 = vmatprep.subr.mxu1 %v216_v53  ;;  %1123 = vmatpush3.msra.mxu0 %v168_v54  ;;  %v266_v51 = vld [vmem:[%s2199_s1 + $0x730] sm:$0xff]  ;;  %v281_v53 = vld [vmem:[%s2199_s1 + $0x7a8] sm:$0xff] }
  0x5f   :  { %1158 = vmatpush3.msra.mxu1 %v200_v55  ;;  %1124 = vmatprep.subr.mxu0 %v183_v56  ;;  %v233_v54 = vld [vmem:[%s2199_s1 + $0x628] sm:$0xff]  ;;  %v248_v56 = vld [vmem:[%s2199_s1 + $0x6a0] sm:$0xff] }
  0x60   :  { %1159 = vmatprep.subr.mxu1 %v215_v57  ;;  %1125 = vmatpush3.msra.mxu0 %v167_v58  ;;  %v265_v55 = vld [vmem:[%s2199_s1 + $0x728] sm:$0xff]  ;;  %v280_v57 = vld [vmem:[%s2199_s1 + $0x7a0] sm:$0xff] }
  0x61   :  { %1160 = vmatpush3.msra.mxu1 %v199_v59  ;;  %1126 = vmatprep.subr.mxu0 %v182_v60  ;;  %v232_v58 = vld [vmem:[%s2199_s1 + $0x620] sm:$0xff]  ;;  %v247_v60 = vld [vmem:[%s2199_s1 + $0x698] sm:$0xff] }
  0x62   :  { %1161 = vmatprep.subr.mxu1 %v214_v61  ;;  %1127 = vmatpush3.msra.mxu0 %v166_v62  ;;  %v264_v59 = vld [vmem:[%s2199_s1 + $0x720] sm:$0xff]  ;;  %v279_v61 = vld [vmem:[%s2199_s1 + $0x798] sm:$0xff] }
  0x63   :  { %1162 = vmatpush3.msra.mxu1 %v198_v63  ;;  %1128 = vmatprep.subr.mxu0 %v181_v0  ;;  %v231_v62 = vld [vmem:[%s2199_s1 + $0x618] sm:$0xff]  ;;  %v246_v0 = vld [vmem:[%s2199_s1 + $0x690] sm:$0xff] }
  0x64   :  { %1163 = vmatprep.subr.mxu1 %v213_v1  ;;  %1129 = vmatpush3.msra.mxu0 %v165_v2  ;;  %v263_v63 = vld [vmem:[%s2199_s1 + $0x718] sm:$0xff]  ;;  %v278_v1 = vld [vmem:[%s2199_s1 + $0x790] sm:$0xff] }
  0x65   :  { %1164 = vmatpush3.msra.mxu1 %v197_v3  ;;  %1130 = vmatprep.subr.mxu0 %v180_v4  ;;  %v230_v2 = vld [vmem:[%s2199_s1 + $0x610] sm:$0xff]  ;;  %v245_v4 = vld [vmem:[%s2199_s1 + $0x688] sm:$0xff] }
  0x66   :  { %1165 = vmatprep.subr.mxu1 %v212_v5  ;;  %1131 = vmatpush3.msra.mxu0 %v164_v6  ;;  %v262_v3 = vld [vmem:[%s2199_s1 + $0x710] sm:$0xff]  ;;  %v277_v5 = vld [vmem:[%s2199_s1 + $0x788] sm:$0xff] }
  0x67   :  { %643 = vmatprep.mubr.f32.mxu0 %v29_v7  ;;  %1166 = vmatpush3.msra.mxu1 %v196_v8  ;;  %v229_v6 = vld [vmem:[%s2199_s1 + $0x608] sm:$0xff]  ;;  %v244_v8 = vld [vmem:[%s2199_s1 + $0x680] sm:$0xff] }
  0x68   :  { %644 = vmatmul.mubr.f32.vlgmr.msra.gmra.mxu0 %v28_v9  ;;  %713 = vmatprep.mubr.f32.mxu1 %v31_v10  ;;  %v261_v7 = vld [vmem:[%s2199_s1 + $0x708] sm:$0xff]  ;;  %v276_v9 = vld [vmem:[%s2199_s1 + $0x780] sm:$0xff] }
  0x69   :  { %1170 = vmatprep.subr.mxu0 %v259_v11  ;;  %1205 = vmatprep.subr.mxu1 %v291_v12  ;;  %v228_v10 = vld [vmem:[%s2199_s1 + $0x600] sm:$0xff]  ;;  %v33_v11 = vld [vmem:[%s2200_s0 + $0x68] sm:$0xff] }
  0x6a   :  { %714 = vmatmul.mubr.f32.vlgmr.msra.gmra.mxu1 %v30_v13  ;;  %1171 = vmatpush3.msra.mxu0 %v243_v14  ;;  %v260_v12 = vld [vmem:[%s2199_s1 + $0x700] sm:$0xff]  ;;  %v35_v13 = vld [vmem:[%s2200_s0 + $0x78] sm:$0xff] }
  0x6b   :  { %1206 = vmatpush3.msra.mxu1 %v275_v15  ;;  %1172 = vmatprep.subr.mxu0 %v258_v16  ;;  %v32_v14 = vld [vmem:[%s2200_s0 + $0x60] sm:$0xff]  ;;  %v34_v15 = vld [vmem:[%s2200_s0 + $0x70] sm:$0xff]  ;;  %v1294_v16 = vmov 0.0  }
  0x6c   :  { %1207 = vmatprep.subr.mxu1 %v290_v17  ;;  %1173 = vmatpush3.msra.mxu0 %v242_v18  ;;  %v875_v17 = vld [vmem:[%s2201_s3 + $0x78] sm:$0xff]  ;;  %v874_v18 = vld [vmem:[%s2201_s3 + $0x70] sm:$0xff] }
  0x6d   :  { %1208 = vmatpush3.msra.mxu1 %v274_v19  ;;  %1174 = vmatprep.subr.mxu0 %v257_v20  ;;  %v873_v19 = vld [vmem:[%s2201_s3 + $0x68] sm:$0xff]  ;;  %v872_v20 = vld [vmem:[%s2201_s3 + $0x60] sm:$0xff] }
  0x6e   :  { %1209 = vmatprep.subr.mxu1 %v289_v21  ;;  %1175 = vmatpush3.msra.mxu0 %v241_v22  ;;  %v871_v21 = vld [vmem:[%s2201_s3 + $0x58] sm:$0xff]  ;;  %v870_v22 = vld [vmem:[%s2201_s3 + $0x50] sm:$0xff] }
  0x6f   :  { %1210 = vmatpush3.msra.mxu1 %v273_v23  ;;  %1176 = vmatprep.subr.mxu0 %v256_v24  ;;  %v869_v23 = vld [vmem:[%s2201_s3 + $0x48] sm:$0xff]  ;;  %v868_v24 = vld [vmem:[%s2201_s3 + $0x40] sm:$0xff] }
  0x70   :  { %1211 = vmatprep.subr.mxu1 %v288_v25  ;;  %1177 = vmatpush3.msra.mxu0 %v240_v26  ;;  %v867_v25 = vld [vmem:[%s2201_s3 + $0x38] sm:$0xff]  ;;  %v866_v26 = vld [vmem:[%s2201_s3 + $0x30] sm:$0xff] }
  0x71   :  { %1212 = vmatpush3.msra.mxu1 %v272_v27  ;;  %1178 = vmatprep.subr.mxu0 %v255_v28  ;;  %v865_v27 = vld [vmem:[%s2201_s3 + $0x28] sm:$0xff]  ;;  %v864_v28 = vld [vmem:[%s2201_s3 + $0x20] sm:$0xff] }
  0x72   :  { %1213 = vmatprep.subr.mxu1 %v287_v29  ;;  %1179 = vmatpush3.msra.mxu0 %v239_v30  ;;  %v863_v29 = vld [vmem:[%s2201_s3 + $0x18] sm:$0xff]  ;;  %v862_v30 = vld [vmem:[%s2201_s3 + $0x10] sm:$0xff] }
  0x73   :  { %1214 = vmatpush3.msra.mxu1 %v271_v31  ;;  %1180 = vmatprep.subr.mxu0 %v254_v32  ;;  %v861_v31 = vld [vmem:[%s2201_s3 + $0x8] sm:$0xff]  ;;  %v860_v32 = vld [vmem:[%s2201_s3] sm:$0xff] }
  0x74   :  { %1215 = vmatprep.subr.mxu1 %v286_v33  ;;  %1181 = vmatpush3.msra.mxu0 %v238_v34 }
  0x75   :  { %1216 = vmatpush3.msra.mxu1 %v270_v35  ;;  %1182 = vmatprep.subr.mxu0 %v253_v36 }
  0x76   :  { %1217 = vmatprep.subr.mxu1 %v285_v37  ;;  %1183 = vmatpush3.msra.mxu0 %v237_v38  ;;  %v958_v38 = vld [vmem:[%s2202_s2] ss:$0 sm:$0xff] }
  0x77   :  { %1218 = vmatpush3.msra.mxu1 %v269_v39  ;;  %1184 = vmatprep.subr.mxu0 %v252_v40 }
  0x78   :  { %1219 = vmatprep.subr.mxu1 %v284_v41  ;;  %1185 = vmatpush3.msra.mxu0 %v236_v42 }
  0x79   :  { %1220 = vmatpush3.msra.mxu1 %v268_v43  ;;  %1186 = vmatprep.subr.mxu0 %v251_v44 }
  0x7a   :  { %1221 = vmatprep.subr.mxu1 %v283_v45  ;;  %1187 = vmatpush3.msra.mxu0 %v235_v46 }
  0x7b   :  { %1222 = vmatpush3.msra.mxu1 %v267_v47  ;;  %1188 = vmatprep.subr.mxu0 %v250_v48 }
  0x7c   :  { %1223 = vmatprep.subr.mxu1 %v282_v49  ;;  %1189 = vmatpush3.msra.mxu0 %v234_v50 }
  0x7d   :  { %1224 = vmatpush3.msra.mxu1 %v266_v51  ;;  %1190 = vmatprep.subr.mxu0 %v249_v52 }
  0x7e   :  { %1225 = vmatprep.subr.mxu1 %v281_v53  ;;  %1191 = vmatpush3.msra.mxu0 %v233_v54 }
  0x7f   :  { %1226 = vmatpush3.msra.mxu1 %v265_v55  ;;  %1192 = vmatprep.subr.mxu0 %v248_v56 }
  0x80   :  { %1227 = vmatprep.subr.mxu1 %v280_v57  ;;  %1193 = vmatpush3.msra.mxu0 %v232_v58 }
  0x81   :  { %1228 = vmatpush3.msra.mxu1 %v264_v59  ;;  %1194 = vmatprep.subr.mxu0 %v247_v60 }
  0x82   :  { %1229 = vmatprep.subr.mxu1 %v279_v61  ;;  %1195 = vmatpush3.msra.mxu0 %v231_v62 }
  0x83   :  { %1230 = vmatpush3.msra.mxu1 %v263_v63  ;;  %1196 = vmatprep.subr.mxu0 %v246_v0 }
  0x84   :  { %1231 = vmatprep.subr.mxu1 %v278_v1  ;;  %1197 = vmatpush3.msra.mxu0 %v230_v2 }
  0x85   :  { %1232 = vmatpush3.msra.mxu1 %v262_v3  ;;  %1198 = vmatprep.subr.mxu0 %v245_v4  ;;  %v959_v3 = vld [vmem:[%s2203_s4] ss:$0 sm:$0xff] }
  0x86   :  { %1233 = vmatprep.subr.mxu1 %v277_v5  ;;  %1199 = vmatpush3.msra.mxu0 %v229_v6 }
  0x87   :  { %1234 = vmatpush3.msra.mxu1 %v261_v7  ;;  %1200 = vmatprep.subr.mxu0 %v244_v8 }
  0x88   :  { %1235 = vmatprep.subr.mxu1 %v276_v9  ;;  %1201 = vmatpush3.msra.mxu0 %v228_v10 }
  0x89   :  { %783 = vmatprep.mubr.f32.mxu0 %v33_v11  ;;  %1236 = vmatpush3.msra.mxu1 %v260_v12 }
  0x8a   :  { %853 = vmatprep.mubr.f32.mxu1 %v35_v13  ;;  %784 = vmatmul.mubr.f32.vlgmr.msra.gmra.mxu0 %v32_v14 }
  0x8b   :  { %854 = vmatmul.mubr.f32.vlgmr.msra.gmra.mxu1 %v34_v15  ;;  %1257 = vmatprep.subr.mxu0 %v1294_v16 }
  0x8c   :  { %1258 = vmatpush3.msra.mxu0 %v875_v17  ;;  %1289 = vmatprep.mubr.msk.f32.mxu0 %vm1295_vm0, %v1294_v16 }
  0x8d   :  { %1259 = vmatprep.subr.mxu0 %v1294_v16 }
  0x8e   :  { %1260 = vmatpush3.msra.mxu0 %v874_v18 }
  0x8f   :  { %1261 = vmatprep.subr.mxu0 %v1294_v16 }
  0x90   :  { %1262 = vmatpush3.msra.mxu0 %v873_v19 }
  0x91   :  { %1263 = vmatprep.subr.mxu0 %v1294_v16 }
  0x92   :  { %1264 = vmatpush3.msra.mxu0 %v872_v20 }
  0x93   :  { %1265 = vmatprep.subr.mxu0 %v1294_v16 }
  0x94   :  { %1266 = vmatpush3.msra.mxu0 %v871_v21 }
  0x95   :  { %1267 = vmatprep.subr.mxu0 %v1294_v16 }
  0x96   :  { %1268 = vmatpush3.msra.mxu0 %v870_v22 }
  0x97   :  { %1269 = vmatprep.subr.mxu0 %v1294_v16 }
  0x98   :  { %1270 = vmatpush3.msra.mxu0 %v869_v23 }
  0x99   :  { %1271 = vmatprep.subr.mxu0 %v1294_v16 }
  0x9a   :  { %1272 = vmatpush3.msra.mxu0 %v868_v24 }
  0x9b   :  { %1273 = vmatprep.subr.mxu0 %v1294_v16 }
  0x9c   :  { %1274 = vmatpush3.msra.mxu0 %v867_v25 }
  0x9d   :  { %1275 = vmatprep.subr.mxu0 %v1294_v16 }
  0x9e   :  { %1276 = vmatpush3.msra.mxu0 %v866_v26 }
  0x9f   :  { %1277 = vmatprep.subr.mxu0 %v1294_v16 }
  0xa0   :  { %1278 = vmatpush3.msra.mxu0 %v865_v27 }
  0xa1   :  { %1279 = vmatprep.subr.mxu0 %v1294_v16 }
  0xa2   :  { %1280 = vmatpush3.msra.mxu0 %v864_v28 }
  0xa3   :  { %1281 = vmatprep.subr.mxu0 %v1294_v16 }
  0xa4   :  { %1282 = vmatpush3.msra.mxu0 %v863_v29 }
  0xa5   :  { %1283 = vmatprep.subr.mxu0 %v1294_v16 }
  0xa6   :  { %1284 = vmatpush3.msra.mxu0 %v862_v30 }
  0xa7   :  { %1285 = vmatprep.subr.mxu0 %v1294_v16 }
  0xa8   :  { %1286 = vmatpush3.msra.mxu0 %v861_v31 }
  0xa9   :  { %1287 = vmatprep.subr.mxu0 %v1294_v16 }
  0xaa   :  { %1288 = vmatpush3.msra.mxu0 %v860_v32 }
  0xe4   :  { %v992_v33 = vpop.f32.mrf.mxu0 }
  0xe6   :  { %v1027_v34 = vpop.f32.mrf.mxu1  ;;  %v993_v35 = vpop.f32.mrf.mxu0 }
  0xe7   :  { %v994_v37 = vadd.f32 %v993_v35, %v992_v33 }
  0xe8   :  { %v1028_v39 = vpop.f32.mrf.mxu1 }
  0xe9   :  { %v366_v42 = vadd.f32 %v994_v37, %v958_v38  ;;  %v1029_v43 = vadd.f32 %v1028_v39, %v1027_v34 }
  0xeb   :  { %v436_v47 = vadd.f32 %v1029_v43, %v366_v42 }
 0x106   :  { %v1062_v36 = vpop.f32.mrf.mxu0 }
 0x108   :  { %v1097_v40 = vpop.f32.mrf.mxu1  ;;  %v1063_v41 = vpop.f32.mrf.mxu0 }
 0x109   :  { %v1064_v45 = vadd.f32 %v1063_v41, %v1062_v36 }
 0x10a   :  { %v1098_v46 = vpop.f32.mrf.mxu1 }
 0x10b   :  { %v506_v50 = vadd.f32 %v1064_v45, %v436_v47  ;;  %v1099_v51 = vadd.f32 %v1098_v46, %v1097_v40 }
 0x10d   :  { %v576_v54 = vadd.f32 %v1099_v51, %v506_v50 }
 0x128   :  { %v1132_v44 = vpop.f32.mrf.mxu0 }
 0x12a   :  { %v1167_v48 = vpop.f32.mrf.mxu1  ;;  %v1133_v49 = vpop.f32.mrf.mxu0 }
 0x12b   :  { %v1134_v52 = vadd.f32 %v1133_v49, %v1132_v44 }
 0x12c   :  { %v1168_v53 = vpop.f32.mrf.mxu1 }
 0x12d   :  { %v646_v55 = vadd.f32 %v1134_v52, %v576_v54  ;;  %v1169_v56 = vadd.f32 %v1168_v53, %v1167_v48 }
 0x12f   :  { %v716_v61 = vadd.f32 %v1169_v56, %v646_v55 }
 0x14a   :  { %v1202_v57 = vpop.f32.mrf.mxu0 }
 0x14b   :  { %v1237_v58 = vpop.f32.mrf.mxu1 }
 0x14c   :  { %v1203_v59 = vpop.f32.mrf.mxu0 }
 0x14d   :  { %v1238_v60 = vpop.f32.mrf.mxu1  ;;  %v1204_v62 = vadd.f32 %v1203_v59, %v1202_v57 }
 0x14e   :  { %v1239_v0 = vadd.f32 %v1238_v60, %v1237_v58 }
 0x14f   :  { %v786_v63 = vadd.f32 %v1204_v62, %v716_v61 }
 0x151   :  { %v856_v1 = vadd.f32 %v1239_v0, %v786_v63 }
 0x153   :  { %v859_v2 = vmax.f32 %v856_v1, 0.0 }
 0x155   :  { %1290 = vmatmul.mubr.f32.vlgmr.msra.gmra.mxu0 %v859_v2 }
 0x215   :  { %v949_v4 = vpop.f32.mrf.mxu0 }
 0x216   :  { %v950_v5 = vadd.f32 %v959_v3, %v949_v4 }
 0x217   :  { %v1291_v6 = vpop.f32.mrf.mxu0 }
 0x218   :  { %953 = vst [vmem:[%s2204_s5] sm:$0xff] %v950_v5 }

</bundles_post_ra>
